<compile_context>
chip_gen: v7x
topology: tpu7x:2x2x1
jax: 0.10.0
libtpu: 0.0.40
codegen_flags: <defaults>
</compile_context>

<pallas_src>
import functools

import jax
import jax.numpy as jnp
from jax.experimental import pallas as pl
from jax.experimental.pallas import tpu as pltpu


# --------------------------------------------------------------------------- #
# Kernel
# --------------------------------------------------------------------------- #
def _path_encoder_kernel(s_ref, p_ref, wt_ref, b_ref, o_ref, *,
                         num_context, db_chunk, act_dtype):
    """One grid step over Bt batch rows.

    s_ref  : (Bt, Db)      query vectors
    p_ref  : (Bt*C, Dg)    context vectors, flattened (b, c) -> b*C + c
    wt_ref : (Dg, Db)      attention weight, pre-transposed
    b_ref  : (1, Db)       attention bias (f32)
    o_ref  : (Bt, Dg)      pooled context output
    """
    bt, db = s_ref.shape
    dg = p_ref.shape[-1]
    C = num_context

    p2 = p_ref[...]                                    # (Bt*C, Dg), input dtype
    s = s_ref[...].astype(jnp.float32)                 # (Bt, Db) f32

    # Attention scores, fused over Db chunks: never materialize the full
    # (Bt*C, Db) f32 activation.  Per chunk: MXU matmul (f32 accumulate),
    # tanh (EUP), "* s, sum over Db" reduction (VPU + XLU lane-reduce).
    scores = jnp.zeros((bt, C), dtype=jnp.float32)
    for d0 in range(0, db, db_chunk):
        dlen = min(db_chunk, db - d0)
        a = jnp.dot(p2, wt_ref[:, d0:d0 + dlen],
                    preferred_element_type=jnp.float32)        # (Bt*C, dlen)
        a = a + b_ref[:, d0:d0 + dlen]                         # bias is f32
        a = jnp.tanh(a.astype(act_dtype)).astype(jnp.float32)
        a3 = a.reshape(bt, C, dlen)                            # f32 split (free when C % 8 == 0)
        scores = scores + jnp.sum(a3 * s[:, None, d0:d0 + dlen], axis=-1)

    # Softmax over the context axis (PyTorch softmax(dim=-2) of (B, C, 1)).
    scores = scores - jnp.max(scores, axis=-1, keepdims=True)
    e = jnp.exp(scores)
    alpha = e * pl.reciprocal(jnp.sum(e, axis=-1, keepdims=True), approx=True)

    # Weighted pooling over contexts on the VPU (f32 accumulate), unrolled over
    # C: avoids Bt serialized M=1 MXU pushes of a batched matvec.
    p3 = p2.reshape(bt, C, dg)
    if C <= 64:
        acc = jnp.zeros((bt, dg), dtype=jnp.float32)
        for ci in range(C):
            acc = acc + alpha[:, ci:ci + 1] * p3[:, ci, :].astype(jnp.float32)
    else:  # very large C: broadcast-multiply + cross-sublane reduce instead
        acc = jnp.sum(alpha[:, :, None] * p3.astype(jnp.float32), axis=1)
    o_ref[...] = acc.astype(o_ref.dtype)


# --------------------------------------------------------------------------- #
# Tiling heuristics
# --------------------------------------------------------------------------- #
def _vmem_budget_bytes():
    """(budget, physical) VMEM bytes; budget ~= half of physical, capped at 64 MiB."""
    cap = 64 << 20                                   # conservative default (v7x)
    try:
        cap = int(getattr(pltpu.get_tpu_info(), "vmem_capacity_bytes", cap))
    except Exception:
        pass
    budget = max(16 << 20, min(cap // 2, 64 << 20))
    return budget, cap


def _choose_bt(B, C, Dg, Db, in_bytes, out_bytes, w_bytes, db_chunk, budget):
    """Batch rows processed per grid step."""
    mult = 8 if in_bytes >= 4 else (16 if in_bytes == 2 else 32)   # sublane pack
    row_bytes = max(1, C * Dg * in_bytes)            # one batch row of p

    # Mem-bound kernel: target multi-MiB p tiles (4 MiB at a 32 MiB budget,
    # 8 MiB at 64 MiB) to get large DMAs and amortize ~0.35us/step overhead.
    tile_target = max(4 << 20, budget // 8)
    bt = max(mult, (tile_target // row_bytes) // mult * mult)

    # Keep >= 2 grid steps whenever the batch allows it, so the "parallel"
    # batch axis can shard across v7x's two TensorCores / megacore.
    half = -(-B // 2)
    half = max(mult, -(-half // mult) * mult)
    bt = min(bt, half)

    def vmem_use(b):
        rows = b * C
        p_t = rows * Dg * in_bytes                   # p tile
        s_t = b * Db * in_bytes                      # s tile
        o_t = b * Dg * out_bytes                     # out tile
        shared = Dg * Db * w_bytes + Db * 4          # W^T + f32 bias
        # live f32 intermediates: activation chunk (x2) + pooling relayout of
        # the p tile + f32 accumulator
        scratch = 2 * rows * min(Db, db_chunk) * 4 + p_t + b * Dg * 4
        return 2 * (p_t + s_t + o_t) + 2 * shared + scratch

    while bt > mult and vmem_use(bt) > budget:
        bt -= mult
    return bt


# --------------------------------------------------------------------------- #
# Wrapper
# --------------------------------------------------------------------------- #
def path_encoder_forward(s, p, weight=None, bias=None, *, w_t=None, bt=None,
                         db_chunk=None, compute_dtype=None):
    """Path_Encoder forward.

    s: (B, Db), p: (B, C, Dg), weight: (Db, Dg) (or w_t=(Dg, Db) pre-transposed),
    bias: (Db,)  ->  (B, Dg).

    compute_dtype: optionally cast inputs/weights (e.g. jnp.bfloat16 on v5e) to
    halve the HBM stream and keep MXU operands bf16; accumulation stays f32.
    """
    if compute_dtype is not None:
        s = s.astype(compute_dtype)
        p = p.astype(compute_dtype)
        if weight is not None:
            weight = weight.astype(compute_dtype)
        if w_t is not None:
            w_t = w_t.astype(compute_dtype)

    B, C, Dg = p.shape
    Db = s.shape[-1]
    out_dtype = p.dtype
    in_bytes = jnp.dtype(p.dtype).itemsize
    out_bytes = jnp.dtype(out_dtype).itemsize

    if w_t is None:
        if weight is None:
            raise ValueError("pass `weight` (Db, Dg) or pre-transposed `w_t` (Dg, Db)")
        w_t = weight.T                               # prefer passing w_t= in production
    w_t = w_t.astype(p.dtype)                        # matched MXU operand dtypes
    b2 = bias.astype(jnp.float32).reshape(1, Db)
    w_bytes = jnp.dtype(w_t.dtype).itemsize

    if db_chunk is None:
        db_chunk = Db if Db <= 512 else 512          # multiple of 128 whenever Db is
    db_chunk = max(1, min(int(db_chunk), Db))

    budget, cap = _vmem_budget_bytes()
    if bt is None:
        bt = _choose_bt(B, C, Dg, Db, in_bytes, out_bytes, w_bytes, db_chunk, budget)
    vmem_limit = int(min(budget + (8 << 20), cap * 3 // 4))

    B_pad = -(-B // bt) * bt
    if B_pad != B:
        # Zero padded rows: uniform softmax over zero contexts -> zero context,
        # sliced off below.  No NaN risk.
        s = jnp.pad(s, ((0, B_pad - B), (0, 0)))
        p = jnp.pad(p, ((0, B_pad - B), (0, 0), (0, 0)))
    p_flat = p.reshape(B_pad * C, Dg)                # free reshape (contiguous)

    act_dtype = jnp.bfloat16 if p.dtype == jnp.bfloat16 else jnp.float32
    kernel = functools.partial(_path_encoder_kernel, num_context=C,
                               db_chunk=db_chunk, act_dtype=act_dtype)

    try:
        cost = pl.CostEstimate(
            flops=int(2 * B_pad * C * Dg * Db + 2 * B_pad * C * Dg),
            transcendentals=int(B_pad * C * (Db + 1)),
            bytes_accessed=int(B_pad * C * Dg * in_bytes + B_pad * Db * in_bytes
                               + Dg * Db * w_bytes + Db * 4 + B_pad * Dg * out_bytes),
        )
    except Exception:
        cost = None

    def build(single_buffer_shared):
        shared_kw = (dict(pipeline_mode=pl.Buffered(1))
                     if single_buffer_shared else {})
        return pl.pallas_call(
            kernel,
            out_shape=jax.ShapeDtypeStruct((B_pad, Dg), out_dtype),
            grid_spec=pltpu.PrefetchScalarGridSpec(
                num_scalar_prefetch=0,
                grid=(B_pad // bt,),
                in_specs=[
                    pl.BlockSpec((bt, Db), lambda i: (i, 0)),                 # s
                    pl.BlockSpec((bt * C, Dg), lambda i: (i, 0)),             # p (flat)
                    pl.BlockSpec((Dg, Db), lambda i: (0, 0), **shared_kw),    # W^T (shared)
                    pl.BlockSpec((1, Db), lambda i: (0, 0), **shared_kw),     # bias (shared)
                ],
                out_specs=pl.BlockSpec((bt, Dg), lambda i: (i, 0)),
            ),
            compiler_params=pltpu.CompilerParams(
                dimension_semantics=("parallel",),   # megacore / v7x 2-TC sharding
                vmem_limit_bytes=vmem_limit,
            ),
            cost_estimate=cost,
        )

    try:
        out = build(True)(s, p_flat, w_t, b2)
    except Exception:
        # Fallback for JAX versions that reject pl.Buffered(1) on an invariant
        # block; the extra weight buffer is small relative to the VMEM budget.
        out = build(False)(s, p_flat, w_t, b2)

    return out[:B]


# --------------------------------------------------------------------------- #
# Pure-JAX reference (mirrors the PyTorch module, f32)
# --------------------------------------------------------------------------- #
def reference_forward(s, p, weight, bias):
    a = jnp.tanh(jnp.einsum("bcg,dg->bcd", p, weight) + bias)      # (B, C, Db)
    alpha = jnp.sum(a * s[:, None, :], axis=-1, keepdims=True)     # (B, C, 1)
    alpha = jax.nn.softmax(alpha, axis=-2)
    return jnp.sum(alpha * p, axis=-2)                             # (B, Dg)


if __name__ == "__main__":
    key = jax.random.PRNGKey(0)
    k_s, k_p, k_w, k_b = jax.random.split(key, 4)

    # --- case 1: f32, tiny shapes (B=2, C=8, Dg=32, Db=16) --------------------
    B, C, Dg, Db = 2, 8, 32, 16
    s = jax.random.normal(k_s, (B, Db), dtype=jnp.float32)
    p = jax.random.normal(k_p, (B, C, Dg), dtype=jnp.float32)
    weight = 0.02 * jax.random.normal(k_w, (Db, Dg), dtype=jnp.float32)  # Linear init std=0.02
    bias = 0.01 * jax.random.normal(k_b, (Db,), dtype=jnp.float32)

    out = jax.block_until_ready(path_encoder_forward(s, p, weight, bias))
    ref = reference_forward(s, p, weight, bias)
    assert out.shape == (B, Dg)
    assert jnp.allclose(out, ref, atol=5e-3, rtol=5e-3), "case 1 (f32) mismatch"

    # --- case 2: bf16 compute path, odd batch (exercises zero-padding) --------
    B2 = 5
    s2 = jax.random.normal(k_s, (B2, Db), dtype=jnp.float32)
    p2 = jax.random.normal(k_p, (B2, C, Dg), dtype=jnp.float32)
    out2 = jax.block_until_ready(
        path_encoder_forward(s2, p2, weight, bias, compute_dtype=jnp.bfloat16))
    ref2 = reference_forward(s2, p2, weight, bias)
    assert out2.shape == (B2, Dg)
    assert jnp.allclose(out2.astype(jnp.float32), ref2, atol=5e-2, rtol=5e-2), \
        "case 2 (bf16) mismatch"

    # --- case 3: pre-transposed weight, Db chunking, multi-step grid ----------
    B3, C3, Dg3, Db3 = 20, 4, 128, 256
    k_s3, k_p3, k_w3, k_b3 = jax.random.split(jax.random.PRNGKey(0), 4)
    s3 = jax.random.normal(k_s3, (B3, Db3), dtype=jnp.float32)
    p3 = jax.random.normal(k_p3, (B3, C3, Dg3), dtype=jnp.float32)
    w3 = 0.02 * jax.random.normal(k_w3, (Db3, Dg3), dtype=jnp.float32)
    b3 = 0.01 * jax.random.normal(k_b3, (Db3,), dtype=jnp.float32)
    out3 = jax.block_until_ready(
        path_encoder_forward(s3, p3, bias=b3, w_t=jnp.transpose(w3),
                             db_chunk=128, bt=8))
    ref3 = reference_forward(s3, p3, w3, b3)
    assert out3.shape == (B3, Dg3)
    assert jnp.allclose(out3, ref3, atol=2e-2, rtol=2e-2), "case 3 mismatch"

    print("KERNEL_OK")
</pallas_src>

<mosaic_0001>
module attributes {stable_mosaic.version = 11 : i64} {
  func.func @_path_encoder_kernel(%arg0: i32, %arg1: memref<8x16xf32, #tpu.memory_space<vmem>>, %arg2: memref<64x32xf32, #tpu.memory_space<vmem>>, %arg3: memref<32x16xf32, #tpu.memory_space<vmem>>, %arg4: memref<1x16xf32, #tpu.memory_space<vmem>>, %arg5: memref<8x32xf32, #tpu.memory_space<vmem>>) attributes {dimension_semantics = [#tpu.dimension_semantics<parallel>], iteration_bounds = array<i64: 1>, scalar_prefetch = 0 : i64, scratch_operands = 0 : i64, tpu.core_type = #tpu.core_type<tc>, window_params = [{transform_indices = @transform_0, window_bounds = array<i64: 8, 16>}, {transform_indices = @transform_1, window_bounds = array<i64: 64, 32>}, {pipeline_mode = #tpu.pipeline_mode<synchronous>, transform_indices = @transform_2, window_bounds = array<i64: 32, 16>}, {pipeline_mode = #tpu.pipeline_mode<synchronous>, transform_indices = @transform_3, window_bounds = array<i64: 1, 16>}, {transform_indices = @transform_4, window_bounds = array<i64: 8, 32>}]} {
    %c0 = arith.constant 0 : index
    %c0_0 = arith.constant 0 : index
    %0 = vector.load %arg2[%c0, %c0_0] : memref<64x32xf32, #tpu.memory_space<vmem>>, vector<64x32xf32>
    %c0_1 = arith.constant 0 : index
    %c0_2 = arith.constant 0 : index
    %1 = vector.load %arg1[%c0_1, %c0_2] : memref<8x16xf32, #tpu.memory_space<vmem>>, vector<8x16xf32>
    %cst = arith.constant 0.000000e+00 : f32
    %2 = vector.broadcast %cst : f32 to vector<8x8xf32>
    %c0_3 = arith.constant 0 : index
    %c0_4 = arith.constant 0 : index
    %3 = vector.load %arg3[%c0_3, %c0_4] : memref<32x16xf32, #tpu.memory_space<vmem>>, vector<32x16xf32>
    %cst_5 = arith.constant dense<0.000000e+00> : vector<64x16xf32>
    %4 = tpu.matmul %0, %3, %cst_5 {dimension_numbers = #tpu.dot_dimension_numbers<[1], [0], [0], [1], [0, 0, 1, 1], [], []>} : vector<64x32xf32>, vector<32x16xf32>, vector<64x16xf32> -> vector<64x16xf32>
    %c0_6 = arith.constant 0 : index
    %c0_7 = arith.constant 0 : index
    %5 = vector.load %arg4[%c0_6, %c0_7] : memref<1x16xf32, #tpu.memory_space<vmem>>, vector<1x16xf32>
    %6 = vector.broadcast %5 : vector<1x16xf32> to vector<64x16xf32>
    %7 = arith.addf %4, %6 : vector<64x16xf32>
    %8 = math.tanh %7 : vector<64x16xf32>
    %9 = vector.shape_cast %8 : vector<64x16xf32> to vector<8x8x16xf32>
    %10 = vector.shape_cast %1 : vector<8x16xf32> to vector<8x1x16xf32>
    %11 = vector.broadcast %10 : vector<8x1x16xf32> to vector<8x8x16xf32>
    %12 = arith.mulf %9, %11 : vector<8x8x16xf32>
    %cst_8 = arith.constant dense<0.000000e+00> : vector<8x8xf32>
    %13 = vector.multi_reduction <add>, %12, %cst_8 [2] : vector<8x8x16xf32> to vector<8x8xf32>
    %14 = arith.addf %2, %13 : vector<8x8xf32>
    %cst_9 = arith.constant dense<0xFF800000> : vector<8xf32>
    %15 = vector.multi_reduction <maximumf>, %14, %cst_9 [1] : vector<8x8xf32> to vector<8xf32>
    %16 = vector.shape_cast %15 : vector<8xf32> to vector<8x1xf32>
    %17 = vector.broadcast %16 : vector<8x1xf32> to vector<8x8xf32>
    %18 = arith.subf %14, %17 : vector<8x8xf32>
    %19 = math.exp %18 : vector<8x8xf32>
    %cst_10 = arith.constant dense<0.000000e+00> : vector<8xf32>
    %20 = vector.multi_reduction <add>, %19, %cst_10 [1] : vector<8x8xf32> to vector<8xf32>
    %21 = vector.shape_cast %20 : vector<8xf32> to vector<8x1xf32>
    %22 = tpu.reciprocal %21 {approx = true} : vector<8x1xf32> -> vector<8x1xf32>
    %23 = vector.broadcast %22 : vector<8x1xf32> to vector<8x8xf32>
    %24 = arith.mulf %19, %23 : vector<8x8xf32>
    %25 = vector.shape_cast %0 : vector<64x32xf32> to vector<8x8x32xf32>
    %cst_11 = arith.constant 0.000000e+00 : f32
    %26 = vector.broadcast %cst_11 : f32 to vector<8x32xf32>
    %27 = vector.extract_strided_slice %24 {offsets = [0, 0], sizes = [8, 1], strides = [1, 1]} : vector<8x8xf32> to vector<8x1xf32>
    %28 = vector.extract_strided_slice %25 {offsets = [0, 0, 0], sizes = [8, 1, 32], strides = [1, 1, 1]} : vector<8x8x32xf32> to vector<8x1x32xf32>
    %29 = vector.shape_cast %28 : vector<8x1x32xf32> to vector<8x32xf32>
    %30 = vector.broadcast %27 : vector<8x1xf32> to vector<8x32xf32>
    %31 = arith.mulf %30, %29 : vector<8x32xf32>
    %32 = arith.addf %26, %31 : vector<8x32xf32>
    %33 = vector.extract_strided_slice %24 {offsets = [0, 1], sizes = [8, 1], strides = [1, 1]} : vector<8x8xf32> to vector<8x1xf32>
    %34 = vector.extract_strided_slice %25 {offsets = [0, 1, 0], sizes = [8, 1, 32], strides = [1, 1, 1]} : vector<8x8x32xf32> to vector<8x1x32xf32>
    %35 = vector.shape_cast %34 : vector<8x1x32xf32> to vector<8x32xf32>
    %36 = vector.broadcast %33 : vector<8x1xf32> to vector<8x32xf32>
    %37 = arith.mulf %36, %35 : vector<8x32xf32>
    %38 = arith.addf %32, %37 : vector<8x32xf32>
    %39 = vector.extract_strided_slice %24 {offsets = [0, 2], sizes = [8, 1], strides = [1, 1]} : vector<8x8xf32> to vector<8x1xf32>
    %40 = vector.extract_strided_slice %25 {offsets = [0, 2, 0], sizes = [8, 1, 32], strides = [1, 1, 1]} : vector<8x8x32xf32> to vector<8x1x32xf32>
    %41 = vector.shape_cast %40 : vector<8x1x32xf32> to vector<8x32xf32>
    %42 = vector.broadcast %39 : vector<8x1xf32> to vector<8x32xf32>
    %43 = arith.mulf %42, %41 : vector<8x32xf32>
    %44 = arith.addf %38, %43 : vector<8x32xf32>
    %45 = vector.extract_strided_slice %24 {offsets = [0, 3], sizes = [8, 1], strides = [1, 1]} : vector<8x8xf32> to vector<8x1xf32>
    %46 = vector.extract_strided_slice %25 {offsets = [0, 3, 0], sizes = [8, 1, 32], strides = [1, 1, 1]} : vector<8x8x32xf32> to vector<8x1x32xf32>
    %47 = vector.shape_cast %46 : vector<8x1x32xf32> to vector<8x32xf32>
    %48 = vector.broadcast %45 : vector<8x1xf32> to vector<8x32xf32>
    %49 = arith.mulf %48, %47 : vector<8x32xf32>
    %50 = arith.addf %44, %49 : vector<8x32xf32>
    %51 = vector.extract_strided_slice %24 {offsets = [0, 4], sizes = [8, 1], strides = [1, 1]} : vector<8x8xf32> to vector<8x1xf32>
    %52 = vector.extract_strided_slice %25 {offsets = [0, 4, 0], sizes = [8, 1, 32], strides = [1, 1, 1]} : vector<8x8x32xf32> to vector<8x1x32xf32>
    %53 = vector.shape_cast %52 : vector<8x1x32xf32> to vector<8x32xf32>
    %54 = vector.broadcast %51 : vector<8x1xf32> to vector<8x32xf32>
    %55 = arith.mulf %54, %53 : vector<8x32xf32>
    %56 = arith.addf %50, %55 : vector<8x32xf32>
    %57 = vector.extract_strided_slice %24 {offsets = [0, 5], sizes = [8, 1], strides = [1, 1]} : vector<8x8xf32> to vector<8x1xf32>
    %58 = vector.extract_strided_slice %25 {offsets = [0, 5, 0], sizes = [8, 1, 32], strides = [1, 1, 1]} : vector<8x8x32xf32> to vector<8x1x32xf32>
    %59 = vector.shape_cast %58 : vector<8x1x32xf32> to vector<8x32xf32>
    %60 = vector.broadcast %57 : vector<8x1xf32> to vector<8x32xf32>
    %61 = arith.mulf %60, %59 : vector<8x32xf32>
    %62 = arith.addf %56, %61 : vector<8x32xf32>
    %63 = vector.extract_strided_slice %24 {offsets = [0, 6], sizes = [8, 1], strides = [1, 1]} : vector<8x8xf32> to vector<8x1xf32>
    %64 = vector.extract_strided_slice %25 {offsets = [0, 6, 0], sizes = [8, 1, 32], strides = [1, 1, 1]} : vector<8x8x32xf32> to vector<8x1x32xf32>
    %65 = vector.shape_cast %64 : vector<8x1x32xf32> to vector<8x32xf32>
    %66 = vector.broadcast %63 : vector<8x1xf32> to vector<8x32xf32>
    %67 = arith.mulf %66, %65 : vector<8x32xf32>
    %68 = arith.addf %62, %67 : vector<8x32xf32>
    %69 = vector.extract_strided_slice %24 {offsets = [0, 7], sizes = [8, 1], strides = [1, 1]} : vector<8x8xf32> to vector<8x1xf32>
    %70 = vector.extract_strided_slice %25 {offsets = [0, 7, 0], sizes = [8, 1, 32], strides = [1, 1, 1]} : vector<8x8x32xf32> to vector<8x1x32xf32>
    %71 = vector.shape_cast %70 : vector<8x1x32xf32> to vector<8x32xf32>
    %72 = vector.broadcast %69 : vector<8x1xf32> to vector<8x32xf32>
    %73 = arith.mulf %72, %71 : vector<8x32xf32>
    %74 = arith.addf %68, %73 : vector<8x32xf32>
    %c0_12 = arith.constant 0 : index
    %c0_13 = arith.constant 0 : index
    %75 = vector.load %arg5[%c0_12, %c0_13] : memref<8x32xf32, #tpu.memory_space<vmem>>, vector<8x32xf32>
    tpu.vector_store %arg5[%c0_12, %c0_13], %74 {strides = array<i32>} : memref<8x32xf32, #tpu.memory_space<vmem>>, vector<8x32xf32>,
    return
  }
  func.func @transform_0(%arg0: i32) -> (i32, i32) {
    %c0_i32 = arith.constant 0 : i32
    %c0_i32_0 = arith.constant 0 : i32
    return %arg0, %c0_i32 : i32, i32
  }
  func.func @transform_1(%arg0: i32) -> (i32, i32) {
    %c0_i32 = arith.constant 0 : i32
    %c0_i32_0 = arith.constant 0 : i32
    return %arg0, %c0_i32 : i32, i32
  }
  func.func @transform_2(%arg0: i32) -> (i32, i32) {
    %c0_i32 = arith.constant 0 : i32
    %c0_i32_0 = arith.constant 0 : i32
    %c0_i32_1 = arith.constant 0 : i32
    return %c0_i32, %c0_i32_0 : i32, i32
  }
  func.func @transform_3(%arg0: i32) -> (i32, i32) {
    %c0_i32 = arith.constant 0 : i32
    %c0_i32_0 = arith.constant 0 : i32
    %c0_i32_1 = arith.constant 0 : i32
    return %c0_i32, %c0_i32_0 : i32, i32
  }
  func.func @transform_4(%arg0: i32) -> (i32, i32) {
    %c0_i32 = arith.constant 0 : i32
    %c0_i32_0 = arith.constant 0 : i32
    return %arg0, %c0_i32 : i32, i32
  }
}

module attributes {stable_mosaic.version = 11 : i64} {
  func.func @_path_encoder_kernel(%arg0: i32, %arg1: memref<8x16xf32, #tpu.memory_space<vmem>>, %arg2: memref<64x32xf32, #tpu.memory_space<vmem>>, %arg3: memref<32x16xf32, #tpu.memory_space<vmem>>, %arg4: memref<1x16xf32, #tpu.memory_space<vmem>>, %arg5: memref<8x32xf32, #tpu.memory_space<vmem>>) attributes {dimension_semantics = [#tpu.dimension_semantics<parallel>], iteration_bounds = array<i64: 1>, scalar_prefetch = 0 : i64, scratch_operands = 0 : i64, tpu.core_type = #tpu.core_type<tc>, window_params = [{transform_indices = @transform_0, window_bounds = array<i64: 8, 16>}, {transform_indices = @transform_1, window_bounds = array<i64: 64, 32>}, {pipeline_mode = #tpu.pipeline_mode<synchronous>, transform_indices = @transform_2, window_bounds = array<i64: 32, 16>}, {pipeline_mode = #tpu.pipeline_mode<synchronous>, transform_indices = @transform_3, window_bounds = array<i64: 1, 16>}, {transform_indices = @transform_4, window_bounds = array<i64: 8, 32>}]} {
    %c0 = arith.constant 0 : index
    %c0_0 = arith.constant 0 : index
    %0 = vector.load %arg2[%c0, %c0_0] : memref<64x32xf32, #tpu.memory_space<vmem>>, vector<64x32xf32>
    %c0_1 = arith.constant 0 : index
    %c0_2 = arith.constant 0 : index
    %1 = vector.load %arg1[%c0_1, %c0_2] : memref<8x16xf32, #tpu.memory_space<vmem>>, vector<8x16xf32>
    %cst = arith.constant 0.000000e+00 : f32
    %2 = vector.broadcast %cst : f32 to vector<8x8xf32>
    %c0_3 = arith.constant 0 : index
    %c0_4 = arith.constant 0 : index
    %3 = vector.load %arg3[%c0_3, %c0_4] : memref<32x16xf32, #tpu.memory_space<vmem>>, vector<32x16xf32>
    %cst_5 = arith.constant dense<0.000000e+00> : vector<64x16xf32>
    %4 = tpu.matmul %0, %3, %cst_5 {dimension_numbers = #tpu.dot_dimension_numbers<[1], [0], [0], [1], [0, 0, 1, 1], [], []>} : vector<64x32xf32>, vector<32x16xf32>, vector<64x16xf32> -> vector<64x16xf32>
    %c0_6 = arith.constant 0 : index
    %c0_7 = arith.constant 0 : index
    %5 = vector.load %arg4[%c0_6, %c0_7] : memref<1x16xf32, #tpu.memory_space<vmem>>, vector<1x16xf32>
    %6 = vector.broadcast %5 : vector<1x16xf32> to vector<64x16xf32>
    %7 = arith.addf %4, %6 : vector<64x16xf32>
    %8 = math.tanh %7 : vector<64x16xf32>
    %9 = vector.shape_cast %8 : vector<64x16xf32> to vector<8x8x16xf32>
    %10 = vector.shape_cast %1 : vector<8x16xf32> to vector<8x1x16xf32>
    %11 = vector.broadcast %10 : vector<8x1x16xf32> to vector<8x8x16xf32>
    %12 = arith.mulf %9, %11 : vector<8x8x16xf32>
    %cst_8 = arith.constant dense<0.000000e+00> : vector<8x8xf32>
    %13 = vector.multi_reduction <add>, %12, %cst_8 [2] : vector<8x8x16xf32> to vector<8x8xf32>
    %14 = arith.addf %2, %13 : vector<8x8xf32>
    %cst_9 = arith.constant dense<0xFF800000> : vector<8xf32>
    %15 = vector.multi_reduction <maximumf>, %14, %cst_9 [1] : vector<8x8xf32> to vector<8xf32>
    %16 = vector.shape_cast %15 : vector<8xf32> to vector<8x1xf32>
    %17 = vector.broadcast %16 : vector<8x1xf32> to vector<8x8xf32>
    %18 = arith.subf %14, %17 : vector<8x8xf32>
    %19 = math.exp %18 : vector<8x8xf32>
    %cst_10 = arith.constant dense<0.000000e+00> : vector<8xf32>
    %20 = vector.multi_reduction <add>, %19, %cst_10 [1] : vector<8x8xf32> to vector<8xf32>
    %21 = vector.shape_cast %20 : vector<8xf32> to vector<8x1xf32>
    %22 = tpu.reciprocal %21 {approx = true} : vector<8x1xf32> -> vector<8x1xf32>
    %23 = vector.broadcast %22 : vector<8x1xf32> to vector<8x8xf32>
    %24 = arith.mulf %19, %23 : vector<8x8xf32>
    %25 = vector.shape_cast %0 : vector<64x32xf32> to vector<8x8x32xf32>
    %cst_11 = arith.constant 0.000000e+00 : f32
    %26 = vector.broadcast %cst_11 : f32 to vector<8x32xf32>
    %27 = vector.extract_strided_slice %24 {offsets = [0, 0], sizes = [8, 1], strides = [1, 1]} : vector<8x8xf32> to vector<8x1xf32>
    %28 = vector.extract_strided_slice %25 {offsets = [0, 0, 0], sizes = [8, 1, 32], strides = [1, 1, 1]} : vector<8x8x32xf32> to vector<8x1x32xf32>
    %29 = vector.shape_cast %28 : vector<8x1x32xf32> to vector<8x32xf32>
    %30 = vector.broadcast %27 : vector<8x1xf32> to vector<8x32xf32>
    %31 = arith.mulf %30, %29 : vector<8x32xf32>
    %32 = arith.addf %26, %31 : vector<8x32xf32>
    %33 = vector.extract_strided_slice %24 {offsets = [0, 1], sizes = [8, 1], strides = [1, 1]} : vector<8x8xf32> to vector<8x1xf32>
    %34 = vector.extract_strided_slice %25 {offsets = [0, 1, 0], sizes = [8, 1, 32], strides = [1, 1, 1]} : vector<8x8x32xf32> to vector<8x1x32xf32>
    %35 = vector.shape_cast %34 : vector<8x1x32xf32> to vector<8x32xf32>
    %36 = vector.broadcast %33 : vector<8x1xf32> to vector<8x32xf32>
    %37 = arith.mulf %36, %35 : vector<8x32xf32>
    %38 = arith.addf %32, %37 : vector<8x32xf32>
    %39 = vector.extract_strided_slice %24 {offsets = [0, 2], sizes = [8, 1], strides = [1, 1]} : vector<8x8xf32> to vector<8x1xf32>
    %40 = vector.extract_strided_slice %25 {offsets = [0, 2, 0], sizes = [8, 1, 32], strides = [1, 1, 1]} : vector<8x8x32xf32> to vector<8x1x32xf32>
    %41 = vector.shape_cast %40 : vector<8x1x32xf32> to vector<8x32xf32>
    %42 = vector.broadcast %39 : vector<8x1xf32> to vector<8x32xf32>
    %43 = arith.mulf %42, %41 : vector<8x32xf32>
    %44 = arith.addf %38, %43 : vector<8x32xf32>
    %45 = vector.extract_strided_slice %24 {offsets = [0, 3], sizes = [8, 1], strides = [1, 1]} : vector<8x8xf32> to vector<8x1xf32>
    %46 = vector.extract_strided_slice %25 {offsets = [0, 3, 0], sizes = [8, 1, 32], strides = [1, 1, 1]} : vector<8x8x32xf32> to vector<8x1x32xf32>
    %47 = vector.shape_cast %46 : vector<8x1x32xf32> to vector<8x32xf32>
    %48 = vector.broadcast %45 : vector<8x1xf32> to vector<8x32xf32>
    %49 = arith.mulf %48, %47 : vector<8x32xf32>
    %50 = arith.addf %44, %49 : vector<8x32xf32>
    %51 = vector.extract_strided_slice %24 {offsets = [0, 4], sizes = [8, 1], strides = [1, 1]} : vector<8x8xf32> to vector<8x1xf32>
    %52 = vector.extract_strided_slice %25 {offsets = [0, 4, 0], sizes = [8, 1, 32], strides = [1, 1, 1]} : vector<8x8x32xf32> to vector<8x1x32xf32>
    %53 = vector.shape_cast %52 : vector<8x1x32xf32> to vector<8x32xf32>
    %54 = vector.broadcast %51 : vector<8x1xf32> to vector<8x32xf32>
    %55 = arith.mulf %54, %53 : vector<8x32xf32>
    %56 = arith.addf %50, %55 : vector<8x32xf32>
    %57 = vector.extract_strided_slice %24 {offsets = [0, 5], sizes = [8, 1], strides = [1, 1]} : vector<8x8xf32> to vector<8x1xf32>
    %58 = vector.extract_strided_slice %25 {offsets = [0, 5, 0], sizes = [8, 1, 32], strides = [1, 1, 1]} : vector<8x8x32xf32> to vector<8x1x32xf32>
    %59 = vector.shape_cast %58 : vector<8x1x32xf32> to vector<8x32xf32>
    %60 = vector.broadcast %57 : vector<8x1xf32> to vector<8x32xf32>
    %61 = arith.mulf %60, %59 : vector<8x32xf32>
    %62 = arith.addf %56, %61 : vector<8x32xf32>
    %63 = vector.extract_strided_slice %24 {offsets = [0, 6], sizes = [8, 1], strides = [1, 1]} : vector<8x8xf32> to vector<8x1xf32>
    %64 = vector.extract_strided_slice %25 {offsets = [0, 6, 0], sizes = [8, 1, 32], strides = [1, 1, 1]} : vector<8x8x32xf32> to vector<8x1x32xf32>
    %65 = vector.shape_cast %64 : vector<8x1x32xf32> to vector<8x32xf32>
    %66 = vector.broadcast %63 : vector<8x1xf32> to vector<8x32xf32>
    %67 = arith.mulf %66, %65 : vector<8x32xf32>
    %68 = arith.addf %62, %67 : vector<8x32xf32>
    %69 = vector.extract_strided_slice %24 {offsets = [0, 7], sizes = [8, 1], strides = [1, 1]} : vector<8x8xf32> to vector<8x1xf32>
    %70 = vector.extract_strided_slice %25 {offsets = [0, 7, 0], sizes = [8, 1, 32], strides = [1, 1, 1]} : vector<8x8x32xf32> to vector<8x1x32xf32>
    %71 = vector.shape_cast %70 : vector<8x1x32xf32> to vector<8x32xf32>
    %72 = vector.broadcast %69 : vector<8x1xf32> to vector<8x32xf32>
    %73 = arith.mulf %72, %71 : vector<8x32xf32>
    %74 = arith.addf %68, %73 : vector<8x32xf32>
    %c0_12 = arith.constant 0 : index
    %c0_13 = arith.constant 0 : index
    %75 = vector.load %arg5[%c0_12, %c0_13] : memref<8x32xf32, #tpu.memory_space<vmem>>, vector<8x32xf32>
    tpu.vector_store %arg5[%c0_12, %c0_13], %74 {strides = array<i32>} : memref<8x32xf32, #tpu.memory_space<vmem>>, vector<8x32xf32>,
    return
  }
  func.func @transform_0(%arg0: i32) -> (i32, i32) {
    %c0_i32 = arith.constant 0 : i32
    %c0_i32_0 = arith.constant 0 : i32
    return %arg0, %c0_i32 : i32, i32
  }
  func.func @transform_1(%arg0: i32) -> (i32, i32) {
    %c0_i32 = arith.constant 0 : i32
    %c0_i32_0 = arith.constant 0 : i32
    return %arg0, %c0_i32 : i32, i32
  }
  func.func @transform_2(%arg0: i32) -> (i32, i32) {
    %c0_i32 = arith.constant 0 : i32
    %c0_i32_0 = arith.constant 0 : i32
    %c0_i32_1 = arith.constant 0 : i32
    return %c0_i32, %c0_i32_0 : i32, i32
  }
  func.func @transform_3(%arg0: i32) -> (i32, i32) {
    %c0_i32 = arith.constant 0 : i32
    %c0_i32_0 = arith.constant 0 : i32
    %c0_i32_1 = arith.constant 0 : i32
    return %c0_i32, %c0_i32_0 : i32, i32
  }
  func.func @transform_4(%arg0: i32) -> (i32, i32) {
    %c0_i32 = arith.constant 0 : i32
    %c0_i32_0 = arith.constant 0 : i32
    return %arg0, %c0_i32 : i32, i32
  }
}

</mosaic_0001>

<bundles_post_ra>
// kernel: tpu_custom_call.1
= control target key start
LH: loop header
LB: loop body
LE: loop exit
PB: predicated region body
PF: predicated region fallthrough
CT: control target
= control target key end

     0   :  { %v5102_v1 = vlaneseq  ;;  %vm38_vm0 = vcmask 261120   ;;  %s5097_s0 = inlined_call_operand.vmem [shape: f32[8,16], index: 0, kind: input, shape index: {}]   ;;  %s5098_s1 = inlined_call_operand.vmem [shape: f32[64,32], index: 1, kind: input, shape index: {}]   ;;  %s5099_s2 = inlined_call_operand.vmem [shape: f32[32,16], index: 2, kind: input, shape index: {}]   ;;  %s5100_s3 = inlined_call_operand.vmem [shape: f32[1,16], index: 3, kind: input, shape index: {}]   ;;  %s5101_s4 = inlined_call_operand.hbm [shape: f32[8,32], index: 4, kind: output, shape index: {}]  }
   0x1   :  { %v3263_v0 = vld [vmem:[%s5098_s1] sm:$0xff]  ;;  %v28_v3 = vld [vmem:[%s5099_s2 + $0x8] sm:$0xff]  ;;  %v29_v5 = vld [vmem:[%s5099_s2 + $0x10] sm:$0xff] }
   0x2   :  { %v27_v2 = vld [vmem:[%s5099_s2] sm:$0xff]  ;;  %v30_v6 = vld [vmem:[%s5099_s2 + $0x18] sm:$0xff]  ;;  %3136 = vmatprep.mubr.msk.f32.mxu0 %vm38_vm0, %v3263_v0  ;;  %v3280_v7 = vshrl.u32 %v5102_v1, 7  ;;  %v3290_v10 = vld [vmem:[%s5098_s1 + $0x10] sm:$0xff] }
   0x3   :  { %v3148_v4 = vpack.c.bf16 %v28_v3, %v27_v2  ;;  %v3152_v8 = vpack.c.bf16 %v30_v6, %v29_v5  ;;  %v3285_v9 = vld [vmem:[%s5098_s1 + $0x20] sm:$0xff] }
   0x4   :  { %5126 = vst [vmem:[#allocation5_spill] sm:$0xff] %v3280_v7  ;;  %v3293_v11 = vsub.s32 0, %v3280_v7 }
   0x5   :  { %3149 = vmatprep.subr.bf16.mxu0 %v3148_v4  ;;  %3156 = vmatprep.subr.bf16.mxu1 %v3148_v4 }
   0x6   :  { %3151 = vmatpush3.bf16.msra.mxu0 %v3148_v4  ;;  %3158 = vmatpush3.bf16.msra.mxu1 %v3148_v4 }
   0x7   :  { %9 = vsyncpa [#allocation3], 0  ;;  %3153 = vmatprep.subr.bf16.mxu0 %v3152_v8  ;;  %3157 = vmatprep.subr.bf16.mxu1 %v3152_v8  ;;  %v593_v12 = vrot.slane %v3263_v0, %v3293_v11  ;;  %v631_v13 = vrot.slane %v3290_v10, %v3293_v11  ;;  %v3304_v14 = vld [vmem:[%s5098_s1 + $0x28] sm:$0xff]  ;;  %v3309_v15 = vld [vmem:[%s5098_s1 + $0x18] sm:$0xff]  ;;  %v669_v20 = vrot.slane %v3285_v9, %v3293_v11  ;;  %v3351_v25 = vsub.s32 1, %v3280_v7 }
   0x8   :  { %3142 = vmatprep.mubr.msk.f32.mxu1 %vm38_vm0, %v3285_v9  ;;  %v3314_v16 = vld [vmem:[%s5098_s1 + $0x8] sm:$0xff]  ;;  %v3319_v17 = vld [vmem:[%s5098_s1 + $0x30] sm:$0xff]  ;;  %v650_v18 = vrot.slane %v3309_v15, %v3293_v11  ;;  %v3334_v19 = vld [vmem:[%s5098_s1 + $0x38] sm:$0xff]  ;;  %v688_v22 = vrot.slane %v3304_v14, %v3293_v11  ;;  %v3370_v34 = vsub.s32 2, %v3280_v7  ;;  %v3437_v5 = vsub.s32 3, %v3280_v7 }
   0x9   :  { %595 = vbcast.lane.b32.xlu0 %v593_v12, 256  ;;  %633 = vbcast.lane.b32.xlu1 %v631_v13, 256  ;;  %v612_v21 = vrot.slane %v3314_v16, %v3293_v11  ;;  %v707_v23 = vrot.slane %v3319_v17, %v3293_v11  ;;  %v726_v24 = vrot.slane %v3334_v19, %v3293_v11  ;;  %vm274_vm1 = vcmask 130048  }
   0xa   :  { %3155 = vmatpush3.bf16.msra.mxu0 %v3152_v8  ;;  %3159 = vmatpush3.bf16.msra.mxu1 %v3152_v8  ;;  %v873_v26 = vrot.slane %v3263_v0, %v3351_v25  ;;  %v892_v27 = vrot.slane %v3314_v16, %v3351_v25  ;;  %v911_v28 = vrot.slane %v3290_v10, %v3351_v25  ;;  %vm349_vm2 = vcmask 1041409  }
   0xb   :  { %v930_v29 = vrot.slane %v3309_v15, %v3351_v25  ;;  %v949_v30 = vrot.slane %v3285_v9, %v3351_v25  ;;  %v968_v31 = vrot.slane %v3304_v14, %v3351_v25  ;;  %v987_v32 = vrot.slane %v3319_v17, %v3351_v25 }
   0xc   :  { %v1006_v33 = vrot.slane %v3334_v19, %v3351_v25  ;;  %v1153_v35 = vrot.slane %v3263_v0, %v3370_v34  ;;  %v1172_v37 = vrot.slane %v3314_v16, %v3370_v34  ;;  %v1191_v42 = vrot.slane %v3290_v10, %v3370_v34 }
   0xd   :  { %3137 = vmatmul.mubr.msk.f32.vlgmr.msra.gmra.mrb[0].mxu0 %vm38_vm0, %v3314_v16  ;;  %599 = vbcast.lane.b32.xlu0 %v593_v12, 264  ;;  %v1210_v47 = vrot.slane %v3309_v15, %v3370_v34  ;;  %v1229_v51 = vrot.slane %v3285_v9, %v3370_v34  ;;  %v1248_v56 = vrot.slane %v3304_v14, %v3370_v34  ;;  %vm351_vm3 = vcmask 1042434  }
   0xe   :  { %3143 = vmatmul.mubr.msk.f32.vlgmr.msra.gmra.mrb[0].mxu1 %vm38_vm0, %v3304_v14  ;;  %3139 = vmatprep.mubr.msk.f32.mxu0 %vm38_vm0, %v3290_v10  ;;  %v1267_v60 = vrot.slane %v3319_v17, %v3370_v34  ;;  %v1286_v2 = vrot.slane %v3334_v19, %v3370_v34  ;;  %vm353_vm4 = vcmask 1043459   ;;  %vm355_vm5 = vcmask 1044484  }
   0xf   :  { %3145 = vmatprep.mubr.msk.f32.mxu1 %vm38_vm0, %v3319_v17  ;;  %656 = vbcast.lane.b32.xlu1 %v650_v18, 264  ;;  %vm357_vm6 = vcmask 1045509   ;;  %vm359_vm7 = vcmask 1046534   ;;  %vm361_vm8 = vcmask 1047559   ;;  %vm364_vm9 = vcmask 64512  }
  0x10   :  { %vm2935_vm10 = vcmask 130112   ;;  %vm2942_vm11 = vcmask 195712   ;;  %vm2949_vm12 = vcmask 261312  }
  0x11   :  { %3140 = vmatmul.mubr.msk.f32.gmra.mrb[2].mxu0 %vm38_vm0, %v3309_v15  ;;  %603 = vbcast.lane.b32.xlu0 %v593_v12, 272 }
  0x12   :  { %3146 = vmatmul.mubr.msk.f32.gmra.mrb[2].mxu1 %vm38_vm0, %v3334_v19 }
  0x13   :  { %664 = vbcast.lane.b32.xlu1 %v650_v18, 280 }
  0x15   :  { %607 = vbcast.lane.b32.xlu0 %v593_v12, 280  ;;  %v1433_v12 = vrot.slane %v3263_v0, %v3437_v5 }
  0x17   :  { %675 = vbcast.lane.b32.xlu1 %v669_v20, 264 }
  0x19   :  { %614 = vbcast.lane.b32.xlu0 %v612_v21, 256 }
  0x1b   :  { %683 = vbcast.lane.b32.xlu1 %v669_v20, 280 }
  0x1d   :  { %618 = vbcast.lane.b32.xlu0 %v612_v21, 264 }
  0x1f   :  { %694 = vbcast.lane.b32.xlu1 %v688_v22, 264 }
  0x21   :  { %622 = vbcast.lane.b32.xlu0 %v612_v21, 272 }
  0x23   :  { %702 = vbcast.lane.b32.xlu1 %v688_v22, 280 }
  0x25   :  { %626 = vbcast.lane.b32.xlu0 %v612_v21, 280  ;;  %v1452_v21 = vrot.slane %v3314_v16, %v3437_v5 }
  0x27   :  { %713 = vbcast.lane.b32.xlu1 %v707_v23, 264 }
  0x29   :  { %637 = vbcast.lane.b32.xlu0 %v631_v13, 264 }
  0x2b   :  { %721 = vbcast.lane.b32.xlu1 %v707_v23, 280 }
  0x2d   :  { %641 = vbcast.lane.b32.xlu0 %v631_v13, 272 }
  0x2f   :  { %732 = vbcast.lane.b32.xlu1 %v726_v24, 264 }
  0x31   :  { %645 = vbcast.lane.b32.xlu0 %v631_v13, 280 }
  0x33   :  { %740 = vbcast.lane.b32.xlu1 %v726_v24, 280 }
  0x35   :  { %652 = vbcast.lane.b32.xlu0 %v650_v18, 256 }
  0x37   :  { %879 = vbcast.lane.b32.xlu1 %v873_v26, 264 }
  0x39   :  { %660 = vbcast.lane.b32.xlu0 %v650_v18, 272 }
  0x3b   :  { %887 = vbcast.lane.b32.xlu1 %v873_v26, 280 }
  0x3d   :  { %671 = vbcast.lane.b32.xlu0 %v669_v20, 256 }
  0x3f   :  { %898 = vbcast.lane.b32.xlu1 %v892_v27, 264 }
  0x41   :  { %679 = vbcast.lane.b32.xlu0 %v669_v20, 272 }
  0x43   :  { %906 = vbcast.lane.b32.xlu1 %v892_v27, 280 }
  0x45   :  { %690 = vbcast.lane.b32.xlu0 %v688_v22, 256 }
  0x47   :  { %917 = vbcast.lane.b32.xlu1 %v911_v28, 264 }
  0x49   :  { %698 = vbcast.lane.b32.xlu0 %v688_v22, 272 }
  0x4b   :  { %925 = vbcast.lane.b32.xlu1 %v911_v28, 280 }
  0x4d   :  { %709 = vbcast.lane.b32.xlu0 %v707_v23, 256 }
  0x4f   :  { %936 = vbcast.lane.b32.xlu1 %v930_v29, 264 }
  0x51   :  { %717 = vbcast.lane.b32.xlu0 %v707_v23, 272 }
  0x53   :  { %944 = vbcast.lane.b32.xlu1 %v930_v29, 280 }
  0x55   :  { %728 = vbcast.lane.b32.xlu0 %v726_v24, 256 }
  0x57   :  { %955 = vbcast.lane.b32.xlu1 %v949_v30, 264 }
  0x59   :  { %736 = vbcast.lane.b32.xlu0 %v726_v24, 272 }
  0x5b   :  { %963 = vbcast.lane.b32.xlu1 %v949_v30, 280 }
  0x5d   :  { %875 = vbcast.lane.b32.xlu0 %v873_v26, 256 }
  0x5f   :  { %974 = vbcast.lane.b32.xlu1 %v968_v31, 264 }
  0x61   :  { %883 = vbcast.lane.b32.xlu0 %v873_v26, 272 }
  0x63   :  { %982 = vbcast.lane.b32.xlu1 %v968_v31, 280 }
  0x65   :  { %894 = vbcast.lane.b32.xlu0 %v892_v27, 256 }
  0x67   :  { %993 = vbcast.lane.b32.xlu1 %v987_v32, 264 }
  0x69   :  { %902 = vbcast.lane.b32.xlu0 %v892_v27, 272  ;;  %v3463_v27 = vrot.slane %v3290_v10, %v3437_v5 }
  0x6b   :  { %1001 = vbcast.lane.b32.xlu1 %v987_v32, 280 }
  0x6d   :  { %913 = vbcast.lane.b32.xlu0 %v911_v28, 256 }
  0x6f   :  { %1012 = vbcast.lane.b32.xlu1 %v1006_v33, 264 }
  0x71   :  { %921 = vbcast.lane.b32.xlu0 %v911_v28, 272 }
  0x73   :  { %1020 = vbcast.lane.b32.xlu1 %v1006_v33, 280 }
  0x75   :  { %932 = vbcast.lane.b32.xlu0 %v930_v29, 256 }
  0x77   :  { %1159 = vbcast.lane.b32.xlu1 %v1153_v35, 264 }
  0x79   :  { %940 = vbcast.lane.b32.xlu0 %v930_v29, 272 }
  0x7b   :  { %v3374_v36 = vpop.permute.xlu0 %595  ;;  %1167 = vbcast.lane.b32.xlu1 %v1153_v35, 280  ;;  %v3378_v38 = vpop.permute.xlu1 %633 }
  0x7c   :  { %5127 = vst [vmem:[#allocation6_spill] sm:$0xff] %v3374_v36  ;;  %5128 = vst [vmem:[#allocation7_spill] sm:$0xff] %v3378_v38 }
  0x7d   :  { %951 = vbcast.lane.b32.xlu0 %v949_v30, 256 }
  0x7f   :  { %v3380_v39 = vpop.permute.xlu0 %599  ;;  %1178 = vbcast.lane.b32.xlu1 %v1172_v37, 264 }
  0x80   :  { %5129 = vst [vmem:[#allocation8_spill] sm:$0xff] %v3380_v39 }
  0x81   :  { %959 = vbcast.lane.b32.xlu0 %v949_v30, 272  ;;  %v3382_v40 = vpop.permute.xlu1 %656 }
  0x82   :  { %5130 = vst [vmem:[#allocation9_spill] sm:$0xff] %v3382_v40 }
  0x83   :  { %v3384_v41 = vpop.permute.xlu0 %603  ;;  %1186 = vbcast.lane.b32.xlu1 %v1172_v37, 280 }
  0x84   :  { %5131 = vst [vmem:[#allocation10_spill] sm:$0xff] %v3384_v41 }
  0x85   :  { %970 = vbcast.lane.b32.xlu0 %v968_v31, 256  ;;  %v3388_v43 = vpop.permute.xlu1 %664 }
  0x86   :  { %5132 = vst [vmem:[#allocation11_spill] sm:$0xff] %v3388_v43 }
  0x87   :  { %v3390_v44 = vpop.permute.xlu0 %607  ;;  %1197 = vbcast.lane.b32.xlu1 %v1191_v42, 264 }
  0x88   :  { %5133 = vst [vmem:[#allocation12_spill] sm:$0xff] %v3390_v44 }
  0x89   :  { %978 = vbcast.lane.b32.xlu0 %v968_v31, 272  ;;  %v3392_v45 = vpop.permute.xlu1 %675 }
  0x8a   :  { %5134 = vst [vmem:[#allocation13_spill] sm:$0xff] %v3392_v45 }
  0x8b   :  { %v3394_v46 = vpop.permute.xlu0 %614  ;;  %1205 = vbcast.lane.b32.xlu1 %v1191_v42, 280 }
  0x8c   :  { %5135 = vst [vmem:[#allocation14_spill] sm:$0xff] %v3394_v46 }
  0x8d   :  { %989 = vbcast.lane.b32.xlu0 %v987_v32, 256  ;;  %v3398_v48 = vpop.permute.xlu1 %683 }
  0x8e   :  { %5136 = vst [vmem:[#allocation15_spill] sm:$0xff] %v3398_v48 }
  0x8f   :  { %v3400_v49 = vpop.permute.xlu0 %618  ;;  %1216 = vbcast.lane.b32.xlu1 %v1210_v47, 264 }
  0x90   :  { %5137 = vst [vmem:[#allocation16_spill] sm:$0xff] %v3400_v49 }
  0x91   :  { %997 = vbcast.lane.b32.xlu0 %v987_v32, 272  ;;  %v3406_v52 = vpop.permute.xlu1 %694 }
  0x92   :  { %5139 = vst [vmem:[#allocation18_spill] sm:$0xff] %v3406_v52 }
  0x93   :  { %v3402_v50 = vpop.permute.xlu0 %622  ;;  %1224 = vbcast.lane.b32.xlu1 %v1210_v47, 280 }
  0x94   :  { %5138 = vst [vmem:[#allocation17_spill] sm:$0xff] %v3402_v50 }
  0x95   :  { %1008 = vbcast.lane.b32.xlu0 %v1006_v33, 256  ;;  %v3410_v54 = vpop.permute.xlu1 %702 }
  0x97   :  { %v3408_v53 = vpop.permute.xlu0 %626  ;;  %1235 = vbcast.lane.b32.xlu1 %v1229_v51, 264 }
  0x98   :  { %5140 = vst [vmem:[#allocation19_spill] sm:$0xff] %v3408_v53 }
  0x99   :  { %1016 = vbcast.lane.b32.xlu0 %v1006_v33, 272  ;;  %v3418_v58 = vpop.permute.xlu1 %713  ;;  %v3232_v33 = vmov 1966171168  }
  0x9b   :  { %v3412_v55 = vpop.permute.xlu0 %637  ;;  %1243 = vbcast.lane.b32.xlu1 %v1229_v51, 280 }
  0x9c   :  { %5141 = vst [vmem:[#allocation20_spill] sm:$0xff] %v3412_v55 }
  0x9d   :  { %1155 = vbcast.lane.b32.xlu0 %v1153_v35, 256  ;;  %v3424_v61 = vpop.permute.xlu1 %721 }
  0x9e   :  { %5144 = vst [vmem:[#allocation23_spill] sm:$0xff] %v3424_v61 }
  0x9f   :  { %v3416_v57 = vpop.permute.xlu0 %641  ;;  %1254 = vbcast.lane.b32.xlu1 %v1248_v56, 264 }
  0xa0   :  { %5142 = vst [vmem:[#allocation21_spill] sm:$0xff] %v3416_v57 }
  0xa1   :  { %1163 = vbcast.lane.b32.xlu0 %v1153_v35, 272  ;;  %v3432_v3 = vpop.permute.xlu1 %732  ;;  %v179_v35 = vunpack.c.l.s4 %v3232_v33 }
  0xa2   :  { %5147 = vst [vmem:[#allocation26_spill] sm:$0xff] %v3432_v3 }
  0xa3   :  { %v3420_v59 = vpop.permute.xlu0 %645  ;;  %1262 = vbcast.lane.b32.xlu1 %v1248_v56, 280 }
  0xa4   :  { %5143 = vst [vmem:[#allocation22_spill] sm:$0xff] %v3420_v59 }
  0xa5   :  { %1174 = vbcast.lane.b32.xlu0 %v1172_v37, 256  ;;  %v3439_v6 = vpop.permute.xlu1 %740 }
  0xa6   :  { %5149 = vst [vmem:[#allocation28_spill] sm:$0xff] %v3439_v6 }
  0xa7   :  { %v3426_v62 = vpop.permute.xlu0 %652  ;;  %1273 = vbcast.lane.b32.xlu1 %v1267_v60, 264 }
  0xa8   :  { %5145 = vst [vmem:[#allocation24_spill] sm:$0xff] %v3426_v62 }
  0xa9   :  { %1182 = vbcast.lane.b32.xlu0 %v1172_v37, 272  ;;  %v3447_v18 = vpop.permute.xlu1 %879 }
  0xaa   :  { %5152 = vst [vmem:[#allocation31_spill] sm:$0xff] %v3447_v18  ;;  %v3963_v18 = vld [vmem:[%s5098_s1 + $0x30] sm:$0xff] }
  0xab   :  { %v3428_v63 = vpop.permute.xlu0 %660  ;;  %1281 = vbcast.lane.b32.xlu1 %v1267_v60, 280 }
  0xac   :  { %5146 = vst [vmem:[#allocation25_spill] sm:$0xff] %v3428_v63 }
  0xad   :  { %1193 = vbcast.lane.b32.xlu0 %v1191_v42, 256  ;;  %v3453_v22 = vpop.permute.xlu1 %887 }
  0xae   :  { %5153 = vst [vmem:[#allocation32_spill] sm:$0xff] %v3453_v22 }
  0xaf   :  { %v3434_v4 = vpop.permute.xlu0 %671  ;;  %1292 = vbcast.lane.b32.xlu1 %v1286_v2, 264 }
  0xb0   :  { %5148 = vst [vmem:[#allocation27_spill] sm:$0xff] %v3434_v4 }
  0xb1   :  { %1201 = vbcast.lane.b32.xlu0 %v1191_v42, 272  ;;  %v3459_v26 = vpop.permute.xlu1 %898 }
  0xb2   :  { %5154 = vst [vmem:[#allocation33_spill] sm:$0xff] %v3459_v26 }
  0xb3   :  { %v3441_v8 = vpop.permute.xlu0 %679  ;;  %1300 = vbcast.lane.b32.xlu1 %v1286_v2, 280 }
  0xb4   :  { %5150 = vst [vmem:[#allocation29_spill] sm:$0xff] %v3441_v8 }
  0xb5   :  { %1212 = vbcast.lane.b32.xlu0 %v1210_v47, 256  ;;  %v3468_v29 = vpop.permute.xlu1 %906 }
  0xb6   :  { %5156 = vst [vmem:[#allocation35_spill] sm:$0xff] %v3468_v29 }
  0xb7   :  { %v3445_v13 = vpop.permute.xlu0 %690  ;;  %1439 = vbcast.lane.b32.xlu1 %v1433_v12, 264 }
  0xb8   :  { %5151 = vst [vmem:[#allocation30_spill] sm:$0xff] %v3445_v13 }
  0xb9   :  { %1220 = vbcast.lane.b32.xlu0 %v1210_v47, 272  ;;  %v3474_v32 = vpop.permute.xlu1 %917  ;;  %v180_v47 = vunpack.c.0.s8 %v179_v35  ;;  %v3496_v35 = vld [vmem:[%s5100_s3] ss:$0 sm:$0xff] }
  0xba   :  { %5159 = vst [vmem:[#allocation38_spill] sm:$0xff] %v3474_v32 }
  0xbb   :  { %v3449_v20 = vpop.permute.xlu0 %698  ;;  %1447 = vbcast.lane.b32.xlu1 %v1433_v12, 280  ;;  %v3486_v6 = vsub.s32 %v180_v47, %v3280_v7 }
  0xbd   :  { %1231 = vbcast.lane.b32.xlu0 %v1229_v51, 256  ;;  %v3478_v42 = vpop.permute.xlu1 %925 }
  0xbe   :  { %5161 = vst [vmem:[#allocation40_spill] sm:$0xff] %v3478_v42 }
  0xbf   :  { %v3455_v23 = vpop.permute.xlu0 %709  ;;  %1458 = vbcast.lane.b32.xlu1 %v1452_v21, 264 }
  0xc1   :  { %1239 = vbcast.lane.b32.xlu0 %v1229_v51, 272  ;;  %v3490_v33 = vpop.permute.xlu1 %936 }
  0xc2   :  { %5164 = vst [vmem:[#allocation43_spill] sm:$0xff] %v3490_v33 }
  0xc3   :  { %v3457_v24 = vpop.permute.xlu0 %717  ;;  %1466 = vbcast.lane.b32.xlu1 %v1452_v21, 280 }
  0xc5   :  { %1250 = vbcast.lane.b32.xlu0 %v1248_v56, 256  ;;  %v3504_v45 = vpop.permute.xlu1 %944 }
  0xc6   :  { %5166 = vst [vmem:[#allocation45_spill] sm:$0xff] %v3504_v45 }
  0xc7   :  { %v3465_v28 = vpop.permute.xlu0 %728  ;;  %1477 = vbcast.lane.b32.xlu1 %v3463_v27, 264 }
  0xc8   :  { %5155 = vst [vmem:[#allocation34_spill] sm:$0xff] %v3465_v28 }
  0xc9   :  { %1258 = vbcast.lane.b32.xlu0 %v1248_v56, 272  ;;  %v26_v56 = vld [vmem:[%s5097_s0] sm:$0xff] }
  0xca   :  { %v177_v1 = vcombine.high %v26_v56, %v26_v56  ;;  %v184_v48 = vrot.slane %v26_v56, %v3486_v6 }
  0xcb   :  { %v3470_v30 = vpop.permute.xlu0 %736 }
  0xcc   :  { %5157 = vst [vmem:[#allocation36_spill] sm:$0xff] %v3470_v30  ;;  %v3499_v52 = vrot.slane %v177_v1, %v3486_v6  ;;  %v192_v56 = vcombine.high %v184_v48, %v184_v48 }
  0xcd   :  { %1269 = vbcast.lane.b32.xlu0 %v1267_v60, 256 }
  0xce   :  { %v193_v30 = vcombine.high %v3499_v52, %v3499_v52  ;;  %v214_v45 = vrot.slane %v192_v56, %v3486_v6 }
  0xcf   :  { %v3472_v31 = vpop.permute.xlu0 %875 }
  0xd0   :  { %5158 = vst [vmem:[#allocation37_spill] sm:$0xff] %v3472_v31  ;;  %v221_v42 = vrot.slane %v193_v30, %v3486_v6 }
  0xd1   :  { %1277 = vbcast.lane.b32.xlu0 %v1267_v60, 272 }
  0xd3   :  { %v3476_v37 = vpop.permute.xlu0 %883 }
  0xd4   :  { %5160 = vst [vmem:[#allocation39_spill] sm:$0xff] %v3476_v37 }
  0xd5   :  { %1288 = vbcast.lane.b32.xlu0 %v1286_v2, 256 }
  0xd7   :  { %v3480_v51 = vpop.permute.xlu0 %894 }
  0xd8   :  { %5162 = vst [vmem:[#allocation41_spill] sm:$0xff] %v3480_v51 }
  0xd9   :  { %1296 = vbcast.lane.b32.xlu0 %v1286_v2, 272 }
  0xdb   :  { %v3488_v60 = vpop.permute.xlu0 %902 }
  0xdc   :  { %5163 = vst [vmem:[#allocation42_spill] sm:$0xff] %v3488_v60 }
  0xdd   :  { %1435 = vbcast.lane.b32.xlu0 %v1433_v12, 256 }
  0xdf   :  { %v3501_v2 = vpop.permute.xlu0 %913 }
  0xe0   :  { %5165 = vst [vmem:[#allocation44_spill] sm:$0xff] %v3501_v2  ;;  %v3138_v13 = vpop.f32.mrb[0].mxu0  ;;  %v225_v2 = vcombine.high %v221_v42, %v221_v42 }
  0xe1   :  { %v3144_v47 = vpop.f32.mrb[0].mxu1  ;;  %v129_v8 = vpop.f32.mrb[1].mxu0  ;;  %1443 = vbcast.lane.b32.xlu0 %v1433_v12, 272 }
  0xe2   :  { %v155_v43 = vadd.f32 %v3144_v47, %v3496_v35  ;;  %v149_v4 = vpop.f32.mrb[1].mxu1 }
  0xe3   :  { %v3508_v63 = vpop.permute.xlu0 %921 }
  0xe4   :  { %5167 = vst [vmem:[#allocation46_spill] sm:$0xff] %v3508_v63  ;;  %3166 = vtanh.f32 %v155_v43  ;;  %v3141_v1 = vpop.f32.mrb[2].mxu0  ;;  %v3517_v63 = vpop.permute.xlu1 %955  ;;  %v224_v43 = vcombine.high %v214_v45, %v214_v45 }
  0xe5   :  { %v145_v62 = vadd.f32 %v3141_v1, %v3496_v35  ;;  %v3147_v33 = vpop.f32.mrb[2].mxu1  ;;  %v139_v40 = vpop.f32.mrb[3].mxu0  ;;  %1454 = vbcast.lane.b32.xlu0 %v1452_v21, 256  ;;  %5169 = vst [vmem:[#allocation48_spill] sm:$0xff] %v3517_v63  ;;  %v249_v1 = vrot.slane %v221_v42, %v3293_v11 }
  0xe6   :  { %v165_v12 = vadd.f32 %v3147_v33, %v3496_v35  ;;  %v140_v47 = vadd.f32 %v3496_v35, %v139_v40  ;;  %v159_v57 = vpop.f32.mrb[3].mxu1  ;;  %v200_v40 = vrot.slane %v184_v48, %v3486_v6  ;;  %v241_v30 = vrot.slane %v224_v43, %v3293_v11 }
  0xe7   :  { %3168 = vtanh.f32 %v145_v62  ;;  %v3515_v59 = vpop.permute.xlu0 %932 }
  0xe8   :  { %5168 = vst [vmem:[#allocation47_spill] sm:$0xff] %v3515_v59  ;;  %3170 = vtanh.f32 %v165_v12  ;;  %v3524_v62 = vpop.permute.xlu1 %963  ;;  %v222_v12 = vcombine.high %v200_v40, %v200_v40 }
  0xe9   :  { %1462 = vbcast.lane.b32.xlu0 %v1452_v21, 272  ;;  %3172 = vtanh.f32 %v140_v47  ;;  %5171 = vst [vmem:[#allocation50_spill] sm:$0xff] %v3524_v62  ;;  %v257_v21 = vrot.slane %v225_v2, %v3293_v11  ;;  %v135_v2 = vadd.f32 %v3138_v13, %v3496_v35 }
  0xea   :  { %v237_v32 = vrot.slane %v222_v12, %v3293_v11 }
  0xeb   :  { %v3520_v33 = vpop.permute.xlu0 %940  ;;  %3174 = vtanh.f32 %v135_v2 }
  0xec   :  { %5170 = vst [vmem:[#allocation49_spill] sm:$0xff] %v3520_v33  ;;  %v3534_v60 = vpop.permute.xlu1 %974 }
  0xed   :  { %1473 = vbcast.lane.b32.xlu0 %v3463_v27, 256  ;;  %5174 = vst [vmem:[#allocation53_spill] sm:$0xff] %v3534_v60  ;;  %v3606_v60 = vsub.s32 4, %v3280_v7 }
  0xee   :  { %v3167_v38 = vpop.eup %3166 }
  0xef   :  { %v271_v56 = vmul.f32 %v3167_v38, %v249_v1  ;;  %v3528_v47 = vpop.permute.xlu0 %951 }
  0xf0   :  { %5172 = vst [vmem:[#allocation51_spill] sm:$0xff] %v3528_v47 }
  0xf1   :  { %v3169_v63 = vpop.eup %3168  ;;  %v290_v42 = vsel %vm274_vm1, %v271_v56, 0.0 }
  0xf2   :  { %v3171_v33 = vpop.eup %3170  ;;  %291 = vadd.xlane.f32.xlu1 %v290_v42  ;;  %v269_v48 = vmul.f32 %v3169_v63, %v241_v30  ;;  %v3541_v63 = vpop.permute.xlu1 %982 }
  0xf3   :  { %v273_v59 = vmul.f32 %v3171_v33, %v257_v21  ;;  %v3173_v55 = vpop.eup %3172  ;;  %v3532_v62 = vpop.permute.xlu0 %959  ;;  %v130_v33 = vadd.f32 %v3496_v35, %v129_v8  ;;  %v150_v21 = vadd.f32 %v3496_v35, %v149_v4  ;;  %v207_v4 = vrot.slane %v3499_v52, %v3486_v6 }
  0xf4   :  { %5173 = vst [vmem:[#allocation52_spill] sm:$0xff] %v3532_v62  ;;  %v284_v38 = vsel %vm274_vm1, %v269_v48, 0.0  ;;  %v268_v1 = vmul.f32 %v3173_v55, %v237_v32  ;;  %v160_v55 = vadd.f32 %v3496_v35, %v159_v57  ;;  %v1490_v6 = vrot.slane %v3309_v15, %v3437_v5 }
  0xf5   :  { %v296_v43 = vsel %vm274_vm1, %v273_v59, 0.0  ;;  %3176 = vtanh.f32 %v130_v33  ;;  %v233_v59 = vrot.slane %v214_v45, %v3293_v11  ;;  %v3175_v32 = vpop.eup %3174  ;;  %v223_v57 = vcombine.high %v207_v4, %v207_v4 }
  0xf6   :  { %285 = vadd.xlane.f32.xlu1 %v284_v38  ;;  %v281_v30 = vsel %vm274_vm1, %v268_v1, 0.0  ;;  %v3548_v13 = vpop.permute.xlu1 %993  ;;  %3178 = vtanh.f32 %v150_v21  ;;  %v229_v38 = vrot.slane %v200_v40, %v3293_v11  ;;  %v245_v1 = vrot.slane %v207_v4, %v3293_v11 }
  0xf7   :  { %v3539_v56 = vpop.permute.xlu0 %970  ;;  %3180 = vtanh.f32 %v160_v55  ;;  %v267_v48 = vmul.f32 %v3175_v32, %v233_v59  ;;  %v253_v55 = vrot.slane %v223_v57, %v3293_v11 }
  0xf8   :  { %5175 = vst [vmem:[#allocation54_spill] sm:$0xff] %v3539_v56 }
  0xfa   :  { %297 = vadd.xlane.f32.xlu1 %v296_v43  ;;  %v3554_v8 = vpop.permute.xlu1 %1001  ;;  %v278_v43 = vsel %vm274_vm1, %v267_v48, 0.0 }
  0xfb   :  { %v3546_v12 = vpop.permute.xlu0 %978  ;;  %5176 = vst [vmem:[#allocation55_spill] sm:$0xff] %v3554_v8 }
  0xfe   :  { %282 = vadd.xlane.f32.xlu1 %v281_v30  ;;  %v3563_v33 = vpop.permute.xlu1 %1012 }
  0xff   :  { %v3552_v42 = vpop.permute.xlu0 %989  ;;  %v3177_v2 = vpop.eup %3176  ;;  %5177 = vst [vmem:[#allocation56_spill] sm:$0xff] %v3563_v33 }
 0x100   :  { %v3179_v35 = vpop.eup %3178  ;;  %v266_v30 = vmul.f32 %v3177_v2, %v229_v38 }
 0x101   :  { %v270_v21 = vmul.f32 %v3179_v35, %v245_v1  ;;  %v3181_v59 = vpop.eup %3180  ;;  %v1509_v1 = vrot.slane %v3285_v9, %v3437_v5 }
 0x102   :  { %v275_v52 = vsel %vm274_vm1, %v266_v30, 0.0  ;;  %v3572_v32 = vpop.permute.xlu1 %1020  ;;  %v272_v4 = vmul.f32 %v3181_v59, %v253_v55  ;;  %v1528_v30 = vrot.slane %v3304_v14, %v3437_v5  ;;  %v1547_v59 = vrot.slane %v3319_v17, %v3437_v5 }
 0x103   :  { %v3561_v45 = vpop.permute.xlu0 %997  ;;  %5179 = vst [vmem:[#allocation58_spill] sm:$0xff] %v3572_v32  ;;  %v287_v48 = vsel %vm274_vm1, %v270_v21, 0.0  ;;  %v1566_v32 = vrot.slane %v3334_v19, %v3437_v5 }
 0x104   :  { %v293_v38 = vsel %vm274_vm1, %v272_v4, 0.0 }
 0x107   :  { %v3570_v40 = vpop.permute.xlu0 %1008 }
 0x108   :  { %5178 = vst [vmem:[#allocation57_spill] sm:$0xff] %v3570_v40 }
 0x10b   :  { %v3576_v2 = vpop.permute.xlu0 %1016 }
 0x10c   :  { %279 = vadd.xlane.f32.xlu0 %v278_v43  ;;  %5180 = vst [vmem:[#allocation59_spill] sm:$0xff] %v3576_v2  ;;  %v3578_v43 = vpop.permute.xlu1 %1159 }
 0x10d   :  { %5181 = vst [vmem:[#allocation60_spill] sm:$0xff] %v3578_v43 }
 0x10f   :  { %1485 = vbcast.lane.b32.xlu1 %v3463_v27, 280  ;;  %v3582_v57 = vpop.permute.xlu0 %1155 }
 0x110   :  { %276 = vadd.xlane.f32.xlu0 %v275_v52  ;;  %5182 = vst [vmem:[#allocation61_spill] sm:$0xff] %v3582_v57  ;;  %v3584_v35 = vpop.permute.xlu1 %1167 }
 0x111   :  { %5183 = vst [vmem:[#allocation62_spill] sm:$0xff] %v3584_v35 }
 0x113   :  { %1496 = vbcast.lane.b32.xlu1 %v1490_v6, 264  ;;  %v3588_v21 = vpop.permute.xlu0 %1163 }
 0x114   :  { %288 = vadd.xlane.f32.xlu0 %v287_v48  ;;  %5184 = vst [vmem:[#allocation63_spill] sm:$0xff] %v3588_v21  ;;  %v3590_v55 = vpop.permute.xlu1 %1178 }
 0x115   :  { %5185 = vst [vmem:[#allocation64_spill] sm:$0xff] %v3590_v55 }
 0x117   :  { %1504 = vbcast.lane.b32.xlu1 %v1490_v6, 280  ;;  %v3594_v52 = vpop.permute.xlu0 %1174 }
 0x118   :  { %294 = vadd.xlane.f32.xlu0 %v293_v38  ;;  %5186 = vst [vmem:[#allocation65_spill] sm:$0xff] %v3594_v52  ;;  %v3596_v48 = vpop.permute.xlu1 %1186 }
 0x119   :  { %5187 = vst [vmem:[#allocation66_spill] sm:$0xff] %v3596_v48  ;;  %v1846_v48 = vrot.slane %v3334_v19, %v3606_v60 }
 0x11b   :  { %1515 = vbcast.lane.b32.xlu1 %v1509_v1, 264  ;;  %v3599_v4 = vpop.permute.xlu0 %1182 }
 0x11c   :  { %5188 = vst [vmem:[#allocation67_spill] sm:$0xff] %v3599_v4  ;;  %v3601_v38 = vpop.permute.xlu1 %1197 }
 0x11d   :  { %5189 = vst [vmem:[#allocation68_spill] sm:$0xff] %v3601_v38  ;;  %v1732_v38 = vrot.slane %v3314_v16, %v3606_v60 }
 0x11f   :  { %1523 = vbcast.lane.b32.xlu1 %v1509_v1, 280  ;;  %v3608_v56 = vpop.permute.xlu0 %1193 }
 0x120   :  { %5190 = vst [vmem:[#allocation69_spill] sm:$0xff] %v3608_v56  ;;  %v3610_v62 = vpop.permute.xlu1 %1205 }
 0x121   :  { %5191 = vst [vmem:[#allocation70_spill] sm:$0xff] %v3610_v62 }
 0x123   :  { %1534 = vbcast.lane.b32.xlu1 %v1528_v30, 264  ;;  %v3614_v2 = vpop.permute.xlu0 %1201 }
 0x124   :  { %5192 = vst [vmem:[#allocation71_spill] sm:$0xff] %v3614_v2  ;;  %v3616_v47 = vpop.permute.xlu1 %1216 }
 0x125   :  { %5193 = vst [vmem:[#allocation72_spill] sm:$0xff] %v3616_v47  ;;  %v1751_v47 = vrot.slane %v3290_v10, %v3606_v60 }
 0x127   :  { %1542 = vbcast.lane.b32.xlu1 %v1528_v30, 280  ;;  %v3620_v4 = vpop.permute.xlu0 %1212 }
 0x128   :  { %5194 = vst [vmem:[#allocation73_spill] sm:$0xff] %v3620_v4  ;;  %v3622_v56 = vpop.permute.xlu1 %1224 }
 0x129   :  { %5195 = vst [vmem:[#allocation74_spill] sm:$0xff] %v3622_v56  ;;  %v1770_v56 = vrot.slane %v3309_v15, %v3606_v60 }
 0x12b   :  { %1553 = vbcast.lane.b32.xlu1 %v1547_v59, 264 }
 0x12c   :  { %v3626_v62 = vpop.permute.xlu1 %1235 }
 0x12d   :  { %5197 = vst [vmem:[#allocation76_spill] sm:$0xff] %v3626_v62  ;;  %v1789_v62 = vrot.slane %v3285_v9, %v3606_v60 }
 0x12e   :  { %1481 = vbcast.lane.b32.xlu0 %v3463_v27, 272  ;;  %v1713_v27 = vrot.slane %v3263_v0, %v3606_v60 }
 0x12f   :  { %1561 = vbcast.lane.b32.xlu1 %v1547_v59, 280 }
 0x130   :  { %v3632_v2 = vpop.permute.xlu1 %1243 }
 0x131   :  { %5199 = vst [vmem:[#allocation78_spill] sm:$0xff] %v3632_v2 }
 0x132   :  { %1492 = vbcast.lane.b32.xlu0 %v1490_v6, 256 }
 0x133   :  { %1572 = vbcast.lane.b32.xlu1 %v1566_v32, 264 }
 0x136   :  { %1500 = vbcast.lane.b32.xlu0 %v1490_v6, 272  ;;  %v3624_v6 = vpop.permute.xlu0 %1220 }
 0x137   :  { %1580 = vbcast.lane.b32.xlu1 %v1566_v32, 280  ;;  %5196 = vst [vmem:[#allocation75_spill] sm:$0xff] %v3624_v6  ;;  %v3638_v6 = vpop.permute.xlu1 %1254 }
 0x138   :  { %5201 = vst [vmem:[#allocation80_spill] sm:$0xff] %v3638_v6  ;;  %v1808_v6 = vrot.slane %v3304_v14, %v3606_v60 }
 0x13a   :  { %1511 = vbcast.lane.b32.xlu0 %v1509_v1, 256 }
 0x13b   :  { %1719 = vbcast.lane.b32.xlu1 %v1713_v27, 264 }
 0x13e   :  { %1519 = vbcast.lane.b32.xlu0 %v1509_v1, 272  ;;  %v3630_v1 = vpop.permute.xlu0 %1231 }
 0x13f   :  { %1727 = vbcast.lane.b32.xlu1 %v1713_v27, 280  ;;  %5198 = vst [vmem:[#allocation77_spill] sm:$0xff] %v3630_v1  ;;  %v3644_v1 = vpop.permute.xlu1 %1262 }
 0x142   :  { %1530 = vbcast.lane.b32.xlu0 %v1528_v30, 256 }
 0x143   :  { %1738 = vbcast.lane.b32.xlu1 %v1732_v38, 264  ;;  %v3648_v2 = vpop.permute.xlu1 %1273 }
 0x146   :  { %1538 = vbcast.lane.b32.xlu0 %v1528_v30, 272  ;;  %v3636_v30 = vpop.permute.xlu0 %1239 }
 0x147   :  { %1746 = vbcast.lane.b32.xlu1 %v1732_v38, 280  ;;  %5200 = vst [vmem:[#allocation79_spill] sm:$0xff] %v3636_v30  ;;  %v3654_v30 = vpop.permute.xlu1 %1281 }
 0x148   :  { %5203 = vst [vmem:[#allocation82_spill] sm:$0xff] %v3654_v30 }
 0x14a   :  { %1549 = vbcast.lane.b32.xlu0 %v1547_v59, 256  ;;  %v3642_v4 = vpop.permute.xlu0 %1250 }
 0x14b   :  { %1757 = vbcast.lane.b32.xlu1 %v1751_v47, 264  ;;  %5202 = vst [vmem:[#allocation81_spill] sm:$0xff] %v3642_v4  ;;  %v1827_v4 = vrot.slane %v3319_v17, %v3606_v60  ;;  %v3660_v50 = vpop.permute.xlu1 %1292 }
 0x14c   :  { %5204 = vst [vmem:[#allocation83_spill] sm:$0xff] %v3660_v50 }
 0x14e   :  { %1557 = vbcast.lane.b32.xlu0 %v1547_v59, 272  ;;  %v3646_v59 = vpop.permute.xlu0 %1258 }
 0x14f   :  { %1765 = vbcast.lane.b32.xlu1 %v1751_v47, 280  ;;  %v3666_v53 = vpop.permute.xlu1 %1300 }
 0x150   :  { %5206 = vst [vmem:[#allocation85_spill] sm:$0xff] %v3666_v53 }
 0x152   :  { %1568 = vbcast.lane.b32.xlu0 %v1566_v32, 256 }
 0x153   :  { %1776 = vbcast.lane.b32.xlu1 %v1770_v56, 264  ;;  %v3673_v51 = vpop.permute.xlu1 %1439 }
 0x154   :  { %5208 = vst [vmem:[#allocation87_spill] sm:$0xff] %v3673_v51 }
 0x156   :  { %1576 = vbcast.lane.b32.xlu0 %v1566_v32, 272  ;;  %v3652_v32 = vpop.permute.xlu0 %1269 }
 0x157   :  { %1784 = vbcast.lane.b32.xlu1 %v1770_v56, 280  ;;  %v3679_v55 = vpop.permute.xlu1 %1447 }
 0x158   :  { %5210 = vst [vmem:[#allocation89_spill] sm:$0xff] %v3679_v55 }
 0x15a   :  { %1715 = vbcast.lane.b32.xlu0 %v1713_v27, 256 }
 0x15b   :  { %1795 = vbcast.lane.b32.xlu1 %v1789_v62, 264 }
 0x15e   :  { %1723 = vbcast.lane.b32.xlu0 %v1713_v27, 272  ;;  %v3658_v27 = vpop.permute.xlu0 %1277 }
 0x15f   :  { %1803 = vbcast.lane.b32.xlu1 %v1789_v62, 280 }
 0x162   :  { %1734 = vbcast.lane.b32.xlu0 %v1732_v38, 256  ;;  %v3664_v29 = vpop.permute.xlu0 %1288 }
 0x163   :  { %1814 = vbcast.lane.b32.xlu1 %v1808_v6, 264  ;;  %5205 = vst [vmem:[#allocation84_spill] sm:$0xff] %v3664_v29 }
 0x166   :  { %1742 = vbcast.lane.b32.xlu0 %v1732_v38, 272  ;;  %v3669_v38 = vsub.s32 5, %v3280_v7  ;;  %v3671_v52 = vpop.permute.xlu0 %1296 }
 0x167   :  { %1822 = vbcast.lane.b32.xlu1 %v1808_v6, 280  ;;  %5207 = vst [vmem:[#allocation86_spill] sm:$0xff] %v3671_v52 }
 0x168   :  { %v3736_v55 = vrot.slane %v3309_v15, %v3669_v38 }
 0x16a   :  { %1753 = vbcast.lane.b32.xlu0 %v1751_v47, 256  ;;  %v3677_v46 = vpop.permute.xlu0 %1435 }
 0x16b   :  { %1833 = vbcast.lane.b32.xlu1 %v1827_v4, 264  ;;  %5209 = vst [vmem:[#allocation88_spill] sm:$0xff] %v3677_v46 }
 0x16e   :  { %1761 = vbcast.lane.b32.xlu0 %v1751_v47, 272  ;;  %v1993_v47 = vrot.slane %v3263_v0, %v3669_v38  ;;  %v3681_v53 = vpop.permute.xlu0 %1443 }
 0x16f   :  { %1841 = vbcast.lane.b32.xlu1 %v1827_v4, 280  ;;  %5211 = vst [vmem:[#allocation90_spill] sm:$0xff] %v3681_v53 }
 0x172   :  { %1772 = vbcast.lane.b32.xlu0 %v1770_v56, 256  ;;  %v3685_v52 = vpop.permute.xlu0 %1454 }
 0x173   :  { %1852 = vbcast.lane.b32.xlu1 %v1846_v48, 264  ;;  %5213 = vst [vmem:[#allocation92_spill] sm:$0xff] %v3685_v52 }
 0x176   :  { %1780 = vbcast.lane.b32.xlu0 %v1770_v56, 272  ;;  %v3683_v56 = vpop.permute.xlu1 %1458  ;;  %v3689_v49 = vpop.permute.xlu0 %1462 }
 0x177   :  { %1860 = vbcast.lane.b32.xlu1 %v1846_v48, 280  ;;  %5212 = vst [vmem:[#allocation91_spill] sm:$0xff] %v3683_v56  ;;  %5215 = vst [vmem:[#allocation94_spill] sm:$0xff] %v3689_v49 }
 0x17a   :  { %1791 = vbcast.lane.b32.xlu0 %v1789_v62, 256  ;;  %v3687_v26 = vpop.permute.xlu1 %1466 }
 0x17b   :  { %1999 = vbcast.lane.b32.xlu1 %v1993_v47, 264  ;;  %5214 = vst [vmem:[#allocation93_spill] sm:$0xff] %v3687_v26 }
 0x17e   :  { %1799 = vbcast.lane.b32.xlu0 %v1789_v62, 272  ;;  %v3691_v21 = vpop.permute.xlu1 %1477  ;;  %v3695_v62 = vpop.permute.xlu0 %1473 }
 0x17f   :  { %2007 = vbcast.lane.b32.xlu1 %v1993_v47, 280  ;;  %5216 = vst [vmem:[#allocation95_spill] sm:$0xff] %v3691_v21  ;;  %5217 = vst [vmem:[#allocation96_spill] sm:$0xff] %v3695_v62  ;;  %v5218_v21 = vlaneseq }
 0x181   :  { %v3709_v49 = vand.u32 127, %v5218_v21 }
 0x182   :  { %1810 = vbcast.lane.b32.xlu0 %v1808_v6, 256  ;;  %v3693_v37 = vpop.xlane.xlu1 %291 }
 0x183   :  { %5219 = vst [vmem:[#allocation97_spill] sm:$0xff] %v3709_v49 }
 0x186   :  { %1818 = vbcast.lane.b32.xlu0 %v1808_v6, 272  ;;  %v3697_v53 = vpop.xlane.xlu1 %285  ;;  %v3703_v6 = vrot.slane %v3314_v16, %v3669_v38  ;;  %v3722_v16 = vsub.s32 %v3709_v49, %v3280_v7 }
 0x188   :  { %2018 = vbcast.lane.b32.xlu1 %v3703_v6, 264  ;;  %5220 = vst [vmem:[#allocation98_spill] sm:$0xff] %v3722_v16  ;;  %v332_v22 = vrot.slane %v3697_v53, %v3722_v16 }
 0x18a   :  { %1829 = vbcast.lane.b32.xlu0 %v1827_v4, 256  ;;  %v3711_v26 = vpop.xlane.xlu1 %297 }
 0x18c   :  { %2026 = vbcast.lane.b32.xlu1 %v3703_v6, 280 }
 0x18e   :  { %1837 = vbcast.lane.b32.xlu0 %v1827_v4, 272 }
 0x192   :  { %1848 = vbcast.lane.b32.xlu0 %v1846_v48, 256 }
 0x196   :  { %1856 = vbcast.lane.b32.xlu0 %v1846_v48, 272  ;;  %v3716_v48 = vrot.slane %v3290_v10, %v3669_v38 }
 0x198   :  { %2037 = vbcast.lane.b32.xlu1 %v3716_v48, 264 }
 0x199   :  { %v3699_v56 = vpop.xlane.xlu0 %279 }
 0x19a   :  { %1995 = vbcast.lane.b32.xlu0 %v1993_v47, 256  ;;  %v324_v10 = vrot.slane %v3699_v56, %v3722_v16 }
 0x19c   :  { %2045 = vbcast.lane.b32.xlu1 %v3716_v48, 280 }
 0x19d   :  { %v3706_v4 = vpop.xlane.xlu0 %276 }
 0x19e   :  { %2003 = vbcast.lane.b32.xlu0 %v1993_v47, 272  ;;  %v320_v21 = vrot.slane %v3706_v4, %v3722_v16  ;;  %v3727_v47 = vpop.xlane.xlu1 %282 }
 0x19f   :  { %v328_v49 = vrot.slane %v3727_v47, %v3722_v16 }
 0x1a0   :  { %v350_v41 = vsel %vm349_vm2, %v324_v10, %v320_v21  ;;  %2056 = vbcast.lane.b32.xlu1 %v3736_v55, 264  ;;  %v2069_v21 = vrot.slane %v3285_v9, %v3669_v38  ;;  %v348_v9 = vrot.slane %v3711_v26, %v3722_v16 }
 0x1a1   :  { %v3718_v62 = vpop.xlane.xlu0 %288  ;;  %v352_v44 = vsel %vm351_vm3, %v328_v49, %v350_v41  ;;  %v340_v49 = vrot.slane %v3693_v37, %v3722_v16 }
 0x1a2   :  { %v336_v15 = vrot.slane %v3718_v62, %v3722_v16  ;;  %v354_v50 = vsel %vm353_vm4, %v332_v22, %v352_v44 }
 0x1a4   :  { %2064 = vbcast.lane.b32.xlu1 %v3736_v55, 280 }
 0x1a5   :  { %v3729_v52 = vpop.xlane.xlu0 %294 }
 0x1a6   :  { %v344_v41 = vrot.slane %v3729_v52, %v3722_v16 }
 0x1a8   :  { %2075 = vbcast.lane.b32.xlu1 %v2069_v21, 264 }
 0x1a9   :  { %v3741_v35 = vpop.permute.xlu0 %1481 }
 0x1aa   :  { %5221 = vst [vmem:[#allocation99_spill] sm:$0xff] %v3741_v35  ;;  %v356_v35 = vsel %vm355_vm5, %v336_v15, %v354_v50  ;;  %v2088_v50 = vrot.slane %v3304_v14, %v3669_v38 }
 0x1ab   :  { %v358_v22 = vsel %vm357_vm6, %v340_v49, %v356_v35 }
 0x1ac   :  { %2083 = vbcast.lane.b32.xlu1 %v2069_v21, 280 }
 0x1ad   :  { %v3747_v46 = vpop.permute.xlu0 %1492 }
 0x1ae   :  { %5222 = vst [vmem:[#allocation100_spill] sm:$0xff] %v3747_v46  ;;  %v360_v46 = vsel %vm359_vm7, %v344_v41, %v358_v22  ;;  %v2107_v41 = vrot.slane %v3319_v17, %v3669_v38  ;;  %v3793_v17 = vsub.s32 6, %v3280_v7 }
 0x1b0   :  { %2094 = vbcast.lane.b32.xlu1 %v2088_v50, 264 }
 0x1b1   :  { %v3755_v10 = vpop.permute.xlu0 %1500 }
 0x1b2   :  { %5223 = vst [vmem:[#allocation101_spill] sm:$0xff] %v3755_v10  ;;  %v362_v10 = vsel %vm361_vm8, %v348_v9, %v360_v46  ;;  %v3233_v9 = vmov 0  }
 0x1b3   :  { %3164 = vset.pattern.permute.xlu0 %v3233_v9  ;;  %3163 = vset.pattern.permute.xlu1 %v3233_v9 }
 0x1b4   :  { %2102 = vbcast.lane.b32.xlu1 %v2088_v50, 280 }
 0x1b5   :  { %v3762_v44 = vpop.permute.xlu0 %1511 }
 0x1b6   :  { %5224 = vst [vmem:[#allocation102_spill] sm:$0xff] %v3762_v44  ;;  %v365_v44 = vsel %vm364_vm9, %v362_v10, -inf  ;;  %v3787_v10 = vpop.permute.xlu1 %1485 }
 0x1b7   :  { %5229 = vst [vmem:[#allocation107_spill] sm:$0xff] %v3787_v10 }
 0x1b8   :  { %2113 = vbcast.lane.b32.xlu1 %v2107_v41, 264 }
 0x1b9   :  { %v3770_v15 = vpop.permute.xlu0 %1519 }
 0x1ba   :  { %5225 = vst [vmem:[#allocation103_spill] sm:$0xff] %v3770_v15  ;;  %v3797_v15 = vpop.permute.xlu1 %1496 }
 0x1bb   :  { %5231 = vst [vmem:[#allocation109_spill] sm:$0xff] %v3797_v15 }
 0x1bc   :  { %2121 = vbcast.lane.b32.xlu1 %v2107_v41, 280 }
 0x1bd   :  { %366 = vmax.xlane.f32.xlu0 %v365_v44  ;;  %v3774_v35 = vpop.permute.xlu0 %1530  ;;  %v2126_v44 = vrot.slane %v3334_v19, %v3669_v38 }
 0x1be   :  { %5226 = vst [vmem:[#allocation104_spill] sm:$0xff] %v3774_v35 }
 0x1c0   :  { %2132 = vbcast.lane.b32.xlu1 %v2126_v44, 264 }
 0x1c1   :  { %v3778_v49 = vpop.permute.xlu0 %1538 }
 0x1c4   :  { %2140 = vbcast.lane.b32.xlu1 %v2126_v44, 280 }
 0x1c5   :  { %v3780_v14 = vpop.permute.xlu0 %1549 }
 0x1c9   :  { %v3782_v22 = vpop.permute.xlu0 %1557 }
 0x1ca   :  { %5227 = vst [vmem:[#allocation105_spill] sm:$0xff] %v3782_v22 }
 0x1cd   :  { %v3785_v46 = vpop.permute.xlu0 %1568 }
 0x1ce   :  { %5228 = vst [vmem:[#allocation106_spill] sm:$0xff] %v3785_v46  ;;  %v3802_v46 = vrot.slane %v3263_v0, %v3793_v17 }
 0x1d0   :  { %2279 = vbcast.lane.b32.xlu1 %v3802_v46, 264 }
 0x1d1   :  { %v3795_v35 = vpop.permute.xlu0 %1576 }
 0x1d2   :  { %5230 = vst [vmem:[#allocation108_spill] sm:$0xff] %v3795_v35 }
 0x1d3   :  { %2014 = vbcast.lane.b32.xlu0 %v3703_v6, 256 }
 0x1d5   :  { %v3806_v19 = vpop.permute.xlu0 %1715 }
 0x1d6   :  { %5232 = vst [vmem:[#allocation110_spill] sm:$0xff] %v3806_v19 }
 0x1d7   :  { %2022 = vbcast.lane.b32.xlu0 %v3703_v6, 272  ;;  %v3808_v6 = vpop.permute.xlu1 %1504 }
 0x1d8   :  { %5233 = vst [vmem:[#allocation111_spill] sm:$0xff] %v3808_v6 }
 0x1d9   :  { %v3811_v9 = vpop.permute.xlu0 %1723 }
 0x1da   :  { %5234 = vst [vmem:[#allocation112_spill] sm:$0xff] %v3811_v9 }
 0x1db   :  { %2033 = vbcast.lane.b32.xlu0 %v3716_v48, 256  ;;  %v3813_v35 = vpop.permute.xlu1 %1515 }
 0x1dc   :  { %5235 = vst [vmem:[#allocation113_spill] sm:$0xff] %v3813_v35 }
 0x1dd   :  { %v3816_v15 = vpop.permute.xlu0 %1734 }
 0x1de   :  { %5236 = vst [vmem:[#allocation114_spill] sm:$0xff] %v3816_v15 }
 0x1df   :  { %2041 = vbcast.lane.b32.xlu0 %v3716_v48, 272  ;;  %v3818_v0 = vpop.permute.xlu1 %1523 }
 0x1e0   :  { %5237 = vst [vmem:[#allocation115_spill] sm:$0xff] %v3818_v0 }
 0x1e1   :  { %v3820_v48 = vpop.permute.xlu0 %1742 }
 0x1e2   :  { %5238 = vst [vmem:[#allocation116_spill] sm:$0xff] %v3820_v48 }
 0x1e3   :  { %2052 = vbcast.lane.b32.xlu0 %v3736_v55, 256  ;;  %v3822_v10 = vpop.permute.xlu1 %1534 }
 0x1e4   :  { %5239 = vst [vmem:[#allocation117_spill] sm:$0xff] %v3822_v10 }
 0x1e5   :  { %v3824_v6 = vpop.permute.xlu0 %1753 }
 0x1e6   :  { %5240 = vst [vmem:[#allocation118_spill] sm:$0xff] %v3824_v6 }
 0x1e7   :  { %2060 = vbcast.lane.b32.xlu0 %v3736_v55, 272  ;;  %v3826_v19 = vpop.permute.xlu1 %1542 }
 0x1e9   :  { %v3828_v35 = vpop.permute.xlu0 %1761 }
 0x1ea   :  { %5241 = vst [vmem:[#allocation119_spill] sm:$0xff] %v3828_v35 }
 0x1eb   :  { %2071 = vbcast.lane.b32.xlu0 %v2069_v21, 256  ;;  %v3830_v55 = vpop.permute.xlu1 %1553 }
 0x1ed   :  { %v3832_v15 = vpop.permute.xlu0 %1772 }
 0x1ee   :  { %5242 = vst [vmem:[#allocation120_spill] sm:$0xff] %v3832_v15 }
 0x1ef   :  { %2079 = vbcast.lane.b32.xlu0 %v2069_v21, 272  ;;  %v3834_v21 = vpop.permute.xlu1 %1561 }
 0x1f0   :  { %5243 = vst [vmem:[#allocation121_spill] sm:$0xff] %v3834_v21 }
 0x1f1   :  { %v3836_v0 = vpop.permute.xlu0 %1780 }
 0x1f2   :  { %5244 = vst [vmem:[#allocation122_spill] sm:$0xff] %v3836_v0 }
 0x1f3   :  { %2090 = vbcast.lane.b32.xlu0 %v2088_v50, 256  ;;  %v3838_v10 = vpop.permute.xlu1 %1572 }
 0x1f4   :  { %5245 = vst [vmem:[#allocation123_spill] sm:$0xff] %v3838_v10 }
 0x1f7   :  { %2098 = vbcast.lane.b32.xlu0 %v2088_v50, 272  ;;  %v3841_v50 = vpop.permute.xlu0 %1791  ;;  %v3843_v6 = vpop.permute.xlu1 %1580 }
 0x1f8   :  { %5246 = vst [vmem:[#allocation124_spill] sm:$0xff] %v3841_v50  ;;  %5247 = vst [vmem:[#allocation125_spill] sm:$0xff] %v3843_v6 }
 0x1fb   :  { %2109 = vbcast.lane.b32.xlu0 %v2107_v41, 256  ;;  %v3845_v35 = vpop.permute.xlu0 %1799  ;;  %v3847_v48 = vpop.permute.xlu1 %1719 }
 0x1fc   :  { %5248 = vst [vmem:[#allocation126_spill] sm:$0xff] %v3845_v35  ;;  %5249 = vst [vmem:[#allocation127_spill] sm:$0xff] %v3847_v48 }
 0x1ff   :  { %2117 = vbcast.lane.b32.xlu0 %v2107_v41, 272  ;;  %v3849_v41 = vpop.permute.xlu0 %1810  ;;  %v3851_v15 = vpop.permute.xlu1 %1727 }
 0x200   :  { %5250 = vst [vmem:[#allocation128_spill] sm:$0xff] %v3849_v41  ;;  %5251 = vst [vmem:[#allocation129_spill] sm:$0xff] %v3851_v15 }
 0x203   :  { %2128 = vbcast.lane.b32.xlu0 %v2126_v44, 256  ;;  %v3853_v21 = vpop.permute.xlu0 %1818 }
 0x207   :  { %2136 = vbcast.lane.b32.xlu0 %v2126_v44, 272  ;;  %v3855_v44 = vpop.permute.xlu1 %1738  ;;  %v3857_v0 = vpop.permute.xlu0 %1829 }
 0x208   :  { %5252 = vst [vmem:[#allocation130_spill] sm:$0xff] %v3855_v44 }
 0x20b   :  { %2275 = vbcast.lane.b32.xlu0 %v3802_v46, 256  ;;  %v3859_v10 = vpop.permute.xlu1 %1746  ;;  %v3861_v9 = vpop.permute.xlu0 %1837 }
 0x20c   :  { %5253 = vst [vmem:[#allocation131_spill] sm:$0xff] %v3859_v10  ;;  %5254 = vst [vmem:[#allocation132_spill] sm:$0xff] %v3861_v9 }
 0x20f   :  { %v3863_v50 = vpop.permute.xlu1 %1757  ;;  %v3865_v6 = vpop.permute.xlu0 %1848 }
 0x210   :  { %5255 = vst [vmem:[#allocation133_spill] sm:$0xff] %v3863_v50  ;;  %5256 = vst [vmem:[#allocation134_spill] sm:$0xff] %v3865_v6 }
 0x213   :  { %v3867_v35 = vpop.permute.xlu1 %1765  ;;  %v3869_v57 = vpop.permute.xlu0 %1856 }
 0x214   :  { %5257 = vst [vmem:[#allocation135_spill] sm:$0xff] %v3867_v35  ;;  %5258 = vst [vmem:[#allocation136_spill] sm:$0xff] %v3869_v57 }
 0x217   :  { %v3871_v41 = vpop.permute.xlu1 %1776  ;;  %v3873_v15 = vpop.permute.xlu0 %1995 }
 0x218   :  { %5259 = vst [vmem:[#allocation137_spill] sm:$0xff] %v3871_v41  ;;  %5260 = vst [vmem:[#allocation138_spill] sm:$0xff] %v3873_v15 }
 0x21b   :  { %v3875_v48 = vpop.permute.xlu1 %1784  ;;  %v3877_v44 = vpop.permute.xlu0 %2003 }
 0x21c   :  { %5261 = vst [vmem:[#allocation139_spill] sm:$0xff] %v3875_v48  ;;  %5262 = vst [vmem:[#allocation140_spill] sm:$0xff] %v3877_v44 }
 0x21f   :  { %v3879_v29 = vpop.permute.xlu1 %1795 }
 0x220   :  { %5263 = vst [vmem:[#allocation141_spill] sm:$0xff] %v3879_v29 }
 0x223   :  { %v3889_v35 = vpop.permute.xlu1 %1803 }
 0x224   :  { %5264 = vst [vmem:[#allocation142_spill] sm:$0xff] %v3889_v35 }
 0x227   :  { %v3891_v44 = vpop.permute.xlu1 %1814 }
 0x228   :  { %5265 = vst [vmem:[#allocation143_spill] sm:$0xff] %v3891_v44 }
 0x22b   :  { %v3893_v29 = vpop.permute.xlu1 %1822 }
 0x24a   :  { %v3881_v10 = vpop.xlane.xlu0 %366 }
 0x24b   :  { %v372_v50 = vrot.slane %v3881_v10, %v3293_v11  ;;  %v376_v6 = vrot.slane %v3881_v10, %v3351_v25  ;;  %v380_v44 = vrot.slane %v3881_v10, %v3370_v34  ;;  %v384_v51 = vrot.slane %v3881_v10, %v3437_v5 }
 0x24d   :  { %v409_v57 = vsub.f32 %v3706_v4, %v372_v50  ;;  %v410_v41 = vsub.f32 %v3699_v56, %v376_v6  ;;  %v3901_v4 = vpop.permute.xlu1 %1833  ;;  %v3917_v6 = vld [vmem:[%s5098_s1 + $0x10] sm:$0xff]  ;;  %v412_v3 = vsub.f32 %v3697_v53, %v384_v51  ;;  %v3973_v53 = vsub.s32 7, %v3280_v7 }
 0x24e   :  { %5266 = vst [vmem:[#allocation144_spill] sm:$0xff] %v3901_v4  ;;  %v396_v51 = vrot.slane %v3881_v10, %v3793_v17 }
 0x24f   :  { %v417_v15 = vmul.f32 1.442695, %v409_v57  ;;  %v419_v48 = vmul.f32 1.442695, %v410_v41  ;;  %v3907_v57 = vld [vmem:[%s5098_s1 + $0x8] sm:$0xff] }
 0x250   :  { %v2292_v56 = vrot.slane %v3907_v57, %v3793_v17 }
 0x251   :  { %3182 = vpow2.f32 %v417_v15  ;;  %v3912_v15 = vpop.permute.xlu1 %1841 }
 0x252   :  { %3184 = vpow2.f32 %v419_v48  ;;  %5267 = vst [vmem:[#allocation145_spill] sm:$0xff] %v3912_v15  ;;  %v2311_v48 = vrot.slane %v3917_v6, %v3793_v17 }
 0x255   :  { %v3921_v50 = vpop.permute.xlu1 %1852 }
 0x256   :  { %5268 = vst [vmem:[#allocation146_spill] sm:$0xff] %v3921_v50 }
 0x259   :  { %v3930_v15 = vpop.permute.xlu1 %1860 }
 0x25a   :  { %5269 = vst [vmem:[#allocation147_spill] sm:$0xff] %v3930_v15 }
 0x25b   :  { %v3895_v31 = vpop.eup %3182 }
 0x25c   :  { %v3897_v36 = vpop.eup %3184  ;;  %442 = vperm.xlu1 %3163, %v3895_v31  }
 0x25d   :  { %445 = vperm.xlu0 %3164, %v3897_v36   ;;  %v3932_v35 = vpop.permute.xlu1 %1999 }
 0x25e   :  { %5270 = vst [vmem:[#allocation148_spill] sm:$0xff] %v3932_v35 }
 0x260   :  { %2287 = vbcast.lane.b32.xlu1 %v3802_v46, 280 }
 0x261   :  { %2283 = vbcast.lane.b32.xlu0 %v3802_v46, 272  ;;  %v3926_v46 = vld [vmem:[%s5098_s1 + $0x18] sm:$0xff]  ;;  %v3943_v15 = vpop.permute.xlu1 %2007 }
 0x262   :  { %v2330_v41 = vrot.slane %v3926_v46, %v3793_v17  ;;  %5271 = vst [vmem:[#allocation149_spill] sm:$0xff] %v3943_v15  ;;  %v388_v15 = vrot.slane %v3881_v10, %v3606_v60  ;;  %v2610_v7 = vrot.slane %v3926_v46, %v3973_v53 }
 0x264   :  { %2298 = vbcast.lane.b32.xlu1 %v2292_v56, 264 }
 0x265   :  { %2294 = vbcast.lane.b32.xlu0 %v2292_v56, 256  ;;  %v3955_v33 = vpop.permute.xlu1 %2018 }
 0x266   :  { %5272 = vst [vmem:[#allocation150_spill] sm:$0xff] %v3955_v33  ;;  %v423_v33 = vmul.f32 1.442695, %v412_v3  ;;  %v400_v3 = vrot.slane %v3881_v10, %v3973_v53 }
 0x268   :  { %2306 = vbcast.lane.b32.xlu1 %v2292_v56, 280 }
 0x269   :  { %2302 = vbcast.lane.b32.xlu0 %v2292_v56, 272  ;;  %v3937_v56 = vld [vmem:[%s5098_s1 + $0x20] sm:$0xff]  ;;  %v3970_v39 = vpop.permute.xlu1 %2026 }
 0x26a   :  { %v2349_v50 = vrot.slane %v3937_v56, %v3793_v17  ;;  %5273 = vst [vmem:[#allocation151_spill] sm:$0xff] %v3970_v39 }
 0x26c   :  { %2317 = vbcast.lane.b32.xlu1 %v2311_v48, 264 }
 0x26d   :  { %2313 = vbcast.lane.b32.xlu0 %v2311_v48, 256  ;;  %v3978_v28 = vpop.permute.xlu1 %2037 }
 0x26e   :  { %5274 = vst [vmem:[#allocation152_spill] sm:$0xff] %v3978_v28 }
 0x270   :  { %2325 = vbcast.lane.b32.xlu1 %v2311_v48, 280 }
 0x271   :  { %2321 = vbcast.lane.b32.xlu0 %v2311_v48, 272  ;;  %v3948_v48 = vld [vmem:[%s5098_s1 + $0x28] sm:$0xff] }
 0x272   :  { %v2368_v35 = vrot.slane %v3948_v48, %v3793_v17  ;;  %v4041_v46 = vrot.slane %v3948_v48, %v3973_v53 }
 0x274   :  { %2336 = vbcast.lane.b32.xlu1 %v2330_v41, 264 }
 0x275   :  { %2332 = vbcast.lane.b32.xlu0 %v2330_v41, 256 }
 0x278   :  { %2344 = vbcast.lane.b32.xlu1 %v2330_v41, 280 }
 0x279   :  { %2340 = vbcast.lane.b32.xlu0 %v2330_v41, 272  ;;  %v411_v41 = vsub.f32 %v3727_v47, %v380_v44  ;;  %v2387_v47 = vrot.slane %v3963_v18, %v3793_v17  ;;  %v392_v44 = vrot.slane %v3881_v10, %v3669_v38 }
 0x27b   :  { %v421_v43 = vmul.f32 1.442695, %v411_v41  ;;  %v414_v41 = vsub.f32 %v3693_v37, %v392_v44  ;;  %v3988_v37 = vld [vmem:[%s5098_s1 + $0x38] sm:$0xff] }
 0x27c   :  { %2355 = vbcast.lane.b32.xlu1 %v2349_v50, 264 }
 0x27d   :  { %2351 = vbcast.lane.b32.xlu0 %v2349_v50, 256  ;;  %3186 = vpow2.f32 %v421_v43  ;;  %v415_v43 = vsub.f32 %v3729_v52, %v396_v51  ;;  %v3994_v52 = vpop.permute.xlu1 %2045 }
 0x27e   :  { %3188 = vpow2.f32 %v423_v33  ;;  %v2406_v33 = vrot.slane %v3988_v37, %v3793_v17  ;;  %5275 = vst [vmem:[#allocation153_spill] sm:$0xff] %v3994_v52 }
 0x27f   :  { %v429_v10 = vmul.f32 1.442695, %v415_v43 }
 0x280   :  { %2363 = vbcast.lane.b32.xlu1 %v2349_v50, 280 }
 0x281   :  { %2359 = vbcast.lane.b32.xlu0 %v2349_v50, 272  ;;  %v413_v50 = vsub.f32 %v3718_v62, %v388_v15  ;;  %v427_v62 = vmul.f32 1.442695, %v414_v41  ;;  %v416_v15 = vsub.f32 %v3711_v26, %v400_v3  ;;  %v3207_v26 = vld [vmem:[%s5098_s1] sm:$0xff]  ;;  %s3234_s1 = smov [#allocation2]  }
 0x282   :  { %v2553_v51 = vrot.slane %v3207_v26, %v3973_v53  ;;  %s3099_s29 = sshll.u32 %s3234_s1, 4  ;;  %s3100_s29 = int_to_ptr.vmem [resolvable:$true] %s3099_s29 }
 0x283   :  { %v425_v40 = vmul.f32 1.442695, %v413_v50  ;;  %v4001_v50 = vpop.permute.xlu1 %2056  ;;  %s3208_s30 = scalar_lea.vmem %s3100_s29, 128  ;;  %p3213_p1 = scmp.lt.s32.totalorder %s3100_s29, %s3100_s29 }
 0x284   :  { %2374 = vbcast.lane.b32.xlu1 %v2368_v35, 264  ;;  %5276 = vst [vmem:[#allocation154_spill] sm:$0xff] %v4001_v50  ;;  %p3209_p0 = scmp.ne.s32.totalorder %s3100_s29, %s3208_s30  ;;  %p3214_p2 = scmp.lt.s32.totalorder %s3208_s30, %s3208_s30 }
 0x285   :  { %2370 = vbcast.lane.b32.xlu0 %v2368_v35, 256  ;;  %3190 = vpow2.f32 %v425_v40 }
 0x286   :  { %3192 = vpow2.f32 %v427_v62  ;;  %v2572_v62 = vrot.slane %v3907_v57, %v3973_v53  ;;  %p3215_p3 = por %p3214_p2, %p3213_p1 }
 0x287   :  { %3194 = vpow2.f32 %v429_v10  ;;  %v4011_v3 = vpop.permute.xlu1 %2064 }
 0x288   :  { %2382 = vbcast.lane.b32.xlu1 %v2368_v35, 280  ;;  %5277 = vst [vmem:[#allocation155_spill] sm:$0xff] %v4011_v3  ;;  %p3216_p4 = pnand %p3215_p3, %p3209_p0 }
 0x289   :  { %2378 = vbcast.lane.b32.xlu0 %v2368_v35, 272  ;;  %v3983_v35 = vpop.eup %3186 }
 0x28a   :  { %v3996_v40 = vpop.eup %3188 }
 0x28b   :  { %v4020_v10 = vpop.permute.xlu1 %2075 }
 0x28c   :  { %2393 = vbcast.lane.b32.xlu1 %v2387_v47, 264  ;;  %5278 = vst [vmem:[#allocation156_spill] sm:$0xff] %v4020_v10 }
 0x28d   :  { %2389 = vbcast.lane.b32.xlu0 %v2387_v47, 256 }
 0x28f   :  { %v3999_v44 = vpop.eup %3190  ;;  %v4025_v26 = vpop.permute.xlu1 %2083 }
 0x290   :  { %2401 = vbcast.lane.b32.xlu1 %v2387_v47, 280  ;;  %v4008_v41 = vpop.eup %3192  ;;  %5279 = vst [vmem:[#allocation157_spill] sm:$0xff] %v4025_v26 }
 0x291   :  { %2397 = vbcast.lane.b32.xlu0 %v2387_v47, 272  ;;  %v431_v47 = vmul.f32 1.442695, %v416_v15  ;;  %v4013_v43 = vpop.eup %3194 }
 0x293   :  { %3196 = vpow2.f32 %v431_v47  ;;  %v2591_v47 = vrot.slane %v3917_v6, %v3973_v53  ;;  %v4027_v57 = vpop.permute.xlu1 %2094  ;;  %v2629_v6 = vrot.slane %v3937_v56, %v3973_v53  ;;  %v4051_v56 = vrot.slane %v3963_v18, %v3973_v53 }
 0x294   :  { %448 = vperm.xlu1 %3163, %v3983_v35   ;;  %5280 = vst [vmem:[#allocation158_spill] sm:$0xff] %v4027_v57 }
 0x295   :  { %2408 = vbcast.lane.b32.xlu0 %v2406_v33, 256 }
 0x297   :  { %v4031_v3 = vpop.permute.xlu1 %2102 }
 0x298   :  { %451 = vperm.xlu1 %3163, %v3996_v40  }
 0x299   :  { %2416 = vbcast.lane.b32.xlu0 %v2406_v33, 272 }
 0x29b   :  { %v4035_v26 = vpop.permute.xlu1 %2113 }
 0x29c   :  { %454 = vperm.xlu1 %3163, %v3999_v44   ;;  %5281 = vst [vmem:[#allocation159_spill] sm:$0xff] %v4035_v26 }
 0x29d   :  { %2555 = vbcast.lane.b32.xlu0 %v2553_v51, 256  ;;  %v4018_v15 = vpop.eup %3196 }
 0x2a0   :  { %457 = vperm.xlu1 %3163, %v4008_v41  }
 0x2a1   :  { %2563 = vbcast.lane.b32.xlu0 %v2553_v51, 272 }
 0x2a4   :  { %460 = vperm.xlu1 %3163, %v4013_v43  }
 0x2a5   :  { %2574 = vbcast.lane.b32.xlu0 %v2572_v62, 256 }
 0x2a8   :  { %463 = vperm.xlu1 %3163, %v4018_v15  }
 0x2a9   :  { %2582 = vbcast.lane.b32.xlu0 %v2572_v62, 272 }
 0x2ac   :  { %2412 = vbcast.lane.b32.xlu1 %v2406_v33, 264 }
 0x2ad   :  { %2593 = vbcast.lane.b32.xlu0 %v2591_v47, 256 }
 0x2b0   :  { %2420 = vbcast.lane.b32.xlu1 %v2406_v33, 280  ;;  %v4037_v33 = vpop.permute.xlu0 %2014 }
 0x2b1   :  { %2601 = vbcast.lane.b32.xlu0 %v2591_v47, 272  ;;  %5282 = vst [vmem:[#allocation160_spill] sm:$0xff] %v4037_v33 }
 0x2b4   :  { %2559 = vbcast.lane.b32.xlu1 %v2553_v51, 264  ;;  %v4046_v57 = vpop.permute.xlu0 %2022 }
 0x2b5   :  { %2612 = vbcast.lane.b32.xlu0 %v2610_v7, 256  ;;  %5284 = vst [vmem:[#allocation162_spill] sm:$0xff] %v4046_v57 }
 0x2b8   :  { %2567 = vbcast.lane.b32.xlu1 %v2553_v51, 280  ;;  %v4043_v51 = vpop.permute.xlu1 %2121  ;;  %v4056_v48 = vpop.permute.xlu0 %2033 }
 0x2b9   :  { %2620 = vbcast.lane.b32.xlu0 %v2610_v7, 272  ;;  %5283 = vst [vmem:[#allocation161_spill] sm:$0xff] %v4043_v51  ;;  %5286 = vst [vmem:[#allocation164_spill] sm:$0xff] %v4056_v48 }
 0x2bc   :  { %2578 = vbcast.lane.b32.xlu1 %v2572_v62, 264  ;;  %v4063_v10 = vpop.permute.xlu0 %2041 }
 0x2bd   :  { %2631 = vbcast.lane.b32.xlu0 %v2629_v6, 256  ;;  %5288 = vst [vmem:[#allocation166_spill] sm:$0xff] %v4063_v10 }
 0x2c0   :  { %2586 = vbcast.lane.b32.xlu1 %v2572_v62, 280  ;;  %v4053_v62 = vpop.permute.xlu1 %2132 }
 0x2c1   :  { %2639 = vbcast.lane.b32.xlu0 %v2629_v6, 272  ;;  %5285 = vst [vmem:[#allocation163_spill] sm:$0xff] %v4053_v62  ;;  %v4067_v62 = vpop.permute.xlu0 %2052 }
 0x2c2   :  { %5290 = vst [vmem:[#allocation168_spill] sm:$0xff] %v4067_v62 }
 0x2c4   :  { %2597 = vbcast.lane.b32.xlu1 %v2591_v47, 264  ;;  %v4058_v51 = vpop.permute.xlu1 %2140 }
 0x2c5   :  { %2650 = vbcast.lane.b32.xlu0 %v4041_v46, 256  ;;  %5287 = vst [vmem:[#allocation165_spill] sm:$0xff] %v4058_v51  ;;  %v4072_v51 = vpop.permute.xlu0 %2060 }
 0x2c6   :  { %5292 = vst [vmem:[#allocation170_spill] sm:$0xff] %v4072_v51 }
 0x2c8   :  { %2605 = vbcast.lane.b32.xlu1 %v2591_v47, 280  ;;  %v2686_v47 = vrot.slane %v3988_v37, %v3973_v53  ;;  %v4065_v18 = vpop.permute.xlu1 %2279 }
 0x2c9   :  { %2658 = vbcast.lane.b32.xlu0 %v4041_v46, 272  ;;  %5289 = vst [vmem:[#allocation167_spill] sm:$0xff] %v4065_v18  ;;  %v4076_v37 = vpop.permute.xlu0 %2071 }
 0x2ca   :  { %5294 = vst [vmem:[#allocation172_spill] sm:$0xff] %v4076_v37 }
 0x2cc   :  { %2616 = vbcast.lane.b32.xlu1 %v2610_v7, 264 }
 0x2cd   :  { %2669 = vbcast.lane.b32.xlu0 %v4051_v56, 256  ;;  %v4082_v28 = vpop.permute.xlu0 %2079 }
 0x2ce   :  { %5297 = vst [vmem:[#allocation175_spill] sm:$0xff] %v4082_v28 }
 0x2d0   :  { %2624 = vbcast.lane.b32.xlu1 %v2610_v7, 280 }
 0x2d1   :  { %2677 = vbcast.lane.b32.xlu0 %v4051_v56, 272  ;;  %v4086_v62 = vpop.permute.xlu0 %2090 }
 0x2d2   :  { %5299 = vst [vmem:[#allocation177_spill] sm:$0xff] %v4086_v62 }
 0x2d4   :  { %2635 = vbcast.lane.b32.xlu1 %v2629_v6, 264 }
 0x2d5   :  { %2688 = vbcast.lane.b32.xlu0 %v2686_v47, 256  ;;  %v4092_v33 = vpop.permute.xlu0 %2098 }
 0x2d8   :  { %2643 = vbcast.lane.b32.xlu1 %v2629_v6, 280 }
 0x2d9   :  { %2696 = vbcast.lane.b32.xlu0 %v2686_v47, 272 }
 0x2db   :  { %v443_v50 = vpop.permute.xlu1 %442 }
 0x2dc   :  { %2654 = vbcast.lane.b32.xlu1 %v4041_v46, 264 }
 0x2df   :  { %v4070_v7 = vpop.permute.xlu1 %2287 }
 0x2e0   :  { %5291 = vst [vmem:[#allocation169_spill] sm:$0xff] %v4070_v7 }
 0x2e3   :  { %v4074_v52 = vpop.permute.xlu1 %2298 }
 0x2e4   :  { %5293 = vst [vmem:[#allocation171_spill] sm:$0xff] %v4074_v52  ;;  %v4096_v52 = vpop.permute.xlu0 %2109 }
 0x2e7   :  { %v4078_v48 = vpop.permute.xlu1 %2306 }
 0x2e8   :  { %5295 = vst [vmem:[#allocation173_spill] sm:$0xff] %v4078_v48 }
 0x2eb   :  { %v4080_v10 = vpop.permute.xlu1 %2317 }
 0x2ec   :  { %5296 = vst [vmem:[#allocation174_spill] sm:$0xff] %v4080_v10  ;;  %v4102_v10 = vpop.permute.xlu0 %2117 }
 0x2ed   :  { %5305 = vst [vmem:[#allocation183_spill] sm:$0xff] %v4102_v10 }
 0x2ef   :  { %v4084_v6 = vpop.permute.xlu1 %2325 }
 0x2f0   :  { %5298 = vst [vmem:[#allocation176_spill] sm:$0xff] %v4084_v6  ;;  %v4106_v6 = vpop.permute.xlu0 %2128 }
 0x2f1   :  { %5306 = vst [vmem:[#allocation184_spill] sm:$0xff] %v4106_v6 }
 0x2f3   :  { %v4088_v57 = vpop.permute.xlu1 %2336 }
 0x2f4   :  { %5300 = vst [vmem:[#allocation178_spill] sm:$0xff] %v4088_v57 }
 0x2f7   :  { %v4090_v39 = vpop.permute.xlu1 %2344 }
 0x2f8   :  { %5301 = vst [vmem:[#allocation179_spill] sm:$0xff] %v4090_v39  ;;  %v4112_v39 = vpop.permute.xlu0 %2136 }
 0x2f9   :  { %5309 = vst [vmem:[#allocation187_spill] sm:$0xff] %v4112_v39 }
 0x2fb   :  { %v4094_v51 = vpop.permute.xlu1 %2355 }
 0x2fc   :  { %5302 = vst [vmem:[#allocation180_spill] sm:$0xff] %v4094_v51  ;;  %v4114_v51 = vpop.permute.xlu0 %2275 }
 0x2fd   :  { %5310 = vst [vmem:[#allocation188_spill] sm:$0xff] %v4114_v51 }
 0x2ff   :  { %v4098_v37 = vpop.permute.xlu1 %2363 }
 0x300   :  { %5303 = vst [vmem:[#allocation181_spill] sm:$0xff] %v4098_v37  ;;  %v446_v37 = vpop.permute.xlu0 %445 }
 0x301   :  { %v472_v10 = vrot.slane %v446_v37, %v3722_v16 }
 0x303   :  { %v4100_v48 = vpop.permute.xlu1 %2374 }
 0x304   :  { %5304 = vst [vmem:[#allocation182_spill] sm:$0xff] %v4100_v48  ;;  %v468_v48 = vrot.slane %v443_v50, %v3722_v16 }
 0x306   :  { %v497_v39 = vsel %vm349_vm2, %v472_v10, %v468_v48 }
 0x307   :  { %v4104_v28 = vpop.permute.xlu1 %2382 }
 0x30b   :  { %v4108_v62 = vpop.permute.xlu1 %2393 }
 0x30c   :  { %5307 = vst [vmem:[#allocation185_spill] sm:$0xff] %v4108_v62 }
 0x30f   :  { %v4110_v57 = vpop.permute.xlu1 %2401 }
 0x310   :  { %5308 = vst [vmem:[#allocation186_spill] sm:$0xff] %v4110_v57 }
 0x313   :  { %v449_v7 = vpop.permute.xlu1 %448 }
 0x314   :  { %v476_v8 = vrot.slane %v449_v7, %v3722_v16 }
 0x316   :  { %v498_v51 = vsel %vm351_vm3, %v476_v8, %v497_v39  ;;  %v4135_v39 = vpop.permute.xlu0 %2283 }
 0x317   :  { %v452_v18 = vpop.permute.xlu1 %451 }
 0x318   :  { %v480_v6 = vrot.slane %v452_v18, %v3722_v16 }
 0x31a   :  { %v499_v26 = vsel %vm353_vm4, %v480_v6, %v498_v51 }
 0x31b   :  { %v455_v30 = vpop.permute.xlu1 %454 }
 0x31c   :  { %v484_v61 = vrot.slane %v455_v30, %v3722_v16 }
 0x31e   :  { %v500_v50 = vsel %vm355_vm5, %v484_v61, %v499_v26  ;;  %v4137_v61 = vpop.permute.xlu0 %2294 }
 0x31f   :  { %v458_v9 = vpop.permute.xlu1 %457  ;;  %5311 = vst [vmem:[#allocation189_spill] sm:$0xff] %v4137_v61 }
 0x320   :  { %v488_v22 = vrot.slane %v458_v9, %v3722_v16 }
 0x322   :  { %v501_v7 = vsel %vm357_vm6, %v488_v22, %v500_v50  ;;  %v4139_v8 = vpop.permute.xlu0 %2302 }
 0x323   :  { %v461_v57 = vpop.permute.xlu1 %460  ;;  %5312 = vst [vmem:[#allocation190_spill] sm:$0xff] %v4139_v8 }
 0x324   :  { %v492_v62 = vrot.slane %v461_v57, %v3722_v16 }
 0x326   :  { %v502_v30 = vsel %vm359_vm7, %v492_v62, %v501_v7  ;;  %v4141_v22 = vpop.permute.xlu0 %2313 }
 0x327   :  { %v464_v37 = vpop.permute.xlu1 %463  ;;  %5313 = vst [vmem:[#allocation191_spill] sm:$0xff] %v4141_v22 }
 0x328   :  { %v496_v18 = vrot.slane %v464_v37, %v3722_v16 }
 0x32a   :  { %v503_v4 = vsel %vm361_vm8, %v496_v18, %v502_v30  ;;  %v4143_v9 = vpop.permute.xlu0 %2321 }
 0x32b   :  { %v505_v10 = vsel %vm364_vm9, %v503_v4, 0.0  ;;  %5314 = vst [vmem:[#allocation192_spill] sm:$0xff] %v4143_v9  ;;  %v4147_v26 = vpop.permute.xlu1 %2412 }
 0x32c   :  { %506 = vadd.xlane.f32.xlu1 %v505_v10  ;;  %5316 = vst [vmem:[#allocation194_spill] sm:$0xff] %v4147_v26 }
 0x32e   :  { %v4145_v4 = vpop.permute.xlu0 %2332 }
 0x32f   :  { %5315 = vst [vmem:[#allocation193_spill] sm:$0xff] %v4145_v4 }
 0x332   :  { %v4149_v57 = vpop.permute.xlu0 %2340 }
 0x333   :  { %5317 = vst [vmem:[#allocation195_spill] sm:$0xff] %v4149_v57 }
 0x336   :  { %v4153_v51 = vpop.permute.xlu0 %2351 }
 0x337   :  { %5319 = vst [vmem:[#allocation197_spill] sm:$0xff] %v4153_v51 }
 0x33a   :  { %v4157_v62 = vpop.permute.xlu0 %2359 }
 0x33b   :  { %5320 = vst [vmem:[#allocation198_spill] sm:$0xff] %v4157_v62 }
 0x33d   :  { %2662 = vbcast.lane.b32.xlu1 %v4041_v46, 280  ;;  %v4151_v46 = vpop.permute.xlu1 %2420 }
 0x33e   :  { %5318 = vst [vmem:[#allocation196_spill] sm:$0xff] %v4151_v46 }
 0x341   :  { %2673 = vbcast.lane.b32.xlu1 %v4051_v56, 264 }
 0x345   :  { %2681 = vbcast.lane.b32.xlu1 %v4051_v56, 280  ;;  %v4155_v56 = vpop.permute.xlu1 %2559 }
 0x349   :  { %2692 = vbcast.lane.b32.xlu1 %v2686_v47, 264  ;;  %v4159_v48 = vpop.permute.xlu1 %2567 }
 0x34d   :  { %2700 = vbcast.lane.b32.xlu1 %v2686_v47, 280  ;;  %v4161_v47 = vpop.permute.xlu0 %2370  ;;  %v4163_v6 = vpop.permute.xlu1 %2578 }
 0x34e   :  { %5321 = vst [vmem:[#allocation199_spill] sm:$0xff] %v4161_v47  ;;  %5322 = vst [vmem:[#allocation200_spill] sm:$0xff] %v4163_v6 }
 0x351   :  { %v4165_v50 = vpop.permute.xlu0 %2378  ;;  %v4167_v37 = vpop.permute.xlu1 %2586 }
 0x352   :  { %5323 = vst [vmem:[#allocation201_spill] sm:$0xff] %v4167_v37 }
 0x355   :  { %v4169_v7 = vpop.permute.xlu0 %2389  ;;  %v4171_v18 = vpop.permute.xlu1 %2597 }
 0x356   :  { %5324 = vst [vmem:[#allocation202_spill] sm:$0xff] %v4171_v18 }
 0x359   :  { %v4173_v30 = vpop.permute.xlu0 %2397  ;;  %v4175_v10 = vpop.permute.xlu1 %2605 }
 0x35a   :  { %5325 = vst [vmem:[#allocation203_spill] sm:$0xff] %v4173_v30  ;;  %5326 = vst [vmem:[#allocation204_spill] sm:$0xff] %v4175_v10 }
 0x35d   :  { %v4177_v16 = vpop.permute.xlu0 %2408  ;;  %v4179_v46 = vpop.permute.xlu1 %2616 }
 0x35e   :  { %5327 = vst [vmem:[#allocation205_spill] sm:$0xff] %v4177_v16  ;;  %5328 = vst [vmem:[#allocation206_spill] sm:$0xff] %v4179_v46 }
 0x361   :  { %v4181_v26 = vpop.permute.xlu0 %2416  ;;  %v4183_v47 = vpop.permute.xlu1 %2624 }
 0x362   :  { %5329 = vst [vmem:[#allocation207_spill] sm:$0xff] %v4181_v26  ;;  %5330 = vst [vmem:[#allocation208_spill] sm:$0xff] %v4183_v47 }
 0x365   :  { %v4185_v62 = vpop.permute.xlu0 %2555  ;;  %v4187_v51 = vpop.permute.xlu1 %2635 }
 0x366   :  { %5331 = vst [vmem:[#allocation209_spill] sm:$0xff] %v4187_v51 }
 0x369   :  { %v4189_v57 = vpop.permute.xlu0 %2563  ;;  %v4191_v4 = vpop.permute.xlu1 %2643 }
 0x36a   :  { %5332 = vst [vmem:[#allocation210_spill] sm:$0xff] %v4191_v4 }
 0x36d   :  { %v4193_v9 = vpop.permute.xlu0 %2574  ;;  %v4195_v30 = vpop.permute.xlu1 %2654 }
 0x36e   :  { %5333 = vst [vmem:[#allocation211_spill] sm:$0xff] %v4193_v9  ;;  %5334 = vst [vmem:[#allocation212_spill] sm:$0xff] %v4195_v30 }
 0x371   :  { %v4197_v10 = vpop.permute.xlu0 %2582 }
 0x372   :  { %5335 = vst [vmem:[#allocation213_spill] sm:$0xff] %v4197_v10 }
 0x375   :  { %v4199_v46 = vpop.permute.xlu0 %2593 }
 0x376   :  { %5336 = vst [vmem:[#allocation214_spill] sm:$0xff] %v4199_v46 }
 0x379   :  { %v4201_v26 = vpop.permute.xlu0 %2601 }
 0x37a   :  { %5337 = vst [vmem:[#allocation215_spill] sm:$0xff] %v4201_v26 }
 0x37d   :  { %v4207_v22 = vpop.permute.xlu0 %2612 }
 0x37e   :  { %5338 = vst [vmem:[#allocation216_spill] sm:$0xff] %v4207_v22 }
 0x381   :  { %v4210_v18 = vpop.permute.xlu0 %2620 }
 0x382   :  { %5339 = vst [vmem:[#allocation217_spill] sm:$0xff] %v4210_v18 }
 0x3b9   :  { %v507_v16 = vpop.xlane.xlu1 %506 }
 0x3ba   :  { %3198 = vrcp.f32 %v507_v16 }
 0x3c4   :  { %v4203_v47 = vpop.eup %3198 }
 0x3c5   :  { %v533_v51 = vrot.slane %v4203_v47, %v3669_v38  ;;  %v537_v26 = vrot.slane %v4203_v47, %v3793_v17  ;;  %v517_v9 = vrot.slane %v4203_v47, %v3351_v25 }
 0x3c7   :  { %v555_v4 = vmul.f32 %v4008_v41, %v533_v51  ;;  %v4225_v22 = vmul.f32 %v4013_v43, %v537_v26  ;;  %v4227_v41 = vpop.permute.xlu0 %2631 }
 0x3c8   :  { %5342 = vst [vmem:[#allocation220_spill] sm:$0xff] %v4227_v41 }
 0x3c9   :  { %v4213_v30 = vrot.slane %v555_v4, %v3293_v11  ;;  %v4216_v16 = vrot.slane %v555_v4, %v3351_v25  ;;  %v4230_v51 = vrot.slane %v555_v4, %v3370_v34  ;;  %v4247_v26 = vrot.slane %v555_v4, %v3437_v5 }
 0x3ca   :  { %v4258_v41 = vrot.slane %v555_v4, %v3606_v60 }
 0x3cb   :  { %5340 = vst [vmem:[#allocation218_spill] sm:$0xff] %v4213_v30  ;;  %5341 = vst [vmem:[#allocation219_spill] sm:$0xff] %v4216_v16  ;;  %v796_v46 = vmul.f32 %v3449_v20, %v4213_v30  ;;  %v1076_v10 = vmul.f32 %v3546_v12, %v4216_v16  ;;  %v797_v8 = vmul.f32 %v3410_v54, %v4213_v30 }
 0x3cc   :  { %5343 = vst [vmem:[#allocation221_spill] sm:$0xff] %v4230_v51  ;;  %v1077_v37 = vmul.f32 %v3541_v63, %v4216_v16  ;;  %v4238_v20 = vrot.slane %v4225_v22, %v3293_v11  ;;  %v4242_v12 = vrot.slane %v4225_v22, %v3351_v25  ;;  %v1356_v43 = vmul.f32 %v3646_v59, %v4230_v51 }
 0x3cd   :  { %v1108_v18 = vadd.f32 %v1076_v10, %v796_v46  ;;  %5344 = vst [vmem:[#allocation222_spill] sm:$0xff] %v4247_v26  ;;  %v4249_v46 = vpop.permute.xlu0 %2639  ;;  %v1636_v30 = vmul.f32 %v3778_v49, %v4247_v26  ;;  %v1357_v59 = vmul.f32 %v3644_v1, %v4230_v51 }
 0x3ce   :  { %5345 = vst [vmem:[#allocation223_spill] sm:$0xff] %v4249_v46  ;;  %v1109_v10 = vadd.f32 %v1077_v37, %v797_v8  ;;  %v798_v63 = vmul.f32 %v3455_v23, %v4238_v20  ;;  %v1078_v16 = vmul.f32 %v3552_v42, %v4242_v12  ;;  %v4264_v46 = vrot.slane %v4225_v22, %v3370_v34 }
 0x3cf   :  { %v1388_v54 = vadd.f32 %v1356_v43, %v1108_v18  ;;  %v541_v8 = vrot.slane %v4203_v47, %v3973_v53  ;;  %v513_v42 = vrot.slane %v4203_v47, %v3293_v11  ;;  %v4273_v43 = vrot.slane %v555_v4, %v3669_v38 }
 0x3d0   :  { %v1389_v37 = vadd.f32 %v1357_v59, %v1109_v10  ;;  %v1110_v18 = vadd.f32 %v1078_v16, %v798_v63  ;;  %v799_v1 = vmul.f32 %v3418_v58, %v4238_v20  ;;  %v1079_v51 = vmul.f32 %v3548_v13, %v4242_v12 }
 0x3d1   :  { %v1668_v23 = vadd.f32 %v1636_v30, %v1388_v54  ;;  %v4270_v49 = vpop.permute.xlu0 %2650  ;;  %v1916_v30 = vmul.f32 %v3853_v21, %v4258_v41  ;;  %v1637_v16 = vmul.f32 %v3826_v19, %v4247_v26  ;;  %v1358_v54 = vmul.f32 %v3652_v32, %v4264_v46 }
 0x3d2   :  { %5346 = vst [vmem:[#allocation224_spill] sm:$0xff] %v4270_v49  ;;  %v4289_v10 = vrot.slane %v4225_v22, %v3437_v5  ;;  %v4292_v58 = vmul.f32 %v4018_v15, %v541_v8  ;;  %v521_v13 = vrot.slane %v4203_v47, %v3370_v34  ;;  %v525_v63 = vrot.slane %v4203_v47, %v3437_v5 }
 0x3d3   :  { %v529_v21 = vrot.slane %v4203_v47, %v3606_v60  ;;  %v1948_v19 = vadd.f32 %v1916_v30, %v1668_v23  ;;  %v1669_v59 = vadd.f32 %v1637_v16, %v1389_v37  ;;  %v1390_v49 = vadd.f32 %v1358_v54, %v1110_v18 }
 0x3d4   :  { %5347 = vst [vmem:[#allocation225_spill] sm:$0xff] %v4292_v58  ;;  %v4301_v32 = vmul.f32 %v3895_v31, %v513_v42  ;;  %v4304_v26 = vrot.slane %v555_v4, %v3793_v17  ;;  %v1111_v15 = vadd.f32 %v1079_v51, %v799_v1  ;;  %v800_v8 = vmul.f32 %v3457_v24, %v4238_v20  ;;  %v2663_v1 = vpop.permute.xlu1 %2662 }
 0x3d5   :  { %v1080_v61 = vmul.f32 %v3561_v45, %v4242_v12  ;;  %v2196_v6 = vmul.f32 %v4092_v33, %v4273_v43  ;;  %v1917_v47 = vmul.f32 %v3893_v29, %v4258_v41  ;;  %v1638_v31 = vmul.f32 %v3780_v14, %v4289_v10  ;;  %v2659_v24 = vpop.permute.xlu0 %2658 }
 0x3d6   :  { %v4318_v23 = vrot.slane %v4225_v22, %v3606_v60  ;;  %v4321_v51 = vrot.slane %v555_v4, %v3973_v53  ;;  %v1359_v45 = vmul.f32 %v3648_v2, %v4264_v46  ;;  %v4326_v37 = vmul.f32 %v3897_v36, %v517_v9 }
 0x3d7   :  { %v4329_v33 = vmul.f32 %v3983_v35, %v521_v13  ;;  %v2228_v29 = vadd.f32 %v2196_v6, %v1948_v19  ;;  %v1949_v18 = vadd.f32 %v1917_v47, %v1669_v59  ;;  %v1670_v14 = vadd.f32 %v1638_v31, %v1390_v49  ;;  %v5356_v47 = vld [vmem:[#allocation185_spill] sm:$0xff] }
 0x3d8   :  { %5348 = vst [vmem:[#allocation226_spill] sm:$0xff] %v4318_v23  ;;  %v4332_v42 = vmul.f32 %v3996_v40, %v525_v63  ;;  %v2476_v4 = vmul.f32 %v4165_v50, %v4304_v26  ;;  %v4338_v30 = vrot.slane %v4225_v22, %v3669_v38  ;;  %v1391_v2 = vadd.f32 %v1359_v45, %v1111_v15 }
 0x3d9   :  { %v1112_v36 = vadd.f32 %v1080_v61, %v800_v8  ;;  %v2197_v35 = vmul.f32 %v4031_v3, %v4273_v43  ;;  %v1918_v9 = vmul.f32 %v3857_v0, %v4318_v23  ;;  %v4346_v40 = vrot.slane %v4225_v22, %v3793_v17  ;;  %v2670_v19 = vpop.permute.xlu0 %2669 }
 0x3da   :  { %5349 = vst [vmem:[#allocation227_spill] sm:$0xff] %v4338_v30  ;;  %v4350_v6 = vrot.slane %v4225_v22, %v3973_v53  ;;  %v2756_v50 = vmul.f32 %v2659_v24, %v4321_v51  ;;  %v1639_v49 = vmul.f32 %v3830_v55, %v4289_v10  ;;  %v1360_v61 = vmul.f32 %v3658_v27, %v4264_v46  ;;  %v5358_v24 = vld [vmem:[#allocation105_spill] sm:$0xff] }
 0x3db   :  { %5350 = vst [vmem:[#allocation228_spill] sm:$0xff] %v4346_v40  ;;  %v4358_v3 = vmul.f32 %v3999_v44, %v529_v21  ;;  %v2508_v0 = vadd.f32 %v2476_v4, %v2228_v29  ;;  %v2229_v16 = vadd.f32 %v2197_v35, %v1949_v18  ;;  %v2477_v54 = vmul.f32 %v4104_v28, %v4304_v26  ;;  %v5354_v21 = vld [vmem:[#allocation144_spill] sm:$0xff]  ;;  %v5355_v28 = vld [vmem:[#allocation159_spill] sm:$0xff] }
 0x3dc   :  { %5351 = vst [vmem:[#allocation229_spill] sm:$0xff] %v4350_v6  ;;  %v1950_v13 = vadd.f32 %v1918_v9, %v1670_v14  ;;  %v4363_v22 = vmul.f32 %v2663_v1, %v4321_v51  ;;  %v2198_v63 = vmul.f32 %v4096_v52, %v4338_v30  ;;  %v1671_v55 = vadd.f32 %v1639_v49, %v1391_v2  ;;  %v2674_v52 = vpop.permute.xlu1 %2673  ;;  %v5362_v35 = vld [vmem:[#allocation23_spill] sm:$0xff] }
 0x3dd   :  { %v1392_v59 = vadd.f32 %v1360_v61, %v1112_v36  ;;  %v2478_v27 = vmul.f32 %v4169_v7, %v4346_v40  ;;  %v4370_v44 = vmul.f32 %v2670_v19, %v4350_v6  ;;  %v1919_v15 = vmul.f32 %v5354_v21, %v4318_v23  ;;  %v5363_v49 = vld [vmem:[#allocation55_spill] sm:$0xff]  ;;  %v5364_v19 = vld [vmem:[#allocation132_spill] sm:$0xff] }
 0x3de   :  { %5352 = vst [vmem:[#allocation230_spill] sm:$0xff] %v4363_v22  ;;  %v2199_v8 = vmul.f32 %v5355_v28, %v4338_v30  ;;  %v4378_v31 = vmul.f32 %v5356_v47, %v4346_v40  ;;  %v1640_v45 = vmul.f32 %v5358_v24, %v4289_v10  ;;  %v4384_v7 = vrot.slane %v4292_v58, %v3293_v11  ;;  %v5371_v47 = vld [vmem:[#allocation8_spill] sm:$0xff]  ;;  %v5372_v24 = vld [vmem:[#allocation31_spill] sm:$0xff]  ;;  %v5380_v22 = vld [vmem:[#allocation37_spill] sm:$0xff] }
 0x3df   :  { %5353 = vst [vmem:[#allocation231_spill] sm:$0xff] %v4370_v44  ;;  %v4388_v29 = vrot.slane %v4292_v58, %v3351_v25  ;;  %v4390_v18 = vadd.f32 %v2756_v50, %v2508_v0  ;;  %v4392_v14 = vadd.f32 %v2477_v54, %v2229_v16  ;;  %v2230_v4 = vadd.f32 %v2198_v63, %v1950_v13  ;;  %v5365_v50 = vld [vmem:[#allocation183_spill] sm:$0xff]  ;;  %v5367_v13 = vld [vmem:[#allocation82_spill] sm:$0xff] }
 0x3e0   :  { %5357 = vst [vmem:[#allocation144_spill] sm:$0xff] %v4378_v31  ;;  %v4395_v1 = vmul.f32 %v2674_v52, %v4350_v6  ;;  %v1951_v2 = vadd.f32 %v1919_v15, %v1671_v55  ;;  %v1672_v36 = vadd.f32 %v1640_v45, %v1392_v59  ;;  %v801_v9 = vmul.f32 %v5362_v35, %v4238_v20  ;;  %v5368_v20 = vld [vmem:[#allocation34_spill] sm:$0xff]  ;;  %v5369_v55 = vld [vmem:[#allocation57_spill] sm:$0xff]  ;;  %v5385_v44 = vld [vmem:[#allocation83_spill] sm:$0xff] }
 0x3e1   :  { %5359 = vst [vmem:[#allocation159_spill] sm:$0xff] %v4390_v18  ;;  %5360 = vst [vmem:[#allocation185_spill] sm:$0xff] %v4392_v14  ;;  %v1081_v61 = vmul.f32 %v5363_v49, %v4242_v12  ;;  %v1920_v21 = vmul.f32 %v5364_v19, %v4318_v23  ;;  %v4405_v0 = vmul.f32 %v5365_v50, %v4338_v30  ;;  %v5384_v30 = vld [vmem:[#allocation61_spill] sm:$0xff]  ;;  %v5386_v18 = vld [vmem:[#allocation148_spill] sm:$0xff] }
 0x3e2   :  { %5361 = vst [vmem:[#allocation105_spill] sm:$0xff] %v4395_v1  ;;  %v561_v16 = vrot.slane %v4301_v32, %v3293_v11  ;;  %v841_v54 = vrot.slane %v4301_v32, %v3351_v25  ;;  %v4413_v63 = vmul.f32 %v5367_v13, %v4264_v46  ;;  %v802_v12 = vmul.f32 %v5368_v20, %v4384_v7  ;;  %v5375_v13 = vld [vmem:[#allocation60_spill] sm:$0xff] }
 0x3e3   :  { %5366 = vst [vmem:[#allocation23_spill] sm:$0xff] %v4405_v0  ;;  %v1082_v59 = vmul.f32 %v5369_v55, %v4388_v29  ;;  %v1121_v15 = vrot.slane %v4301_v32, %v3370_v34  ;;  %v4421_v28 = vadd.f32 %v2478_v27, %v2230_v4  ;;  %v4427_v35 = vrot.slane %v4301_v32, %v3437_v5 }
 0x3e4   :  { %v775_v52 = vmul.f32 %v5371_v47, %v561_v16  ;;  %v1055_v45 = vmul.f32 %v5372_v24, %v841_v54  ;;  %v4429_v46 = vadd.f32 %v2199_v8, %v1951_v2  ;;  %v4431_v49 = vadd.f32 %v1920_v21, %v1672_v36  ;;  %v5376_v2 = vld [vmem:[#allocation26_spill] sm:$0xff] }
 0x3e5   :  { %5370 = vst [vmem:[#allocation55_spill] sm:$0xff] %v4421_v28  ;;  %v4433_v19 = vadd.f32 %v1081_v61, %v801_v9  ;;  %v4437_v50 = vrot.slane %v4292_v58, %v3370_v34  ;;  %v4441_v27 = vrot.slane %v4292_v58, %v3437_v5  ;;  %v1335_v20 = vmul.f32 %v5375_v13, %v1121_v15  ;;  %v5377_v9 = vld [vmem:[#allocation56_spill] sm:$0xff] }
 0x3e6   :  { %5373 = vst [vmem:[#allocation132_spill] sm:$0xff] %v4429_v46  ;;  %5374 = vst [vmem:[#allocation183_spill] sm:$0xff] %v4431_v49  ;;  %v1087_v4 = vadd.f32 %v1055_v45, %v775_v52  ;;  %v4446_v55 = vrot.slane %v4301_v32, %v3606_v60  ;;  %v1114_v8 = vadd.f32 %v1082_v59, %v802_v12  ;;  %v5378_v52 = vld [vmem:[#allocation87_spill] sm:$0xff]  ;;  %v5379_v45 = vld [vmem:[#allocation6_spill] sm:$0xff] }
 0x3e7   :  { %v803_v36 = vmul.f32 %v5376_v2, %v4384_v7  ;;  %v1083_v61 = vmul.f32 %v5377_v9, %v4388_v29  ;;  %v4454_v21 = vrot.slane %v4301_v32, %v3669_v38  ;;  %v1615_v24 = vmul.f32 %v5378_v52, %v4427_v35  ;;  %v5381_v12 = vld [vmem:[#allocation84_spill] sm:$0xff]  ;;  %v5383_v52 = vld [vmem:[#allocation127_spill] sm:$0xff] }
 0x3e8   :  { %v1367_v47 = vadd.f32 %v1335_v20, %v1087_v4  ;;  %v774_v13 = vmul.f32 %v5379_v45, %v561_v16  ;;  %v1054_v14 = vmul.f32 %v5380_v22, %v841_v54  ;;  %v1362_v59 = vmul.f32 %v5381_v12, %v4437_v50 }
 0x3e9   :  { %v4464_v2 = vrot.slane %v4292_v58, %v3606_v60  ;;  %v4468_v9 = vrot.slane %v4301_v32, %v3793_v17  ;;  %v4472_v4 = vrot.slane %v4301_v32, %v3973_v53  ;;  %v1895_v45 = vmul.f32 %v5383_v52, %v4446_v55  ;;  %v5388_v52 = vld [vmem:[#allocation12_spill] sm:$0xff] }
 0x3ea   :  { %v1647_v20 = vadd.f32 %v1615_v24, %v1367_v47  ;;  %v1086_v22 = vadd.f32 %v1054_v14, %v774_v13  ;;  %v1334_v6 = vmul.f32 %v5384_v30, %v1121_v15  ;;  %v4477_v12 = vadd.f32 %v1362_v59, %v1114_v8  ;;  %v5387_v47 = vld [vmem:[#allocation88_spill] sm:$0xff]  ;;  %v5389_v30 = vld [vmem:[#allocation167_spill] sm:$0xff] }
 0x3eb   :  { %5382 = vst [vmem:[#allocation82_spill] sm:$0xff] %v4464_v2  ;;  %v4479_v1 = vadd.f32 %v1083_v61, %v803_v36  ;;  %v4483_v28 = vmul.f32 %v5385_v44, %v4437_v50  ;;  %v2175_v23 = vmul.f32 %v5386_v18, %v4454_v21  ;;  %v1614_v24 = vmul.f32 %v5387_v47, %v4427_v35  ;;  %v5390_v61 = vld [vmem:[#allocation110_spill] sm:$0xff]  ;;  %v5391_v13 = vld [vmem:[#allocation32_spill] sm:$0xff] }
 0x3ec   :  { %v1927_v32 = vadd.f32 %v1895_v45, %v1647_v20  ;;  %v1366_v40 = vadd.f32 %v1334_v6, %v1086_v22  ;;  %v777_v14 = vmul.f32 %v5388_v52, %v561_v16  ;;  %v2455_v8 = vmul.f32 %v5389_v30, %v4468_v9  ;;  %v5392_v6 = vld [vmem:[#allocation138_spill] sm:$0xff]  ;;  %v5393_v45 = vld [vmem:[#allocation188_spill] sm:$0xff] }
 0x3ed   :  { %v2735_v36 = vmul.f32 %v4155_v56, %v4472_v4  ;;  %v1894_v44 = vmul.f32 %v5390_v61, %v4446_v55  ;;  %v1057_v59 = vmul.f32 %v5391_v13, %v841_v54  ;;  %v2174_v20 = vmul.f32 %v5392_v6, %v4454_v21  ;;  %v5394_v30 = vld [vmem:[#allocation62_spill] sm:$0xff]  ;;  %v5396_v13 = vld [vmem:[#allocation89_spill] sm:$0xff] }
 0x3ee   :  { %v2207_v0 = vadd.f32 %v2175_v23, %v1927_v32  ;;  %v1646_v18 = vadd.f32 %v1614_v24, %v1366_v40  ;;  %v2454_v22 = vmul.f32 %v5393_v45, %v4468_v9  ;;  %v2734_v47 = vmul.f32 %v4185_v62, %v4472_v4  ;;  %v5395_v56 = vld [vmem:[#allocation10_spill] sm:$0xff]  ;;  %v5397_v40 = vld [vmem:[#allocation39_spill] sm:$0xff]  ;;  %v5398_v6 = vld [vmem:[#allocation129_spill] sm:$0xff] }
 0x3ef   :  { %v1089_v52 = vadd.f32 %v1057_v59, %v777_v14  ;;  %v1337_v49 = vmul.f32 %v5394_v30, %v1121_v15  ;;  %v776_v31 = vmul.f32 %v5395_v56, %v561_v16  ;;  %v1617_v23 = vmul.f32 %v5396_v13, %v4427_v35  ;;  %v5399_v45 = vld [vmem:[#allocation149_spill] sm:$0xff]  ;;  %v5402_v13 = vld [vmem:[#allocation90_spill] sm:$0xff] }
 0x3f0   :  { %v2487_v46 = vadd.f32 %v2455_v8, %v2207_v0  ;;  %v1926_v61 = vadd.f32 %v1894_v44, %v1646_v18  ;;  %v1056_v32 = vmul.f32 %v5397_v40, %v841_v54  ;;  %v1897_v58 = vmul.f32 %v5398_v6, %v4446_v55  ;;  %v5400_v62 = vld [vmem:[#allocation169_spill] sm:$0xff]  ;;  %v5401_v0 = vld [vmem:[#allocation63_spill] sm:$0xff] }
 0x3f1   :  { %v1369_v24 = vadd.f32 %v1337_v49, %v1089_v52  ;;  %v2177_v2 = vmul.f32 %v5399_v45, %v4454_v21  ;;  %v2457_v14 = vmul.f32 %v5400_v62, %v4468_v9  ;;  %v1336_v8 = vmul.f32 %v5401_v0, %v1121_v15  ;;  %v5408_v0 = vld [vmem:[#allocation14_spill] sm:$0xff] }
 0x3f2   :  { %v2767_v59 = vadd.f32 %v2735_v36, %v2487_v46  ;;  %v2206_v30 = vadd.f32 %v2174_v20, %v1926_v61  ;;  %v1088_v16 = vadd.f32 %v1056_v32, %v776_v31  ;;  %v2737_v18 = vmul.f32 %v4159_v48, %v4472_v4  ;;  %v5403_v36 = vld [vmem:[#allocation16_spill] sm:$0xff]  ;;  %v5404_v48 = vld [vmem:[#allocation33_spill] sm:$0xff] }
 0x3f3   :  { %v1649_v44 = vadd.f32 %v1617_v23, %v1369_v24  ;;  %v565_v54 = vrot.slane %v4326_v37, %v3293_v11  ;;  %v845_v49 = vrot.slane %v4326_v37, %v3351_v25  ;;  %v1616_v46 = vmul.f32 %v5402_v13, %v4427_v35 }
 0x3f4   :  { %2834 = vperm.xlu1 %3163, %v2767_v59   ;;  %v2486_v52 = vadd.f32 %v2454_v22, %v2206_v30  ;;  %v1368_v56 = vadd.f32 %v1336_v8, %v1088_v16  ;;  %v4525_v31 = vrot.slane %v4326_v37, %v3370_v34  ;;  %v4531_v23 = vrot.slane %v4326_v37, %v3437_v5  ;;  %v5405_v22 = vld [vmem:[#allocation112_spill] sm:$0xff] }
 0x3f5   :  { %v1929_v15 = vadd.f32 %v1897_v58, %v1649_v44  ;;  %v779_v20 = vmul.f32 %v5403_v36, %v565_v54  ;;  %v1059_v61 = vmul.f32 %v5404_v48, %v845_v49  ;;  %v1896_v24 = vmul.f32 %v5405_v22, %v4446_v55  ;;  %v5406_v58 = vld [vmem:[#allocation140_spill] sm:$0xff]  ;;  %v5411_v36 = vld [vmem:[#allocation130_spill] sm:$0xff] }
 0x3f6   :  { %v2766_v40 = vadd.f32 %v2734_v47, %v2486_v52  ;;  %v1648_v32 = vadd.f32 %v1616_v46, %v1368_v56  ;;  %v4537_v35 = vrot.slane %v4326_v37, %v3606_v60  ;;  %v2176_v45 = vmul.f32 %v5406_v58, %v4454_v21  ;;  %v5407_v59 = vld [vmem:[#allocation64_spill] sm:$0xff]  ;;  %v5409_v21 = vld [vmem:[#allocation91_spill] sm:$0xff]  ;;  %v5410_v56 = vld [vmem:[#allocation41_spill] sm:$0xff] }
 0x3f7   :  { %v2209_v6 = vadd.f32 %v2177_v2, %v1929_v15  ;;  %v1091_v62 = vadd.f32 %v1059_v61, %v779_v20  ;;  %v1339_v30 = vmul.f32 %v5407_v59, %v4525_v31  ;;  %v4545_v47 = vrot.slane %v4326_v37, %v3669_v38  ;;  %v5413_v58 = vld [vmem:[#allocation150_spill] sm:$0xff] }
 0x3f8   :  { %2831 = vperm.xlu0 %3164, %v2766_v40   ;;  %v1928_v16 = vadd.f32 %v1896_v24, %v1648_v32  ;;  %v4549_v55 = vrot.slane %v4326_v37, %v3793_v17  ;;  %v778_v8 = vmul.f32 %v5408_v0, %v565_v54  ;;  %v1619_v52 = vmul.f32 %v5409_v21, %v4531_v23  ;;  %v5412_v32 = vld [vmem:[#allocation65_spill] sm:$0xff] }
 0x3f9   :  { %v2489_v2 = vadd.f32 %v2457_v14, %v2209_v6  ;;  %v1371_v44 = vadd.f32 %v1339_v30, %v1091_v62  ;;  %v1058_v13 = vmul.f32 %v5410_v56, %v845_v49  ;;  %v2456_v15 = vmul.f32 %v4135_v39, %v4468_v9  ;;  %v5414_v9 = vld [vmem:[#allocation171_spill] sm:$0xff] }
 0x3fa   :  { %v2208_v46 = vadd.f32 %v2176_v45, %v1928_v16  ;;  %v1899_v20 = vmul.f32 %v5411_v36, %v4537_v35  ;;  %v4561_v48 = vrot.slane %v4326_v37, %v3973_v53  ;;  %v1338_v22 = vmul.f32 %v5412_v32, %v4525_v31  ;;  %v5416_v30 = vld [vmem:[#allocation19_spill] sm:$0xff] }
 0x3fb   :  { %v2769_v61 = vadd.f32 %v2737_v18, %v2489_v2  ;;  %v1651_v40 = vadd.f32 %v1619_v52, %v1371_v44  ;;  %v1090_v14 = vadd.f32 %v1058_v13, %v778_v8  ;;  %v2736_v6 = vmul.f32 %v4189_v57, %v4472_v4  ;;  %v5415_v18 = vld [vmem:[#allocation92_spill] sm:$0xff]  ;;  %v5418_v57 = vld [vmem:[#allocation114_spill] sm:$0xff]  ;;  %v5419_v44 = vld [vmem:[#allocation35_spill] sm:$0xff] }
 0x3fc   :  { %v2488_v24 = vadd.f32 %v2456_v15, %v2208_v46  ;;  %v2179_v39 = vmul.f32 %v5413_v58, %v4545_v47  ;;  %v2459_v45 = vmul.f32 %v5414_v9, %v4549_v55  ;;  %v1618_v59 = vmul.f32 %v5415_v18, %v4531_v23  ;;  %v5417_v8 = vld [vmem:[#allocation200_spill] sm:$0xff]  ;;  %v5421_v15 = vld [vmem:[#allocation189_spill] sm:$0xff] }
 0x3fd   :  { %2840 = vperm.xlu1 %3163, %v2769_v61   ;;  %v1931_v62 = vadd.f32 %v1899_v20, %v1651_v40  ;;  %v1370_v37 = vadd.f32 %v1338_v22, %v1090_v14  ;;  %v781_v16 = vmul.f32 %v5416_v30, %v565_v54  ;;  %v2739_v2 = vmul.f32 %v5417_v8, %v4561_v48  ;;  %v5420_v13 = vld [vmem:[#allocation160_spill] sm:$0xff]  ;;  %v5422_v20 = vld [vmem:[#allocation211_spill] sm:$0xff]  ;;  %v5423_v14 = vld [vmem:[#allocation66_spill] sm:$0xff] }
 0x3fe   :  { %v2768_v0 = vadd.f32 %v2736_v6, %v2488_v24  ;;  %v1898_v4 = vmul.f32 %v5418_v57, %v4537_v35  ;;  %v1061_v21 = vmul.f32 %v5419_v44, %v845_v49  ;;  %v2178_v46 = vmul.f32 %v5420_v13, %v4545_v47  ;;  %v5424_v22 = vld [vmem:[#allocation17_spill] sm:$0xff] }
 0x3ff   :  { %v2211_v52 = vadd.f32 %v2179_v39, %v1931_v62  ;;  %v1650_v56 = vadd.f32 %v1618_v59, %v1370_v37  ;;  %v2458_v36 = vmul.f32 %v5421_v15, %v4549_v55  ;;  %v2738_v61 = vmul.f32 %v5422_v20, %v4561_v48  ;;  %v5425_v39 = vld [vmem:[#allocation93_spill] sm:$0xff]  ;;  %v5426_v62 = vld [vmem:[#allocation42_spill] sm:$0xff]  ;;  %v5427_v59 = vld [vmem:[#allocation131_spill] sm:$0xff] }
 0x400   :  { %2837 = vperm.xlu0 %3164, %v2768_v0   ;;  %v1093_v40 = vadd.f32 %v1061_v21, %v781_v16  ;;  %v1341_v32 = vmul.f32 %v5423_v14, %v4525_v31  ;;  %v780_v24 = vmul.f32 %v5424_v22, %v565_v54  ;;  %v1621_v9 = vmul.f32 %v5425_v39, %v4531_v23  ;;  %v5428_v0 = vld [vmem:[#allocation151_spill] sm:$0xff]  ;;  %v5429_v16 = vld [vmem:[#allocation173_spill] sm:$0xff] }
 0x401   :  { %v2491_v6 = vadd.f32 %v2459_v45, %v2211_v52  ;;  %v1930_v58 = vadd.f32 %v1898_v4, %v1650_v56  ;;  %v1060_v37 = vmul.f32 %v5426_v62, %v845_v49  ;;  %v1901_v30 = vmul.f32 %v5427_v59, %v4537_v35  ;;  %v5430_v45 = vld [vmem:[#allocation67_spill] sm:$0xff]  ;;  %v5431_v56 = vld [vmem:[#allocation201_spill] sm:$0xff] }
 0x402   :  { %v1373_v18 = vadd.f32 %v1341_v32, %v1093_v40  ;;  %v2181_v8 = vmul.f32 %v5428_v0, %v4545_v47  ;;  %v2461_v57 = vmul.f32 %v5429_v16, %v4549_v55  ;;  %v1340_v4 = vmul.f32 %v5430_v45, %v4525_v31  ;;  %v5433_v32 = vld [vmem:[#allocation20_spill] sm:$0xff] }
 0x403   :  { %v2771_v44 = vadd.f32 %v2739_v2, %v2491_v6  ;;  %v2210_v21 = vadd.f32 %v2178_v46, %v1930_v58  ;;  %v1092_v54 = vadd.f32 %v1060_v37, %v780_v24  ;;  %v2741_v49 = vmul.f32 %v5431_v56, %v4561_v48  ;;  %v5432_v2 = vld [vmem:[#allocation94_spill] sm:$0xff]  ;;  %v5437_v0 = vld [vmem:[#allocation68_spill] sm:$0xff] }
 0x404   :  { %v1653_v52 = vadd.f32 %v1621_v9, %v1373_v18  ;;  %v569_v13 = vrot.slane %v4329_v33, %v3293_v11  ;;  %v849_v15 = vrot.slane %v4329_v33, %v3351_v25  ;;  %v1620_v46 = vmul.f32 %v5432_v2, %v4531_v23  ;;  %v5434_v24 = vld [vmem:[#allocation38_spill] sm:$0xff] }
 0x405   :  { %2846 = vperm.xlu1 %3163, %v2771_v44   ;;  %v2490_v20 = vadd.f32 %v2458_v36, %v2210_v21  ;;  %v1372_v40 = vadd.f32 %v1340_v4, %v1092_v54  ;;  %v4609_v14 = vrot.slane %v4329_v33, %v3370_v34  ;;  %v4615_v58 = vrot.slane %v4329_v33, %v3437_v5  ;;  %v5435_v36 = vld [vmem:[#allocation116_spill] sm:$0xff]  ;;  %v5436_v18 = vld [vmem:[#allocation162_spill] sm:$0xff]  ;;  %v5438_v21 = vld [vmem:[#allocation7_spill] sm:$0xff] }
 0x406   :  { %v1933_v31 = vadd.f32 %v1901_v30, %v1653_v52  ;;  %v783_v22 = vmul.f32 %v5433_v32, %v569_v13  ;;  %v1063_v6 = vmul.f32 %v5434_v24, %v849_v15  ;;  %v1900_v62 = vmul.f32 %v5435_v36, %v4537_v35  ;;  %v5440_v52 = vld [vmem:[#allocation44_spill] sm:$0xff]  ;;  %v5444_v36 = vld [vmem:[#allocation213_spill] sm:$0xff] }
 0x407   :  { %v2770_v39 = vadd.f32 %v2738_v61, %v2490_v20  ;;  %v1652_v9 = vadd.f32 %v1620_v46, %v1372_v40  ;;  %v4621_v23 = vrot.slane %v4329_v33, %v3606_v60  ;;  %v2180_v59 = vmul.f32 %v5436_v18, %v4545_v47  ;;  %v5439_v47 = vld [vmem:[#allocation95_spill] sm:$0xff]  ;;  %v5441_v40 = vld [vmem:[#allocation190_spill] sm:$0xff]  ;;  %v5442_v46 = vld [vmem:[#allocation133_spill] sm:$0xff] }
 0x408   :  { %v2213_v37 = vadd.f32 %v2181_v8, %v1933_v31  ;;  %v1095_v30 = vadd.f32 %v1063_v6, %v783_v22  ;;  %v1343_v16 = vmul.f32 %v5437_v0, %v4609_v14  ;;  %v4629_v61 = vrot.slane %v4329_v33, %v3669_v38  ;;  %v5443_v6 = vld [vmem:[#allocation69_spill] sm:$0xff]  ;;  %v5446_v18 = vld [vmem:[#allocation174_spill] sm:$0xff] }
 0x409   :  { %2843 = vperm.xlu0 %3164, %v2770_v39   ;;  %v1932_v44 = vadd.f32 %v1900_v62, %v1652_v9  ;;  %v4633_v35 = vrot.slane %v4329_v33, %v3793_v17  ;;  %v782_v54 = vmul.f32 %v5438_v21, %v569_v13  ;;  %v1623_v4 = vmul.f32 %v5439_v47, %v4615_v58  ;;  %v5451_v47 = vld [vmem:[#allocation40_spill] sm:$0xff] }
 0x40a   :  { %v2493_v8 = vadd.f32 %v2461_v57, %v2213_v37  ;;  %v1375_v45 = vadd.f32 %v1343_v16, %v1095_v30  ;;  %v1062_v56 = vmul.f32 %v5440_v52, %v849_v15  ;;  %v2460_v2 = vmul.f32 %v5441_v40, %v4549_v55  ;;  %v5445_v37 = vld [vmem:[#allocation152_spill] sm:$0xff]  ;;  %v5448_v16 = vld [vmem:[#allocation22_spill] sm:$0xff] }
 0x40b   :  { %v2212_v20 = vadd.f32 %v2180_v59, %v1932_v44  ;;  %v1903_v31 = vmul.f32 %v5442_v46, %v4621_v23  ;;  %v4645_v32 = vrot.slane %v4329_v33, %v3973_v53  ;;  %v1342_v39 = vmul.f32 %v5443_v6, %v4609_v14 }
 0x40c   :  { %v2773_v22 = vadd.f32 %v2741_v49, %v2493_v8  ;;  %v1655_v24 = vadd.f32 %v1623_v4, %v1375_v45  ;;  %v1094_v57 = vadd.f32 %v1062_v56, %v782_v54  ;;  %v2740_v62 = vmul.f32 %v5444_v36, %v4561_v48  ;;  %v5447_v49 = vld [vmem:[#allocation96_spill] sm:$0xff]  ;;  %v5449_v54 = vld [vmem:[#allocation202_spill] sm:$0xff] }
 0x40d   :  { %v2492_v9 = vadd.f32 %v2460_v2, %v2212_v20  ;;  %v2183_v55 = vmul.f32 %v5445_v37, %v4629_v61  ;;  %v2463_v59 = vmul.f32 %v5446_v18, %v4633_v35  ;;  %v1622_v0 = vmul.f32 %v5447_v49, %v4615_v58  ;;  %v5450_v48 = vld [vmem:[#allocation118_spill] sm:$0xff]  ;;  %v5452_v20 = vld [vmem:[#allocation164_spill] sm:$0xff]  ;;  %v5453_v2 = vld [vmem:[#allocation191_spill] sm:$0xff] }
 0x40e   :  { %2852 = vperm.xlu1 %3163, %v2773_v22   ;;  %v1935_v30 = vadd.f32 %v1903_v31, %v1655_v24  ;;  %v1374_v33 = vadd.f32 %v1342_v39, %v1094_v57  ;;  %v785_v44 = vmul.f32 %v5448_v16, %v569_v13  ;;  %v2743_v8 = vmul.f32 %v5449_v54, %v4645_v32  ;;  %v5454_v31 = vld [vmem:[#allocation214_spill] sm:$0xff]  ;;  %v5456_v39 = vld [vmem:[#allocation21_spill] sm:$0xff]  ;;  %v5457_v37 = vld [vmem:[#allocation107_spill] sm:$0xff] }
 0x40f   :  { %v2772_v21 = vadd.f32 %v2740_v62, %v2492_v9  ;;  %v1902_v45 = vmul.f32 %v5450_v48, %v4621_v23  ;;  %v1065_v4 = vmul.f32 %v5451_v47, %v849_v15  ;;  %v2182_v40 = vmul.f32 %v5452_v20, %v4629_v61  ;;  %v5455_v57 = vld [vmem:[#allocation70_spill] sm:$0xff]  ;;  %v5459_v49 = vld [vmem:[#allocation135_spill] sm:$0xff]  ;;  %v5460_v16 = vld [vmem:[#allocation153_spill] sm:$0xff] }
 0x410   :  { %v2215_v52 = vadd.f32 %v2183_v55, %v1935_v30  ;;  %v1654_v56 = vadd.f32 %v1622_v0, %v1374_v33  ;;  %v2462_v46 = vmul.f32 %v5453_v2, %v4633_v35  ;;  %v2742_v22 = vmul.f32 %v5454_v31, %v4645_v32  ;;  %v5458_v18 = vld [vmem:[#allocation46_spill] sm:$0xff] }
 0x411   :  { %2849 = vperm.xlu0 %3164, %v2772_v21   ;;  %v1097_v24 = vadd.f32 %v1065_v4, %v785_v44  ;;  %v1345_v6 = vmul.f32 %v5455_v57, %v4609_v14  ;;  %v784_v9 = vmul.f32 %v5456_v39, %v569_v13  ;;  %v1625_v55 = vmul.f32 %v5457_v37, %v4615_v58  ;;  %v5461_v44 = vld [vmem:[#allocation176_spill] sm:$0xff]  ;;  %v5465_v57 = vld [vmem:[#allocation9_spill] sm:$0xff]  ;;  %v5466_v39 = vld [vmem:[#allocation43_spill] sm:$0xff] }
 0x412   :  { %v2495_v36 = vadd.f32 %v2463_v59, %v2215_v52  ;;  %v1934_v62 = vadd.f32 %v1902_v45, %v1654_v56  ;;  %v1064_v30 = vmul.f32 %v5458_v18, %v849_v15  ;;  %v1905_v0 = vmul.f32 %v5459_v49, %v4621_v23  ;;  %v5462_v59 = vld [vmem:[#allocation71_spill] sm:$0xff]  ;;  %v5463_v52 = vld [vmem:[#allocation204_spill] sm:$0xff] }
 0x413   :  { %v1377_v33 = vadd.f32 %v1345_v6, %v1097_v24  ;;  %v2185_v21 = vmul.f32 %v5460_v16, %v4629_v61  ;;  %v2465_v54 = vmul.f32 %v5461_v44, %v4633_v35  ;;  %v1344_v45 = vmul.f32 %v5462_v59, %v4609_v14  ;;  %v5467_v37 = vld [vmem:[#allocation119_spill] sm:$0xff] }
 0x414   :  { %v2775_v48 = vadd.f32 %v2743_v8, %v2495_v36  ;;  %v2214_v47 = vadd.f32 %v2182_v40, %v1934_v62  ;;  %v1096_v13 = vadd.f32 %v1064_v30, %v784_v9  ;;  %v2745_v15 = vmul.f32 %v5463_v52, %v4645_v32  ;;  %v5464_v40 = vld [vmem:[#allocation99_spill] sm:$0xff]  ;;  %v5468_v30 = vld [vmem:[#allocation166_spill] sm:$0xff] }
 0x415   :  { %v1657_v4 = vadd.f32 %v1625_v55, %v1377_v33  ;;  %v4687_v56 = vrot.slane %v4332_v42, %v3293_v11  ;;  %v4691_v20 = vrot.slane %v4332_v42, %v3351_v25  ;;  %v1624_v31 = vmul.f32 %v5464_v40, %v4615_v58 }
 0x416   :  { %2858 = vperm.xlu1 %3163, %v2775_v48   ;;  %v2494_v2 = vadd.f32 %v2462_v46, %v2214_v47  ;;  %v1376_v8 = vadd.f32 %v1344_v45, %v1096_v13  ;;  %v4697_v14 = vrot.slane %v4332_v42, %v3370_v34  ;;  %v4705_v36 = vrot.slane %v4332_v42, %v3437_v5  ;;  %v5471_v47 = vld [vmem:[#allocation24_spill] sm:$0xff] }
 0x417   :  { %v1937_v24 = vadd.f32 %v1905_v0, %v1657_v4  ;;  %v787_v6 = vmul.f32 %v5465_v57, %v4687_v56  ;;  %v1067_v9 = vmul.f32 %v5466_v39, %v4691_v20  ;;  %v1904_v58 = vmul.f32 %v5467_v37, %v4621_v23  ;;  %v5469_v0 = vld [vmem:[#allocation72_spill] sm:$0xff]  ;;  %v5473_v4 = vld [vmem:[#allocation47_spill] sm:$0xff] }
 0x418   :  { %v2774_v46 = vadd.f32 %v2742_v22, %v2494_v2  ;;  %v1656_v62 = vadd.f32 %v1624_v31, %v1376_v8  ;;  %v4711_v55 = vrot.slane %v4332_v42, %v3606_v60  ;;  %v2184_v33 = vmul.f32 %v5468_v30, %v4629_v61  ;;  %v5470_v22 = vld [vmem:[#allocation192_spill] sm:$0xff]  ;;  %v5472_v61 = vld [vmem:[#allocation109_spill] sm:$0xff] }
 0x419   :  { %v2217_v18 = vadd.f32 %v2185_v21, %v1937_v24  ;;  %v1099_v49 = vadd.f32 %v1067_v9, %v787_v6  ;;  %v1347_v16 = vmul.f32 %v5469_v0, %v4697_v14  ;;  %v2464_v48 = vmul.f32 %v5470_v22, %v4633_v35  ;;  %v5474_v8 = vld [vmem:[#allocation137_spill] sm:$0xff] }
 0x41a   :  { %2855 = vperm.xlu0 %3164, %v2774_v46   ;;  %v1936_v44 = vadd.f32 %v1904_v58, %v1656_v62  ;;  %v4721_v23 = vrot.slane %v4332_v42, %v3669_v38  ;;  %v786_v13 = vmul.f32 %v5471_v47, %v4687_v56  ;;  %v1627_v45 = vmul.f32 %v5472_v61, %v4705_v36  ;;  %v5475_v6 = vld [vmem:[#allocation73_spill] sm:$0xff]  ;;  %v5476_v62 = vld [vmem:[#allocation215_spill] sm:$0xff]  ;;  %v5477_v58 = vld [vmem:[#allocation154_spill] sm:$0xff] }
 0x41b   :  { %v2497_v21 = vadd.f32 %v2465_v54, %v2217_v18  ;;  %v1379_v59 = vadd.f32 %v1347_v16, %v1099_v49  ;;  %v1066_v52 = vmul.f32 %v5473_v4, %v4691_v20  ;;  %v1907_v40 = vmul.f32 %v5474_v8, %v4711_v55  ;;  %v5479_v49 = vld [vmem:[#allocation25_spill] sm:$0xff]  ;;  %v5480_v16 = vld [vmem:[#allocation36_spill] sm:$0xff]  ;;  %v5486_v8 = vld [vmem:[#allocation75_spill] sm:$0xff] }
 0x41c   :  { %v2216_v2 = vadd.f32 %v2184_v33, %v1936_v44  ;;  %v4733_v35 = vrot.slane %v4332_v42, %v3793_v17  ;;  %v4737_v31 = vrot.slane %v4332_v42, %v3973_v53  ;;  %v1346_v39 = vmul.f32 %v5475_v6, %v4697_v14  ;;  %v5481_v44 = vld [vmem:[#allocation178_spill] sm:$0xff]  ;;  %v5482_v22 = vld [vmem:[#allocation49_spill] sm:$0xff]  ;;  %v5484_v61 = vld [vmem:[#allocation120_spill] sm:$0xff] }
 0x41d   :  { %v2777_v54 = vadd.f32 %v2745_v15, %v2497_v21  ;;  %v1659_v24 = vadd.f32 %v1627_v45, %v1379_v59  ;;  %v1098_v57 = vadd.f32 %v1066_v52, %v786_v13  ;;  %v4743_v9 = vadd.f32 %v4483_v28, %v4479_v1  ;;  %v5478_v15 = vld [vmem:[#allocation100_spill] sm:$0xff]  ;;  %v5483_v13 = vld [vmem:[#allocation206_spill] sm:$0xff] }
 0x41e   :  { %v2496_v46 = vadd.f32 %v2464_v48, %v2216_v2  ;;  %v2744_v37 = vmul.f32 %v5476_v62, %v4645_v32  ;;  %v2187_v18 = vmul.f32 %v5477_v58, %v4721_v23  ;;  %v1626_v33 = vmul.f32 %v5478_v15, %v4705_v36  ;;  %v5485_v4 = vld [vmem:[#allocation168_spill] sm:$0xff]  ;;  %v5488_v58 = vld [vmem:[#allocation101_spill] sm:$0xff] }
 0x41f   :  { %2864 = vperm.xlu1 %3163, %v2777_v54   ;;  %v1939_v42 = vadd.f32 %v1907_v40, %v1659_v24  ;;  %v1378_v30 = vadd.f32 %v1346_v39, %v1098_v57  ;;  %v788_v0 = vmul.f32 %v5479_v49, %v4687_v56  ;;  %v4755_v1 = vmul.f32 %v5480_v16, %v4384_v7 }
 0x420   :  { %v2776_v28 = vadd.f32 %v2744_v37, %v2496_v46  ;;  %v2467_v32 = vmul.f32 %v5481_v44, %v4733_v35  ;;  %v1068_v48 = vmul.f32 %v5482_v22, %v4691_v20  ;;  %v2747_v21 = vmul.f32 %v5483_v13, %v4737_v31  ;;  %v5487_v46 = vld [vmem:[#allocation193_spill] sm:$0xff] }
 0x421   :  { %v2219_v47 = vadd.f32 %v2187_v18, %v1939_v42  ;;  %v1658_v59 = vadd.f32 %v1626_v33, %v1378_v30  ;;  %v1906_v45 = vmul.f32 %v5484_v61, %v4711_v55  ;;  %v2186_v52 = vmul.f32 %v5485_v4, %v4721_v23  ;;  %v5490_v33 = vld [vmem:[#allocation51_spill] sm:$0xff]  ;;  %v5494_v13 = vld [vmem:[#allocation77_spill] sm:$0xff] }
 0x422   :  { %2861 = vperm.xlu0 %3164, %v2776_v28   ;;  %v1100_v2 = vadd.f32 %v1068_v48, %v788_v0  ;;  %v1348_v40 = vmul.f32 %v5486_v8, %v4697_v14  ;;  %v4771_v54 = vrot.slane %v4358_v3, %v3293_v11  ;;  %v4775_v6 = vrot.slane %v4358_v3, %v3351_v25  ;;  %v5489_v11 = vld [vmem:[#allocation27_spill] sm:$0xff]  ;;  %v5492_v28 = vld [vmem:[#allocation122_spill] sm:$0xff]  ;;  %v5496_v4 = vld [vmem:[#allocation13_spill] sm:$0xff] }
 0x423   :  { %v2499_v24 = vadd.f32 %v2467_v32, %v2219_v47  ;;  %v1938_v57 = vadd.f32 %v1906_v45, %v1658_v59  ;;  %v4779_v39 = vrot.slane %v4358_v3, %v3370_v34  ;;  %v2466_v62 = vmul.f32 %v5487_v46, %v4733_v35  ;;  %v5491_v34 = vld [vmem:[#allocation216_spill] sm:$0xff]  ;;  %v5493_v32 = vld [vmem:[#allocation170_spill] sm:$0xff]  ;;  %v5495_v61 = vld [vmem:[#allocation195_spill] sm:$0xff] }
 0x424   :  { %v1380_v37 = vadd.f32 %v1348_v40, %v1100_v2  ;;  %v1628_v18 = vmul.f32 %v5488_v58, %v4705_v36  ;;  %v790_v42 = vmul.f32 %v5489_v11, %v4771_v54  ;;  %v1070_v25 = vmul.f32 %v5490_v33, %v4775_v6  ;;  %v5497_v2 = vld [vmem:[#allocation48_spill] sm:$0xff] }
 0x425   :  { %v2779_v30 = vadd.f32 %v2747_v21, %v2499_v24  ;;  %v2218_v15 = vadd.f32 %v2186_v52, %v1938_v57  ;;  %v4791_v49 = vrot.slane %v4358_v3, %v3437_v5  ;;  %v2746_v0 = vmul.f32 %v5491_v34, %v4737_v31  ;;  %v5498_v57 = vld [vmem:[#allocation102_spill] sm:$0xff]  ;;  %v5501_v33 = vld [vmem:[#allocation124_spill] sm:$0xff] }
 0x426   :  { %v1660_v16 = vadd.f32 %v1628_v18, %v1380_v37  ;;  %v1908_v44 = vmul.f32 %v5492_v28, %v4711_v55  ;;  %v2188_v22 = vmul.f32 %v5493_v32, %v4721_v23  ;;  %v1102_v47 = vadd.f32 %v1070_v25, %v790_v42  ;;  %v5499_v18 = vld [vmem:[#allocation76_spill] sm:$0xff]  ;;  %v5500_v42 = vld [vmem:[#allocation217_spill] sm:$0xff]  ;;  %v5503_v32 = vld [vmem:[#allocation11_spill] sm:$0xff] }
 0x427   :  { %2870 = vperm.xlu1 %3163, %v2779_v30   ;;  %v2498_v48 = vadd.f32 %v2466_v62, %v2218_v15  ;;  %v1350_v21 = vmul.f32 %v5494_v13, %v4779_v39  ;;  %v4803_v5 = vrot.slane %v4358_v3, %v3606_v60  ;;  %v2468_v45 = vmul.f32 %v5495_v61, %v4733_v35  ;;  %v5502_v28 = vld [vmem:[#allocation113_spill] sm:$0xff] }
 0x428   :  { %v1940_v59 = vadd.f32 %v1908_v44, %v1660_v16  ;;  %v791_v52 = vmul.f32 %v5496_v4, %v4771_v54  ;;  %v1071_v8 = vmul.f32 %v5497_v2, %v4775_v6  ;;  %v1630_v46 = vmul.f32 %v5498_v57, %v4791_v49  ;;  %v5506_v61 = vld [vmem:[#allocation45_spill] sm:$0xff] }
 0x429   :  { %v2778_v40 = vadd.f32 %v2746_v0, %v2498_v48  ;;  %v1382_v24 = vadd.f32 %v1350_v21, %v1102_v47  ;;  %v4815_v62 = vrot.slane %v4358_v3, %v3669_v38  ;;  %v4819_v37 = vrot.slane %v4358_v3, %v3793_v17  ;;  %v5504_v48 = vld [vmem:[#allocation59_spill] sm:$0xff]  ;;  %v5505_v21 = vld [vmem:[#allocation172_spill] sm:$0xff] }
 0x42a   :  { %v2220_v60 = vadd.f32 %v2188_v22, %v1940_v59  ;;  %v1103_v58 = vadd.f32 %v1071_v8, %v791_v52  ;;  %v1351_v11 = vmul.f32 %v5499_v18, %v4779_v39  ;;  %v2748_v30 = vmul.f32 %v5500_v42, %v4737_v31  ;;  %v5508_v8 = vld [vmem:[#allocation141_spill] sm:$0xff] }
 0x42b   :  { %2867 = vperm.xlu0 %3164, %v2778_v40   ;;  %v1662_v15 = vadd.f32 %v1630_v46, %v1382_v24  ;;  %v1910_v25 = vmul.f32 %v5501_v33, %v4803_v5  ;;  %v4829_v34 = vrot.slane %v4358_v3, %v3973_v53  ;;  %v1631_v44 = vmul.f32 %v5502_v28, %v4791_v49  ;;  %v5509_v24 = vld [vmem:[#allocation220_spill] sm:$0xff]  ;;  %v5512_v42 = vld [vmem:[#allocation29_spill] sm:$0xff] }
 0x42c   :  { %v2500_v0 = vadd.f32 %v2468_v45, %v2220_v60  ;;  %v1383_v16 = vadd.f32 %v1351_v11, %v1103_v58  ;;  %v789_v22 = vmul.f32 %v5503_v32, %v4687_v56  ;;  %v4837_v47 = vmul.f32 %v5504_v48, %v4388_v29  ;;  %v5507_v45 = vld [vmem:[#allocation197_spill] sm:$0xff]  ;;  %v5510_v60 = vld [vmem:[#allocation74_spill] sm:$0xff] }
 0x42d   :  { %v1942_v13 = vadd.f32 %v1910_v25, %v1662_v15  ;;  %v2190_v59 = vmul.f32 %v5505_v21, %v4815_v62  ;;  %v1069_v3 = vmul.f32 %v5506_v61, %v4691_v20  ;;  %v2470_v52 = vmul.f32 %v5507_v45, %v4819_v37  ;;  %v5511_v20 = vld [vmem:[#allocation156_spill] sm:$0xff]  ;;  %v5517_v21 = vld [vmem:[#allocation79_spill] sm:$0xff] }
 0x42e   :  { %v2780_v4 = vadd.f32 %v2748_v30, %v2500_v0  ;;  %v1663_v2 = vadd.f32 %v1631_v44, %v1383_v16  ;;  %v1911_v40 = vmul.f32 %v5508_v8, %v4803_v5  ;;  %v2750_v57 = vmul.f32 %v5509_v24, %v4829_v34  ;;  %v5513_v15 = vld [vmem:[#allocation52_spill] sm:$0xff]  ;;  %v5515_v44 = vld [vmem:[#allocation111_spill] sm:$0xff] }
 0x42f   :  { %v2222_v56 = vadd.f32 %v2190_v59, %v1942_v13  ;;  %v1101_v46 = vadd.f32 %v1069_v3, %v789_v22  ;;  %v1349_v58 = vmul.f32 %v5510_v60, %v4697_v14  ;;  %v2191_v11 = vmul.f32 %v5511_v20, %v4815_v62  ;;  %v5514_v0 = vld [vmem:[#allocation180_spill] sm:$0xff]  ;;  %v5516_v22 = vld [vmem:[#allocation209_spill] sm:$0xff]  ;;  %v5523_v60 = vld [vmem:[#allocation54_spill] sm:$0xff] }
 0x430   :  { %2873 = vperm.xlu0 %3164, %v2780_v4   ;;  %v1943_v18 = vadd.f32 %v1911_v40, %v1663_v2  ;;  %v792_v30 = vmul.f32 %v5512_v42, %v4771_v54  ;;  %v1072_v33 = vmul.f32 %v5513_v15, %v4775_v6  ;;  %v2471_v16 = vmul.f32 %v5514_v0, %v4819_v37  ;;  %v5518_v4 = vld [vmem:[#allocation139_spill] sm:$0xff]  ;;  %v5520_v2 = vld [vmem:[#allocation30_spill] sm:$0xff]  ;;  %v5527_v0 = vld [vmem:[#allocation221_spill] sm:$0xff] }
 0x431   :  { %v2502_v25 = vadd.f32 %v2470_v52, %v2222_v56  ;;  %v1381_v28 = vadd.f32 %v1349_v58, %v1101_v46  ;;  %v1629_v32 = vmul.f32 %v5515_v44, %v4705_v36  ;;  %v2751_v48 = vmul.f32 %v5516_v22, %v4829_v34  ;;  %v5519_v52 = vld [vmem:[#allocation218_spill] sm:$0xff]  ;;  %v5521_v36 = vld [vmem:[#allocation103_spill] sm:$0xff] }
 0x432   :  { %v2223_v14 = vadd.f32 %v2191_v11, %v1943_v18  ;;  %v1104_v13 = vadd.f32 %v1072_v33, %v792_v30  ;;  %v1352_v59 = vmul.f32 %v5517_v21, %v4779_v39  ;;  %v1909_v45 = vmul.f32 %v5518_v4, %v4711_v55  ;;  %v5522_v46 = vld [vmem:[#allocation219_spill] sm:$0xff]  ;;  %v5526_v55 = vld [vmem:[#allocation126_spill] sm:$0xff]  ;;  %v5534_v4 = vld [vmem:[#allocation104_spill] sm:$0xff] }
 0x433   :  { %v2782_v61 = vadd.f32 %v2750_v57, %v2502_v25  ;;  %v1661_v3 = vadd.f32 %v1629_v32, %v1381_v28  ;;  %v794_v8 = vmul.f32 %v5520_v2, %v5519_v52  ;;  %v1632_v24 = vmul.f32 %v5521_v36, %v4791_v49  ;;  %v5524_v20 = vld [vmem:[#allocation155_spill] sm:$0xff]  ;;  %v5529_v32 = vld [vmem:[#allocation208_spill] sm:$0xff]  ;;  %v5530_v22 = vld [vmem:[#allocation18_spill] sm:$0xff] }
 0x434   :  { %v2503_v40 = vadd.f32 %v2471_v16, %v2223_v14  ;;  %v1384_v56 = vadd.f32 %v1352_v59, %v1104_v13  ;;  %v1074_v58 = vmul.f32 %v5523_v60, %v5522_v46  ;;  %v2189_v57 = vmul.f32 %v5524_v20, %v4721_v23  ;;  %v5525_v11 = vld [vmem:[#allocation179_spill] sm:$0xff]  ;;  %v5528_v16 = vld [vmem:[#allocation81_spill] sm:$0xff] }
 0x435   :  { %2879 = vperm.xlu1 %3163, %v2782_v61   ;;  %v1941_v18 = vadd.f32 %v1909_v45, %v1661_v3  ;;  %v2469_v42 = vmul.f32 %v5525_v11, %v4733_v35  ;;  %v1912_v30 = vmul.f32 %v5526_v55, %v4803_v5  ;;  %v1354_v28 = vmul.f32 %v5528_v16, %v5527_v0  ;;  %v5531_v23 = vld [vmem:[#allocation53_spill] sm:$0xff]  ;;  %v5532_v59 = vld [vmem:[#allocation175_spill] sm:$0xff]  ;;  %v5533_v3 = vld [vmem:[#allocation222_spill] sm:$0xff] }
 0x436   :  { %v2783_v15 = vadd.f32 %v2751_v48, %v2503_v40  ;;  %v1664_v33 = vadd.f32 %v1632_v24, %v1384_v56  ;;  %v1106_v25 = vadd.f32 %v1074_v58, %v794_v8  ;;  %v2749_v14 = vmul.f32 %v5529_v32, %v4737_v31  ;;  %v5535_v8 = vld [vmem:[#allocation198_spill] sm:$0xff]  ;;  %v5536_v56 = vld [vmem:[#allocation80_spill] sm:$0xff]  ;;  %v5538_v58 = vld [vmem:[#allocation117_spill] sm:$0xff] }
 0x437   :  { %v2221_v44 = vadd.f32 %v2189_v57, %v1941_v18  ;;  %v795_v13 = vmul.f32 %v5530_v22, %v5519_v52  ;;  %v1075_v21 = vmul.f32 %v5531_v23, %v5522_v46  ;;  %v2192_v48 = vmul.f32 %v5532_v59, %v4815_v62  ;;  %v5537_v46 = vld [vmem:[#allocation128_spill] sm:$0xff]  ;;  %v5539_v11 = vld [vmem:[#allocation15_spill] sm:$0xff]  ;;  %v5540_v55 = vld [vmem:[#allocation50_spill] sm:$0xff] }
 0x438   :  { %2882 = vperm.xlu0 %3164, %v2783_v15   ;;  %v1944_v35 = vadd.f32 %v1912_v30, %v1664_v33  ;;  %v1386_v61 = vadd.f32 %v1354_v28, %v1106_v25  ;;  %v1634_v45 = vmul.f32 %v5534_v4, %v5533_v3  ;;  %v2472_v40 = vmul.f32 %v5535_v8, %v4819_v37  ;;  %v5541_v33 = vld [vmem:[#allocation223_spill] sm:$0xff]  ;;  %v5542_v16 = vld [vmem:[#allocation177_spill] sm:$0xff] }
 0x439   :  { %v2501_v2 = vadd.f32 %v2469_v42, %v2221_v44  ;;  %v1107_v31 = vadd.f32 %v1075_v21, %v795_v13  ;;  %v1355_v52 = vmul.f32 %v5536_v56, %v5527_v0  ;;  %v1914_v60 = vmul.f32 %v5537_v46, %v4258_v41  ;;  %v5543_v32 = vld [vmem:[#allocation143_spill] sm:$0xff]  ;;  %v5544_v13 = vld [vmem:[#allocation78_spill] sm:$0xff] }
 0x43a   :  { %v2224_v36 = vadd.f32 %v2192_v48, %v1944_v35  ;;  %v1666_v24 = vadd.f32 %v1634_v45, %v1386_v61  ;;  %v1635_v18 = vmul.f32 %v5538_v58, %v5533_v3  ;;  %v793_v42 = vmul.f32 %v5539_v11, %v4771_v54  ;;  %v5545_v35 = vld [vmem:[#allocation199_spill] sm:$0xff]  ;;  %v5546_v61 = vld [vmem:[#allocation158_spill] sm:$0xff]  ;;  %v5556_v11 = vld [vmem:[#allocation212_spill] sm:$0xff] }
 0x43b   :  { %v2781_v20 = vadd.f32 %v2749_v14, %v2501_v2  ;;  %v1387_v57 = vadd.f32 %v1355_v52, %v1107_v31  ;;  %v1073_v30 = vmul.f32 %v5540_v55, %v4775_v6  ;;  %v2752_v25 = vmul.f32 %v5541_v33, %v4829_v34  ;;  %v5547_v45 = vld [vmem:[#allocation115_spill] sm:$0xff]  ;;  %v5548_v2 = vld [vmem:[#allocation28_spill] sm:$0xff]  ;;  %v5551_v52 = vld [vmem:[#allocation182_spill] sm:$0xff] }
 0x43c   :  { %v2504_v15 = vadd.f32 %v2472_v40, %v2224_v36  ;;  %v1946_v0 = vadd.f32 %v1914_v60, %v1666_v24  ;;  %v2194_v28 = vmul.f32 %v5542_v16, %v4273_v43  ;;  %v1915_v14 = vmul.f32 %v5543_v32, %v4258_v41  ;;  %v5552_v24 = vld [vmem:[#allocation142_spill] sm:$0xff] }
 0x43d   :  { %2876 = vperm.xlu1 %3163, %v2781_v20   ;;  %v1667_v44 = vadd.f32 %v1635_v18, %v1387_v57  ;;  %v1105_v22 = vadd.f32 %v1073_v30, %v793_v42  ;;  %v1353_v54 = vmul.f32 %v5544_v13, %v4779_v39  ;;  %v1116_v6 = vadd.f32 %v4837_v47, %v4755_v1  ;;  %v5549_v39 = vld [vmem:[#allocation58_spill] sm:$0xff]  ;;  %v5550_v47 = vld [vmem:[#allocation224_spill] sm:$0xff] }
 0x43e   :  { %v2784_v23 = vadd.f32 %v2752_v25, %v2504_v15  ;;  %v2226_v21 = vadd.f32 %v2194_v28, %v1946_v0  ;;  %v2474_v59 = vmul.f32 %v5545_v35, %v4304_v26  ;;  %v2195_v3 = vmul.f32 %v5546_v61, %v4273_v43  ;;  %v5566_v35 = vld [vmem:[#allocation210_spill] sm:$0xff] }
 0x43f   :  { %v1947_v48 = vadd.f32 %v1915_v14, %v1667_v44  ;;  %v1385_v4 = vadd.f32 %v1353_v54, %v1105_v22  ;;  %v1633_v41 = vmul.f32 %v5547_v45, %v4791_v49  ;;  %v805_v8 = vmul.f32 %v5548_v2, %v4384_v7  ;;  %v5553_v49 = vld [vmem:[#allocation106_spill] sm:$0xff]  ;;  %v5554_v7 = vld [vmem:[#allocation123_spill] sm:$0xff]  ;;  %v5558_v44 = vld [vmem:[#allocation181_spill] sm:$0xff]  ;;  %v2678_v45 = vpop.permute.xlu0 %2677 }
 0x440   :  { %v1085_v40 = vmul.f32 %v5549_v39, %v4388_v29  ;;  %2885 = vperm.xlu0 %3164, %v2784_v23   ;;  %v2506_v1 = vadd.f32 %v2474_v59, %v2226_v21  ;;  %v2754_v31 = vmul.f32 %v5550_v47, %v4321_v51  ;;  %v2475_v36 = vmul.f32 %v5551_v52, %v4304_v26  ;;  %v5555_v29 = vld [vmem:[#allocation86_spill] sm:$0xff]  ;;  %v5557_v26 = vld [vmem:[#allocation157_spill] sm:$0xff]  ;;  %v5564_v54 = vld [vmem:[#allocation108_spill] sm:$0xff] }
 0x441   :  { %v2227_v56 = vadd.f32 %v2195_v3, %v1947_v48  ;;  %v1665_v43 = vadd.f32 %v1633_v41, %v1385_v4  ;;  %v1913_v46 = vmul.f32 %v5552_v24, %v4803_v5  ;;  %v1642_v60 = vmul.f32 %v5553_v49, %v4441_v27  ;;  %v5560_v22 = vld [vmem:[#allocation82_spill] sm:$0xff]  ;;  %v5565_v23 = vld [vmem:[#allocation85_spill] sm:$0xff]  ;;  %v5567_v59 = vld [vmem:[#allocation132_spill] sm:$0xff] }
 0x442   :  { %v1643_v58 = vmul.f32 %v5554_v7, %v4441_v27  ;;  %v1364_v18 = vmul.f32 %v5555_v29, %v4437_v50  ;;  %v2786_v20 = vadd.f32 %v2754_v31, %v2506_v1  ;;  %v2755_v42 = vmul.f32 %v5556_v11, %v4321_v51  ;;  %v5559_v51 = vld [vmem:[#allocation121_spill] sm:$0xff]  ;;  %v5568_v48 = vld [vmem:[#allocation144_spill] sm:$0xff]  ;;  %v5569_v3 = vld [vmem:[#allocation183_spill] sm:$0xff] }
 0x443   :  { %v2507_v57 = vadd.f32 %v2475_v36, %v2227_v56  ;;  %v1945_v55 = vadd.f32 %v1913_v46, %v1665_v43  ;;  %v2193_v30 = vmul.f32 %v5557_v26, %v4815_v62  ;;  %v1393_v5 = vadd.f32 %v4413_v63, %v4433_v19  ;;  %v5561_v62 = vld [vmem:[#allocation134_spill] sm:$0xff]  ;;  %v5562_v63 = vld [vmem:[#allocation225_spill] sm:$0xff]  ;;  %v5570_v4 = vld [vmem:[#allocation23_spill] sm:$0xff] }
 0x444   :  { %v1674_v15 = vadd.f32 %v1642_v60, %v4477_v12  ;;  %v1675_v33 = vadd.f32 %v1643_v58, %v4743_v9  ;;  %v1396_v25 = vadd.f32 %v1364_v18, %v1116_v6  ;;  %2891 = vperm.xlu1 %3163, %v2786_v20   ;;  %v1117_v0 = vadd.f32 %v1085_v40, %v805_v8  ;;  %v5563_v12 = vld [vmem:[#allocation146_spill] sm:$0xff]  ;;  %v5571_v47 = vld [vmem:[#allocation228_spill] sm:$0xff]  ;;  %v5574_v52 = vld [vmem:[#allocation145_spill] sm:$0xff] }
 0x445   :  { %v2787_v16 = vadd.f32 %v2755_v42, %v2507_v57  ;;  %v2225_v28 = vadd.f32 %v2193_v30, %v1945_v55  ;;  %v2473_v32 = vmul.f32 %v5558_v44, %v4819_v37  ;;  %v1641_v14 = vmul.f32 %v5559_v51, %v4289_v10  ;;  %v5573_v56 = vld [vmem:[#allocation226_spill] sm:$0xff]  ;;  %v5575_v43 = vld [vmem:[#allocation184_spill] sm:$0xff]  ;;  %v5576_v49 = vld [vmem:[#allocation163_spill] sm:$0xff] }
 0x446   :  { %v1922_v13 = vmul.f32 %v5561_v62, %v5560_v22  ;;  %v1989_v19 = vrot.slane %v5562_v63, %v3669_v38  ;;  %v1923_v9 = vmul.f32 %v5563_v12, %v5560_v22  ;;  %v1644_v6 = vmul.f32 %v5564_v54, %v4441_v27  ;;  %v5577_v7 = vld [vmem:[#allocation136_spill] sm:$0xff]  ;;  %v5578_v29 = vld [vmem:[#allocation125_spill] sm:$0xff]  ;;  %v5579_v20 = vld [vmem:[#allocation159_spill] sm:$0xff]  ;;  %v2689_v62 = vpop.permute.xlu0 %2688 }
 0x447   :  { %v1365_v21 = vmul.f32 %v5565_v23, %v4437_v50  ;;  %2894 = vperm.xlu0 %3164, %v2787_v16   ;;  %v2505_v37 = vadd.f32 %v2473_v32, %v2225_v28  ;;  %v2753_v10 = vmul.f32 %v5566_v35, %v4829_v34  ;;  %v2511_v61 = vadd.f32 %v5568_v48, %v5567_v59  ;;  %v5572_v50 = vld [vmem:[#allocation203_spill] sm:$0xff]  ;;  %v2682_v34 = vpop.permute.xlu1 %2681  ;;  %v5582_v55 = vld [vmem:[#allocation105_spill] sm:$0xff] }
 0x448   :  { %v2232_v38 = vadd.f32 %v5570_v4, %v5569_v3  ;;  %v1673_v41 = vadd.f32 %v1641_v14, %v1393_v5  ;;  %v1954_v2 = vadd.f32 %v1922_v13, %v1674_v15  ;;  %v1955_v8 = vadd.f32 %v1923_v9, %v1675_v33  ;;  %v5580_v57 = vld [vmem:[#allocation55_spill] sm:$0xff]  ;;  %v5585_v44 = vld [vmem:[#allocation161_spill] sm:$0xff]  ;;  %v5587_v13 = vld [vmem:[#allocation194_spill] sm:$0xff] }
 0x449   :  { %v1676_v39 = vadd.f32 %v1644_v6, %v1396_v25  ;;  %v1397_v40 = vadd.f32 %v1365_v21, %v1117_v0  ;;  %v2785_v1 = vadd.f32 %v2753_v10, %v2505_v37  ;;  %v2480_v31 = vmul.f32 %v5572_v50, %v5571_v47  ;;  %v5581_v11 = vld [vmem:[#allocation231_spill] sm:$0xff]  ;;  %v5583_v0 = vld [vmem:[#allocation229_spill] sm:$0xff]  ;;  %v5591_v37 = vld [vmem:[#allocation230_spill] sm:$0xff] }
 0x44a   :  { %v1921_v36 = vmul.f32 %v5574_v52, %v5573_v56  ;;  %v2202_v24 = vmul.f32 %v5575_v43, %v1989_v19  ;;  %v2269_v46 = vrot.slane %v5562_v63, %v3793_v17  ;;  %v2203_v60 = vmul.f32 %v5576_v49, %v1989_v19  ;;  %v5584_v28 = vld [vmem:[#allocation227_spill] sm:$0xff]  ;;  %v5590_v21 = vld [vmem:[#allocation185_spill] sm:$0xff] }
 0x44b   :  { %v1924_v58 = vmul.f32 %v5577_v7, %v5560_v22  ;;  %v1645_v18 = vmul.f32 %v5578_v29, %v4441_v27  ;;  %2888 = vperm.xlu1 %3163, %v2785_v1   ;;  %2897 = vperm.xlu0 %3164, %v5579_v20   ;;  %v2790_v42 = vadd.f32 %v5581_v11, %v5580_v57  ;;  %v5586_v27 = vld [vmem:[#allocation205_spill] sm:$0xff]  ;;  %v5588_v9 = vld [vmem:[#allocation187_spill] sm:$0xff]  ;;  %v2693_v48 = vpop.permute.xlu1 %2692  ;;  %v2697_v1 = vpop.permute.xlu0 %2696 }
 0x44c   :  { %v2791_v26 = vadd.f32 %v5582_v55, %v2511_v61  ;;  %v2512_v30 = vadd.f32 %v2480_v31, %v2232_v38  ;;  %v1953_v5 = vadd.f32 %v1921_v36, %v1673_v41  ;;  %v2234_v15 = vadd.f32 %v2202_v24, %v1954_v2  ;;  %v5589_v6 = vld [vmem:[#allocation147_spill] sm:$0xff]  ;;  %v5595_v24 = vld [vmem:[#allocation196_spill] sm:$0xff] }
 0x44d   :  { %v2235_v17 = vadd.f32 %v2203_v60, %v1955_v8  ;;  %v1956_v33 = vadd.f32 %v1924_v58, %v1676_v39  ;;  %v1677_v25 = vadd.f32 %v1645_v18, %v1397_v40  ;;  %v2760_v16 = vmul.f32 %v2678_v45, %v5583_v0  ;;  %v5593_v2 = vld [vmem:[#allocation207_spill] sm:$0xff] }
 0x44e   :  { %v2201_v32 = vmul.f32 %v5585_v44, %v5584_v28  ;;  %v2482_v51 = vmul.f32 %v5586_v27, %v2269_v46  ;;  %v2549_v14 = vrot.slane %v5562_v63, %v3973_v53  ;;  %v2483_v12 = vmul.f32 %v5587_v13, %v2269_v46  ;;  %v5592_v63 = vld [vmem:[#allocation186_spill] sm:$0xff]  ;;  %v5596_v27 = vld [vmem:[#allocation97_spill] sm:$0xff] }
 0x44f   :  { %v2204_v54 = vmul.f32 %v5588_v9, %v1989_v19  ;;  %v1925_v23 = vmul.f32 %v5589_v6, %v5560_v22  ;;  %2903 = vperm.xlu1 %3163, %v2790_v42   ;;  %2906 = vperm.xlu0 %3164, %v2791_v26   ;;  %v2789_v35 = vadd.f32 %v5591_v37, %v5590_v21  ;;  %v5594_v22 = vld [vmem:[#allocation165_spill] sm:$0xff]  ;;  %v2944_v9 = vadd.s32 4294967272, %v5596_v27  ;;  %v5598_v37 = vld [vmem:[#allocation98_spill] sm:$0xff] }
 0x450   :  { %v2792_v10 = vadd.f32 %v2760_v16, %v2512_v30  ;;  %v2233_v59 = vadd.f32 %v2201_v32, %v1953_v5  ;;  %v2514_v61 = vadd.f32 %v2482_v51, %v2234_v15  ;;  %v2515_v3 = vadd.f32 %v2483_v12, %v2235_v17  ;;  %v5597_v13 = vld [vmem:[#allocation5_spill] sm:$0xff] }
 0x451   :  { %v2236_v4 = vadd.f32 %v2204_v54, %v1956_v33  ;;  %v1957_v53 = vadd.f32 %v1925_v23, %v1677_v25  ;;  %v2481_v38 = vmul.f32 %v5592_v63, %v5571_v47  ;;  %v2762_v45 = vmul.f32 %v2689_v62, %v2549_v14  ;;  %v2701_v47 = vpop.permute.xlu1 %2700 }
 0x452   :  { %v2763_v41 = vmul.f32 %v2693_v48, %v2549_v14  ;;  %v2484_v8 = vmul.f32 %v5593_v2, %v2269_v46  ;;  %v2205_v39 = vmul.f32 %v5594_v22, %v1989_v19  ;;  %v2761_v36 = vmul.f32 %v2682_v34, %v5583_v0 }
 0x453   :  { %2900 = vperm.xlu1 %3163, %v2789_v35   ;;  %2909 = vperm.xlu0 %3164, %v2792_v10   ;;  %v2513_v40 = vadd.f32 %v2481_v38, %v2233_v59  ;;  %v2794_v50 = vadd.f32 %v2762_v45, %v2514_v61  ;;  %v2764_v43 = vmul.f32 %v2697_v1, %v2549_v14  ;;  %v2930_v51 = vadd.s32 4294967288, %v5596_v27 }
 0x454   :  { %v2795_v31 = vadd.f32 %v2763_v41, %v2515_v3  ;;  %v2516_v56 = vadd.f32 %v2484_v8, %v2236_v4  ;;  %v2237_v52 = vadd.f32 %v2205_v39, %v1957_v53  ;;  %v2485_v49 = vmul.f32 %v5595_v24, %v2269_v46 }
 0x455   :  { %v2793_v60 = vadd.f32 %v2761_v36, %v2513_v40  ;;  %v2765_v19 = vmul.f32 %v2701_v47, %v2549_v14  ;;  %v2937_v14 = vadd.s32 4294967280, %v5596_v27  ;;  %v5004_v12 = vsub.s32 %v2930_v51, %v5597_v13 }
 0x456   :  { %v2796_v7 = vadd.f32 %v2764_v43, %v2516_v56  ;;  %v2517_v58 = vadd.f32 %v2485_v49, %v2237_v52  ;;  %v5017_v10 = vsub.s32 %v2944_v9, %v5597_v13 }
 0x457   :  { %2915 = vperm.xlu1 %3163, %v2794_v50   ;;  %2918 = vperm.xlu0 %3164, %v2795_v31   ;;  %v5008_v54 = vsub.s32 %v2937_v14, %v5597_v13 }
 0x458   :  { %v2797_v29 = vadd.f32 %v2765_v19, %v2517_v58 }
 0x45b   :  { %2912 = vperm.xlu1 %3163, %v2793_v60   ;;  %2921 = vperm.xlu0 %3164, %v2796_v7  }
 0x45f   :  { %2924 = vperm.xlu1 %3163, %v2797_v29  }
 0x473   :  { %v2835_v20 = vpop.permute.xlu1 %2834 }
 0x474   :  { %v2934_v21 = vrot.slane %v2835_v20, %v5004_v12 }
 0x477   :  { %v2832_v18 = vpop.permute.xlu0 %2831 }
 0x478   :  { %v2929_v35 = vrot.slane %v2832_v18, %v5598_v37 }
 0x47a   :  { %v2936_v63 = vsel %vm2935_vm10, %v2934_v21, %v2929_v35 }
 0x47c   :  { %v2841_v11 = vpop.permute.xlu1 %2840 }
 0x47d   :  { %v2948_v38 = vrot.slane %v2841_v11, %v5017_v10 }
 0x47f   :  { %v2838_v57 = vpop.permute.xlu0 %2837 }
 0x480   :  { %v2941_v59 = vrot.slane %v2838_v57, %v5008_v54 }
 0x482   :  { %v2943_v2 = vsel %vm2942_vm11, %v2941_v59, %v2936_v63 }
 0x483   :  { %v2950_v43 = vsel %vm2949_vm12, %v2948_v38, %v2943_v2 }
 0x484   :  { %v2847_v34 = vpop.permute.xlu1 %2846 }
 0x485   :  { %v2958_v3 = vrot.slane %v2847_v34, %v5004_v12 }
 0x488   :  { %v2844_v42 = vpop.permute.xlu0 %2843 }
 0x489   :  { %v2954_v4 = vrot.slane %v2844_v42, %v5598_v37 }
 0x48b   :  { %v2959_v1 = vsel %vm2935_vm10, %v2958_v3, %v2954_v4 }
 0x48d   :  { %v2853_v26 = vpop.permute.xlu1 %2852 }
 0x48e   :  { %v2968_v50 = vrot.slane %v2853_v26, %v5017_v10 }
 0x490   :  { %v2850_v55 = vpop.permute.xlu0 %2849 }
 0x491   :  { %v2963_v53 = vrot.slane %v2850_v55, %v5008_v54 }
 0x493   :  { %v2964_v52 = vsel %vm2942_vm11, %v2963_v53, %v2959_v1 }
 0x494   :  { %v2969_v18 = vsel %vm2949_vm12, %v2968_v50, %v2964_v52 }
 0x495   :  { %v2859_v30 = vpop.permute.xlu1 %2858  ;;  %v3084_v14 = vsel %vm349_vm2, %v2969_v18, %v2950_v43 }
 0x496   :  { %v2977_v45 = vrot.slane %v2859_v30, %v5004_v12 }
 0x499   :  { %v2856_v46 = vpop.permute.xlu0 %2855 }
 0x49a   :  { %v2973_v41 = vrot.slane %v2856_v46, %v5598_v37 }
 0x49c   :  { %v2978_v24 = vsel %vm2935_vm10, %v2977_v45, %v2973_v41 }
 0x49e   :  { %v4997_v15 = vpop.permute.xlu1 %2864 }
 0x49f   :  { %v2987_v49 = vrot.slane %v4997_v15, %v5017_v10 }
 0x4a1   :  { %v2862_v5 = vpop.permute.xlu0 %2861 }
 0x4a2   :  { %v2982_v31 = vrot.slane %v2862_v5, %v5008_v54 }
 0x4a4   :  { %v2983_v20 = vsel %vm2942_vm11, %v2982_v31, %v2978_v24 }
 0x4a6   :  { %v2871_v33 = vpop.permute.xlu1 %2870 }
 0x4a7   :  { %v2996_v8 = vrot.slane %v2871_v33, %v5004_v12 }
 0x4aa   :  { %v2868_v17 = vpop.permute.xlu0 %2867 }
 0x4ab   :  { %v2992_v22 = vrot.slane %v2868_v17, %v5598_v37  ;;  %v2988_v17 = vsel %vm2949_vm12, %v2987_v49, %v2983_v20 }
 0x4ac   :  { %v3085_v9 = vsel %vm351_vm3, %v2988_v17, %v3084_v14 }
 0x4ad   :  { %v2997_v47 = vsel %vm2935_vm10, %v2996_v8, %v2992_v22 }
 0x4af   :  { %v2874_v25 = vpop.permute.xlu0 %2873 }
 0x4b0   :  { %v3001_v56 = vrot.slane %v2874_v25, %v5008_v54 }
 0x4b2   :  { %v3002_v57 = vsel %vm2942_vm11, %v3001_v56, %v2997_v47 }
 0x4b4   :  { %v2880_v0 = vpop.permute.xlu1 %2879 }
 0x4b5   :  { %v3011_v60 = vrot.slane %v2880_v0, %v5598_v37 }
 0x4b7   :  { %v2883_v16 = vpop.permute.xlu0 %2882 }
 0x4b8   :  { %v3015_v36 = vrot.slane %v2883_v16, %v5004_v12 }
 0x4ba   :  { %v3016_v42 = vsel %vm2935_vm10, %v3015_v36, %v3011_v60 }
 0x4bc   :  { %v2877_v28 = vpop.permute.xlu1 %2876 }
 0x4bd   :  { %v3006_v7 = vrot.slane %v2877_v28, %v5017_v10 }
 0x4bf   :  { %v2886_v44 = vpop.permute.xlu0 %2885  ;;  %v3007_v33 = vsel %vm2949_vm12, %v3006_v7, %v3002_v57 }
 0x4c0   :  { %v3020_v58 = vrot.slane %v2886_v44, %v5008_v54 }
 0x4c2   :  { %v3021_v25 = vsel %vm2942_vm11, %v3020_v58, %v3016_v42 }
 0x4c3   :  { %v4999_v32 = vpop.permute.xlu1 %2891 }
 0x4c4   :  { %v3030_v46 = vrot.slane %v4999_v32, %v5598_v37 }
 0x4c6   :  { %v2895_v62 = vpop.permute.xlu0 %2894 }
 0x4c7   :  { %v3034_v11 = vrot.slane %v2895_v62, %v5004_v12 }
 0x4c9   :  { %v3035_v44 = vsel %vm2935_vm10, %v3034_v11, %v3030_v46 }
 0x4ca   :  { %v5010_v6 = vpop.permute.xlu1 %2888  ;;  %v5012_v23 = vpop.permute.xlu0 %2897 }
 0x4cb   :  { %v3025_v34 = vrot.slane %v5010_v6, %v5017_v10  ;;  %v3039_v55 = vrot.slane %v5012_v23, %v5008_v54 }
 0x4cd   :  { %v3026_v62 = vsel %vm2949_vm12, %v3025_v34, %v3021_v25  ;;  %v3040_v13 = vsel %vm2942_vm11, %v3039_v55, %v3035_v44 }
 0x4ce   :  { %v2904_v48 = vpop.permute.xlu1 %2903  ;;  %v2907_v61 = vpop.permute.xlu0 %2906 }
 0x4cf   :  { %v3053_v26 = vrot.slane %v2907_v61, %v5004_v12  ;;  %v3049_v0 = vrot.slane %v2904_v48, %v5598_v37 }
 0x4d2   :  { %v2901_v39 = vpop.permute.xlu1 %2900  ;;  %v2910_v40 = vpop.permute.xlu0 %2909 }
 0x4d3   :  { %v3044_v30 = vrot.slane %v2901_v39, %v5017_v10  ;;  %v3058_v5 = vrot.slane %v2910_v40, %v5008_v54 }
 0x4d5   :  { %v3045_v6 = vsel %vm2949_vm12, %v3044_v30, %v3040_v13 }
 0x4d6   :  { %v2916_v19 = vpop.permute.xlu1 %2915  ;;  %v2919_v29 = vpop.permute.xlu0 %2918 }
 0x4d7   :  { %v3072_v15 = vrot.slane %v2919_v29, %v5004_v12  ;;  %v3068_v32 = vrot.slane %v2916_v19, %v5598_v37  ;;  %v3054_v12 = vsel %vm2935_vm10, %v3053_v26, %v3049_v0  ;;  %v3086_v37 = vsel %vm353_vm4, %v3007_v33, %v3085_v9 }
 0x4d8   :  { %v3059_v23 = vsel %vm2942_vm11, %v3058_v5, %v3054_v12  ;;  %v3087_v48 = vsel %vm355_vm5, %v3026_v62, %v3086_v37 }
 0x4d9   :  { %v3073_v21 = vsel %vm2935_vm10, %v3072_v15, %v3068_v32  ;;  %v3088_v3 = vsel %vm357_vm6, %v3045_v6, %v3087_v48 }
 0x4da   :  { %v2913_v16 = vpop.permute.xlu1 %2912  ;;  %v2922_v28 = vpop.permute.xlu0 %2921 }
 0x4db   :  { %v3063_v27 = vrot.slane %v2913_v16, %v5017_v10  ;;  %v3077_v51 = vrot.slane %v2922_v28, %v5008_v54 }
 0x4dd   :  { %v3064_v54 = vsel %vm2949_vm12, %v3063_v27, %v3059_v23  ;;  %v3078_v59 = vsel %vm2942_vm11, %v3077_v51, %v3073_v21 }
 0x4de   :  { %v2925_v35 = vpop.permute.xlu1 %2924  ;;  %v3089_v53 = vsel %vm359_vm7, %v3064_v54, %v3088_v3 }
 0x4df   :  { %v3082_v61 = vrot.slane %v2925_v35, %v5017_v10 }
 0x4e1   :  { %v3083_v4 = vsel %vm2949_vm12, %v3082_v61, %v3078_v59 }
 0x4e2   :  { %v3090_v63 = vsel %vm361_vm8, %v3083_v4, %v3089_v53 }
 0x4e3   :  { %3092 = vst.msk [vmem:[#allocation2] sm:$0xff] %vm38_vm0, %v3090_v63 }
 0x4e4   :  { %3219 = shalt.err (!%p3216_p4)
}
 0x4e5   :  { %s3220_s7 = scalar_lea.hbm %s5101_s4, 128 }
 0x4e6   :  { %p3221_p5 = scmp.ne.s32.totalorder %s5101_s4, %s3220_s7  ;;  %p3224_p6 = scmp.lt.u32.totalorder %s3220_s7, %s5101_s4 }
 0x4e8   :  { %p3226_p7 = pnand %p3224_p6, %p3221_p5 }
 0x4ea   :  { %3229 = shalt.err (!%p3226_p7)
}
 0x4eb   :  { %3102 = dma.vmem_to_hbm [thread:$0]  %s3100_s29, 128, %s5101_s4, [#allocation3]  }
 0x4ec   :  { %3230 = dma.done.wait [#allocation3], 128  }
 0x4ed   :  { %3231 = vsyncadd [#allocation3], 4294967168 }
 0x4ee   :  { %3106 = vsyncpa [#allocation3], 1 }

// kernel: tpu_custom_call.1
= control target key start
LH: loop header
LB: loop body
LE: loop exit
PB: predicated region body
PF: predicated region fallthrough
CT: control target
= control target key end

     0   :  { %v5102_v1 = vlaneseq  ;;  %vm38_vm0 = vcmask 261120   ;;  %s5097_s0 = inlined_call_operand.vmem [shape: f32[8,16], index: 0, kind: input, shape index: {}]   ;;  %s5098_s1 = inlined_call_operand.vmem [shape: f32[64,32], index: 1, kind: input, shape index: {}]   ;;  %s5099_s2 = inlined_call_operand.vmem [shape: f32[32,16], index: 2, kind: input, shape index: {}]   ;;  %s5100_s3 = inlined_call_operand.vmem [shape: f32[1,16], index: 3, kind: input, shape index: {}]   ;;  %s5101_s4 = inlined_call_operand.hbm [shape: f32[8,32], index: 4, kind: output, shape index: {}]  }
   0x1   :  { %v3263_v0 = vld [vmem:[%s5098_s1] sm:$0xff]  ;;  %v28_v3 = vld [vmem:[%s5099_s2 + $0x8] sm:$0xff]  ;;  %v29_v5 = vld [vmem:[%s5099_s2 + $0x10] sm:$0xff] }
   0x2   :  { %v27_v2 = vld [vmem:[%s5099_s2] sm:$0xff]  ;;  %v30_v6 = vld [vmem:[%s5099_s2 + $0x18] sm:$0xff]  ;;  %3136 = vmatprep.mubr.msk.f32.mxu0 %vm38_vm0, %v3263_v0  ;;  %v3280_v7 = vshrl.u32 %v5102_v1, 7  ;;  %v3290_v10 = vld [vmem:[%s5098_s1 + $0x10] sm:$0xff] }
   0x3   :  { %v3148_v4 = vpack.c.bf16 %v28_v3, %v27_v2  ;;  %v3152_v8 = vpack.c.bf16 %v30_v6, %v29_v5  ;;  %v3285_v9 = vld [vmem:[%s5098_s1 + $0x20] sm:$0xff] }
   0x4   :  { %5126 = vst [vmem:[#allocation5_spill] sm:$0xff] %v3280_v7  ;;  %v3293_v11 = vsub.s32 0, %v3280_v7 }
   0x5   :  { %3149 = vmatprep.subr.bf16.mxu0 %v3148_v4  ;;  %3156 = vmatprep.subr.bf16.mxu1 %v3148_v4 }
   0x6   :  { %3151 = vmatpush3.bf16.msra.mxu0 %v3148_v4  ;;  %3158 = vmatpush3.bf16.msra.mxu1 %v3148_v4 }
   0x7   :  { %9 = vsyncpa [#allocation3], 0  ;;  %3153 = vmatprep.subr.bf16.mxu0 %v3152_v8  ;;  %3157 = vmatprep.subr.bf16.mxu1 %v3152_v8  ;;  %v593_v12 = vrot.slane %v3263_v0, %v3293_v11  ;;  %v631_v13 = vrot.slane %v3290_v10, %v3293_v11  ;;  %v3304_v14 = vld [vmem:[%s5098_s1 + $0x28] sm:$0xff]  ;;  %v3309_v15 = vld [vmem:[%s5098_s1 + $0x18] sm:$0xff]  ;;  %v669_v20 = vrot.slane %v3285_v9, %v3293_v11  ;;  %v3351_v25 = vsub.s32 1, %v3280_v7 }
   0x8   :  { %3142 = vmatprep.mubr.msk.f32.mxu1 %vm38_vm0, %v3285_v9  ;;  %v3314_v16 = vld [vmem:[%s5098_s1 + $0x8] sm:$0xff]  ;;  %v3319_v17 = vld [vmem:[%s5098_s1 + $0x30] sm:$0xff]  ;;  %v650_v18 = vrot.slane %v3309_v15, %v3293_v11  ;;  %v3334_v19 = vld [vmem:[%s5098_s1 + $0x38] sm:$0xff]  ;;  %v688_v22 = vrot.slane %v3304_v14, %v3293_v11  ;;  %v3370_v34 = vsub.s32 2, %v3280_v7  ;;  %v3437_v5 = vsub.s32 3, %v3280_v7 }
   0x9   :  { %595 = vbcast.lane.b32.xlu0 %v593_v12, 256  ;;  %633 = vbcast.lane.b32.xlu1 %v631_v13, 256  ;;  %v612_v21 = vrot.slane %v3314_v16, %v3293_v11  ;;  %v707_v23 = vrot.slane %v3319_v17, %v3293_v11  ;;  %v726_v24 = vrot.slane %v3334_v19, %v3293_v11  ;;  %vm274_vm1 = vcmask 130048  }
   0xa   :  { %3155 = vmatpush3.bf16.msra.mxu0 %v3152_v8  ;;  %3159 = vmatpush3.bf16.msra.mxu1 %v3152_v8  ;;  %v873_v26 = vrot.slane %v3263_v0, %v3351_v25  ;;  %v892_v27 = vrot.slane %v3314_v16, %v3351_v25  ;;  %v911_v28 = vrot.slane %v3290_v10, %v3351_v25  ;;  %vm349_vm2 = vcmask 1041409  }
   0xb   :  { %v930_v29 = vrot.slane %v3309_v15, %v3351_v25  ;;  %v949_v30 = vrot.slane %v3285_v9, %v3351_v25  ;;  %v968_v31 = vrot.slane %v3304_v14, %v3351_v25  ;;  %v987_v32 = vrot.slane %v3319_v17, %v3351_v25 }
   0xc   :  { %v1006_v33 = vrot.slane %v3334_v19, %v3351_v25  ;;  %v1153_v35 = vrot.slane %v3263_v0, %v3370_v34  ;;  %v1172_v37 = vrot.slane %v3314_v16, %v3370_v34  ;;  %v1191_v42 = vrot.slane %v3290_v10, %v3370_v34 }
   0xd   :  { %3137 = vmatmul.mubr.msk.f32.vlgmr.msra.gmra.mrb[0].mxu0 %vm38_vm0, %v3314_v16  ;;  %599 = vbcast.lane.b32.xlu0 %v593_v12, 264  ;;  %v1210_v47 = vrot.slane %v3309_v15, %v3370_v34  ;;  %v1229_v51 = vrot.slane %v3285_v9, %v3370_v34  ;;  %v1248_v56 = vrot.slane %v3304_v14, %v3370_v34  ;;  %vm351_vm3 = vcmask 1042434  }
   0xe   :  { %3143 = vmatmul.mubr.msk.f32.vlgmr.msra.gmra.mrb[0].mxu1 %vm38_vm0, %v3304_v14  ;;  %3139 = vmatprep.mubr.msk.f32.mxu0 %vm38_vm0, %v3290_v10  ;;  %v1267_v60 = vrot.slane %v3319_v17, %v3370_v34  ;;  %v1286_v2 = vrot.slane %v3334_v19, %v3370_v34  ;;  %vm353_vm4 = vcmask 1043459   ;;  %vm355_vm5 = vcmask 1044484  }
   0xf   :  { %3145 = vmatprep.mubr.msk.f32.mxu1 %vm38_vm0, %v3319_v17  ;;  %656 = vbcast.lane.b32.xlu1 %v650_v18, 264  ;;  %vm357_vm6 = vcmask 1045509   ;;  %vm359_vm7 = vcmask 1046534   ;;  %vm361_vm8 = vcmask 1047559   ;;  %vm364_vm9 = vcmask 64512  }
  0x10   :  { %vm2935_vm10 = vcmask 130112   ;;  %vm2942_vm11 = vcmask 195712   ;;  %vm2949_vm12 = vcmask 261312  }
  0x11   :  { %3140 = vmatmul.mubr.msk.f32.gmra.mrb[2].mxu0 %vm38_vm0, %v3309_v15  ;;  %603 = vbcast.lane.b32.xlu0 %v593_v12, 272 }
  0x12   :  { %3146 = vmatmul.mubr.msk.f32.gmra.mrb[2].mxu1 %vm38_vm0, %v3334_v19 }
  0x13   :  { %664 = vbcast.lane.b32.xlu1 %v650_v18, 280 }
  0x15   :  { %607 = vbcast.lane.b32.xlu0 %v593_v12, 280  ;;  %v1433_v12 = vrot.slane %v3263_v0, %v3437_v5 }
  0x17   :  { %675 = vbcast.lane.b32.xlu1 %v669_v20, 264 }
  0x19   :  { %614 = vbcast.lane.b32.xlu0 %v612_v21, 256 }
  0x1b   :  { %683 = vbcast.lane.b32.xlu1 %v669_v20, 280 }
  0x1d   :  { %618 = vbcast.lane.b32.xlu0 %v612_v21, 264 }
  0x1f   :  { %694 = vbcast.lane.b32.xlu1 %v688_v22, 264 }
  0x21   :  { %622 = vbcast.lane.b32.xlu0 %v612_v21, 272 }
  0x23   :  { %702 = vbcast.lane.b32.xlu1 %v688_v22, 280 }
  0x25   :  { %626 = vbcast.lane.b32.xlu0 %v612_v21, 280  ;;  %v1452_v21 = vrot.slane %v3314_v16, %v3437_v5 }
  0x27   :  { %713 = vbcast.lane.b32.xlu1 %v707_v23, 264 }
  0x29   :  { %637 = vbcast.lane.b32.xlu0 %v631_v13, 264 }
  0x2b   :  { %721 = vbcast.lane.b32.xlu1 %v707_v23, 280 }
  0x2d   :  { %641 = vbcast.lane.b32.xlu0 %v631_v13, 272 }
  0x2f   :  { %732 = vbcast.lane.b32.xlu1 %v726_v24, 264 }
  0x31   :  { %645 = vbcast.lane.b32.xlu0 %v631_v13, 280 }
  0x33   :  { %740 = vbcast.lane.b32.xlu1 %v726_v24, 280 }
  0x35   :  { %652 = vbcast.lane.b32.xlu0 %v650_v18, 256 }
  0x37   :  { %879 = vbcast.lane.b32.xlu1 %v873_v26, 264 }
  0x39   :  { %660 = vbcast.lane.b32.xlu0 %v650_v18, 272 }
  0x3b   :  { %887 = vbcast.lane.b32.xlu1 %v873_v26, 280 }
  0x3d   :  { %671 = vbcast.lane.b32.xlu0 %v669_v20, 256 }
  0x3f   :  { %898 = vbcast.lane.b32.xlu1 %v892_v27, 264 }
  0x41   :  { %679 = vbcast.lane.b32.xlu0 %v669_v20, 272 }
  0x43   :  { %906 = vbcast.lane.b32.xlu1 %v892_v27, 280 }
  0x45   :  { %690 = vbcast.lane.b32.xlu0 %v688_v22, 256 }
  0x47   :  { %917 = vbcast.lane.b32.xlu1 %v911_v28, 264 }
  0x49   :  { %698 = vbcast.lane.b32.xlu0 %v688_v22, 272 }
  0x4b   :  { %925 = vbcast.lane.b32.xlu1 %v911_v28, 280 }
  0x4d   :  { %709 = vbcast.lane.b32.xlu0 %v707_v23, 256 }
  0x4f   :  { %936 = vbcast.lane.b32.xlu1 %v930_v29, 264 }
  0x51   :  { %717 = vbcast.lane.b32.xlu0 %v707_v23, 272 }
  0x53   :  { %944 = vbcast.lane.b32.xlu1 %v930_v29, 280 }
  0x55   :  { %728 = vbcast.lane.b32.xlu0 %v726_v24, 256 }
  0x57   :  { %955 = vbcast.lane.b32.xlu1 %v949_v30, 264 }
  0x59   :  { %736 = vbcast.lane.b32.xlu0 %v726_v24, 272 }
  0x5b   :  { %963 = vbcast.lane.b32.xlu1 %v949_v30, 280 }
  0x5d   :  { %875 = vbcast.lane.b32.xlu0 %v873_v26, 256 }
  0x5f   :  { %974 = vbcast.lane.b32.xlu1 %v968_v31, 264 }
  0x61   :  { %883 = vbcast.lane.b32.xlu0 %v873_v26, 272 }
  0x63   :  { %982 = vbcast.lane.b32.xlu1 %v968_v31, 280 }
  0x65   :  { %894 = vbcast.lane.b32.xlu0 %v892_v27, 256 }
  0x67   :  { %993 = vbcast.lane.b32.xlu1 %v987_v32, 264 }
  0x69   :  { %902 = vbcast.lane.b32.xlu0 %v892_v27, 272  ;;  %v3463_v27 = vrot.slane %v3290_v10, %v3437_v5 }
  0x6b   :  { %1001 = vbcast.lane.b32.xlu1 %v987_v32, 280 }
  0x6d   :  { %913 = vbcast.lane.b32.xlu0 %v911_v28, 256 }
  0x6f   :  { %1012 = vbcast.lane.b32.xlu1 %v1006_v33, 264 }
  0x71   :  { %921 = vbcast.lane.b32.xlu0 %v911_v28, 272 }
  0x73   :  { %1020 = vbcast.lane.b32.xlu1 %v1006_v33, 280 }
  0x75   :  { %932 = vbcast.lane.b32.xlu0 %v930_v29, 256 }
  0x77   :  { %1159 = vbcast.lane.b32.xlu1 %v1153_v35, 264 }
  0x79   :  { %940 = vbcast.lane.b32.xlu0 %v930_v29, 272 }
  0x7b   :  { %v3374_v36 = vpop.permute.xlu0 %595  ;;  %1167 = vbcast.lane.b32.xlu1 %v1153_v35, 280  ;;  %v3378_v38 = vpop.permute.xlu1 %633 }
  0x7c   :  { %5127 = vst [vmem:[#allocation6_spill] sm:$0xff] %v3374_v36  ;;  %5128 = vst [vmem:[#allocation7_spill] sm:$0xff] %v3378_v38 }
  0x7d   :  { %951 = vbcast.lane.b32.xlu0 %v949_v30, 256 }
  0x7f   :  { %v3380_v39 = vpop.permute.xlu0 %599  ;;  %1178 = vbcast.lane.b32.xlu1 %v1172_v37, 264 }
  0x80   :  { %5129 = vst [vmem:[#allocation8_spill] sm:$0xff] %v3380_v39 }
  0x81   :  { %959 = vbcast.lane.b32.xlu0 %v949_v30, 272  ;;  %v3382_v40 = vpop.permute.xlu1 %656 }
  0x82   :  { %5130 = vst [vmem:[#allocation9_spill] sm:$0xff] %v3382_v40 }
  0x83   :  { %v3384_v41 = vpop.permute.xlu0 %603  ;;  %1186 = vbcast.lane.b32.xlu1 %v1172_v37, 280 }
  0x84   :  { %5131 = vst [vmem:[#allocation10_spill] sm:$0xff] %v3384_v41 }
  0x85   :  { %970 = vbcast.lane.b32.xlu0 %v968_v31, 256  ;;  %v3388_v43 = vpop.permute.xlu1 %664 }
  0x86   :  { %5132 = vst [vmem:[#allocation11_spill] sm:$0xff] %v3388_v43 }
  0x87   :  { %v3390_v44 = vpop.permute.xlu0 %607  ;;  %1197 = vbcast.lane.b32.xlu1 %v1191_v42, 264 }
  0x88   :  { %5133 = vst [vmem:[#allocation12_spill] sm:$0xff] %v3390_v44 }
  0x89   :  { %978 = vbcast.lane.b32.xlu0 %v968_v31, 272  ;;  %v3392_v45 = vpop.permute.xlu1 %675 }
  0x8a   :  { %5134 = vst [vmem:[#allocation13_spill] sm:$0xff] %v3392_v45 }
  0x8b   :  { %v3394_v46 = vpop.permute.xlu0 %614  ;;  %1205 = vbcast.lane.b32.xlu1 %v1191_v42, 280 }
  0x8c   :  { %5135 = vst [vmem:[#allocation14_spill] sm:$0xff] %v3394_v46 }
  0x8d   :  { %989 = vbcast.lane.b32.xlu0 %v987_v32, 256  ;;  %v3398_v48 = vpop.permute.xlu1 %683 }
  0x8e   :  { %5136 = vst [vmem:[#allocation15_spill] sm:$0xff] %v3398_v48 }
  0x8f   :  { %v3400_v49 = vpop.permute.xlu0 %618  ;;  %1216 = vbcast.lane.b32.xlu1 %v1210_v47, 264 }
  0x90   :  { %5137 = vst [vmem:[#allocation16_spill] sm:$0xff] %v3400_v49 }
  0x91   :  { %997 = vbcast.lane.b32.xlu0 %v987_v32, 272  ;;  %v3406_v52 = vpop.permute.xlu1 %694 }
  0x92   :  { %5139 = vst [vmem:[#allocation18_spill] sm:$0xff] %v3406_v52 }
  0x93   :  { %v3402_v50 = vpop.permute.xlu0 %622  ;;  %1224 = vbcast.lane.b32.xlu1 %v1210_v47, 280 }
  0x94   :  { %5138 = vst [vmem:[#allocation17_spill] sm:$0xff] %v3402_v50 }
  0x95   :  { %1008 = vbcast.lane.b32.xlu0 %v1006_v33, 256  ;;  %v3410_v54 = vpop.permute.xlu1 %702 }
  0x97   :  { %v3408_v53 = vpop.permute.xlu0 %626  ;;  %1235 = vbcast.lane.b32.xlu1 %v1229_v51, 264 }
  0x98   :  { %5140 = vst [vmem:[#allocation19_spill] sm:$0xff] %v3408_v53 }
  0x99   :  { %1016 = vbcast.lane.b32.xlu0 %v1006_v33, 272  ;;  %v3418_v58 = vpop.permute.xlu1 %713  ;;  %v3232_v33 = vmov 1966171168  }
  0x9b   :  { %v3412_v55 = vpop.permute.xlu0 %637  ;;  %1243 = vbcast.lane.b32.xlu1 %v1229_v51, 280 }
  0x9c   :  { %5141 = vst [vmem:[#allocation20_spill] sm:$0xff] %v3412_v55 }
  0x9d   :  { %1155 = vbcast.lane.b32.xlu0 %v1153_v35, 256  ;;  %v3424_v61 = vpop.permute.xlu1 %721 }
  0x9e   :  { %5144 = vst [vmem:[#allocation23_spill] sm:$0xff] %v3424_v61 }
  0x9f   :  { %v3416_v57 = vpop.permute.xlu0 %641  ;;  %1254 = vbcast.lane.b32.xlu1 %v1248_v56, 264 }
  0xa0   :  { %5142 = vst [vmem:[#allocation21_spill] sm:$0xff] %v3416_v57 }
  0xa1   :  { %1163 = vbcast.lane.b32.xlu0 %v1153_v35, 272  ;;  %v3432_v3 = vpop.permute.xlu1 %732  ;;  %v179_v35 = vunpack.c.l.s4 %v3232_v33 }
  0xa2   :  { %5147 = vst [vmem:[#allocation26_spill] sm:$0xff] %v3432_v3 }
  0xa3   :  { %v3420_v59 = vpop.permute.xlu0 %645  ;;  %1262 = vbcast.lane.b32.xlu1 %v1248_v56, 280 }
  0xa4   :  { %5143 = vst [vmem:[#allocation22_spill] sm:$0xff] %v3420_v59 }
  0xa5   :  { %1174 = vbcast.lane.b32.xlu0 %v1172_v37, 256  ;;  %v3439_v6 = vpop.permute.xlu1 %740 }
  0xa6   :  { %5149 = vst [vmem:[#allocation28_spill] sm:$0xff] %v3439_v6 }
  0xa7   :  { %v3426_v62 = vpop.permute.xlu0 %652  ;;  %1273 = vbcast.lane.b32.xlu1 %v1267_v60, 264 }
  0xa8   :  { %5145 = vst [vmem:[#allocation24_spill] sm:$0xff] %v3426_v62 }
  0xa9   :  { %1182 = vbcast.lane.b32.xlu0 %v1172_v37, 272  ;;  %v3447_v18 = vpop.permute.xlu1 %879 }
  0xaa   :  { %5152 = vst [vmem:[#allocation31_spill] sm:$0xff] %v3447_v18  ;;  %v3963_v18 = vld [vmem:[%s5098_s1 + $0x30] sm:$0xff] }
  0xab   :  { %v3428_v63 = vpop.permute.xlu0 %660  ;;  %1281 = vbcast.lane.b32.xlu1 %v1267_v60, 280 }
  0xac   :  { %5146 = vst [vmem:[#allocation25_spill] sm:$0xff] %v3428_v63 }
  0xad   :  { %1193 = vbcast.lane.b32.xlu0 %v1191_v42, 256  ;;  %v3453_v22 = vpop.permute.xlu1 %887 }
  0xae   :  { %5153 = vst [vmem:[#allocation32_spill] sm:$0xff] %v3453_v22 }
  0xaf   :  { %v3434_v4 = vpop.permute.xlu0 %671  ;;  %1292 = vbcast.lane.b32.xlu1 %v1286_v2, 264 }
  0xb0   :  { %5148 = vst [vmem:[#allocation27_spill] sm:$0xff] %v3434_v4 }
  0xb1   :  { %1201 = vbcast.lane.b32.xlu0 %v1191_v42, 272  ;;  %v3459_v26 = vpop.permute.xlu1 %898 }
  0xb2   :  { %5154 = vst [vmem:[#allocation33_spill] sm:$0xff] %v3459_v26 }
  0xb3   :  { %v3441_v8 = vpop.permute.xlu0 %679  ;;  %1300 = vbcast.lane.b32.xlu1 %v1286_v2, 280 }
  0xb4   :  { %5150 = vst [vmem:[#allocation29_spill] sm:$0xff] %v3441_v8 }
  0xb5   :  { %1212 = vbcast.lane.b32.xlu0 %v1210_v47, 256  ;;  %v3468_v29 = vpop.permute.xlu1 %906 }
  0xb6   :  { %5156 = vst [vmem:[#allocation35_spill] sm:$0xff] %v3468_v29 }
  0xb7   :  { %v3445_v13 = vpop.permute.xlu0 %690  ;;  %1439 = vbcast.lane.b32.xlu1 %v1433_v12, 264 }
  0xb8   :  { %5151 = vst [vmem:[#allocation30_spill] sm:$0xff] %v3445_v13 }
  0xb9   :  { %1220 = vbcast.lane.b32.xlu0 %v1210_v47, 272  ;;  %v3474_v32 = vpop.permute.xlu1 %917  ;;  %v180_v47 = vunpack.c.0.s8 %v179_v35  ;;  %v3496_v35 = vld [vmem:[%s5100_s3] ss:$0 sm:$0xff] }
  0xba   :  { %5159 = vst [vmem:[#allocation38_spill] sm:$0xff] %v3474_v32 }
  0xbb   :  { %v3449_v20 = vpop.permute.xlu0 %698  ;;  %1447 = vbcast.lane.b32.xlu1 %v1433_v12, 280  ;;  %v3486_v6 = vsub.s32 %v180_v47, %v3280_v7 }
  0xbd   :  { %1231 = vbcast.lane.b32.xlu0 %v1229_v51, 256  ;;  %v3478_v42 = vpop.permute.xlu1 %925 }
  0xbe   :  { %5161 = vst [vmem:[#allocation40_spill] sm:$0xff] %v3478_v42 }
  0xbf   :  { %v3455_v23 = vpop.permute.xlu0 %709  ;;  %1458 = vbcast.lane.b32.xlu1 %v1452_v21, 264 }
  0xc1   :  { %1239 = vbcast.lane.b32.xlu0 %v1229_v51, 272  ;;  %v3490_v33 = vpop.permute.xlu1 %936 }
  0xc2   :  { %5164 = vst [vmem:[#allocation43_spill] sm:$0xff] %v3490_v33 }
  0xc3   :  { %v3457_v24 = vpop.permute.xlu0 %717  ;;  %1466 = vbcast.lane.b32.xlu1 %v1452_v21, 280 }
  0xc5   :  { %1250 = vbcast.lane.b32.xlu0 %v1248_v56, 256  ;;  %v3504_v45 = vpop.permute.xlu1 %944 }
  0xc6   :  { %5166 = vst [vmem:[#allocation45_spill] sm:$0xff] %v3504_v45 }
  0xc7   :  { %v3465_v28 = vpop.permute.xlu0 %728  ;;  %1477 = vbcast.lane.b32.xlu1 %v3463_v27, 264 }
  0xc8   :  { %5155 = vst [vmem:[#allocation34_spill] sm:$0xff] %v3465_v28 }
  0xc9   :  { %1258 = vbcast.lane.b32.xlu0 %v1248_v56, 272  ;;  %v26_v56 = vld [vmem:[%s5097_s0] sm:$0xff] }
  0xca   :  { %v177_v1 = vcombine.high %v26_v56, %v26_v56  ;;  %v184_v48 = vrot.slane %v26_v56, %v3486_v6 }
  0xcb   :  { %v3470_v30 = vpop.permute.xlu0 %736 }
  0xcc   :  { %5157 = vst [vmem:[#allocation36_spill] sm:$0xff] %v3470_v30  ;;  %v3499_v52 = vrot.slane %v177_v1, %v3486_v6  ;;  %v192_v56 = vcombine.high %v184_v48, %v184_v48 }
  0xcd   :  { %1269 = vbcast.lane.b32.xlu0 %v1267_v60, 256 }
  0xce   :  { %v193_v30 = vcombine.high %v3499_v52, %v3499_v52  ;;  %v214_v45 = vrot.slane %v192_v56, %v3486_v6 }
  0xcf   :  { %v3472_v31 = vpop.permute.xlu0 %875 }
  0xd0   :  { %5158 = vst [vmem:[#allocation37_spill] sm:$0xff] %v3472_v31  ;;  %v221_v42 = vrot.slane %v193_v30, %v3486_v6 }
  0xd1   :  { %1277 = vbcast.lane.b32.xlu0 %v1267_v60, 272 }
  0xd3   :  { %v3476_v37 = vpop.permute.xlu0 %883 }
  0xd4   :  { %5160 = vst [vmem:[#allocation39_spill] sm:$0xff] %v3476_v37 }
  0xd5   :  { %1288 = vbcast.lane.b32.xlu0 %v1286_v2, 256 }
  0xd7   :  { %v3480_v51 = vpop.permute.xlu0 %894 }
  0xd8   :  { %5162 = vst [vmem:[#allocation41_spill] sm:$0xff] %v3480_v51 }
  0xd9   :  { %1296 = vbcast.lane.b32.xlu0 %v1286_v2, 272 }
  0xdb   :  { %v3488_v60 = vpop.permute.xlu0 %902 }
  0xdc   :  { %5163 = vst [vmem:[#allocation42_spill] sm:$0xff] %v3488_v60 }
  0xdd   :  { %1435 = vbcast.lane.b32.xlu0 %v1433_v12, 256 }
  0xdf   :  { %v3501_v2 = vpop.permute.xlu0 %913 }
  0xe0   :  { %5165 = vst [vmem:[#allocation44_spill] sm:$0xff] %v3501_v2  ;;  %v3138_v13 = vpop.f32.mrb[0].mxu0  ;;  %v225_v2 = vcombine.high %v221_v42, %v221_v42 }
  0xe1   :  { %v3144_v47 = vpop.f32.mrb[0].mxu1  ;;  %v129_v8 = vpop.f32.mrb[1].mxu0  ;;  %1443 = vbcast.lane.b32.xlu0 %v1433_v12, 272 }
  0xe2   :  { %v155_v43 = vadd.f32 %v3144_v47, %v3496_v35  ;;  %v149_v4 = vpop.f32.mrb[1].mxu1 }
  0xe3   :  { %v3508_v63 = vpop.permute.xlu0 %921 }
  0xe4   :  { %5167 = vst [vmem:[#allocation46_spill] sm:$0xff] %v3508_v63  ;;  %3166 = vtanh.f32 %v155_v43  ;;  %v3141_v1 = vpop.f32.mrb[2].mxu0  ;;  %v3517_v63 = vpop.permute.xlu1 %955  ;;  %v224_v43 = vcombine.high %v214_v45, %v214_v45 }
  0xe5   :  { %v145_v62 = vadd.f32 %v3141_v1, %v3496_v35  ;;  %v3147_v33 = vpop.f32.mrb[2].mxu1  ;;  %v139_v40 = vpop.f32.mrb[3].mxu0  ;;  %1454 = vbcast.lane.b32.xlu0 %v1452_v21, 256  ;;  %5169 = vst [vmem:[#allocation48_spill] sm:$0xff] %v3517_v63  ;;  %v249_v1 = vrot.slane %v221_v42, %v3293_v11 }
  0xe6   :  { %v165_v12 = vadd.f32 %v3147_v33, %v3496_v35  ;;  %v140_v47 = vadd.f32 %v3496_v35, %v139_v40  ;;  %v159_v57 = vpop.f32.mrb[3].mxu1  ;;  %v200_v40 = vrot.slane %v184_v48, %v3486_v6  ;;  %v241_v30 = vrot.slane %v224_v43, %v3293_v11 }
  0xe7   :  { %3168 = vtanh.f32 %v145_v62  ;;  %v3515_v59 = vpop.permute.xlu0 %932 }
  0xe8   :  { %5168 = vst [vmem:[#allocation47_spill] sm:$0xff] %v3515_v59  ;;  %3170 = vtanh.f32 %v165_v12  ;;  %v3524_v62 = vpop.permute.xlu1 %963  ;;  %v222_v12 = vcombine.high %v200_v40, %v200_v40 }
  0xe9   :  { %1462 = vbcast.lane.b32.xlu0 %v1452_v21, 272  ;;  %3172 = vtanh.f32 %v140_v47  ;;  %5171 = vst [vmem:[#allocation50_spill] sm:$0xff] %v3524_v62  ;;  %v257_v21 = vrot.slane %v225_v2, %v3293_v11  ;;  %v135_v2 = vadd.f32 %v3138_v13, %v3496_v35 }
  0xea   :  { %v237_v32 = vrot.slane %v222_v12, %v3293_v11 }
  0xeb   :  { %v3520_v33 = vpop.permute.xlu0 %940  ;;  %3174 = vtanh.f32 %v135_v2 }
  0xec   :  { %5170 = vst [vmem:[#allocation49_spill] sm:$0xff] %v3520_v33  ;;  %v3534_v60 = vpop.permute.xlu1 %974 }
  0xed   :  { %1473 = vbcast.lane.b32.xlu0 %v3463_v27, 256  ;;  %5174 = vst [vmem:[#allocation53_spill] sm:$0xff] %v3534_v60  ;;  %v3606_v60 = vsub.s32 4, %v3280_v7 }
  0xee   :  { %v3167_v38 = vpop.eup %3166 }
  0xef   :  { %v271_v56 = vmul.f32 %v3167_v38, %v249_v1  ;;  %v3528_v47 = vpop.permute.xlu0 %951 }
  0xf0   :  { %5172 = vst [vmem:[#allocation51_spill] sm:$0xff] %v3528_v47 }
  0xf1   :  { %v3169_v63 = vpop.eup %3168  ;;  %v290_v42 = vsel %vm274_vm1, %v271_v56, 0.0 }
  0xf2   :  { %v3171_v33 = vpop.eup %3170  ;;  %291 = vadd.xlane.f32.xlu1 %v290_v42  ;;  %v269_v48 = vmul.f32 %v3169_v63, %v241_v30  ;;  %v3541_v63 = vpop.permute.xlu1 %982 }
  0xf3   :  { %v273_v59 = vmul.f32 %v3171_v33, %v257_v21  ;;  %v3173_v55 = vpop.eup %3172  ;;  %v3532_v62 = vpop.permute.xlu0 %959  ;;  %v130_v33 = vadd.f32 %v3496_v35, %v129_v8  ;;  %v150_v21 = vadd.f32 %v3496_v35, %v149_v4  ;;  %v207_v4 = vrot.slane %v3499_v52, %v3486_v6 }
  0xf4   :  { %5173 = vst [vmem:[#allocation52_spill] sm:$0xff] %v3532_v62  ;;  %v284_v38 = vsel %vm274_vm1, %v269_v48, 0.0  ;;  %v268_v1 = vmul.f32 %v3173_v55, %v237_v32  ;;  %v160_v55 = vadd.f32 %v3496_v35, %v159_v57  ;;  %v1490_v6 = vrot.slane %v3309_v15, %v3437_v5 }
  0xf5   :  { %v296_v43 = vsel %vm274_vm1, %v273_v59, 0.0  ;;  %3176 = vtanh.f32 %v130_v33  ;;  %v233_v59 = vrot.slane %v214_v45, %v3293_v11  ;;  %v3175_v32 = vpop.eup %3174  ;;  %v223_v57 = vcombine.high %v207_v4, %v207_v4 }
  0xf6   :  { %285 = vadd.xlane.f32.xlu1 %v284_v38  ;;  %v281_v30 = vsel %vm274_vm1, %v268_v1, 0.0  ;;  %v3548_v13 = vpop.permute.xlu1 %993  ;;  %3178 = vtanh.f32 %v150_v21  ;;  %v229_v38 = vrot.slane %v200_v40, %v3293_v11  ;;  %v245_v1 = vrot.slane %v207_v4, %v3293_v11 }
  0xf7   :  { %v3539_v56 = vpop.permute.xlu0 %970  ;;  %3180 = vtanh.f32 %v160_v55  ;;  %v267_v48 = vmul.f32 %v3175_v32, %v233_v59  ;;  %v253_v55 = vrot.slane %v223_v57, %v3293_v11 }
  0xf8   :  { %5175 = vst [vmem:[#allocation54_spill] sm:$0xff] %v3539_v56 }
  0xfa   :  { %297 = vadd.xlane.f32.xlu1 %v296_v43  ;;  %v3554_v8 = vpop.permute.xlu1 %1001  ;;  %v278_v43 = vsel %vm274_vm1, %v267_v48, 0.0 }
  0xfb   :  { %v3546_v12 = vpop.permute.xlu0 %978  ;;  %5176 = vst [vmem:[#allocation55_spill] sm:$0xff] %v3554_v8 }
  0xfe   :  { %282 = vadd.xlane.f32.xlu1 %v281_v30  ;;  %v3563_v33 = vpop.permute.xlu1 %1012 }
  0xff   :  { %v3552_v42 = vpop.permute.xlu0 %989  ;;  %v3177_v2 = vpop.eup %3176  ;;  %5177 = vst [vmem:[#allocation56_spill] sm:$0xff] %v3563_v33 }
 0x100   :  { %v3179_v35 = vpop.eup %3178  ;;  %v266_v30 = vmul.f32 %v3177_v2, %v229_v38 }
 0x101   :  { %v270_v21 = vmul.f32 %v3179_v35, %v245_v1  ;;  %v3181_v59 = vpop.eup %3180  ;;  %v1509_v1 = vrot.slane %v3285_v9, %v3437_v5 }
 0x102   :  { %v275_v52 = vsel %vm274_vm1, %v266_v30, 0.0  ;;  %v3572_v32 = vpop.permute.xlu1 %1020  ;;  %v272_v4 = vmul.f32 %v3181_v59, %v253_v55  ;;  %v1528_v30 = vrot.slane %v3304_v14, %v3437_v5  ;;  %v1547_v59 = vrot.slane %v3319_v17, %v3437_v5 }
 0x103   :  { %v3561_v45 = vpop.permute.xlu0 %997  ;;  %5179 = vst [vmem:[#allocation58_spill] sm:$0xff] %v3572_v32  ;;  %v287_v48 = vsel %vm274_vm1, %v270_v21, 0.0  ;;  %v1566_v32 = vrot.slane %v3334_v19, %v3437_v5 }
 0x104   :  { %v293_v38 = vsel %vm274_vm1, %v272_v4, 0.0 }
 0x107   :  { %v3570_v40 = vpop.permute.xlu0 %1008 }
 0x108   :  { %5178 = vst [vmem:[#allocation57_spill] sm:$0xff] %v3570_v40 }
 0x10b   :  { %v3576_v2 = vpop.permute.xlu0 %1016 }
 0x10c   :  { %279 = vadd.xlane.f32.xlu0 %v278_v43  ;;  %5180 = vst [vmem:[#allocation59_spill] sm:$0xff] %v3576_v2  ;;  %v3578_v43 = vpop.permute.xlu1 %1159 }
 0x10d   :  { %5181 = vst [vmem:[#allocation60_spill] sm:$0xff] %v3578_v43 }
 0x10f   :  { %1485 = vbcast.lane.b32.xlu1 %v3463_v27, 280  ;;  %v3582_v57 = vpop.permute.xlu0 %1155 }
 0x110   :  { %276 = vadd.xlane.f32.xlu0 %v275_v52  ;;  %5182 = vst [vmem:[#allocation61_spill] sm:$0xff] %v3582_v57  ;;  %v3584_v35 = vpop.permute.xlu1 %1167 }
 0x111   :  { %5183 = vst [vmem:[#allocation62_spill] sm:$0xff] %v3584_v35 }
 0x113   :  { %1496 = vbcast.lane.b32.xlu1 %v1490_v6, 264  ;;  %v3588_v21 = vpop.permute.xlu0 %1163 }
 0x114   :  { %288 = vadd.xlane.f32.xlu0 %v287_v48  ;;  %5184 = vst [vmem:[#allocation63_spill] sm:$0xff] %v3588_v21  ;;  %v3590_v55 = vpop.permute.xlu1 %1178 }
 0x115   :  { %5185 = vst [vmem:[#allocation64_spill] sm:$0xff] %v3590_v55 }
 0x117   :  { %1504 = vbcast.lane.b32.xlu1 %v1490_v6, 280  ;;  %v3594_v52 = vpop.permute.xlu0 %1174 }
 0x118   :  { %294 = vadd.xlane.f32.xlu0 %v293_v38  ;;  %5186 = vst [vmem:[#allocation65_spill] sm:$0xff] %v3594_v52  ;;  %v3596_v48 = vpop.permute.xlu1 %1186 }
 0x119   :  { %5187 = vst [vmem:[#allocation66_spill] sm:$0xff] %v3596_v48  ;;  %v1846_v48 = vrot.slane %v3334_v19, %v3606_v60 }
 0x11b   :  { %1515 = vbcast.lane.b32.xlu1 %v1509_v1, 264  ;;  %v3599_v4 = vpop.permute.xlu0 %1182 }
 0x11c   :  { %5188 = vst [vmem:[#allocation67_spill] sm:$0xff] %v3599_v4  ;;  %v3601_v38 = vpop.permute.xlu1 %1197 }
 0x11d   :  { %5189 = vst [vmem:[#allocation68_spill] sm:$0xff] %v3601_v38  ;;  %v1732_v38 = vrot.slane %v3314_v16, %v3606_v60 }
 0x11f   :  { %1523 = vbcast.lane.b32.xlu1 %v1509_v1, 280  ;;  %v3608_v56 = vpop.permute.xlu0 %1193 }
 0x120   :  { %5190 = vst [vmem:[#allocation69_spill] sm:$0xff] %v3608_v56  ;;  %v3610_v62 = vpop.permute.xlu1 %1205 }
 0x121   :  { %5191 = vst [vmem:[#allocation70_spill] sm:$0xff] %v3610_v62 }
 0x123   :  { %1534 = vbcast.lane.b32.xlu1 %v1528_v30, 264  ;;  %v3614_v2 = vpop.permute.xlu0 %1201 }
 0x124   :  { %5192 = vst [vmem:[#allocation71_spill] sm:$0xff] %v3614_v2  ;;  %v3616_v47 = vpop.permute.xlu1 %1216 }
 0x125   :  { %5193 = vst [vmem:[#allocation72_spill] sm:$0xff] %v3616_v47  ;;  %v1751_v47 = vrot.slane %v3290_v10, %v3606_v60 }
 0x127   :  { %1542 = vbcast.lane.b32.xlu1 %v1528_v30, 280  ;;  %v3620_v4 = vpop.permute.xlu0 %1212 }
 0x128   :  { %5194 = vst [vmem:[#allocation73_spill] sm:$0xff] %v3620_v4  ;;  %v3622_v56 = vpop.permute.xlu1 %1224 }
 0x129   :  { %5195 = vst [vmem:[#allocation74_spill] sm:$0xff] %v3622_v56  ;;  %v1770_v56 = vrot.slane %v3309_v15, %v3606_v60 }
 0x12b   :  { %1553 = vbcast.lane.b32.xlu1 %v1547_v59, 264 }
 0x12c   :  { %v3626_v62 = vpop.permute.xlu1 %1235 }
 0x12d   :  { %5197 = vst [vmem:[#allocation76_spill] sm:$0xff] %v3626_v62  ;;  %v1789_v62 = vrot.slane %v3285_v9, %v3606_v60 }
 0x12e   :  { %1481 = vbcast.lane.b32.xlu0 %v3463_v27, 272  ;;  %v1713_v27 = vrot.slane %v3263_v0, %v3606_v60 }
 0x12f   :  { %1561 = vbcast.lane.b32.xlu1 %v1547_v59, 280 }
 0x130   :  { %v3632_v2 = vpop.permute.xlu1 %1243 }
 0x131   :  { %5199 = vst [vmem:[#allocation78_spill] sm:$0xff] %v3632_v2 }
 0x132   :  { %1492 = vbcast.lane.b32.xlu0 %v1490_v6, 256 }
 0x133   :  { %1572 = vbcast.lane.b32.xlu1 %v1566_v32, 264 }
 0x136   :  { %1500 = vbcast.lane.b32.xlu0 %v1490_v6, 272  ;;  %v3624_v6 = vpop.permute.xlu0 %1220 }
 0x137   :  { %1580 = vbcast.lane.b32.xlu1 %v1566_v32, 280  ;;  %5196 = vst [vmem:[#allocation75_spill] sm:$0xff] %v3624_v6  ;;  %v3638_v6 = vpop.permute.xlu1 %1254 }
 0x138   :  { %5201 = vst [vmem:[#allocation80_spill] sm:$0xff] %v3638_v6  ;;  %v1808_v6 = vrot.slane %v3304_v14, %v3606_v60 }
 0x13a   :  { %1511 = vbcast.lane.b32.xlu0 %v1509_v1, 256 }
 0x13b   :  { %1719 = vbcast.lane.b32.xlu1 %v1713_v27, 264 }
 0x13e   :  { %1519 = vbcast.lane.b32.xlu0 %v1509_v1, 272  ;;  %v3630_v1 = vpop.permute.xlu0 %1231 }
 0x13f   :  { %1727 = vbcast.lane.b32.xlu1 %v1713_v27, 280  ;;  %5198 = vst [vmem:[#allocation77_spill] sm:$0xff] %v3630_v1  ;;  %v3644_v1 = vpop.permute.xlu1 %1262 }
 0x142   :  { %1530 = vbcast.lane.b32.xlu0 %v1528_v30, 256 }
 0x143   :  { %1738 = vbcast.lane.b32.xlu1 %v1732_v38, 264  ;;  %v3648_v2 = vpop.permute.xlu1 %1273 }
 0x146   :  { %1538 = vbcast.lane.b32.xlu0 %v1528_v30, 272  ;;  %v3636_v30 = vpop.permute.xlu0 %1239 }
 0x147   :  { %1746 = vbcast.lane.b32.xlu1 %v1732_v38, 280  ;;  %5200 = vst [vmem:[#allocation79_spill] sm:$0xff] %v3636_v30  ;;  %v3654_v30 = vpop.permute.xlu1 %1281 }
 0x148   :  { %5203 = vst [vmem:[#allocation82_spill] sm:$0xff] %v3654_v30 }
 0x14a   :  { %1549 = vbcast.lane.b32.xlu0 %v1547_v59, 256  ;;  %v3642_v4 = vpop.permute.xlu0 %1250 }
 0x14b   :  { %1757 = vbcast.lane.b32.xlu1 %v1751_v47, 264  ;;  %5202 = vst [vmem:[#allocation81_spill] sm:$0xff] %v3642_v4  ;;  %v1827_v4 = vrot.slane %v3319_v17, %v3606_v60  ;;  %v3660_v50 = vpop.permute.xlu1 %1292 }
 0x14c   :  { %5204 = vst [vmem:[#allocation83_spill] sm:$0xff] %v3660_v50 }
 0x14e   :  { %1557 = vbcast.lane.b32.xlu0 %v1547_v59, 272  ;;  %v3646_v59 = vpop.permute.xlu0 %1258 }
 0x14f   :  { %1765 = vbcast.lane.b32.xlu1 %v1751_v47, 280  ;;  %v3666_v53 = vpop.permute.xlu1 %1300 }
 0x150   :  { %5206 = vst [vmem:[#allocation85_spill] sm:$0xff] %v3666_v53 }
 0x152   :  { %1568 = vbcast.lane.b32.xlu0 %v1566_v32, 256 }
 0x153   :  { %1776 = vbcast.lane.b32.xlu1 %v1770_v56, 264  ;;  %v3673_v51 = vpop.permute.xlu1 %1439 }
 0x154   :  { %5208 = vst [vmem:[#allocation87_spill] sm:$0xff] %v3673_v51 }
 0x156   :  { %1576 = vbcast.lane.b32.xlu0 %v1566_v32, 272  ;;  %v3652_v32 = vpop.permute.xlu0 %1269 }
 0x157   :  { %1784 = vbcast.lane.b32.xlu1 %v1770_v56, 280  ;;  %v3679_v55 = vpop.permute.xlu1 %1447 }
 0x158   :  { %5210 = vst [vmem:[#allocation89_spill] sm:$0xff] %v3679_v55 }
 0x15a   :  { %1715 = vbcast.lane.b32.xlu0 %v1713_v27, 256 }
 0x15b   :  { %1795 = vbcast.lane.b32.xlu1 %v1789_v62, 264 }
 0x15e   :  { %1723 = vbcast.lane.b32.xlu0 %v1713_v27, 272  ;;  %v3658_v27 = vpop.permute.xlu0 %1277 }
 0x15f   :  { %1803 = vbcast.lane.b32.xlu1 %v1789_v62, 280 }
 0x162   :  { %1734 = vbcast.lane.b32.xlu0 %v1732_v38, 256  ;;  %v3664_v29 = vpop.permute.xlu0 %1288 }
 0x163   :  { %1814 = vbcast.lane.b32.xlu1 %v1808_v6, 264  ;;  %5205 = vst [vmem:[#allocation84_spill] sm:$0xff] %v3664_v29 }
 0x166   :  { %1742 = vbcast.lane.b32.xlu0 %v1732_v38, 272  ;;  %v3669_v38 = vsub.s32 5, %v3280_v7  ;;  %v3671_v52 = vpop.permute.xlu0 %1296 }
 0x167   :  { %1822 = vbcast.lane.b32.xlu1 %v1808_v6, 280  ;;  %5207 = vst [vmem:[#allocation86_spill] sm:$0xff] %v3671_v52 }
 0x168   :  { %v3736_v55 = vrot.slane %v3309_v15, %v3669_v38 }
 0x16a   :  { %1753 = vbcast.lane.b32.xlu0 %v1751_v47, 256  ;;  %v3677_v46 = vpop.permute.xlu0 %1435 }
 0x16b   :  { %1833 = vbcast.lane.b32.xlu1 %v1827_v4, 264  ;;  %5209 = vst [vmem:[#allocation88_spill] sm:$0xff] %v3677_v46 }
 0x16e   :  { %1761 = vbcast.lane.b32.xlu0 %v1751_v47, 272  ;;  %v1993_v47 = vrot.slane %v3263_v0, %v3669_v38  ;;  %v3681_v53 = vpop.permute.xlu0 %1443 }
 0x16f   :  { %1841 = vbcast.lane.b32.xlu1 %v1827_v4, 280  ;;  %5211 = vst [vmem:[#allocation90_spill] sm:$0xff] %v3681_v53 }
 0x172   :  { %1772 = vbcast.lane.b32.xlu0 %v1770_v56, 256  ;;  %v3685_v52 = vpop.permute.xlu0 %1454 }
 0x173   :  { %1852 = vbcast.lane.b32.xlu1 %v1846_v48, 264  ;;  %5213 = vst [vmem:[#allocation92_spill] sm:$0xff] %v3685_v52 }
 0x176   :  { %1780 = vbcast.lane.b32.xlu0 %v1770_v56, 272  ;;  %v3683_v56 = vpop.permute.xlu1 %1458  ;;  %v3689_v49 = vpop.permute.xlu0 %1462 }
 0x177   :  { %1860 = vbcast.lane.b32.xlu1 %v1846_v48, 280  ;;  %5212 = vst [vmem:[#allocation91_spill] sm:$0xff] %v3683_v56  ;;  %5215 = vst [vmem:[#allocation94_spill] sm:$0xff] %v3689_v49 }
 0x17a   :  { %1791 = vbcast.lane.b32.xlu0 %v1789_v62, 256  ;;  %v3687_v26 = vpop.permute.xlu1 %1466 }
 0x17b   :  { %1999 = vbcast.lane.b32.xlu1 %v1993_v47, 264  ;;  %5214 = vst [vmem:[#allocation93_spill] sm:$0xff] %v3687_v26 }
 0x17e   :  { %1799 = vbcast.lane.b32.xlu0 %v1789_v62, 272  ;;  %v3691_v21 = vpop.permute.xlu1 %1477  ;;  %v3695_v62 = vpop.permute.xlu0 %1473 }
 0x17f   :  { %2007 = vbcast.lane.b32.xlu1 %v1993_v47, 280  ;;  %5216 = vst [vmem:[#allocation95_spill] sm:$0xff] %v3691_v21  ;;  %5217 = vst [vmem:[#allocation96_spill] sm:$0xff] %v3695_v62  ;;  %v5218_v21 = vlaneseq }
 0x181   :  { %v3709_v49 = vand.u32 127, %v5218_v21 }
 0x182   :  { %1810 = vbcast.lane.b32.xlu0 %v1808_v6, 256  ;;  %v3693_v37 = vpop.xlane.xlu1 %291 }
 0x183   :  { %5219 = vst [vmem:[#allocation97_spill] sm:$0xff] %v3709_v49 }
 0x186   :  { %1818 = vbcast.lane.b32.xlu0 %v1808_v6, 272  ;;  %v3697_v53 = vpop.xlane.xlu1 %285  ;;  %v3703_v6 = vrot.slane %v3314_v16, %v3669_v38  ;;  %v3722_v16 = vsub.s32 %v3709_v49, %v3280_v7 }
 0x188   :  { %2018 = vbcast.lane.b32.xlu1 %v3703_v6, 264  ;;  %5220 = vst [vmem:[#allocation98_spill] sm:$0xff] %v3722_v16  ;;  %v332_v22 = vrot.slane %v3697_v53, %v3722_v16 }
 0x18a   :  { %1829 = vbcast.lane.b32.xlu0 %v1827_v4, 256  ;;  %v3711_v26 = vpop.xlane.xlu1 %297 }
 0x18c   :  { %2026 = vbcast.lane.b32.xlu1 %v3703_v6, 280 }
 0x18e   :  { %1837 = vbcast.lane.b32.xlu0 %v1827_v4, 272 }
 0x192   :  { %1848 = vbcast.lane.b32.xlu0 %v1846_v48, 256 }
 0x196   :  { %1856 = vbcast.lane.b32.xlu0 %v1846_v48, 272  ;;  %v3716_v48 = vrot.slane %v3290_v10, %v3669_v38 }
 0x198   :  { %2037 = vbcast.lane.b32.xlu1 %v3716_v48, 264 }
 0x199   :  { %v3699_v56 = vpop.xlane.xlu0 %279 }
 0x19a   :  { %1995 = vbcast.lane.b32.xlu0 %v1993_v47, 256  ;;  %v324_v10 = vrot.slane %v3699_v56, %v3722_v16 }
 0x19c   :  { %2045 = vbcast.lane.b32.xlu1 %v3716_v48, 280 }
 0x19d   :  { %v3706_v4 = vpop.xlane.xlu0 %276 }
 0x19e   :  { %2003 = vbcast.lane.b32.xlu0 %v1993_v47, 272  ;;  %v320_v21 = vrot.slane %v3706_v4, %v3722_v16  ;;  %v3727_v47 = vpop.xlane.xlu1 %282 }
 0x19f   :  { %v328_v49 = vrot.slane %v3727_v47, %v3722_v16 }
 0x1a0   :  { %v350_v41 = vsel %vm349_vm2, %v324_v10, %v320_v21  ;;  %2056 = vbcast.lane.b32.xlu1 %v3736_v55, 264  ;;  %v2069_v21 = vrot.slane %v3285_v9, %v3669_v38  ;;  %v348_v9 = vrot.slane %v3711_v26, %v3722_v16 }
 0x1a1   :  { %v3718_v62 = vpop.xlane.xlu0 %288  ;;  %v352_v44 = vsel %vm351_vm3, %v328_v49, %v350_v41  ;;  %v340_v49 = vrot.slane %v3693_v37, %v3722_v16 }
 0x1a2   :  { %v336_v15 = vrot.slane %v3718_v62, %v3722_v16  ;;  %v354_v50 = vsel %vm353_vm4, %v332_v22, %v352_v44 }
 0x1a4   :  { %2064 = vbcast.lane.b32.xlu1 %v3736_v55, 280 }
 0x1a5   :  { %v3729_v52 = vpop.xlane.xlu0 %294 }
 0x1a6   :  { %v344_v41 = vrot.slane %v3729_v52, %v3722_v16 }
 0x1a8   :  { %2075 = vbcast.lane.b32.xlu1 %v2069_v21, 264 }
 0x1a9   :  { %v3741_v35 = vpop.permute.xlu0 %1481 }
 0x1aa   :  { %5221 = vst [vmem:[#allocation99_spill] sm:$0xff] %v3741_v35  ;;  %v356_v35 = vsel %vm355_vm5, %v336_v15, %v354_v50  ;;  %v2088_v50 = vrot.slane %v3304_v14, %v3669_v38 }
 0x1ab   :  { %v358_v22 = vsel %vm357_vm6, %v340_v49, %v356_v35 }
 0x1ac   :  { %2083 = vbcast.lane.b32.xlu1 %v2069_v21, 280 }
 0x1ad   :  { %v3747_v46 = vpop.permute.xlu0 %1492 }
 0x1ae   :  { %5222 = vst [vmem:[#allocation100_spill] sm:$0xff] %v3747_v46  ;;  %v360_v46 = vsel %vm359_vm7, %v344_v41, %v358_v22  ;;  %v2107_v41 = vrot.slane %v3319_v17, %v3669_v38  ;;  %v3793_v17 = vsub.s32 6, %v3280_v7 }
 0x1b0   :  { %2094 = vbcast.lane.b32.xlu1 %v2088_v50, 264 }
 0x1b1   :  { %v3755_v10 = vpop.permute.xlu0 %1500 }
 0x1b2   :  { %5223 = vst [vmem:[#allocation101_spill] sm:$0xff] %v3755_v10  ;;  %v362_v10 = vsel %vm361_vm8, %v348_v9, %v360_v46  ;;  %v3233_v9 = vmov 0  }
 0x1b3   :  { %3164 = vset.pattern.permute.xlu0 %v3233_v9  ;;  %3163 = vset.pattern.permute.xlu1 %v3233_v9 }
 0x1b4   :  { %2102 = vbcast.lane.b32.xlu1 %v2088_v50, 280 }
 0x1b5   :  { %v3762_v44 = vpop.permute.xlu0 %1511 }
 0x1b6   :  { %5224 = vst [vmem:[#allocation102_spill] sm:$0xff] %v3762_v44  ;;  %v365_v44 = vsel %vm364_vm9, %v362_v10, -inf  ;;  %v3787_v10 = vpop.permute.xlu1 %1485 }
 0x1b7   :  { %5229 = vst [vmem:[#allocation107_spill] sm:$0xff] %v3787_v10 }
 0x1b8   :  { %2113 = vbcast.lane.b32.xlu1 %v2107_v41, 264 }
 0x1b9   :  { %v3770_v15 = vpop.permute.xlu0 %1519 }
 0x1ba   :  { %5225 = vst [vmem:[#allocation103_spill] sm:$0xff] %v3770_v15  ;;  %v3797_v15 = vpop.permute.xlu1 %1496 }
 0x1bb   :  { %5231 = vst [vmem:[#allocation109_spill] sm:$0xff] %v3797_v15 }
 0x1bc   :  { %2121 = vbcast.lane.b32.xlu1 %v2107_v41, 280 }
 0x1bd   :  { %366 = vmax.xlane.f32.xlu0 %v365_v44  ;;  %v3774_v35 = vpop.permute.xlu0 %1530  ;;  %v2126_v44 = vrot.slane %v3334_v19, %v3669_v38 }
 0x1be   :  { %5226 = vst [vmem:[#allocation104_spill] sm:$0xff] %v3774_v35 }
 0x1c0   :  { %2132 = vbcast.lane.b32.xlu1 %v2126_v44, 264 }
 0x1c1   :  { %v3778_v49 = vpop.permute.xlu0 %1538 }
 0x1c4   :  { %2140 = vbcast.lane.b32.xlu1 %v2126_v44, 280 }
 0x1c5   :  { %v3780_v14 = vpop.permute.xlu0 %1549 }
 0x1c9   :  { %v3782_v22 = vpop.permute.xlu0 %1557 }
 0x1ca   :  { %5227 = vst [vmem:[#allocation105_spill] sm:$0xff] %v3782_v22 }
 0x1cd   :  { %v3785_v46 = vpop.permute.xlu0 %1568 }
 0x1ce   :  { %5228 = vst [vmem:[#allocation106_spill] sm:$0xff] %v3785_v46  ;;  %v3802_v46 = vrot.slane %v3263_v0, %v3793_v17 }
 0x1d0   :  { %2279 = vbcast.lane.b32.xlu1 %v3802_v46, 264 }
 0x1d1   :  { %v3795_v35 = vpop.permute.xlu0 %1576 }
 0x1d2   :  { %5230 = vst [vmem:[#allocation108_spill] sm:$0xff] %v3795_v35 }
 0x1d3   :  { %2014 = vbcast.lane.b32.xlu0 %v3703_v6, 256 }
 0x1d5   :  { %v3806_v19 = vpop.permute.xlu0 %1715 }
 0x1d6   :  { %5232 = vst [vmem:[#allocation110_spill] sm:$0xff] %v3806_v19 }
 0x1d7   :  { %2022 = vbcast.lane.b32.xlu0 %v3703_v6, 272  ;;  %v3808_v6 = vpop.permute.xlu1 %1504 }
 0x1d8   :  { %5233 = vst [vmem:[#allocation111_spill] sm:$0xff] %v3808_v6 }
 0x1d9   :  { %v3811_v9 = vpop.permute.xlu0 %1723 }
 0x1da   :  { %5234 = vst [vmem:[#allocation112_spill] sm:$0xff] %v3811_v9 }
 0x1db   :  { %2033 = vbcast.lane.b32.xlu0 %v3716_v48, 256  ;;  %v3813_v35 = vpop.permute.xlu1 %1515 }
 0x1dc   :  { %5235 = vst [vmem:[#allocation113_spill] sm:$0xff] %v3813_v35 }
 0x1dd   :  { %v3816_v15 = vpop.permute.xlu0 %1734 }
 0x1de   :  { %5236 = vst [vmem:[#allocation114_spill] sm:$0xff] %v3816_v15 }
 0x1df   :  { %2041 = vbcast.lane.b32.xlu0 %v3716_v48, 272  ;;  %v3818_v0 = vpop.permute.xlu1 %1523 }
 0x1e0   :  { %5237 = vst [vmem:[#allocation115_spill] sm:$0xff] %v3818_v0 }
 0x1e1   :  { %v3820_v48 = vpop.permute.xlu0 %1742 }
 0x1e2   :  { %5238 = vst [vmem:[#allocation116_spill] sm:$0xff] %v3820_v48 }
 0x1e3   :  { %2052 = vbcast.lane.b32.xlu0 %v3736_v55, 256  ;;  %v3822_v10 = vpop.permute.xlu1 %1534 }
 0x1e4   :  { %5239 = vst [vmem:[#allocation117_spill] sm:$0xff] %v3822_v10 }
 0x1e5   :  { %v3824_v6 = vpop.permute.xlu0 %1753 }
 0x1e6   :  { %5240 = vst [vmem:[#allocation118_spill] sm:$0xff] %v3824_v6 }
 0x1e7   :  { %2060 = vbcast.lane.b32.xlu0 %v3736_v55, 272  ;;  %v3826_v19 = vpop.permute.xlu1 %1542 }
 0x1e9   :  { %v3828_v35 = vpop.permute.xlu0 %1761 }
 0x1ea   :  { %5241 = vst [vmem:[#allocation119_spill] sm:$0xff] %v3828_v35 }
 0x1eb   :  { %2071 = vbcast.lane.b32.xlu0 %v2069_v21, 256  ;;  %v3830_v55 = vpop.permute.xlu1 %1553 }
 0x1ed   :  { %v3832_v15 = vpop.permute.xlu0 %1772 }
 0x1ee   :  { %5242 = vst [vmem:[#allocation120_spill] sm:$0xff] %v3832_v15 }
 0x1ef   :  { %2079 = vbcast.lane.b32.xlu0 %v2069_v21, 272  ;;  %v3834_v21 = vpop.permute.xlu1 %1561 }
 0x1f0   :  { %5243 = vst [vmem:[#allocation121_spill] sm:$0xff] %v3834_v21 }
 0x1f1   :  { %v3836_v0 = vpop.permute.xlu0 %1780 }
 0x1f2   :  { %5244 = vst [vmem:[#allocation122_spill] sm:$0xff] %v3836_v0 }
 0x1f3   :  { %2090 = vbcast.lane.b32.xlu0 %v2088_v50, 256  ;;  %v3838_v10 = vpop.permute.xlu1 %1572 }
 0x1f4   :  { %5245 = vst [vmem:[#allocation123_spill] sm:$0xff] %v3838_v10 }
 0x1f7   :  { %2098 = vbcast.lane.b32.xlu0 %v2088_v50, 272  ;;  %v3841_v50 = vpop.permute.xlu0 %1791  ;;  %v3843_v6 = vpop.permute.xlu1 %1580 }
 0x1f8   :  { %5246 = vst [vmem:[#allocation124_spill] sm:$0xff] %v3841_v50  ;;  %5247 = vst [vmem:[#allocation125_spill] sm:$0xff] %v3843_v6 }
 0x1fb   :  { %2109 = vbcast.lane.b32.xlu0 %v2107_v41, 256  ;;  %v3845_v35 = vpop.permute.xlu0 %1799  ;;  %v3847_v48 = vpop.permute.xlu1 %1719 }
 0x1fc   :  { %5248 = vst [vmem:[#allocation126_spill] sm:$0xff] %v3845_v35  ;;  %5249 = vst [vmem:[#allocation127_spill] sm:$0xff] %v3847_v48 }
 0x1ff   :  { %2117 = vbcast.lane.b32.xlu0 %v2107_v41, 272  ;;  %v3849_v41 = vpop.permute.xlu0 %1810  ;;  %v3851_v15 = vpop.permute.xlu1 %1727 }
 0x200   :  { %5250 = vst [vmem:[#allocation128_spill] sm:$0xff] %v3849_v41  ;;  %5251 = vst [vmem:[#allocation129_spill] sm:$0xff] %v3851_v15 }
 0x203   :  { %2128 = vbcast.lane.b32.xlu0 %v2126_v44, 256  ;;  %v3853_v21 = vpop.permute.xlu0 %1818 }
 0x207   :  { %2136 = vbcast.lane.b32.xlu0 %v2126_v44, 272  ;;  %v3855_v44 = vpop.permute.xlu1 %1738  ;;  %v3857_v0 = vpop.permute.xlu0 %1829 }
 0x208   :  { %5252 = vst [vmem:[#allocation130_spill] sm:$0xff] %v3855_v44 }
 0x20b   :  { %2275 = vbcast.lane.b32.xlu0 %v3802_v46, 256  ;;  %v3859_v10 = vpop.permute.xlu1 %1746  ;;  %v3861_v9 = vpop.permute.xlu0 %1837 }
 0x20c   :  { %5253 = vst [vmem:[#allocation131_spill] sm:$0xff] %v3859_v10  ;;  %5254 = vst [vmem:[#allocation132_spill] sm:$0xff] %v3861_v9 }
 0x20f   :  { %v3863_v50 = vpop.permute.xlu1 %1757  ;;  %v3865_v6 = vpop.permute.xlu0 %1848 }
 0x210   :  { %5255 = vst [vmem:[#allocation133_spill] sm:$0xff] %v3863_v50  ;;  %5256 = vst [vmem:[#allocation134_spill] sm:$0xff] %v3865_v6 }
 0x213   :  { %v3867_v35 = vpop.permute.xlu1 %1765  ;;  %v3869_v57 = vpop.permute.xlu0 %1856 }
 0x214   :  { %5257 = vst [vmem:[#allocation135_spill] sm:$0xff] %v3867_v35  ;;  %5258 = vst [vmem:[#allocation136_spill] sm:$0xff] %v3869_v57 }
 0x217   :  { %v3871_v41 = vpop.permute.xlu1 %1776  ;;  %v3873_v15 = vpop.permute.xlu0 %1995 }
 0x218   :  { %5259 = vst [vmem:[#allocation137_spill] sm:$0xff] %v3871_v41  ;;  %5260 = vst [vmem:[#allocation138_spill] sm:$0xff] %v3873_v15 }
 0x21b   :  { %v3875_v48 = vpop.permute.xlu1 %1784  ;;  %v3877_v44 = vpop.permute.xlu0 %2003 }
 0x21c   :  { %5261 = vst [vmem:[#allocation139_spill] sm:$0xff] %v3875_v48  ;;  %5262 = vst [vmem:[#allocation140_spill] sm:$0xff] %v3877_v44 }
 0x21f   :  { %v3879_v29 = vpop.permute.xlu1 %1795 }
 0x220   :  { %5263 = vst [vmem:[#allocation141_spill] sm:$0xff] %v3879_v29 }
 0x223   :  { %v3889_v35 = vpop.permute.xlu1 %1803 }
 0x224   :  { %5264 = vst [vmem:[#allocation142_spill] sm:$0xff] %v3889_v35 }
 0x227   :  { %v3891_v44 = vpop.permute.xlu1 %1814 }
 0x228   :  { %5265 = vst [vmem:[#allocation143_spill] sm:$0xff] %v3891_v44 }
 0x22b   :  { %v3893_v29 = vpop.permute.xlu1 %1822 }
 0x24a   :  { %v3881_v10 = vpop.xlane.xlu0 %366 }
 0x24b   :  { %v372_v50 = vrot.slane %v3881_v10, %v3293_v11  ;;  %v376_v6 = vrot.slane %v3881_v10, %v3351_v25  ;;  %v380_v44 = vrot.slane %v3881_v10, %v3370_v34  ;;  %v384_v51 = vrot.slane %v3881_v10, %v3437_v5 }
 0x24d   :  { %v409_v57 = vsub.f32 %v3706_v4, %v372_v50  ;;  %v410_v41 = vsub.f32 %v3699_v56, %v376_v6  ;;  %v3901_v4 = vpop.permute.xlu1 %1833  ;;  %v3917_v6 = vld [vmem:[%s5098_s1 + $0x10] sm:$0xff]  ;;  %v412_v3 = vsub.f32 %v3697_v53, %v384_v51  ;;  %v3973_v53 = vsub.s32 7, %v3280_v7 }
 0x24e   :  { %5266 = vst [vmem:[#allocation144_spill] sm:$0xff] %v3901_v4  ;;  %v396_v51 = vrot.slane %v3881_v10, %v3793_v17 }
 0x24f   :  { %v417_v15 = vmul.f32 1.442695, %v409_v57  ;;  %v419_v48 = vmul.f32 1.442695, %v410_v41  ;;  %v3907_v57 = vld [vmem:[%s5098_s1 + $0x8] sm:$0xff] }
 0x250   :  { %v2292_v56 = vrot.slane %v3907_v57, %v3793_v17 }
 0x251   :  { %3182 = vpow2.f32 %v417_v15  ;;  %v3912_v15 = vpop.permute.xlu1 %1841 }
 0x252   :  { %3184 = vpow2.f32 %v419_v48  ;;  %5267 = vst [vmem:[#allocation145_spill] sm:$0xff] %v3912_v15  ;;  %v2311_v48 = vrot.slane %v3917_v6, %v3793_v17 }
 0x255   :  { %v3921_v50 = vpop.permute.xlu1 %1852 }
 0x256   :  { %5268 = vst [vmem:[#allocation146_spill] sm:$0xff] %v3921_v50 }
 0x259   :  { %v3930_v15 = vpop.permute.xlu1 %1860 }
 0x25a   :  { %5269 = vst [vmem:[#allocation147_spill] sm:$0xff] %v3930_v15 }
 0x25b   :  { %v3895_v31 = vpop.eup %3182 }
 0x25c   :  { %v3897_v36 = vpop.eup %3184  ;;  %442 = vperm.xlu1 %3163, %v3895_v31  }
 0x25d   :  { %445 = vperm.xlu0 %3164, %v3897_v36   ;;  %v3932_v35 = vpop.permute.xlu1 %1999 }
 0x25e   :  { %5270 = vst [vmem:[#allocation148_spill] sm:$0xff] %v3932_v35 }
 0x260   :  { %2287 = vbcast.lane.b32.xlu1 %v3802_v46, 280 }
 0x261   :  { %2283 = vbcast.lane.b32.xlu0 %v3802_v46, 272  ;;  %v3926_v46 = vld [vmem:[%s5098_s1 + $0x18] sm:$0xff]  ;;  %v3943_v15 = vpop.permute.xlu1 %2007 }
 0x262   :  { %v2330_v41 = vrot.slane %v3926_v46, %v3793_v17  ;;  %5271 = vst [vmem:[#allocation149_spill] sm:$0xff] %v3943_v15  ;;  %v388_v15 = vrot.slane %v3881_v10, %v3606_v60  ;;  %v2610_v7 = vrot.slane %v3926_v46, %v3973_v53 }
 0x264   :  { %2298 = vbcast.lane.b32.xlu1 %v2292_v56, 264 }
 0x265   :  { %2294 = vbcast.lane.b32.xlu0 %v2292_v56, 256  ;;  %v3955_v33 = vpop.permute.xlu1 %2018 }
 0x266   :  { %5272 = vst [vmem:[#allocation150_spill] sm:$0xff] %v3955_v33  ;;  %v423_v33 = vmul.f32 1.442695, %v412_v3  ;;  %v400_v3 = vrot.slane %v3881_v10, %v3973_v53 }
 0x268   :  { %2306 = vbcast.lane.b32.xlu1 %v2292_v56, 280 }
 0x269   :  { %2302 = vbcast.lane.b32.xlu0 %v2292_v56, 272  ;;  %v3937_v56 = vld [vmem:[%s5098_s1 + $0x20] sm:$0xff]  ;;  %v3970_v39 = vpop.permute.xlu1 %2026 }
 0x26a   :  { %v2349_v50 = vrot.slane %v3937_v56, %v3793_v17  ;;  %5273 = vst [vmem:[#allocation151_spill] sm:$0xff] %v3970_v39 }
 0x26c   :  { %2317 = vbcast.lane.b32.xlu1 %v2311_v48, 264 }
 0x26d   :  { %2313 = vbcast.lane.b32.xlu0 %v2311_v48, 256  ;;  %v3978_v28 = vpop.permute.xlu1 %2037 }
 0x26e   :  { %5274 = vst [vmem:[#allocation152_spill] sm:$0xff] %v3978_v28 }
 0x270   :  { %2325 = vbcast.lane.b32.xlu1 %v2311_v48, 280 }
 0x271   :  { %2321 = vbcast.lane.b32.xlu0 %v2311_v48, 272  ;;  %v3948_v48 = vld [vmem:[%s5098_s1 + $0x28] sm:$0xff] }
 0x272   :  { %v2368_v35 = vrot.slane %v3948_v48, %v3793_v17  ;;  %v4041_v46 = vrot.slane %v3948_v48, %v3973_v53 }
 0x274   :  { %2336 = vbcast.lane.b32.xlu1 %v2330_v41, 264 }
 0x275   :  { %2332 = vbcast.lane.b32.xlu0 %v2330_v41, 256 }
 0x278   :  { %2344 = vbcast.lane.b32.xlu1 %v2330_v41, 280 }
 0x279   :  { %2340 = vbcast.lane.b32.xlu0 %v2330_v41, 272  ;;  %v411_v41 = vsub.f32 %v3727_v47, %v380_v44  ;;  %v2387_v47 = vrot.slane %v3963_v18, %v3793_v17  ;;  %v392_v44 = vrot.slane %v3881_v10, %v3669_v38 }
 0x27b   :  { %v421_v43 = vmul.f32 1.442695, %v411_v41  ;;  %v414_v41 = vsub.f32 %v3693_v37, %v392_v44  ;;  %v3988_v37 = vld [vmem:[%s5098_s1 + $0x38] sm:$0xff] }
 0x27c   :  { %2355 = vbcast.lane.b32.xlu1 %v2349_v50, 264 }
 0x27d   :  { %2351 = vbcast.lane.b32.xlu0 %v2349_v50, 256  ;;  %3186 = vpow2.f32 %v421_v43  ;;  %v415_v43 = vsub.f32 %v3729_v52, %v396_v51  ;;  %v3994_v52 = vpop.permute.xlu1 %2045 }
 0x27e   :  { %3188 = vpow2.f32 %v423_v33  ;;  %v2406_v33 = vrot.slane %v3988_v37, %v3793_v17  ;;  %5275 = vst [vmem:[#allocation153_spill] sm:$0xff] %v3994_v52 }
 0x27f   :  { %v429_v10 = vmul.f32 1.442695, %v415_v43 }
 0x280   :  { %2363 = vbcast.lane.b32.xlu1 %v2349_v50, 280 }
 0x281   :  { %2359 = vbcast.lane.b32.xlu0 %v2349_v50, 272  ;;  %v413_v50 = vsub.f32 %v3718_v62, %v388_v15  ;;  %v427_v62 = vmul.f32 1.442695, %v414_v41  ;;  %v416_v15 = vsub.f32 %v3711_v26, %v400_v3  ;;  %v3207_v26 = vld [vmem:[%s5098_s1] sm:$0xff]  ;;  %s3234_s1 = smov [#allocation2]  }
 0x282   :  { %v2553_v51 = vrot.slane %v3207_v26, %v3973_v53  ;;  %s3099_s29 = sshll.u32 %s3234_s1, 4  ;;  %s3100_s29 = int_to_ptr.vmem [resolvable:$true] %s3099_s29 }
 0x283   :  { %v425_v40 = vmul.f32 1.442695, %v413_v50  ;;  %v4001_v50 = vpop.permute.xlu1 %2056  ;;  %s3208_s30 = scalar_lea.vmem %s3100_s29, 128  ;;  %p3213_p1 = scmp.lt.s32.totalorder %s3100_s29, %s3100_s29 }
 0x284   :  { %2374 = vbcast.lane.b32.xlu1 %v2368_v35, 264  ;;  %5276 = vst [vmem:[#allocation154_spill] sm:$0xff] %v4001_v50  ;;  %p3209_p0 = scmp.ne.s32.totalorder %s3100_s29, %s3208_s30  ;;  %p3214_p2 = scmp.lt.s32.totalorder %s3208_s30, %s3208_s30 }
 0x285   :  { %2370 = vbcast.lane.b32.xlu0 %v2368_v35, 256  ;;  %3190 = vpow2.f32 %v425_v40 }
 0x286   :  { %3192 = vpow2.f32 %v427_v62  ;;  %v2572_v62 = vrot.slane %v3907_v57, %v3973_v53  ;;  %p3215_p3 = por %p3214_p2, %p3213_p1 }
 0x287   :  { %3194 = vpow2.f32 %v429_v10  ;;  %v4011_v3 = vpop.permute.xlu1 %2064 }
 0x288   :  { %2382 = vbcast.lane.b32.xlu1 %v2368_v35, 280  ;;  %5277 = vst [vmem:[#allocation155_spill] sm:$0xff] %v4011_v3  ;;  %p3216_p4 = pnand %p3215_p3, %p3209_p0 }
 0x289   :  { %2378 = vbcast.lane.b32.xlu0 %v2368_v35, 272  ;;  %v3983_v35 = vpop.eup %3186 }
 0x28a   :  { %v3996_v40 = vpop.eup %3188 }
 0x28b   :  { %v4020_v10 = vpop.permute.xlu1 %2075 }
 0x28c   :  { %2393 = vbcast.lane.b32.xlu1 %v2387_v47, 264  ;;  %5278 = vst [vmem:[#allocation156_spill] sm:$0xff] %v4020_v10 }
 0x28d   :  { %2389 = vbcast.lane.b32.xlu0 %v2387_v47, 256 }
 0x28f   :  { %v3999_v44 = vpop.eup %3190  ;;  %v4025_v26 = vpop.permute.xlu1 %2083 }
 0x290   :  { %2401 = vbcast.lane.b32.xlu1 %v2387_v47, 280  ;;  %v4008_v41 = vpop.eup %3192  ;;  %5279 = vst [vmem:[#allocation157_spill] sm:$0xff] %v4025_v26 }
 0x291   :  { %2397 = vbcast.lane.b32.xlu0 %v2387_v47, 272  ;;  %v431_v47 = vmul.f32 1.442695, %v416_v15  ;;  %v4013_v43 = vpop.eup %3194 }
 0x293   :  { %3196 = vpow2.f32 %v431_v47  ;;  %v2591_v47 = vrot.slane %v3917_v6, %v3973_v53  ;;  %v4027_v57 = vpop.permute.xlu1 %2094  ;;  %v2629_v6 = vrot.slane %v3937_v56, %v3973_v53  ;;  %v4051_v56 = vrot.slane %v3963_v18, %v3973_v53 }
 0x294   :  { %448 = vperm.xlu1 %3163, %v3983_v35   ;;  %5280 = vst [vmem:[#allocation158_spill] sm:$0xff] %v4027_v57 }
 0x295   :  { %2408 = vbcast.lane.b32.xlu0 %v2406_v33, 256 }
 0x297   :  { %v4031_v3 = vpop.permute.xlu1 %2102 }
 0x298   :  { %451 = vperm.xlu1 %3163, %v3996_v40  }
 0x299   :  { %2416 = vbcast.lane.b32.xlu0 %v2406_v33, 272 }
 0x29b   :  { %v4035_v26 = vpop.permute.xlu1 %2113 }
 0x29c   :  { %454 = vperm.xlu1 %3163, %v3999_v44   ;;  %5281 = vst [vmem:[#allocation159_spill] sm:$0xff] %v4035_v26 }
 0x29d   :  { %2555 = vbcast.lane.b32.xlu0 %v2553_v51, 256  ;;  %v4018_v15 = vpop.eup %3196 }
 0x2a0   :  { %457 = vperm.xlu1 %3163, %v4008_v41  }
 0x2a1   :  { %2563 = vbcast.lane.b32.xlu0 %v2553_v51, 272 }
 0x2a4   :  { %460 = vperm.xlu1 %3163, %v4013_v43  }
 0x2a5   :  { %2574 = vbcast.lane.b32.xlu0 %v2572_v62, 256 }
 0x2a8   :  { %463 = vperm.xlu1 %3163, %v4018_v15  }
 0x2a9   :  { %2582 = vbcast.lane.b32.xlu0 %v2572_v62, 272 }
 0x2ac   :  { %2412 = vbcast.lane.b32.xlu1 %v2406_v33, 264 }
 0x2ad   :  { %2593 = vbcast.lane.b32.xlu0 %v2591_v47, 256 }
 0x2b0   :  { %2420 = vbcast.lane.b32.xlu1 %v2406_v33, 280  ;;  %v4037_v33 = vpop.permute.xlu0 %2014 }
 0x2b1   :  { %2601 = vbcast.lane.b32.xlu0 %v2591_v47, 272  ;;  %5282 = vst [vmem:[#allocation160_spill] sm:$0xff] %v4037_v33 }
 0x2b4   :  { %2559 = vbcast.lane.b32.xlu1 %v2553_v51, 264  ;;  %v4046_v57 = vpop.permute.xlu0 %2022 }
 0x2b5   :  { %2612 = vbcast.lane.b32.xlu0 %v2610_v7, 256  ;;  %5284 = vst [vmem:[#allocation162_spill] sm:$0xff] %v4046_v57 }
 0x2b8   :  { %2567 = vbcast.lane.b32.xlu1 %v2553_v51, 280  ;;  %v4043_v51 = vpop.permute.xlu1 %2121  ;;  %v4056_v48 = vpop.permute.xlu0 %2033 }
 0x2b9   :  { %2620 = vbcast.lane.b32.xlu0 %v2610_v7, 272  ;;  %5283 = vst [vmem:[#allocation161_spill] sm:$0xff] %v4043_v51  ;;  %5286 = vst [vmem:[#allocation164_spill] sm:$0xff] %v4056_v48 }
 0x2bc   :  { %2578 = vbcast.lane.b32.xlu1 %v2572_v62, 264  ;;  %v4063_v10 = vpop.permute.xlu0 %2041 }
 0x2bd   :  { %2631 = vbcast.lane.b32.xlu0 %v2629_v6, 256  ;;  %5288 = vst [vmem:[#allocation166_spill] sm:$0xff] %v4063_v10 }
 0x2c0   :  { %2586 = vbcast.lane.b32.xlu1 %v2572_v62, 280  ;;  %v4053_v62 = vpop.permute.xlu1 %2132 }
 0x2c1   :  { %2639 = vbcast.lane.b32.xlu0 %v2629_v6, 272  ;;  %5285 = vst [vmem:[#allocation163_spill] sm:$0xff] %v4053_v62  ;;  %v4067_v62 = vpop.permute.xlu0 %2052 }
 0x2c2   :  { %5290 = vst [vmem:[#allocation168_spill] sm:$0xff] %v4067_v62 }
 0x2c4   :  { %2597 = vbcast.lane.b32.xlu1 %v2591_v47, 264  ;;  %v4058_v51 = vpop.permute.xlu1 %2140 }
 0x2c5   :  { %2650 = vbcast.lane.b32.xlu0 %v4041_v46, 256  ;;  %5287 = vst [vmem:[#allocation165_spill] sm:$0xff] %v4058_v51  ;;  %v4072_v51 = vpop.permute.xlu0 %2060 }
 0x2c6   :  { %5292 = vst [vmem:[#allocation170_spill] sm:$0xff] %v4072_v51 }
 0x2c8   :  { %2605 = vbcast.lane.b32.xlu1 %v2591_v47, 280  ;;  %v2686_v47 = vrot.slane %v3988_v37, %v3973_v53  ;;  %v4065_v18 = vpop.permute.xlu1 %2279 }
 0x2c9   :  { %2658 = vbcast.lane.b32.xlu0 %v4041_v46, 272  ;;  %5289 = vst [vmem:[#allocation167_spill] sm:$0xff] %v4065_v18  ;;  %v4076_v37 = vpop.permute.xlu0 %2071 }
 0x2ca   :  { %5294 = vst [vmem:[#allocation172_spill] sm:$0xff] %v4076_v37 }
 0x2cc   :  { %2616 = vbcast.lane.b32.xlu1 %v2610_v7, 264 }
 0x2cd   :  { %2669 = vbcast.lane.b32.xlu0 %v4051_v56, 256  ;;  %v4082_v28 = vpop.permute.xlu0 %2079 }
 0x2ce   :  { %5297 = vst [vmem:[#allocation175_spill] sm:$0xff] %v4082_v28 }
 0x2d0   :  { %2624 = vbcast.lane.b32.xlu1 %v2610_v7, 280 }
 0x2d1   :  { %2677 = vbcast.lane.b32.xlu0 %v4051_v56, 272  ;;  %v4086_v62 = vpop.permute.xlu0 %2090 }
 0x2d2   :  { %5299 = vst [vmem:[#allocation177_spill] sm:$0xff] %v4086_v62 }
 0x2d4   :  { %2635 = vbcast.lane.b32.xlu1 %v2629_v6, 264 }
 0x2d5   :  { %2688 = vbcast.lane.b32.xlu0 %v2686_v47, 256  ;;  %v4092_v33 = vpop.permute.xlu0 %2098 }
 0x2d8   :  { %2643 = vbcast.lane.b32.xlu1 %v2629_v6, 280 }
 0x2d9   :  { %2696 = vbcast.lane.b32.xlu0 %v2686_v47, 272 }
 0x2db   :  { %v443_v50 = vpop.permute.xlu1 %442 }
 0x2dc   :  { %2654 = vbcast.lane.b32.xlu1 %v4041_v46, 264 }
 0x2df   :  { %v4070_v7 = vpop.permute.xlu1 %2287 }
 0x2e0   :  { %5291 = vst [vmem:[#allocation169_spill] sm:$0xff] %v4070_v7 }
 0x2e3   :  { %v4074_v52 = vpop.permute.xlu1 %2298 }
 0x2e4   :  { %5293 = vst [vmem:[#allocation171_spill] sm:$0xff] %v4074_v52  ;;  %v4096_v52 = vpop.permute.xlu0 %2109 }
 0x2e7   :  { %v4078_v48 = vpop.permute.xlu1 %2306 }
 0x2e8   :  { %5295 = vst [vmem:[#allocation173_spill] sm:$0xff] %v4078_v48 }
 0x2eb   :  { %v4080_v10 = vpop.permute.xlu1 %2317 }
 0x2ec   :  { %5296 = vst [vmem:[#allocation174_spill] sm:$0xff] %v4080_v10  ;;  %v4102_v10 = vpop.permute.xlu0 %2117 }
 0x2ed   :  { %5305 = vst [vmem:[#allocation183_spill] sm:$0xff] %v4102_v10 }
 0x2ef   :  { %v4084_v6 = vpop.permute.xlu1 %2325 }
 0x2f0   :  { %5298 = vst [vmem:[#allocation176_spill] sm:$0xff] %v4084_v6  ;;  %v4106_v6 = vpop.permute.xlu0 %2128 }
 0x2f1   :  { %5306 = vst [vmem:[#allocation184_spill] sm:$0xff] %v4106_v6 }
 0x2f3   :  { %v4088_v57 = vpop.permute.xlu1 %2336 }
 0x2f4   :  { %5300 = vst [vmem:[#allocation178_spill] sm:$0xff] %v4088_v57 }
 0x2f7   :  { %v4090_v39 = vpop.permute.xlu1 %2344 }
 0x2f8   :  { %5301 = vst [vmem:[#allocation179_spill] sm:$0xff] %v4090_v39  ;;  %v4112_v39 = vpop.permute.xlu0 %2136 }
 0x2f9   :  { %5309 = vst [vmem:[#allocation187_spill] sm:$0xff] %v4112_v39 }
 0x2fb   :  { %v4094_v51 = vpop.permute.xlu1 %2355 }
 0x2fc   :  { %5302 = vst [vmem:[#allocation180_spill] sm:$0xff] %v4094_v51  ;;  %v4114_v51 = vpop.permute.xlu0 %2275 }
 0x2fd   :  { %5310 = vst [vmem:[#allocation188_spill] sm:$0xff] %v4114_v51 }
 0x2ff   :  { %v4098_v37 = vpop.permute.xlu1 %2363 }
 0x300   :  { %5303 = vst [vmem:[#allocation181_spill] sm:$0xff] %v4098_v37  ;;  %v446_v37 = vpop.permute.xlu0 %445 }
 0x301   :  { %v472_v10 = vrot.slane %v446_v37, %v3722_v16 }
 0x303   :  { %v4100_v48 = vpop.permute.xlu1 %2374 }
 0x304   :  { %5304 = vst [vmem:[#allocation182_spill] sm:$0xff] %v4100_v48  ;;  %v468_v48 = vrot.slane %v443_v50, %v3722_v16 }
 0x306   :  { %v497_v39 = vsel %vm349_vm2, %v472_v10, %v468_v48 }
 0x307   :  { %v4104_v28 = vpop.permute.xlu1 %2382 }
 0x30b   :  { %v4108_v62 = vpop.permute.xlu1 %2393 }
 0x30c   :  { %5307 = vst [vmem:[#allocation185_spill] sm:$0xff] %v4108_v62 }
 0x30f   :  { %v4110_v57 = vpop.permute.xlu1 %2401 }
 0x310   :  { %5308 = vst [vmem:[#allocation186_spill] sm:$0xff] %v4110_v57 }
 0x313   :  { %v449_v7 = vpop.permute.xlu1 %448 }
 0x314   :  { %v476_v8 = vrot.slane %v449_v7, %v3722_v16 }
 0x316   :  { %v498_v51 = vsel %vm351_vm3, %v476_v8, %v497_v39  ;;  %v4135_v39 = vpop.permute.xlu0 %2283 }
 0x317   :  { %v452_v18 = vpop.permute.xlu1 %451 }
 0x318   :  { %v480_v6 = vrot.slane %v452_v18, %v3722_v16 }
 0x31a   :  { %v499_v26 = vsel %vm353_vm4, %v480_v6, %v498_v51 }
 0x31b   :  { %v455_v30 = vpop.permute.xlu1 %454 }
 0x31c   :  { %v484_v61 = vrot.slane %v455_v30, %v3722_v16 }
 0x31e   :  { %v500_v50 = vsel %vm355_vm5, %v484_v61, %v499_v26  ;;  %v4137_v61 = vpop.permute.xlu0 %2294 }
 0x31f   :  { %v458_v9 = vpop.permute.xlu1 %457  ;;  %5311 = vst [vmem:[#allocation189_spill] sm:$0xff] %v4137_v61 }
 0x320   :  { %v488_v22 = vrot.slane %v458_v9, %v3722_v16 }
 0x322   :  { %v501_v7 = vsel %vm357_vm6, %v488_v22, %v500_v50  ;;  %v4139_v8 = vpop.permute.xlu0 %2302 }
 0x323   :  { %v461_v57 = vpop.permute.xlu1 %460  ;;  %5312 = vst [vmem:[#allocation190_spill] sm:$0xff] %v4139_v8 }
 0x324   :  { %v492_v62 = vrot.slane %v461_v57, %v3722_v16 }
 0x326   :  { %v502_v30 = vsel %vm359_vm7, %v492_v62, %v501_v7  ;;  %v4141_v22 = vpop.permute.xlu0 %2313 }
 0x327   :  { %v464_v37 = vpop.permute.xlu1 %463  ;;  %5313 = vst [vmem:[#allocation191_spill] sm:$0xff] %v4141_v22 }
 0x328   :  { %v496_v18 = vrot.slane %v464_v37, %v3722_v16 }
 0x32a   :  { %v503_v4 = vsel %vm361_vm8, %v496_v18, %v502_v30  ;;  %v4143_v9 = vpop.permute.xlu0 %2321 }
 0x32b   :  { %v505_v10 = vsel %vm364_vm9, %v503_v4, 0.0  ;;  %5314 = vst [vmem:[#allocation192_spill] sm:$0xff] %v4143_v9  ;;  %v4147_v26 = vpop.permute.xlu1 %2412 }
 0x32c   :  { %506 = vadd.xlane.f32.xlu1 %v505_v10  ;;  %5316 = vst [vmem:[#allocation194_spill] sm:$0xff] %v4147_v26 }
 0x32e   :  { %v4145_v4 = vpop.permute.xlu0 %2332 }
 0x32f   :  { %5315 = vst [vmem:[#allocation193_spill] sm:$0xff] %v4145_v4 }
 0x332   :  { %v4149_v57 = vpop.permute.xlu0 %2340 }
 0x333   :  { %5317 = vst [vmem:[#allocation195_spill] sm:$0xff] %v4149_v57 }
 0x336   :  { %v4153_v51 = vpop.permute.xlu0 %2351 }
 0x337   :  { %5319 = vst [vmem:[#allocation197_spill] sm:$0xff] %v4153_v51 }
 0x33a   :  { %v4157_v62 = vpop.permute.xlu0 %2359 }
 0x33b   :  { %5320 = vst [vmem:[#allocation198_spill] sm:$0xff] %v4157_v62 }
 0x33d   :  { %2662 = vbcast.lane.b32.xlu1 %v4041_v46, 280  ;;  %v4151_v46 = vpop.permute.xlu1 %2420 }
 0x33e   :  { %5318 = vst [vmem:[#allocation196_spill] sm:$0xff] %v4151_v46 }
 0x341   :  { %2673 = vbcast.lane.b32.xlu1 %v4051_v56, 264 }
 0x345   :  { %2681 = vbcast.lane.b32.xlu1 %v4051_v56, 280  ;;  %v4155_v56 = vpop.permute.xlu1 %2559 }
 0x349   :  { %2692 = vbcast.lane.b32.xlu1 %v2686_v47, 264  ;;  %v4159_v48 = vpop.permute.xlu1 %2567 }
 0x34d   :  { %2700 = vbcast.lane.b32.xlu1 %v2686_v47, 280  ;;  %v4161_v47 = vpop.permute.xlu0 %2370  ;;  %v4163_v6 = vpop.permute.xlu1 %2578 }
 0x34e   :  { %5321 = vst [vmem:[#allocation199_spill] sm:$0xff] %v4161_v47  ;;  %5322 = vst [vmem:[#allocation200_spill] sm:$0xff] %v4163_v6 }
 0x351   :  { %v4165_v50 = vpop.permute.xlu0 %2378  ;;  %v4167_v37 = vpop.permute.xlu1 %2586 }
 0x352   :  { %5323 = vst [vmem:[#allocation201_spill] sm:$0xff] %v4167_v37 }
 0x355   :  { %v4169_v7 = vpop.permute.xlu0 %2389  ;;  %v4171_v18 = vpop.permute.xlu1 %2597 }
 0x356   :  { %5324 = vst [vmem:[#allocation202_spill] sm:$0xff] %v4171_v18 }
 0x359   :  { %v4173_v30 = vpop.permute.xlu0 %2397  ;;  %v4175_v10 = vpop.permute.xlu1 %2605 }
 0x35a   :  { %5325 = vst [vmem:[#allocation203_spill] sm:$0xff] %v4173_v30  ;;  %5326 = vst [vmem:[#allocation204_spill] sm:$0xff] %v4175_v10 }
 0x35d   :  { %v4177_v16 = vpop.permute.xlu0 %2408  ;;  %v4179_v46 = vpop.permute.xlu1 %2616 }
 0x35e   :  { %5327 = vst [vmem:[#allocation205_spill] sm:$0xff] %v4177_v16  ;;  %5328 = vst [vmem:[#allocation206_spill] sm:$0xff] %v4179_v46 }
 0x361   :  { %v4181_v26 = vpop.permute.xlu0 %2416  ;;  %v4183_v47 = vpop.permute.xlu1 %2624 }
 0x362   :  { %5329 = vst [vmem:[#allocation207_spill] sm:$0xff] %v4181_v26  ;;  %5330 = vst [vmem:[#allocation208_spill] sm:$0xff] %v4183_v47 }
 0x365   :  { %v4185_v62 = vpop.permute.xlu0 %2555  ;;  %v4187_v51 = vpop.permute.xlu1 %2635 }
 0x366   :  { %5331 = vst [vmem:[#allocation209_spill] sm:$0xff] %v4187_v51 }
 0x369   :  { %v4189_v57 = vpop.permute.xlu0 %2563  ;;  %v4191_v4 = vpop.permute.xlu1 %2643 }
 0x36a   :  { %5332 = vst [vmem:[#allocation210_spill] sm:$0xff] %v4191_v4 }
 0x36d   :  { %v4193_v9 = vpop.permute.xlu0 %2574  ;;  %v4195_v30 = vpop.permute.xlu1 %2654 }
 0x36e   :  { %5333 = vst [vmem:[#allocation211_spill] sm:$0xff] %v4193_v9  ;;  %5334 = vst [vmem:[#allocation212_spill] sm:$0xff] %v4195_v30 }
 0x371   :  { %v4197_v10 = vpop.permute.xlu0 %2582 }
 0x372   :  { %5335 = vst [vmem:[#allocation213_spill] sm:$0xff] %v4197_v10 }
 0x375   :  { %v4199_v46 = vpop.permute.xlu0 %2593 }
 0x376   :  { %5336 = vst [vmem:[#allocation214_spill] sm:$0xff] %v4199_v46 }
 0x379   :  { %v4201_v26 = vpop.permute.xlu0 %2601 }
 0x37a   :  { %5337 = vst [vmem:[#allocation215_spill] sm:$0xff] %v4201_v26 }
 0x37d   :  { %v4207_v22 = vpop.permute.xlu0 %2612 }
 0x37e   :  { %5338 = vst [vmem:[#allocation216_spill] sm:$0xff] %v4207_v22 }
 0x381   :  { %v4210_v18 = vpop.permute.xlu0 %2620 }
 0x382   :  { %5339 = vst [vmem:[#allocation217_spill] sm:$0xff] %v4210_v18 }
 0x3b9   :  { %v507_v16 = vpop.xlane.xlu1 %506 }
 0x3ba   :  { %3198 = vrcp.f32 %v507_v16 }
 0x3c4   :  { %v4203_v47 = vpop.eup %3198 }
 0x3c5   :  { %v533_v51 = vrot.slane %v4203_v47, %v3669_v38  ;;  %v537_v26 = vrot.slane %v4203_v47, %v3793_v17  ;;  %v517_v9 = vrot.slane %v4203_v47, %v3351_v25 }
 0x3c7   :  { %v555_v4 = vmul.f32 %v4008_v41, %v533_v51  ;;  %v4225_v22 = vmul.f32 %v4013_v43, %v537_v26  ;;  %v4227_v41 = vpop.permute.xlu0 %2631 }
 0x3c8   :  { %5342 = vst [vmem:[#allocation220_spill] sm:$0xff] %v4227_v41 }
 0x3c9   :  { %v4213_v30 = vrot.slane %v555_v4, %v3293_v11  ;;  %v4216_v16 = vrot.slane %v555_v4, %v3351_v25  ;;  %v4230_v51 = vrot.slane %v555_v4, %v3370_v34  ;;  %v4247_v26 = vrot.slane %v555_v4, %v3437_v5 }
 0x3ca   :  { %v4258_v41 = vrot.slane %v555_v4, %v3606_v60 }
 0x3cb   :  { %5340 = vst [vmem:[#allocation218_spill] sm:$0xff] %v4213_v30  ;;  %5341 = vst [vmem:[#allocation219_spill] sm:$0xff] %v4216_v16  ;;  %v796_v46 = vmul.f32 %v3449_v20, %v4213_v30  ;;  %v1076_v10 = vmul.f32 %v3546_v12, %v4216_v16  ;;  %v797_v8 = vmul.f32 %v3410_v54, %v4213_v30 }
 0x3cc   :  { %5343 = vst [vmem:[#allocation221_spill] sm:$0xff] %v4230_v51  ;;  %v1077_v37 = vmul.f32 %v3541_v63, %v4216_v16  ;;  %v4238_v20 = vrot.slane %v4225_v22, %v3293_v11  ;;  %v4242_v12 = vrot.slane %v4225_v22, %v3351_v25  ;;  %v1356_v43 = vmul.f32 %v3646_v59, %v4230_v51 }
 0x3cd   :  { %v1108_v18 = vadd.f32 %v1076_v10, %v796_v46  ;;  %5344 = vst [vmem:[#allocation222_spill] sm:$0xff] %v4247_v26  ;;  %v4249_v46 = vpop.permute.xlu0 %2639  ;;  %v1636_v30 = vmul.f32 %v3778_v49, %v4247_v26  ;;  %v1357_v59 = vmul.f32 %v3644_v1, %v4230_v51 }
 0x3ce   :  { %5345 = vst [vmem:[#allocation223_spill] sm:$0xff] %v4249_v46  ;;  %v1109_v10 = vadd.f32 %v1077_v37, %v797_v8  ;;  %v798_v63 = vmul.f32 %v3455_v23, %v4238_v20  ;;  %v1078_v16 = vmul.f32 %v3552_v42, %v4242_v12  ;;  %v4264_v46 = vrot.slane %v4225_v22, %v3370_v34 }
 0x3cf   :  { %v1388_v54 = vadd.f32 %v1356_v43, %v1108_v18  ;;  %v541_v8 = vrot.slane %v4203_v47, %v3973_v53  ;;  %v513_v42 = vrot.slane %v4203_v47, %v3293_v11  ;;  %v4273_v43 = vrot.slane %v555_v4, %v3669_v38 }
 0x3d0   :  { %v1389_v37 = vadd.f32 %v1357_v59, %v1109_v10  ;;  %v1110_v18 = vadd.f32 %v1078_v16, %v798_v63  ;;  %v799_v1 = vmul.f32 %v3418_v58, %v4238_v20  ;;  %v1079_v51 = vmul.f32 %v3548_v13, %v4242_v12 }
 0x3d1   :  { %v1668_v23 = vadd.f32 %v1636_v30, %v1388_v54  ;;  %v4270_v49 = vpop.permute.xlu0 %2650  ;;  %v1916_v30 = vmul.f32 %v3853_v21, %v4258_v41  ;;  %v1637_v16 = vmul.f32 %v3826_v19, %v4247_v26  ;;  %v1358_v54 = vmul.f32 %v3652_v32, %v4264_v46 }
 0x3d2   :  { %5346 = vst [vmem:[#allocation224_spill] sm:$0xff] %v4270_v49  ;;  %v4289_v10 = vrot.slane %v4225_v22, %v3437_v5  ;;  %v4292_v58 = vmul.f32 %v4018_v15, %v541_v8  ;;  %v521_v13 = vrot.slane %v4203_v47, %v3370_v34  ;;  %v525_v63 = vrot.slane %v4203_v47, %v3437_v5 }
 0x3d3   :  { %v529_v21 = vrot.slane %v4203_v47, %v3606_v60  ;;  %v1948_v19 = vadd.f32 %v1916_v30, %v1668_v23  ;;  %v1669_v59 = vadd.f32 %v1637_v16, %v1389_v37  ;;  %v1390_v49 = vadd.f32 %v1358_v54, %v1110_v18 }
 0x3d4   :  { %5347 = vst [vmem:[#allocation225_spill] sm:$0xff] %v4292_v58  ;;  %v4301_v32 = vmul.f32 %v3895_v31, %v513_v42  ;;  %v4304_v26 = vrot.slane %v555_v4, %v3793_v17  ;;  %v1111_v15 = vadd.f32 %v1079_v51, %v799_v1  ;;  %v800_v8 = vmul.f32 %v3457_v24, %v4238_v20  ;;  %v2663_v1 = vpop.permute.xlu1 %2662 }
 0x3d5   :  { %v1080_v61 = vmul.f32 %v3561_v45, %v4242_v12  ;;  %v2196_v6 = vmul.f32 %v4092_v33, %v4273_v43  ;;  %v1917_v47 = vmul.f32 %v3893_v29, %v4258_v41  ;;  %v1638_v31 = vmul.f32 %v3780_v14, %v4289_v10  ;;  %v2659_v24 = vpop.permute.xlu0 %2658 }
 0x3d6   :  { %v4318_v23 = vrot.slane %v4225_v22, %v3606_v60  ;;  %v4321_v51 = vrot.slane %v555_v4, %v3973_v53  ;;  %v1359_v45 = vmul.f32 %v3648_v2, %v4264_v46  ;;  %v4326_v37 = vmul.f32 %v3897_v36, %v517_v9 }
 0x3d7   :  { %v4329_v33 = vmul.f32 %v3983_v35, %v521_v13  ;;  %v2228_v29 = vadd.f32 %v2196_v6, %v1948_v19  ;;  %v1949_v18 = vadd.f32 %v1917_v47, %v1669_v59  ;;  %v1670_v14 = vadd.f32 %v1638_v31, %v1390_v49  ;;  %v5356_v47 = vld [vmem:[#allocation185_spill] sm:$0xff] }
 0x3d8   :  { %5348 = vst [vmem:[#allocation226_spill] sm:$0xff] %v4318_v23  ;;  %v4332_v42 = vmul.f32 %v3996_v40, %v525_v63  ;;  %v2476_v4 = vmul.f32 %v4165_v50, %v4304_v26  ;;  %v4338_v30 = vrot.slane %v4225_v22, %v3669_v38  ;;  %v1391_v2 = vadd.f32 %v1359_v45, %v1111_v15 }
 0x3d9   :  { %v1112_v36 = vadd.f32 %v1080_v61, %v800_v8  ;;  %v2197_v35 = vmul.f32 %v4031_v3, %v4273_v43  ;;  %v1918_v9 = vmul.f32 %v3857_v0, %v4318_v23  ;;  %v4346_v40 = vrot.slane %v4225_v22, %v3793_v17  ;;  %v2670_v19 = vpop.permute.xlu0 %2669 }
 0x3da   :  { %5349 = vst [vmem:[#allocation227_spill] sm:$0xff] %v4338_v30  ;;  %v4350_v6 = vrot.slane %v4225_v22, %v3973_v53  ;;  %v2756_v50 = vmul.f32 %v2659_v24, %v4321_v51  ;;  %v1639_v49 = vmul.f32 %v3830_v55, %v4289_v10  ;;  %v1360_v61 = vmul.f32 %v3658_v27, %v4264_v46  ;;  %v5358_v24 = vld [vmem:[#allocation105_spill] sm:$0xff] }
 0x3db   :  { %5350 = vst [vmem:[#allocation228_spill] sm:$0xff] %v4346_v40  ;;  %v4358_v3 = vmul.f32 %v3999_v44, %v529_v21  ;;  %v2508_v0 = vadd.f32 %v2476_v4, %v2228_v29  ;;  %v2229_v16 = vadd.f32 %v2197_v35, %v1949_v18  ;;  %v2477_v54 = vmul.f32 %v4104_v28, %v4304_v26  ;;  %v5354_v21 = vld [vmem:[#allocation144_spill] sm:$0xff]  ;;  %v5355_v28 = vld [vmem:[#allocation159_spill] sm:$0xff] }
 0x3dc   :  { %5351 = vst [vmem:[#allocation229_spill] sm:$0xff] %v4350_v6  ;;  %v1950_v13 = vadd.f32 %v1918_v9, %v1670_v14  ;;  %v4363_v22 = vmul.f32 %v2663_v1, %v4321_v51  ;;  %v2198_v63 = vmul.f32 %v4096_v52, %v4338_v30  ;;  %v1671_v55 = vadd.f32 %v1639_v49, %v1391_v2  ;;  %v2674_v52 = vpop.permute.xlu1 %2673  ;;  %v5362_v35 = vld [vmem:[#allocation23_spill] sm:$0xff] }
 0x3dd   :  { %v1392_v59 = vadd.f32 %v1360_v61, %v1112_v36  ;;  %v2478_v27 = vmul.f32 %v4169_v7, %v4346_v40  ;;  %v4370_v44 = vmul.f32 %v2670_v19, %v4350_v6  ;;  %v1919_v15 = vmul.f32 %v5354_v21, %v4318_v23  ;;  %v5363_v49 = vld [vmem:[#allocation55_spill] sm:$0xff]  ;;  %v5364_v19 = vld [vmem:[#allocation132_spill] sm:$0xff] }
 0x3de   :  { %5352 = vst [vmem:[#allocation230_spill] sm:$0xff] %v4363_v22  ;;  %v2199_v8 = vmul.f32 %v5355_v28, %v4338_v30  ;;  %v4378_v31 = vmul.f32 %v5356_v47, %v4346_v40  ;;  %v1640_v45 = vmul.f32 %v5358_v24, %v4289_v10  ;;  %v4384_v7 = vrot.slane %v4292_v58, %v3293_v11  ;;  %v5371_v47 = vld [vmem:[#allocation8_spill] sm:$0xff]  ;;  %v5372_v24 = vld [vmem:[#allocation31_spill] sm:$0xff]  ;;  %v5380_v22 = vld [vmem:[#allocation37_spill] sm:$0xff] }
 0x3df   :  { %5353 = vst [vmem:[#allocation231_spill] sm:$0xff] %v4370_v44  ;;  %v4388_v29 = vrot.slane %v4292_v58, %v3351_v25  ;;  %v4390_v18 = vadd.f32 %v2756_v50, %v2508_v0  ;;  %v4392_v14 = vadd.f32 %v2477_v54, %v2229_v16  ;;  %v2230_v4 = vadd.f32 %v2198_v63, %v1950_v13  ;;  %v5365_v50 = vld [vmem:[#allocation183_spill] sm:$0xff]  ;;  %v5367_v13 = vld [vmem:[#allocation82_spill] sm:$0xff] }
 0x3e0   :  { %5357 = vst [vmem:[#allocation144_spill] sm:$0xff] %v4378_v31  ;;  %v4395_v1 = vmul.f32 %v2674_v52, %v4350_v6  ;;  %v1951_v2 = vadd.f32 %v1919_v15, %v1671_v55  ;;  %v1672_v36 = vadd.f32 %v1640_v45, %v1392_v59  ;;  %v801_v9 = vmul.f32 %v5362_v35, %v4238_v20  ;;  %v5368_v20 = vld [vmem:[#allocation34_spill] sm:$0xff]  ;;  %v5369_v55 = vld [vmem:[#allocation57_spill] sm:$0xff]  ;;  %v5385_v44 = vld [vmem:[#allocation83_spill] sm:$0xff] }
 0x3e1   :  { %5359 = vst [vmem:[#allocation159_spill] sm:$0xff] %v4390_v18  ;;  %5360 = vst [vmem:[#allocation185_spill] sm:$0xff] %v4392_v14  ;;  %v1081_v61 = vmul.f32 %v5363_v49, %v4242_v12  ;;  %v1920_v21 = vmul.f32 %v5364_v19, %v4318_v23  ;;  %v4405_v0 = vmul.f32 %v5365_v50, %v4338_v30  ;;  %v5384_v30 = vld [vmem:[#allocation61_spill] sm:$0xff]  ;;  %v5386_v18 = vld [vmem:[#allocation148_spill] sm:$0xff] }
 0x3e2   :  { %5361 = vst [vmem:[#allocation105_spill] sm:$0xff] %v4395_v1  ;;  %v561_v16 = vrot.slane %v4301_v32, %v3293_v11  ;;  %v841_v54 = vrot.slane %v4301_v32, %v3351_v25  ;;  %v4413_v63 = vmul.f32 %v5367_v13, %v4264_v46  ;;  %v802_v12 = vmul.f32 %v5368_v20, %v4384_v7  ;;  %v5375_v13 = vld [vmem:[#allocation60_spill] sm:$0xff] }
 0x3e3   :  { %5366 = vst [vmem:[#allocation23_spill] sm:$0xff] %v4405_v0  ;;  %v1082_v59 = vmul.f32 %v5369_v55, %v4388_v29  ;;  %v1121_v15 = vrot.slane %v4301_v32, %v3370_v34  ;;  %v4421_v28 = vadd.f32 %v2478_v27, %v2230_v4  ;;  %v4427_v35 = vrot.slane %v4301_v32, %v3437_v5 }
 0x3e4   :  { %v775_v52 = vmul.f32 %v5371_v47, %v561_v16  ;;  %v1055_v45 = vmul.f32 %v5372_v24, %v841_v54  ;;  %v4429_v46 = vadd.f32 %v2199_v8, %v1951_v2  ;;  %v4431_v49 = vadd.f32 %v1920_v21, %v1672_v36  ;;  %v5376_v2 = vld [vmem:[#allocation26_spill] sm:$0xff] }
 0x3e5   :  { %5370 = vst [vmem:[#allocation55_spill] sm:$0xff] %v4421_v28  ;;  %v4433_v19 = vadd.f32 %v1081_v61, %v801_v9  ;;  %v4437_v50 = vrot.slane %v4292_v58, %v3370_v34  ;;  %v4441_v27 = vrot.slane %v4292_v58, %v3437_v5  ;;  %v1335_v20 = vmul.f32 %v5375_v13, %v1121_v15  ;;  %v5377_v9 = vld [vmem:[#allocation56_spill] sm:$0xff] }
 0x3e6   :  { %5373 = vst [vmem:[#allocation132_spill] sm:$0xff] %v4429_v46  ;;  %5374 = vst [vmem:[#allocation183_spill] sm:$0xff] %v4431_v49  ;;  %v1087_v4 = vadd.f32 %v1055_v45, %v775_v52  ;;  %v4446_v55 = vrot.slane %v4301_v32, %v3606_v60  ;;  %v1114_v8 = vadd.f32 %v1082_v59, %v802_v12  ;;  %v5378_v52 = vld [vmem:[#allocation87_spill] sm:$0xff]  ;;  %v5379_v45 = vld [vmem:[#allocation6_spill] sm:$0xff] }
 0x3e7   :  { %v803_v36 = vmul.f32 %v5376_v2, %v4384_v7  ;;  %v1083_v61 = vmul.f32 %v5377_v9, %v4388_v29  ;;  %v4454_v21 = vrot.slane %v4301_v32, %v3669_v38  ;;  %v1615_v24 = vmul.f32 %v5378_v52, %v4427_v35  ;;  %v5381_v12 = vld [vmem:[#allocation84_spill] sm:$0xff]  ;;  %v5383_v52 = vld [vmem:[#allocation127_spill] sm:$0xff] }
 0x3e8   :  { %v1367_v47 = vadd.f32 %v1335_v20, %v1087_v4  ;;  %v774_v13 = vmul.f32 %v5379_v45, %v561_v16  ;;  %v1054_v14 = vmul.f32 %v5380_v22, %v841_v54  ;;  %v1362_v59 = vmul.f32 %v5381_v12, %v4437_v50 }
 0x3e9   :  { %v4464_v2 = vrot.slane %v4292_v58, %v3606_v60  ;;  %v4468_v9 = vrot.slane %v4301_v32, %v3793_v17  ;;  %v4472_v4 = vrot.slane %v4301_v32, %v3973_v53  ;;  %v1895_v45 = vmul.f32 %v5383_v52, %v4446_v55  ;;  %v5388_v52 = vld [vmem:[#allocation12_spill] sm:$0xff] }
 0x3ea   :  { %v1647_v20 = vadd.f32 %v1615_v24, %v1367_v47  ;;  %v1086_v22 = vadd.f32 %v1054_v14, %v774_v13  ;;  %v1334_v6 = vmul.f32 %v5384_v30, %v1121_v15  ;;  %v4477_v12 = vadd.f32 %v1362_v59, %v1114_v8  ;;  %v5387_v47 = vld [vmem:[#allocation88_spill] sm:$0xff]  ;;  %v5389_v30 = vld [vmem:[#allocation167_spill] sm:$0xff] }
 0x3eb   :  { %5382 = vst [vmem:[#allocation82_spill] sm:$0xff] %v4464_v2  ;;  %v4479_v1 = vadd.f32 %v1083_v61, %v803_v36  ;;  %v4483_v28 = vmul.f32 %v5385_v44, %v4437_v50  ;;  %v2175_v23 = vmul.f32 %v5386_v18, %v4454_v21  ;;  %v1614_v24 = vmul.f32 %v5387_v47, %v4427_v35  ;;  %v5390_v61 = vld [vmem:[#allocation110_spill] sm:$0xff]  ;;  %v5391_v13 = vld [vmem:[#allocation32_spill] sm:$0xff] }
 0x3ec   :  { %v1927_v32 = vadd.f32 %v1895_v45, %v1647_v20  ;;  %v1366_v40 = vadd.f32 %v1334_v6, %v1086_v22  ;;  %v777_v14 = vmul.f32 %v5388_v52, %v561_v16  ;;  %v2455_v8 = vmul.f32 %v5389_v30, %v4468_v9  ;;  %v5392_v6 = vld [vmem:[#allocation138_spill] sm:$0xff]  ;;  %v5393_v45 = vld [vmem:[#allocation188_spill] sm:$0xff] }
 0x3ed   :  { %v2735_v36 = vmul.f32 %v4155_v56, %v4472_v4  ;;  %v1894_v44 = vmul.f32 %v5390_v61, %v4446_v55  ;;  %v1057_v59 = vmul.f32 %v5391_v13, %v841_v54  ;;  %v2174_v20 = vmul.f32 %v5392_v6, %v4454_v21  ;;  %v5394_v30 = vld [vmem:[#allocation62_spill] sm:$0xff]  ;;  %v5396_v13 = vld [vmem:[#allocation89_spill] sm:$0xff] }
 0x3ee   :  { %v2207_v0 = vadd.f32 %v2175_v23, %v1927_v32  ;;  %v1646_v18 = vadd.f32 %v1614_v24, %v1366_v40  ;;  %v2454_v22 = vmul.f32 %v5393_v45, %v4468_v9  ;;  %v2734_v47 = vmul.f32 %v4185_v62, %v4472_v4  ;;  %v5395_v56 = vld [vmem:[#allocation10_spill] sm:$0xff]  ;;  %v5397_v40 = vld [vmem:[#allocation39_spill] sm:$0xff]  ;;  %v5398_v6 = vld [vmem:[#allocation129_spill] sm:$0xff] }
 0x3ef   :  { %v1089_v52 = vadd.f32 %v1057_v59, %v777_v14  ;;  %v1337_v49 = vmul.f32 %v5394_v30, %v1121_v15  ;;  %v776_v31 = vmul.f32 %v5395_v56, %v561_v16  ;;  %v1617_v23 = vmul.f32 %v5396_v13, %v4427_v35  ;;  %v5399_v45 = vld [vmem:[#allocation149_spill] sm:$0xff]  ;;  %v5402_v13 = vld [vmem:[#allocation90_spill] sm:$0xff] }
 0x3f0   :  { %v2487_v46 = vadd.f32 %v2455_v8, %v2207_v0  ;;  %v1926_v61 = vadd.f32 %v1894_v44, %v1646_v18  ;;  %v1056_v32 = vmul.f32 %v5397_v40, %v841_v54  ;;  %v1897_v58 = vmul.f32 %v5398_v6, %v4446_v55  ;;  %v5400_v62 = vld [vmem:[#allocation169_spill] sm:$0xff]  ;;  %v5401_v0 = vld [vmem:[#allocation63_spill] sm:$0xff] }
 0x3f1   :  { %v1369_v24 = vadd.f32 %v1337_v49, %v1089_v52  ;;  %v2177_v2 = vmul.f32 %v5399_v45, %v4454_v21  ;;  %v2457_v14 = vmul.f32 %v5400_v62, %v4468_v9  ;;  %v1336_v8 = vmul.f32 %v5401_v0, %v1121_v15  ;;  %v5408_v0 = vld [vmem:[#allocation14_spill] sm:$0xff] }
 0x3f2   :  { %v2767_v59 = vadd.f32 %v2735_v36, %v2487_v46  ;;  %v2206_v30 = vadd.f32 %v2174_v20, %v1926_v61  ;;  %v1088_v16 = vadd.f32 %v1056_v32, %v776_v31  ;;  %v2737_v18 = vmul.f32 %v4159_v48, %v4472_v4  ;;  %v5403_v36 = vld [vmem:[#allocation16_spill] sm:$0xff]  ;;  %v5404_v48 = vld [vmem:[#allocation33_spill] sm:$0xff] }
 0x3f3   :  { %v1649_v44 = vadd.f32 %v1617_v23, %v1369_v24  ;;  %v565_v54 = vrot.slane %v4326_v37, %v3293_v11  ;;  %v845_v49 = vrot.slane %v4326_v37, %v3351_v25  ;;  %v1616_v46 = vmul.f32 %v5402_v13, %v4427_v35 }
 0x3f4   :  { %2834 = vperm.xlu1 %3163, %v2767_v59   ;;  %v2486_v52 = vadd.f32 %v2454_v22, %v2206_v30  ;;  %v1368_v56 = vadd.f32 %v1336_v8, %v1088_v16  ;;  %v4525_v31 = vrot.slane %v4326_v37, %v3370_v34  ;;  %v4531_v23 = vrot.slane %v4326_v37, %v3437_v5  ;;  %v5405_v22 = vld [vmem:[#allocation112_spill] sm:$0xff] }
 0x3f5   :  { %v1929_v15 = vadd.f32 %v1897_v58, %v1649_v44  ;;  %v779_v20 = vmul.f32 %v5403_v36, %v565_v54  ;;  %v1059_v61 = vmul.f32 %v5404_v48, %v845_v49  ;;  %v1896_v24 = vmul.f32 %v5405_v22, %v4446_v55  ;;  %v5406_v58 = vld [vmem:[#allocation140_spill] sm:$0xff]  ;;  %v5411_v36 = vld [vmem:[#allocation130_spill] sm:$0xff] }
 0x3f6   :  { %v2766_v40 = vadd.f32 %v2734_v47, %v2486_v52  ;;  %v1648_v32 = vadd.f32 %v1616_v46, %v1368_v56  ;;  %v4537_v35 = vrot.slane %v4326_v37, %v3606_v60  ;;  %v2176_v45 = vmul.f32 %v5406_v58, %v4454_v21  ;;  %v5407_v59 = vld [vmem:[#allocation64_spill] sm:$0xff]  ;;  %v5409_v21 = vld [vmem:[#allocation91_spill] sm:$0xff]  ;;  %v5410_v56 = vld [vmem:[#allocation41_spill] sm:$0xff] }
 0x3f7   :  { %v2209_v6 = vadd.f32 %v2177_v2, %v1929_v15  ;;  %v1091_v62 = vadd.f32 %v1059_v61, %v779_v20  ;;  %v1339_v30 = vmul.f32 %v5407_v59, %v4525_v31  ;;  %v4545_v47 = vrot.slane %v4326_v37, %v3669_v38  ;;  %v5413_v58 = vld [vmem:[#allocation150_spill] sm:$0xff] }
 0x3f8   :  { %2831 = vperm.xlu0 %3164, %v2766_v40   ;;  %v1928_v16 = vadd.f32 %v1896_v24, %v1648_v32  ;;  %v4549_v55 = vrot.slane %v4326_v37, %v3793_v17  ;;  %v778_v8 = vmul.f32 %v5408_v0, %v565_v54  ;;  %v1619_v52 = vmul.f32 %v5409_v21, %v4531_v23  ;;  %v5412_v32 = vld [vmem:[#allocation65_spill] sm:$0xff] }
 0x3f9   :  { %v2489_v2 = vadd.f32 %v2457_v14, %v2209_v6  ;;  %v1371_v44 = vadd.f32 %v1339_v30, %v1091_v62  ;;  %v1058_v13 = vmul.f32 %v5410_v56, %v845_v49  ;;  %v2456_v15 = vmul.f32 %v4135_v39, %v4468_v9  ;;  %v5414_v9 = vld [vmem:[#allocation171_spill] sm:$0xff] }
 0x3fa   :  { %v2208_v46 = vadd.f32 %v2176_v45, %v1928_v16  ;;  %v1899_v20 = vmul.f32 %v5411_v36, %v4537_v35  ;;  %v4561_v48 = vrot.slane %v4326_v37, %v3973_v53  ;;  %v1338_v22 = vmul.f32 %v5412_v32, %v4525_v31  ;;  %v5416_v30 = vld [vmem:[#allocation19_spill] sm:$0xff] }
 0x3fb   :  { %v2769_v61 = vadd.f32 %v2737_v18, %v2489_v2  ;;  %v1651_v40 = vadd.f32 %v1619_v52, %v1371_v44  ;;  %v1090_v14 = vadd.f32 %v1058_v13, %v778_v8  ;;  %v2736_v6 = vmul.f32 %v4189_v57, %v4472_v4  ;;  %v5415_v18 = vld [vmem:[#allocation92_spill] sm:$0xff]  ;;  %v5418_v57 = vld [vmem:[#allocation114_spill] sm:$0xff]  ;;  %v5419_v44 = vld [vmem:[#allocation35_spill] sm:$0xff] }
 0x3fc   :  { %v2488_v24 = vadd.f32 %v2456_v15, %v2208_v46  ;;  %v2179_v39 = vmul.f32 %v5413_v58, %v4545_v47  ;;  %v2459_v45 = vmul.f32 %v5414_v9, %v4549_v55  ;;  %v1618_v59 = vmul.f32 %v5415_v18, %v4531_v23  ;;  %v5417_v8 = vld [vmem:[#allocation200_spill] sm:$0xff]  ;;  %v5421_v15 = vld [vmem:[#allocation189_spill] sm:$0xff] }
 0x3fd   :  { %2840 = vperm.xlu1 %3163, %v2769_v61   ;;  %v1931_v62 = vadd.f32 %v1899_v20, %v1651_v40  ;;  %v1370_v37 = vadd.f32 %v1338_v22, %v1090_v14  ;;  %v781_v16 = vmul.f32 %v5416_v30, %v565_v54  ;;  %v2739_v2 = vmul.f32 %v5417_v8, %v4561_v48  ;;  %v5420_v13 = vld [vmem:[#allocation160_spill] sm:$0xff]  ;;  %v5422_v20 = vld [vmem:[#allocation211_spill] sm:$0xff]  ;;  %v5423_v14 = vld [vmem:[#allocation66_spill] sm:$0xff] }
 0x3fe   :  { %v2768_v0 = vadd.f32 %v2736_v6, %v2488_v24  ;;  %v1898_v4 = vmul.f32 %v5418_v57, %v4537_v35  ;;  %v1061_v21 = vmul.f32 %v5419_v44, %v845_v49  ;;  %v2178_v46 = vmul.f32 %v5420_v13, %v4545_v47  ;;  %v5424_v22 = vld [vmem:[#allocation17_spill] sm:$0xff] }
 0x3ff   :  { %v2211_v52 = vadd.f32 %v2179_v39, %v1931_v62  ;;  %v1650_v56 = vadd.f32 %v1618_v59, %v1370_v37  ;;  %v2458_v36 = vmul.f32 %v5421_v15, %v4549_v55  ;;  %v2738_v61 = vmul.f32 %v5422_v20, %v4561_v48  ;;  %v5425_v39 = vld [vmem:[#allocation93_spill] sm:$0xff]  ;;  %v5426_v62 = vld [vmem:[#allocation42_spill] sm:$0xff]  ;;  %v5427_v59 = vld [vmem:[#allocation131_spill] sm:$0xff] }
 0x400   :  { %2837 = vperm.xlu0 %3164, %v2768_v0   ;;  %v1093_v40 = vadd.f32 %v1061_v21, %v781_v16  ;;  %v1341_v32 = vmul.f32 %v5423_v14, %v4525_v31  ;;  %v780_v24 = vmul.f32 %v5424_v22, %v565_v54  ;;  %v1621_v9 = vmul.f32 %v5425_v39, %v4531_v23  ;;  %v5428_v0 = vld [vmem:[#allocation151_spill] sm:$0xff]  ;;  %v5429_v16 = vld [vmem:[#allocation173_spill] sm:$0xff] }
 0x401   :  { %v2491_v6 = vadd.f32 %v2459_v45, %v2211_v52  ;;  %v1930_v58 = vadd.f32 %v1898_v4, %v1650_v56  ;;  %v1060_v37 = vmul.f32 %v5426_v62, %v845_v49  ;;  %v1901_v30 = vmul.f32 %v5427_v59, %v4537_v35  ;;  %v5430_v45 = vld [vmem:[#allocation67_spill] sm:$0xff]  ;;  %v5431_v56 = vld [vmem:[#allocation201_spill] sm:$0xff] }
 0x402   :  { %v1373_v18 = vadd.f32 %v1341_v32, %v1093_v40  ;;  %v2181_v8 = vmul.f32 %v5428_v0, %v4545_v47  ;;  %v2461_v57 = vmul.f32 %v5429_v16, %v4549_v55  ;;  %v1340_v4 = vmul.f32 %v5430_v45, %v4525_v31  ;;  %v5433_v32 = vld [vmem:[#allocation20_spill] sm:$0xff] }
 0x403   :  { %v2771_v44 = vadd.f32 %v2739_v2, %v2491_v6  ;;  %v2210_v21 = vadd.f32 %v2178_v46, %v1930_v58  ;;  %v1092_v54 = vadd.f32 %v1060_v37, %v780_v24  ;;  %v2741_v49 = vmul.f32 %v5431_v56, %v4561_v48  ;;  %v5432_v2 = vld [vmem:[#allocation94_spill] sm:$0xff]  ;;  %v5437_v0 = vld [vmem:[#allocation68_spill] sm:$0xff] }
 0x404   :  { %v1653_v52 = vadd.f32 %v1621_v9, %v1373_v18  ;;  %v569_v13 = vrot.slane %v4329_v33, %v3293_v11  ;;  %v849_v15 = vrot.slane %v4329_v33, %v3351_v25  ;;  %v1620_v46 = vmul.f32 %v5432_v2, %v4531_v23  ;;  %v5434_v24 = vld [vmem:[#allocation38_spill] sm:$0xff] }
 0x405   :  { %2846 = vperm.xlu1 %3163, %v2771_v44   ;;  %v2490_v20 = vadd.f32 %v2458_v36, %v2210_v21  ;;  %v1372_v40 = vadd.f32 %v1340_v4, %v1092_v54  ;;  %v4609_v14 = vrot.slane %v4329_v33, %v3370_v34  ;;  %v4615_v58 = vrot.slane %v4329_v33, %v3437_v5  ;;  %v5435_v36 = vld [vmem:[#allocation116_spill] sm:$0xff]  ;;  %v5436_v18 = vld [vmem:[#allocation162_spill] sm:$0xff]  ;;  %v5438_v21 = vld [vmem:[#allocation7_spill] sm:$0xff] }
 0x406   :  { %v1933_v31 = vadd.f32 %v1901_v30, %v1653_v52  ;;  %v783_v22 = vmul.f32 %v5433_v32, %v569_v13  ;;  %v1063_v6 = vmul.f32 %v5434_v24, %v849_v15  ;;  %v1900_v62 = vmul.f32 %v5435_v36, %v4537_v35  ;;  %v5440_v52 = vld [vmem:[#allocation44_spill] sm:$0xff]  ;;  %v5444_v36 = vld [vmem:[#allocation213_spill] sm:$0xff] }
 0x407   :  { %v2770_v39 = vadd.f32 %v2738_v61, %v2490_v20  ;;  %v1652_v9 = vadd.f32 %v1620_v46, %v1372_v40  ;;  %v4621_v23 = vrot.slane %v4329_v33, %v3606_v60  ;;  %v2180_v59 = vmul.f32 %v5436_v18, %v4545_v47  ;;  %v5439_v47 = vld [vmem:[#allocation95_spill] sm:$0xff]  ;;  %v5441_v40 = vld [vmem:[#allocation190_spill] sm:$0xff]  ;;  %v5442_v46 = vld [vmem:[#allocation133_spill] sm:$0xff] }
 0x408   :  { %v2213_v37 = vadd.f32 %v2181_v8, %v1933_v31  ;;  %v1095_v30 = vadd.f32 %v1063_v6, %v783_v22  ;;  %v1343_v16 = vmul.f32 %v5437_v0, %v4609_v14  ;;  %v4629_v61 = vrot.slane %v4329_v33, %v3669_v38  ;;  %v5443_v6 = vld [vmem:[#allocation69_spill] sm:$0xff]  ;;  %v5446_v18 = vld [vmem:[#allocation174_spill] sm:$0xff] }
 0x409   :  { %2843 = vperm.xlu0 %3164, %v2770_v39   ;;  %v1932_v44 = vadd.f32 %v1900_v62, %v1652_v9  ;;  %v4633_v35 = vrot.slane %v4329_v33, %v3793_v17  ;;  %v782_v54 = vmul.f32 %v5438_v21, %v569_v13  ;;  %v1623_v4 = vmul.f32 %v5439_v47, %v4615_v58  ;;  %v5451_v47 = vld [vmem:[#allocation40_spill] sm:$0xff] }
 0x40a   :  { %v2493_v8 = vadd.f32 %v2461_v57, %v2213_v37  ;;  %v1375_v45 = vadd.f32 %v1343_v16, %v1095_v30  ;;  %v1062_v56 = vmul.f32 %v5440_v52, %v849_v15  ;;  %v2460_v2 = vmul.f32 %v5441_v40, %v4549_v55  ;;  %v5445_v37 = vld [vmem:[#allocation152_spill] sm:$0xff]  ;;  %v5448_v16 = vld [vmem:[#allocation22_spill] sm:$0xff] }
 0x40b   :  { %v2212_v20 = vadd.f32 %v2180_v59, %v1932_v44  ;;  %v1903_v31 = vmul.f32 %v5442_v46, %v4621_v23  ;;  %v4645_v32 = vrot.slane %v4329_v33, %v3973_v53  ;;  %v1342_v39 = vmul.f32 %v5443_v6, %v4609_v14 }
 0x40c   :  { %v2773_v22 = vadd.f32 %v2741_v49, %v2493_v8  ;;  %v1655_v24 = vadd.f32 %v1623_v4, %v1375_v45  ;;  %v1094_v57 = vadd.f32 %v1062_v56, %v782_v54  ;;  %v2740_v62 = vmul.f32 %v5444_v36, %v4561_v48  ;;  %v5447_v49 = vld [vmem:[#allocation96_spill] sm:$0xff]  ;;  %v5449_v54 = vld [vmem:[#allocation202_spill] sm:$0xff] }
 0x40d   :  { %v2492_v9 = vadd.f32 %v2460_v2, %v2212_v20  ;;  %v2183_v55 = vmul.f32 %v5445_v37, %v4629_v61  ;;  %v2463_v59 = vmul.f32 %v5446_v18, %v4633_v35  ;;  %v1622_v0 = vmul.f32 %v5447_v49, %v4615_v58  ;;  %v5450_v48 = vld [vmem:[#allocation118_spill] sm:$0xff]  ;;  %v5452_v20 = vld [vmem:[#allocation164_spill] sm:$0xff]  ;;  %v5453_v2 = vld [vmem:[#allocation191_spill] sm:$0xff] }
 0x40e   :  { %2852 = vperm.xlu1 %3163, %v2773_v22   ;;  %v1935_v30 = vadd.f32 %v1903_v31, %v1655_v24  ;;  %v1374_v33 = vadd.f32 %v1342_v39, %v1094_v57  ;;  %v785_v44 = vmul.f32 %v5448_v16, %v569_v13  ;;  %v2743_v8 = vmul.f32 %v5449_v54, %v4645_v32  ;;  %v5454_v31 = vld [vmem:[#allocation214_spill] sm:$0xff]  ;;  %v5456_v39 = vld [vmem:[#allocation21_spill] sm:$0xff]  ;;  %v5457_v37 = vld [vmem:[#allocation107_spill] sm:$0xff] }
 0x40f   :  { %v2772_v21 = vadd.f32 %v2740_v62, %v2492_v9  ;;  %v1902_v45 = vmul.f32 %v5450_v48, %v4621_v23  ;;  %v1065_v4 = vmul.f32 %v5451_v47, %v849_v15  ;;  %v2182_v40 = vmul.f32 %v5452_v20, %v4629_v61  ;;  %v5455_v57 = vld [vmem:[#allocation70_spill] sm:$0xff]  ;;  %v5459_v49 = vld [vmem:[#allocation135_spill] sm:$0xff]  ;;  %v5460_v16 = vld [vmem:[#allocation153_spill] sm:$0xff] }
 0x410   :  { %v2215_v52 = vadd.f32 %v2183_v55, %v1935_v30  ;;  %v1654_v56 = vadd.f32 %v1622_v0, %v1374_v33  ;;  %v2462_v46 = vmul.f32 %v5453_v2, %v4633_v35  ;;  %v2742_v22 = vmul.f32 %v5454_v31, %v4645_v32  ;;  %v5458_v18 = vld [vmem:[#allocation46_spill] sm:$0xff] }
 0x411   :  { %2849 = vperm.xlu0 %3164, %v2772_v21   ;;  %v1097_v24 = vadd.f32 %v1065_v4, %v785_v44  ;;  %v1345_v6 = vmul.f32 %v5455_v57, %v4609_v14  ;;  %v784_v9 = vmul.f32 %v5456_v39, %v569_v13  ;;  %v1625_v55 = vmul.f32 %v5457_v37, %v4615_v58  ;;  %v5461_v44 = vld [vmem:[#allocation176_spill] sm:$0xff]  ;;  %v5465_v57 = vld [vmem:[#allocation9_spill] sm:$0xff]  ;;  %v5466_v39 = vld [vmem:[#allocation43_spill] sm:$0xff] }
 0x412   :  { %v2495_v36 = vadd.f32 %v2463_v59, %v2215_v52  ;;  %v1934_v62 = vadd.f32 %v1902_v45, %v1654_v56  ;;  %v1064_v30 = vmul.f32 %v5458_v18, %v849_v15  ;;  %v1905_v0 = vmul.f32 %v5459_v49, %v4621_v23  ;;  %v5462_v59 = vld [vmem:[#allocation71_spill] sm:$0xff]  ;;  %v5463_v52 = vld [vmem:[#allocation204_spill] sm:$0xff] }
 0x413   :  { %v1377_v33 = vadd.f32 %v1345_v6, %v1097_v24  ;;  %v2185_v21 = vmul.f32 %v5460_v16, %v4629_v61  ;;  %v2465_v54 = vmul.f32 %v5461_v44, %v4633_v35  ;;  %v1344_v45 = vmul.f32 %v5462_v59, %v4609_v14  ;;  %v5467_v37 = vld [vmem:[#allocation119_spill] sm:$0xff] }
 0x414   :  { %v2775_v48 = vadd.f32 %v2743_v8, %v2495_v36  ;;  %v2214_v47 = vadd.f32 %v2182_v40, %v1934_v62  ;;  %v1096_v13 = vadd.f32 %v1064_v30, %v784_v9  ;;  %v2745_v15 = vmul.f32 %v5463_v52, %v4645_v32  ;;  %v5464_v40 = vld [vmem:[#allocation99_spill] sm:$0xff]  ;;  %v5468_v30 = vld [vmem:[#allocation166_spill] sm:$0xff] }
 0x415   :  { %v1657_v4 = vadd.f32 %v1625_v55, %v1377_v33  ;;  %v4687_v56 = vrot.slane %v4332_v42, %v3293_v11  ;;  %v4691_v20 = vrot.slane %v4332_v42, %v3351_v25  ;;  %v1624_v31 = vmul.f32 %v5464_v40, %v4615_v58 }
 0x416   :  { %2858 = vperm.xlu1 %3163, %v2775_v48   ;;  %v2494_v2 = vadd.f32 %v2462_v46, %v2214_v47  ;;  %v1376_v8 = vadd.f32 %v1344_v45, %v1096_v13  ;;  %v4697_v14 = vrot.slane %v4332_v42, %v3370_v34  ;;  %v4705_v36 = vrot.slane %v4332_v42, %v3437_v5  ;;  %v5471_v47 = vld [vmem:[#allocation24_spill] sm:$0xff] }
 0x417   :  { %v1937_v24 = vadd.f32 %v1905_v0, %v1657_v4  ;;  %v787_v6 = vmul.f32 %v5465_v57, %v4687_v56  ;;  %v1067_v9 = vmul.f32 %v5466_v39, %v4691_v20  ;;  %v1904_v58 = vmul.f32 %v5467_v37, %v4621_v23  ;;  %v5469_v0 = vld [vmem:[#allocation72_spill] sm:$0xff]  ;;  %v5473_v4 = vld [vmem:[#allocation47_spill] sm:$0xff] }
 0x418   :  { %v2774_v46 = vadd.f32 %v2742_v22, %v2494_v2  ;;  %v1656_v62 = vadd.f32 %v1624_v31, %v1376_v8  ;;  %v4711_v55 = vrot.slane %v4332_v42, %v3606_v60  ;;  %v2184_v33 = vmul.f32 %v5468_v30, %v4629_v61  ;;  %v5470_v22 = vld [vmem:[#allocation192_spill] sm:$0xff]  ;;  %v5472_v61 = vld [vmem:[#allocation109_spill] sm:$0xff] }
 0x419   :  { %v2217_v18 = vadd.f32 %v2185_v21, %v1937_v24  ;;  %v1099_v49 = vadd.f32 %v1067_v9, %v787_v6  ;;  %v1347_v16 = vmul.f32 %v5469_v0, %v4697_v14  ;;  %v2464_v48 = vmul.f32 %v5470_v22, %v4633_v35  ;;  %v5474_v8 = vld [vmem:[#allocation137_spill] sm:$0xff] }
 0x41a   :  { %2855 = vperm.xlu0 %3164, %v2774_v46   ;;  %v1936_v44 = vadd.f32 %v1904_v58, %v1656_v62  ;;  %v4721_v23 = vrot.slane %v4332_v42, %v3669_v38  ;;  %v786_v13 = vmul.f32 %v5471_v47, %v4687_v56  ;;  %v1627_v45 = vmul.f32 %v5472_v61, %v4705_v36  ;;  %v5475_v6 = vld [vmem:[#allocation73_spill] sm:$0xff]  ;;  %v5476_v62 = vld [vmem:[#allocation215_spill] sm:$0xff]  ;;  %v5477_v58 = vld [vmem:[#allocation154_spill] sm:$0xff] }
 0x41b   :  { %v2497_v21 = vadd.f32 %v2465_v54, %v2217_v18  ;;  %v1379_v59 = vadd.f32 %v1347_v16, %v1099_v49  ;;  %v1066_v52 = vmul.f32 %v5473_v4, %v4691_v20  ;;  %v1907_v40 = vmul.f32 %v5474_v8, %v4711_v55  ;;  %v5479_v49 = vld [vmem:[#allocation25_spill] sm:$0xff]  ;;  %v5480_v16 = vld [vmem:[#allocation36_spill] sm:$0xff]  ;;  %v5486_v8 = vld [vmem:[#allocation75_spill] sm:$0xff] }
 0x41c   :  { %v2216_v2 = vadd.f32 %v2184_v33, %v1936_v44  ;;  %v4733_v35 = vrot.slane %v4332_v42, %v3793_v17  ;;  %v4737_v31 = vrot.slane %v4332_v42, %v3973_v53  ;;  %v1346_v39 = vmul.f32 %v5475_v6, %v4697_v14  ;;  %v5481_v44 = vld [vmem:[#allocation178_spill] sm:$0xff]  ;;  %v5482_v22 = vld [vmem:[#allocation49_spill] sm:$0xff]  ;;  %v5484_v61 = vld [vmem:[#allocation120_spill] sm:$0xff] }
 0x41d   :  { %v2777_v54 = vadd.f32 %v2745_v15, %v2497_v21  ;;  %v1659_v24 = vadd.f32 %v1627_v45, %v1379_v59  ;;  %v1098_v57 = vadd.f32 %v1066_v52, %v786_v13  ;;  %v4743_v9 = vadd.f32 %v4483_v28, %v4479_v1  ;;  %v5478_v15 = vld [vmem:[#allocation100_spill] sm:$0xff]  ;;  %v5483_v13 = vld [vmem:[#allocation206_spill] sm:$0xff] }
 0x41e   :  { %v2496_v46 = vadd.f32 %v2464_v48, %v2216_v2  ;;  %v2744_v37 = vmul.f32 %v5476_v62, %v4645_v32  ;;  %v2187_v18 = vmul.f32 %v5477_v58, %v4721_v23  ;;  %v1626_v33 = vmul.f32 %v5478_v15, %v4705_v36  ;;  %v5485_v4 = vld [vmem:[#allocation168_spill] sm:$0xff]  ;;  %v5488_v58 = vld [vmem:[#allocation101_spill] sm:$0xff] }
 0x41f   :  { %2864 = vperm.xlu1 %3163, %v2777_v54   ;;  %v1939_v42 = vadd.f32 %v1907_v40, %v1659_v24  ;;  %v1378_v30 = vadd.f32 %v1346_v39, %v1098_v57  ;;  %v788_v0 = vmul.f32 %v5479_v49, %v4687_v56  ;;  %v4755_v1 = vmul.f32 %v5480_v16, %v4384_v7 }
 0x420   :  { %v2776_v28 = vadd.f32 %v2744_v37, %v2496_v46  ;;  %v2467_v32 = vmul.f32 %v5481_v44, %v4733_v35  ;;  %v1068_v48 = vmul.f32 %v5482_v22, %v4691_v20  ;;  %v2747_v21 = vmul.f32 %v5483_v13, %v4737_v31  ;;  %v5487_v46 = vld [vmem:[#allocation193_spill] sm:$0xff] }
 0x421   :  { %v2219_v47 = vadd.f32 %v2187_v18, %v1939_v42  ;;  %v1658_v59 = vadd.f32 %v1626_v33, %v1378_v30  ;;  %v1906_v45 = vmul.f32 %v5484_v61, %v4711_v55  ;;  %v2186_v52 = vmul.f32 %v5485_v4, %v4721_v23  ;;  %v5490_v33 = vld [vmem:[#allocation51_spill] sm:$0xff]  ;;  %v5494_v13 = vld [vmem:[#allocation77_spill] sm:$0xff] }
 0x422   :  { %2861 = vperm.xlu0 %3164, %v2776_v28   ;;  %v1100_v2 = vadd.f32 %v1068_v48, %v788_v0  ;;  %v1348_v40 = vmul.f32 %v5486_v8, %v4697_v14  ;;  %v4771_v54 = vrot.slane %v4358_v3, %v3293_v11  ;;  %v4775_v6 = vrot.slane %v4358_v3, %v3351_v25  ;;  %v5489_v11 = vld [vmem:[#allocation27_spill] sm:$0xff]  ;;  %v5492_v28 = vld [vmem:[#allocation122_spill] sm:$0xff]  ;;  %v5496_v4 = vld [vmem:[#allocation13_spill] sm:$0xff] }
 0x423   :  { %v2499_v24 = vadd.f32 %v2467_v32, %v2219_v47  ;;  %v1938_v57 = vadd.f32 %v1906_v45, %v1658_v59  ;;  %v4779_v39 = vrot.slane %v4358_v3, %v3370_v34  ;;  %v2466_v62 = vmul.f32 %v5487_v46, %v4733_v35  ;;  %v5491_v34 = vld [vmem:[#allocation216_spill] sm:$0xff]  ;;  %v5493_v32 = vld [vmem:[#allocation170_spill] sm:$0xff]  ;;  %v5495_v61 = vld [vmem:[#allocation195_spill] sm:$0xff] }
 0x424   :  { %v1380_v37 = vadd.f32 %v1348_v40, %v1100_v2  ;;  %v1628_v18 = vmul.f32 %v5488_v58, %v4705_v36  ;;  %v790_v42 = vmul.f32 %v5489_v11, %v4771_v54  ;;  %v1070_v25 = vmul.f32 %v5490_v33, %v4775_v6  ;;  %v5497_v2 = vld [vmem:[#allocation48_spill] sm:$0xff] }
 0x425   :  { %v2779_v30 = vadd.f32 %v2747_v21, %v2499_v24  ;;  %v2218_v15 = vadd.f32 %v2186_v52, %v1938_v57  ;;  %v4791_v49 = vrot.slane %v4358_v3, %v3437_v5  ;;  %v2746_v0 = vmul.f32 %v5491_v34, %v4737_v31  ;;  %v5498_v57 = vld [vmem:[#allocation102_spill] sm:$0xff]  ;;  %v5501_v33 = vld [vmem:[#allocation124_spill] sm:$0xff] }
 0x426   :  { %v1660_v16 = vadd.f32 %v1628_v18, %v1380_v37  ;;  %v1908_v44 = vmul.f32 %v5492_v28, %v4711_v55  ;;  %v2188_v22 = vmul.f32 %v5493_v32, %v4721_v23  ;;  %v1102_v47 = vadd.f32 %v1070_v25, %v790_v42  ;;  %v5499_v18 = vld [vmem:[#allocation76_spill] sm:$0xff]  ;;  %v5500_v42 = vld [vmem:[#allocation217_spill] sm:$0xff]  ;;  %v5503_v32 = vld [vmem:[#allocation11_spill] sm:$0xff] }
 0x427   :  { %2870 = vperm.xlu1 %3163, %v2779_v30   ;;  %v2498_v48 = vadd.f32 %v2466_v62, %v2218_v15  ;;  %v1350_v21 = vmul.f32 %v5494_v13, %v4779_v39  ;;  %v4803_v5 = vrot.slane %v4358_v3, %v3606_v60  ;;  %v2468_v45 = vmul.f32 %v5495_v61, %v4733_v35  ;;  %v5502_v28 = vld [vmem:[#allocation113_spill] sm:$0xff] }
 0x428   :  { %v1940_v59 = vadd.f32 %v1908_v44, %v1660_v16  ;;  %v791_v52 = vmul.f32 %v5496_v4, %v4771_v54  ;;  %v1071_v8 = vmul.f32 %v5497_v2, %v4775_v6  ;;  %v1630_v46 = vmul.f32 %v5498_v57, %v4791_v49  ;;  %v5506_v61 = vld [vmem:[#allocation45_spill] sm:$0xff] }
 0x429   :  { %v2778_v40 = vadd.f32 %v2746_v0, %v2498_v48  ;;  %v1382_v24 = vadd.f32 %v1350_v21, %v1102_v47  ;;  %v4815_v62 = vrot.slane %v4358_v3, %v3669_v38  ;;  %v4819_v37 = vrot.slane %v4358_v3, %v3793_v17  ;;  %v5504_v48 = vld [vmem:[#allocation59_spill] sm:$0xff]  ;;  %v5505_v21 = vld [vmem:[#allocation172_spill] sm:$0xff] }
 0x42a   :  { %v2220_v60 = vadd.f32 %v2188_v22, %v1940_v59  ;;  %v1103_v58 = vadd.f32 %v1071_v8, %v791_v52  ;;  %v1351_v11 = vmul.f32 %v5499_v18, %v4779_v39  ;;  %v2748_v30 = vmul.f32 %v5500_v42, %v4737_v31  ;;  %v5508_v8 = vld [vmem:[#allocation141_spill] sm:$0xff] }
 0x42b   :  { %2867 = vperm.xlu0 %3164, %v2778_v40   ;;  %v1662_v15 = vadd.f32 %v1630_v46, %v1382_v24  ;;  %v1910_v25 = vmul.f32 %v5501_v33, %v4803_v5  ;;  %v4829_v34 = vrot.slane %v4358_v3, %v3973_v53  ;;  %v1631_v44 = vmul.f32 %v5502_v28, %v4791_v49  ;;  %v5509_v24 = vld [vmem:[#allocation220_spill] sm:$0xff]  ;;  %v5512_v42 = vld [vmem:[#allocation29_spill] sm:$0xff] }
 0x42c   :  { %v2500_v0 = vadd.f32 %v2468_v45, %v2220_v60  ;;  %v1383_v16 = vadd.f32 %v1351_v11, %v1103_v58  ;;  %v789_v22 = vmul.f32 %v5503_v32, %v4687_v56  ;;  %v4837_v47 = vmul.f32 %v5504_v48, %v4388_v29  ;;  %v5507_v45 = vld [vmem:[#allocation197_spill] sm:$0xff]  ;;  %v5510_v60 = vld [vmem:[#allocation74_spill] sm:$0xff] }
 0x42d   :  { %v1942_v13 = vadd.f32 %v1910_v25, %v1662_v15  ;;  %v2190_v59 = vmul.f32 %v5505_v21, %v4815_v62  ;;  %v1069_v3 = vmul.f32 %v5506_v61, %v4691_v20  ;;  %v2470_v52 = vmul.f32 %v5507_v45, %v4819_v37  ;;  %v5511_v20 = vld [vmem:[#allocation156_spill] sm:$0xff]  ;;  %v5517_v21 = vld [vmem:[#allocation79_spill] sm:$0xff] }
 0x42e   :  { %v2780_v4 = vadd.f32 %v2748_v30, %v2500_v0  ;;  %v1663_v2 = vadd.f32 %v1631_v44, %v1383_v16  ;;  %v1911_v40 = vmul.f32 %v5508_v8, %v4803_v5  ;;  %v2750_v57 = vmul.f32 %v5509_v24, %v4829_v34  ;;  %v5513_v15 = vld [vmem:[#allocation52_spill] sm:$0xff]  ;;  %v5515_v44 = vld [vmem:[#allocation111_spill] sm:$0xff] }
 0x42f   :  { %v2222_v56 = vadd.f32 %v2190_v59, %v1942_v13  ;;  %v1101_v46 = vadd.f32 %v1069_v3, %v789_v22  ;;  %v1349_v58 = vmul.f32 %v5510_v60, %v4697_v14  ;;  %v2191_v11 = vmul.f32 %v5511_v20, %v4815_v62  ;;  %v5514_v0 = vld [vmem:[#allocation180_spill] sm:$0xff]  ;;  %v5516_v22 = vld [vmem:[#allocation209_spill] sm:$0xff]  ;;  %v5523_v60 = vld [vmem:[#allocation54_spill] sm:$0xff] }
 0x430   :  { %2873 = vperm.xlu0 %3164, %v2780_v4   ;;  %v1943_v18 = vadd.f32 %v1911_v40, %v1663_v2  ;;  %v792_v30 = vmul.f32 %v5512_v42, %v4771_v54  ;;  %v1072_v33 = vmul.f32 %v5513_v15, %v4775_v6  ;;  %v2471_v16 = vmul.f32 %v5514_v0, %v4819_v37  ;;  %v5518_v4 = vld [vmem:[#allocation139_spill] sm:$0xff]  ;;  %v5520_v2 = vld [vmem:[#allocation30_spill] sm:$0xff]  ;;  %v5527_v0 = vld [vmem:[#allocation221_spill] sm:$0xff] }
 0x431   :  { %v2502_v25 = vadd.f32 %v2470_v52, %v2222_v56  ;;  %v1381_v28 = vadd.f32 %v1349_v58, %v1101_v46  ;;  %v1629_v32 = vmul.f32 %v5515_v44, %v4705_v36  ;;  %v2751_v48 = vmul.f32 %v5516_v22, %v4829_v34  ;;  %v5519_v52 = vld [vmem:[#allocation218_spill] sm:$0xff]  ;;  %v5521_v36 = vld [vmem:[#allocation103_spill] sm:$0xff] }
 0x432   :  { %v2223_v14 = vadd.f32 %v2191_v11, %v1943_v18  ;;  %v1104_v13 = vadd.f32 %v1072_v33, %v792_v30  ;;  %v1352_v59 = vmul.f32 %v5517_v21, %v4779_v39  ;;  %v1909_v45 = vmul.f32 %v5518_v4, %v4711_v55  ;;  %v5522_v46 = vld [vmem:[#allocation219_spill] sm:$0xff]  ;;  %v5526_v55 = vld [vmem:[#allocation126_spill] sm:$0xff]  ;;  %v5534_v4 = vld [vmem:[#allocation104_spill] sm:$0xff] }
 0x433   :  { %v2782_v61 = vadd.f32 %v2750_v57, %v2502_v25  ;;  %v1661_v3 = vadd.f32 %v1629_v32, %v1381_v28  ;;  %v794_v8 = vmul.f32 %v5520_v2, %v5519_v52  ;;  %v1632_v24 = vmul.f32 %v5521_v36, %v4791_v49  ;;  %v5524_v20 = vld [vmem:[#allocation155_spill] sm:$0xff]  ;;  %v5529_v32 = vld [vmem:[#allocation208_spill] sm:$0xff]  ;;  %v5530_v22 = vld [vmem:[#allocation18_spill] sm:$0xff] }
 0x434   :  { %v2503_v40 = vadd.f32 %v2471_v16, %v2223_v14  ;;  %v1384_v56 = vadd.f32 %v1352_v59, %v1104_v13  ;;  %v1074_v58 = vmul.f32 %v5523_v60, %v5522_v46  ;;  %v2189_v57 = vmul.f32 %v5524_v20, %v4721_v23  ;;  %v5525_v11 = vld [vmem:[#allocation179_spill] sm:$0xff]  ;;  %v5528_v16 = vld [vmem:[#allocation81_spill] sm:$0xff] }
 0x435   :  { %2879 = vperm.xlu1 %3163, %v2782_v61   ;;  %v1941_v18 = vadd.f32 %v1909_v45, %v1661_v3  ;;  %v2469_v42 = vmul.f32 %v5525_v11, %v4733_v35  ;;  %v1912_v30 = vmul.f32 %v5526_v55, %v4803_v5  ;;  %v1354_v28 = vmul.f32 %v5528_v16, %v5527_v0  ;;  %v5531_v23 = vld [vmem:[#allocation53_spill] sm:$0xff]  ;;  %v5532_v59 = vld [vmem:[#allocation175_spill] sm:$0xff]  ;;  %v5533_v3 = vld [vmem:[#allocation222_spill] sm:$0xff] }
 0x436   :  { %v2783_v15 = vadd.f32 %v2751_v48, %v2503_v40  ;;  %v1664_v33 = vadd.f32 %v1632_v24, %v1384_v56  ;;  %v1106_v25 = vadd.f32 %v1074_v58, %v794_v8  ;;  %v2749_v14 = vmul.f32 %v5529_v32, %v4737_v31  ;;  %v5535_v8 = vld [vmem:[#allocation198_spill] sm:$0xff]  ;;  %v5536_v56 = vld [vmem:[#allocation80_spill] sm:$0xff]  ;;  %v5538_v58 = vld [vmem:[#allocation117_spill] sm:$0xff] }
 0x437   :  { %v2221_v44 = vadd.f32 %v2189_v57, %v1941_v18  ;;  %v795_v13 = vmul.f32 %v5530_v22, %v5519_v52  ;;  %v1075_v21 = vmul.f32 %v5531_v23, %v5522_v46  ;;  %v2192_v48 = vmul.f32 %v5532_v59, %v4815_v62  ;;  %v5537_v46 = vld [vmem:[#allocation128_spill] sm:$0xff]  ;;  %v5539_v11 = vld [vmem:[#allocation15_spill] sm:$0xff]  ;;  %v5540_v55 = vld [vmem:[#allocation50_spill] sm:$0xff] }
 0x438   :  { %2882 = vperm.xlu0 %3164, %v2783_v15   ;;  %v1944_v35 = vadd.f32 %v1912_v30, %v1664_v33  ;;  %v1386_v61 = vadd.f32 %v1354_v28, %v1106_v25  ;;  %v1634_v45 = vmul.f32 %v5534_v4, %v5533_v3  ;;  %v2472_v40 = vmul.f32 %v5535_v8, %v4819_v37  ;;  %v5541_v33 = vld [vmem:[#allocation223_spill] sm:$0xff]  ;;  %v5542_v16 = vld [vmem:[#allocation177_spill] sm:$0xff] }
 0x439   :  { %v2501_v2 = vadd.f32 %v2469_v42, %v2221_v44  ;;  %v1107_v31 = vadd.f32 %v1075_v21, %v795_v13  ;;  %v1355_v52 = vmul.f32 %v5536_v56, %v5527_v0  ;;  %v1914_v60 = vmul.f32 %v5537_v46, %v4258_v41  ;;  %v5543_v32 = vld [vmem:[#allocation143_spill] sm:$0xff]  ;;  %v5544_v13 = vld [vmem:[#allocation78_spill] sm:$0xff] }
 0x43a   :  { %v2224_v36 = vadd.f32 %v2192_v48, %v1944_v35  ;;  %v1666_v24 = vadd.f32 %v1634_v45, %v1386_v61  ;;  %v1635_v18 = vmul.f32 %v5538_v58, %v5533_v3  ;;  %v793_v42 = vmul.f32 %v5539_v11, %v4771_v54  ;;  %v5545_v35 = vld [vmem:[#allocation199_spill] sm:$0xff]  ;;  %v5546_v61 = vld [vmem:[#allocation158_spill] sm:$0xff]  ;;  %v5556_v11 = vld [vmem:[#allocation212_spill] sm:$0xff] }
 0x43b   :  { %v2781_v20 = vadd.f32 %v2749_v14, %v2501_v2  ;;  %v1387_v57 = vadd.f32 %v1355_v52, %v1107_v31  ;;  %v1073_v30 = vmul.f32 %v5540_v55, %v4775_v6  ;;  %v2752_v25 = vmul.f32 %v5541_v33, %v4829_v34  ;;  %v5547_v45 = vld [vmem:[#allocation115_spill] sm:$0xff]  ;;  %v5548_v2 = vld [vmem:[#allocation28_spill] sm:$0xff]  ;;  %v5551_v52 = vld [vmem:[#allocation182_spill] sm:$0xff] }
 0x43c   :  { %v2504_v15 = vadd.f32 %v2472_v40, %v2224_v36  ;;  %v1946_v0 = vadd.f32 %v1914_v60, %v1666_v24  ;;  %v2194_v28 = vmul.f32 %v5542_v16, %v4273_v43  ;;  %v1915_v14 = vmul.f32 %v5543_v32, %v4258_v41  ;;  %v5552_v24 = vld [vmem:[#allocation142_spill] sm:$0xff] }
 0x43d   :  { %2876 = vperm.xlu1 %3163, %v2781_v20   ;;  %v1667_v44 = vadd.f32 %v1635_v18, %v1387_v57  ;;  %v1105_v22 = vadd.f32 %v1073_v30, %v793_v42  ;;  %v1353_v54 = vmul.f32 %v5544_v13, %v4779_v39  ;;  %v1116_v6 = vadd.f32 %v4837_v47, %v4755_v1  ;;  %v5549_v39 = vld [vmem:[#allocation58_spill] sm:$0xff]  ;;  %v5550_v47 = vld [vmem:[#allocation224_spill] sm:$0xff] }
 0x43e   :  { %v2784_v23 = vadd.f32 %v2752_v25, %v2504_v15  ;;  %v2226_v21 = vadd.f32 %v2194_v28, %v1946_v0  ;;  %v2474_v59 = vmul.f32 %v5545_v35, %v4304_v26  ;;  %v2195_v3 = vmul.f32 %v5546_v61, %v4273_v43  ;;  %v5566_v35 = vld [vmem:[#allocation210_spill] sm:$0xff] }
 0x43f   :  { %v1947_v48 = vadd.f32 %v1915_v14, %v1667_v44  ;;  %v1385_v4 = vadd.f32 %v1353_v54, %v1105_v22  ;;  %v1633_v41 = vmul.f32 %v5547_v45, %v4791_v49  ;;  %v805_v8 = vmul.f32 %v5548_v2, %v4384_v7  ;;  %v5553_v49 = vld [vmem:[#allocation106_spill] sm:$0xff]  ;;  %v5554_v7 = vld [vmem:[#allocation123_spill] sm:$0xff]  ;;  %v5558_v44 = vld [vmem:[#allocation181_spill] sm:$0xff]  ;;  %v2678_v45 = vpop.permute.xlu0 %2677 }
 0x440   :  { %v1085_v40 = vmul.f32 %v5549_v39, %v4388_v29  ;;  %2885 = vperm.xlu0 %3164, %v2784_v23   ;;  %v2506_v1 = vadd.f32 %v2474_v59, %v2226_v21  ;;  %v2754_v31 = vmul.f32 %v5550_v47, %v4321_v51  ;;  %v2475_v36 = vmul.f32 %v5551_v52, %v4304_v26  ;;  %v5555_v29 = vld [vmem:[#allocation86_spill] sm:$0xff]  ;;  %v5557_v26 = vld [vmem:[#allocation157_spill] sm:$0xff]  ;;  %v5564_v54 = vld [vmem:[#allocation108_spill] sm:$0xff] }
 0x441   :  { %v2227_v56 = vadd.f32 %v2195_v3, %v1947_v48  ;;  %v1665_v43 = vadd.f32 %v1633_v41, %v1385_v4  ;;  %v1913_v46 = vmul.f32 %v5552_v24, %v4803_v5  ;;  %v1642_v60 = vmul.f32 %v5553_v49, %v4441_v27  ;;  %v5560_v22 = vld [vmem:[#allocation82_spill] sm:$0xff]  ;;  %v5565_v23 = vld [vmem:[#allocation85_spill] sm:$0xff]  ;;  %v5567_v59 = vld [vmem:[#allocation132_spill] sm:$0xff] }
 0x442   :  { %v1643_v58 = vmul.f32 %v5554_v7, %v4441_v27  ;;  %v1364_v18 = vmul.f32 %v5555_v29, %v4437_v50  ;;  %v2786_v20 = vadd.f32 %v2754_v31, %v2506_v1  ;;  %v2755_v42 = vmul.f32 %v5556_v11, %v4321_v51  ;;  %v5559_v51 = vld [vmem:[#allocation121_spill] sm:$0xff]  ;;  %v5568_v48 = vld [vmem:[#allocation144_spill] sm:$0xff]  ;;  %v5569_v3 = vld [vmem:[#allocation183_spill] sm:$0xff] }
 0x443   :  { %v2507_v57 = vadd.f32 %v2475_v36, %v2227_v56  ;;  %v1945_v55 = vadd.f32 %v1913_v46, %v1665_v43  ;;  %v2193_v30 = vmul.f32 %v5557_v26, %v4815_v62  ;;  %v1393_v5 = vadd.f32 %v4413_v63, %v4433_v19  ;;  %v5561_v62 = vld [vmem:[#allocation134_spill] sm:$0xff]  ;;  %v5562_v63 = vld [vmem:[#allocation225_spill] sm:$0xff]  ;;  %v5570_v4 = vld [vmem:[#allocation23_spill] sm:$0xff] }
 0x444   :  { %v1674_v15 = vadd.f32 %v1642_v60, %v4477_v12  ;;  %v1675_v33 = vadd.f32 %v1643_v58, %v4743_v9  ;;  %v1396_v25 = vadd.f32 %v1364_v18, %v1116_v6  ;;  %2891 = vperm.xlu1 %3163, %v2786_v20   ;;  %v1117_v0 = vadd.f32 %v1085_v40, %v805_v8  ;;  %v5563_v12 = vld [vmem:[#allocation146_spill] sm:$0xff]  ;;  %v5571_v47 = vld [vmem:[#allocation228_spill] sm:$0xff]  ;;  %v5574_v52 = vld [vmem:[#allocation145_spill] sm:$0xff] }
 0x445   :  { %v2787_v16 = vadd.f32 %v2755_v42, %v2507_v57  ;;  %v2225_v28 = vadd.f32 %v2193_v30, %v1945_v55  ;;  %v2473_v32 = vmul.f32 %v5558_v44, %v4819_v37  ;;  %v1641_v14 = vmul.f32 %v5559_v51, %v4289_v10  ;;  %v5573_v56 = vld [vmem:[#allocation226_spill] sm:$0xff]  ;;  %v5575_v43 = vld [vmem:[#allocation184_spill] sm:$0xff]  ;;  %v5576_v49 = vld [vmem:[#allocation163_spill] sm:$0xff] }
 0x446   :  { %v1922_v13 = vmul.f32 %v5561_v62, %v5560_v22  ;;  %v1989_v19 = vrot.slane %v5562_v63, %v3669_v38  ;;  %v1923_v9 = vmul.f32 %v5563_v12, %v5560_v22  ;;  %v1644_v6 = vmul.f32 %v5564_v54, %v4441_v27  ;;  %v5577_v7 = vld [vmem:[#allocation136_spill] sm:$0xff]  ;;  %v5578_v29 = vld [vmem:[#allocation125_spill] sm:$0xff]  ;;  %v5579_v20 = vld [vmem:[#allocation159_spill] sm:$0xff]  ;;  %v2689_v62 = vpop.permute.xlu0 %2688 }
 0x447   :  { %v1365_v21 = vmul.f32 %v5565_v23, %v4437_v50  ;;  %2894 = vperm.xlu0 %3164, %v2787_v16   ;;  %v2505_v37 = vadd.f32 %v2473_v32, %v2225_v28  ;;  %v2753_v10 = vmul.f32 %v5566_v35, %v4829_v34  ;;  %v2511_v61 = vadd.f32 %v5568_v48, %v5567_v59  ;;  %v5572_v50 = vld [vmem:[#allocation203_spill] sm:$0xff]  ;;  %v2682_v34 = vpop.permute.xlu1 %2681  ;;  %v5582_v55 = vld [vmem:[#allocation105_spill] sm:$0xff] }
 0x448   :  { %v2232_v38 = vadd.f32 %v5570_v4, %v5569_v3  ;;  %v1673_v41 = vadd.f32 %v1641_v14, %v1393_v5  ;;  %v1954_v2 = vadd.f32 %v1922_v13, %v1674_v15  ;;  %v1955_v8 = vadd.f32 %v1923_v9, %v1675_v33  ;;  %v5580_v57 = vld [vmem:[#allocation55_spill] sm:$0xff]  ;;  %v5585_v44 = vld [vmem:[#allocation161_spill] sm:$0xff]  ;;  %v5587_v13 = vld [vmem:[#allocation194_spill] sm:$0xff] }
 0x449   :  { %v1676_v39 = vadd.f32 %v1644_v6, %v1396_v25  ;;  %v1397_v40 = vadd.f32 %v1365_v21, %v1117_v0  ;;  %v2785_v1 = vadd.f32 %v2753_v10, %v2505_v37  ;;  %v2480_v31 = vmul.f32 %v5572_v50, %v5571_v47  ;;  %v5581_v11 = vld [vmem:[#allocation231_spill] sm:$0xff]  ;;  %v5583_v0 = vld [vmem:[#allocation229_spill] sm:$0xff]  ;;  %v5591_v37 = vld [vmem:[#allocation230_spill] sm:$0xff] }
 0x44a   :  { %v1921_v36 = vmul.f32 %v5574_v52, %v5573_v56  ;;  %v2202_v24 = vmul.f32 %v5575_v43, %v1989_v19  ;;  %v2269_v46 = vrot.slane %v5562_v63, %v3793_v17  ;;  %v2203_v60 = vmul.f32 %v5576_v49, %v1989_v19  ;;  %v5584_v28 = vld [vmem:[#allocation227_spill] sm:$0xff]  ;;  %v5590_v21 = vld [vmem:[#allocation185_spill] sm:$0xff] }
 0x44b   :  { %v1924_v58 = vmul.f32 %v5577_v7, %v5560_v22  ;;  %v1645_v18 = vmul.f32 %v5578_v29, %v4441_v27  ;;  %2888 = vperm.xlu1 %3163, %v2785_v1   ;;  %2897 = vperm.xlu0 %3164, %v5579_v20   ;;  %v2790_v42 = vadd.f32 %v5581_v11, %v5580_v57  ;;  %v5586_v27 = vld [vmem:[#allocation205_spill] sm:$0xff]  ;;  %v5588_v9 = vld [vmem:[#allocation187_spill] sm:$0xff]  ;;  %v2693_v48 = vpop.permute.xlu1 %2692  ;;  %v2697_v1 = vpop.permute.xlu0 %2696 }
 0x44c   :  { %v2791_v26 = vadd.f32 %v5582_v55, %v2511_v61  ;;  %v2512_v30 = vadd.f32 %v2480_v31, %v2232_v38  ;;  %v1953_v5 = vadd.f32 %v1921_v36, %v1673_v41  ;;  %v2234_v15 = vadd.f32 %v2202_v24, %v1954_v2  ;;  %v5589_v6 = vld [vmem:[#allocation147_spill] sm:$0xff]  ;;  %v5595_v24 = vld [vmem:[#allocation196_spill] sm:$0xff] }
 0x44d   :  { %v2235_v17 = vadd.f32 %v2203_v60, %v1955_v8  ;;  %v1956_v33 = vadd.f32 %v1924_v58, %v1676_v39  ;;  %v1677_v25 = vadd.f32 %v1645_v18, %v1397_v40  ;;  %v2760_v16 = vmul.f32 %v2678_v45, %v5583_v0  ;;  %v5593_v2 = vld [vmem:[#allocation207_spill] sm:$0xff] }
 0x44e   :  { %v2201_v32 = vmul.f32 %v5585_v44, %v5584_v28  ;;  %v2482_v51 = vmul.f32 %v5586_v27, %v2269_v46  ;;  %v2549_v14 = vrot.slane %v5562_v63, %v3973_v53  ;;  %v2483_v12 = vmul.f32 %v5587_v13, %v2269_v46  ;;  %v5592_v63 = vld [vmem:[#allocation186_spill] sm:$0xff]  ;;  %v5596_v27 = vld [vmem:[#allocation97_spill] sm:$0xff] }
 0x44f   :  { %v2204_v54 = vmul.f32 %v5588_v9, %v1989_v19  ;;  %v1925_v23 = vmul.f32 %v5589_v6, %v5560_v22  ;;  %2903 = vperm.xlu1 %3163, %v2790_v42   ;;  %2906 = vperm.xlu0 %3164, %v2791_v26   ;;  %v2789_v35 = vadd.f32 %v5591_v37, %v5590_v21  ;;  %v5594_v22 = vld [vmem:[#allocation165_spill] sm:$0xff]  ;;  %v2944_v9 = vadd.s32 4294967272, %v5596_v27  ;;  %v5598_v37 = vld [vmem:[#allocation98_spill] sm:$0xff] }
 0x450   :  { %v2792_v10 = vadd.f32 %v2760_v16, %v2512_v30  ;;  %v2233_v59 = vadd.f32 %v2201_v32, %v1953_v5  ;;  %v2514_v61 = vadd.f32 %v2482_v51, %v2234_v15  ;;  %v2515_v3 = vadd.f32 %v2483_v12, %v2235_v17  ;;  %v5597_v13 = vld [vmem:[#allocation5_spill] sm:$0xff] }
 0x451   :  { %v2236_v4 = vadd.f32 %v2204_v54, %v1956_v33  ;;  %v1957_v53 = vadd.f32 %v1925_v23, %v1677_v25  ;;  %v2481_v38 = vmul.f32 %v5592_v63, %v5571_v47  ;;  %v2762_v45 = vmul.f32 %v2689_v62, %v2549_v14  ;;  %v2701_v47 = vpop.permute.xlu1 %2700 }
 0x452   :  { %v2763_v41 = vmul.f32 %v2693_v48, %v2549_v14  ;;  %v2484_v8 = vmul.f32 %v5593_v2, %v2269_v46  ;;  %v2205_v39 = vmul.f32 %v5594_v22, %v1989_v19  ;;  %v2761_v36 = vmul.f32 %v2682_v34, %v5583_v0 }
 0x453   :  { %2900 = vperm.xlu1 %3163, %v2789_v35   ;;  %2909 = vperm.xlu0 %3164, %v2792_v10   ;;  %v2513_v40 = vadd.f32 %v2481_v38, %v2233_v59  ;;  %v2794_v50 = vadd.f32 %v2762_v45, %v2514_v61  ;;  %v2764_v43 = vmul.f32 %v2697_v1, %v2549_v14  ;;  %v2930_v51 = vadd.s32 4294967288, %v5596_v27 }
 0x454   :  { %v2795_v31 = vadd.f32 %v2763_v41, %v2515_v3  ;;  %v2516_v56 = vadd.f32 %v2484_v8, %v2236_v4  ;;  %v2237_v52 = vadd.f32 %v2205_v39, %v1957_v53  ;;  %v2485_v49 = vmul.f32 %v5595_v24, %v2269_v46 }
 0x455   :  { %v2793_v60 = vadd.f32 %v2761_v36, %v2513_v40  ;;  %v2765_v19 = vmul.f32 %v2701_v47, %v2549_v14  ;;  %v2937_v14 = vadd.s32 4294967280, %v5596_v27  ;;  %v5004_v12 = vsub.s32 %v2930_v51, %v5597_v13 }
 0x456   :  { %v2796_v7 = vadd.f32 %v2764_v43, %v2516_v56  ;;  %v2517_v58 = vadd.f32 %v2485_v49, %v2237_v52  ;;  %v5017_v10 = vsub.s32 %v2944_v9, %v5597_v13 }
 0x457   :  { %2915 = vperm.xlu1 %3163, %v2794_v50   ;;  %2918 = vperm.xlu0 %3164, %v2795_v31   ;;  %v5008_v54 = vsub.s32 %v2937_v14, %v5597_v13 }
 0x458   :  { %v2797_v29 = vadd.f32 %v2765_v19, %v2517_v58 }
 0x45b   :  { %2912 = vperm.xlu1 %3163, %v2793_v60   ;;  %2921 = vperm.xlu0 %3164, %v2796_v7  }
 0x45f   :  { %2924 = vperm.xlu1 %3163, %v2797_v29  }
 0x473   :  { %v2835_v20 = vpop.permute.xlu1 %2834 }
 0x474   :  { %v2934_v21 = vrot.slane %v2835_v20, %v5004_v12 }
 0x477   :  { %v2832_v18 = vpop.permute.xlu0 %2831 }
 0x478   :  { %v2929_v35 = vrot.slane %v2832_v18, %v5598_v37 }
 0x47a   :  { %v2936_v63 = vsel %vm2935_vm10, %v2934_v21, %v2929_v35 }
 0x47c   :  { %v2841_v11 = vpop.permute.xlu1 %2840 }
 0x47d   :  { %v2948_v38 = vrot.slane %v2841_v11, %v5017_v10 }
 0x47f   :  { %v2838_v57 = vpop.permute.xlu0 %2837 }
 0x480   :  { %v2941_v59 = vrot.slane %v2838_v57, %v5008_v54 }
 0x482   :  { %v2943_v2 = vsel %vm2942_vm11, %v2941_v59, %v2936_v63 }
 0x483   :  { %v2950_v43 = vsel %vm2949_vm12, %v2948_v38, %v2943_v2 }
 0x484   :  { %v2847_v34 = vpop.permute.xlu1 %2846 }
 0x485   :  { %v2958_v3 = vrot.slane %v2847_v34, %v5004_v12 }
 0x488   :  { %v2844_v42 = vpop.permute.xlu0 %2843 }
 0x489   :  { %v2954_v4 = vrot.slane %v2844_v42, %v5598_v37 }
 0x48b   :  { %v2959_v1 = vsel %vm2935_vm10, %v2958_v3, %v2954_v4 }
 0x48d   :  { %v2853_v26 = vpop.permute.xlu1 %2852 }
 0x48e   :  { %v2968_v50 = vrot.slane %v2853_v26, %v5017_v10 }
 0x490   :  { %v2850_v55 = vpop.permute.xlu0 %2849 }
 0x491   :  { %v2963_v53 = vrot.slane %v2850_v55, %v5008_v54 }
 0x493   :  { %v2964_v52 = vsel %vm2942_vm11, %v2963_v53, %v2959_v1 }
 0x494   :  { %v2969_v18 = vsel %vm2949_vm12, %v2968_v50, %v2964_v52 }
 0x495   :  { %v2859_v30 = vpop.permute.xlu1 %2858  ;;  %v3084_v14 = vsel %vm349_vm2, %v2969_v18, %v2950_v43 }
 0x496   :  { %v2977_v45 = vrot.slane %v2859_v30, %v5004_v12 }
 0x499   :  { %v2856_v46 = vpop.permute.xlu0 %2855 }
 0x49a   :  { %v2973_v41 = vrot.slane %v2856_v46, %v5598_v37 }
 0x49c   :  { %v2978_v24 = vsel %vm2935_vm10, %v2977_v45, %v2973_v41 }
 0x49e   :  { %v4997_v15 = vpop.permute.xlu1 %2864 }
 0x49f   :  { %v2987_v49 = vrot.slane %v4997_v15, %v5017_v10 }
 0x4a1   :  { %v2862_v5 = vpop.permute.xlu0 %2861 }
 0x4a2   :  { %v2982_v31 = vrot.slane %v2862_v5, %v5008_v54 }
 0x4a4   :  { %v2983_v20 = vsel %vm2942_vm11, %v2982_v31, %v2978_v24 }
 0x4a6   :  { %v2871_v33 = vpop.permute.xlu1 %2870 }
 0x4a7   :  { %v2996_v8 = vrot.slane %v2871_v33, %v5004_v12 }
 0x4aa   :  { %v2868_v17 = vpop.permute.xlu0 %2867 }
 0x4ab   :  { %v2992_v22 = vrot.slane %v2868_v17, %v5598_v37  ;;  %v2988_v17 = vsel %vm2949_vm12, %v2987_v49, %v2983_v20 }
 0x4ac   :  { %v3085_v9 = vsel %vm351_vm3, %v2988_v17, %v3084_v14 }
 0x4ad   :  { %v2997_v47 = vsel %vm2935_vm10, %v2996_v8, %v2992_v22 }
 0x4af   :  { %v2874_v25 = vpop.permute.xlu0 %2873 }
 0x4b0   :  { %v3001_v56 = vrot.slane %v2874_v25, %v5008_v54 }
 0x4b2   :  { %v3002_v57 = vsel %vm2942_vm11, %v3001_v56, %v2997_v47 }
 0x4b4   :  { %v2880_v0 = vpop.permute.xlu1 %2879 }
 0x4b5   :  { %v3011_v60 = vrot.slane %v2880_v0, %v5598_v37 }
 0x4b7   :  { %v2883_v16 = vpop.permute.xlu0 %2882 }
 0x4b8   :  { %v3015_v36 = vrot.slane %v2883_v16, %v5004_v12 }
 0x4ba   :  { %v3016_v42 = vsel %vm2935_vm10, %v3015_v36, %v3011_v60 }
 0x4bc   :  { %v2877_v28 = vpop.permute.xlu1 %2876 }
 0x4bd   :  { %v3006_v7 = vrot.slane %v2877_v28, %v5017_v10 }
 0x4bf   :  { %v2886_v44 = vpop.permute.xlu0 %2885  ;;  %v3007_v33 = vsel %vm2949_vm12, %v3006_v7, %v3002_v57 }
 0x4c0   :  { %v3020_v58 = vrot.slane %v2886_v44, %v5008_v54 }
 0x4c2   :  { %v3021_v25 = vsel %vm2942_vm11, %v3020_v58, %v3016_v42 }
 0x4c3   :  { %v4999_v32 = vpop.permute.xlu1 %2891 }
 0x4c4   :  { %v3030_v46 = vrot.slane %v4999_v32, %v5598_v37 }
 0x4c6   :  { %v2895_v62 = vpop.permute.xlu0 %2894 }
 0x4c7   :  { %v3034_v11 = vrot.slane %v2895_v62, %v5004_v12 }
 0x4c9   :  { %v3035_v44 = vsel %vm2935_vm10, %v3034_v11, %v3030_v46 }
 0x4ca   :  { %v5010_v6 = vpop.permute.xlu1 %2888  ;;  %v5012_v23 = vpop.permute.xlu0 %2897 }
 0x4cb   :  { %v3025_v34 = vrot.slane %v5010_v6, %v5017_v10  ;;  %v3039_v55 = vrot.slane %v5012_v23, %v5008_v54 }
 0x4cd   :  { %v3026_v62 = vsel %vm2949_vm12, %v3025_v34, %v3021_v25  ;;  %v3040_v13 = vsel %vm2942_vm11, %v3039_v55, %v3035_v44 }
 0x4ce   :  { %v2904_v48 = vpop.permute.xlu1 %2903  ;;  %v2907_v61 = vpop.permute.xlu0 %2906 }
 0x4cf   :  { %v3053_v26 = vrot.slane %v2907_v61, %v5004_v12  ;;  %v3049_v0 = vrot.slane %v2904_v48, %v5598_v37 }
 0x4d2   :  { %v2901_v39 = vpop.permute.xlu1 %2900  ;;  %v2910_v40 = vpop.permute.xlu0 %2909 }
 0x4d3   :  { %v3044_v30 = vrot.slane %v2901_v39, %v5017_v10  ;;  %v3058_v5 = vrot.slane %v2910_v40, %v5008_v54 }
 0x4d5   :  { %v3045_v6 = vsel %vm2949_vm12, %v3044_v30, %v3040_v13 }
 0x4d6   :  { %v2916_v19 = vpop.permute.xlu1 %2915  ;;  %v2919_v29 = vpop.permute.xlu0 %2918 }
 0x4d7   :  { %v3072_v15 = vrot.slane %v2919_v29, %v5004_v12  ;;  %v3068_v32 = vrot.slane %v2916_v19, %v5598_v37  ;;  %v3054_v12 = vsel %vm2935_vm10, %v3053_v26, %v3049_v0  ;;  %v3086_v37 = vsel %vm353_vm4, %v3007_v33, %v3085_v9 }
 0x4d8   :  { %v3059_v23 = vsel %vm2942_vm11, %v3058_v5, %v3054_v12  ;;  %v3087_v48 = vsel %vm355_vm5, %v3026_v62, %v3086_v37 }
 0x4d9   :  { %v3073_v21 = vsel %vm2935_vm10, %v3072_v15, %v3068_v32  ;;  %v3088_v3 = vsel %vm357_vm6, %v3045_v6, %v3087_v48 }
 0x4da   :  { %v2913_v16 = vpop.permute.xlu1 %2912  ;;  %v2922_v28 = vpop.permute.xlu0 %2921 }
 0x4db   :  { %v3063_v27 = vrot.slane %v2913_v16, %v5017_v10  ;;  %v3077_v51 = vrot.slane %v2922_v28, %v5008_v54 }
 0x4dd   :  { %v3064_v54 = vsel %vm2949_vm12, %v3063_v27, %v3059_v23  ;;  %v3078_v59 = vsel %vm2942_vm11, %v3077_v51, %v3073_v21 }
 0x4de   :  { %v2925_v35 = vpop.permute.xlu1 %2924  ;;  %v3089_v53 = vsel %vm359_vm7, %v3064_v54, %v3088_v3 }
 0x4df   :  { %v3082_v61 = vrot.slane %v2925_v35, %v5017_v10 }
 0x4e1   :  { %v3083_v4 = vsel %vm2949_vm12, %v3082_v61, %v3078_v59 }
 0x4e2   :  { %v3090_v63 = vsel %vm361_vm8, %v3083_v4, %v3089_v53 }
 0x4e3   :  { %3092 = vst.msk [vmem:[#allocation2] sm:$0xff] %vm38_vm0, %v3090_v63 }
 0x4e4   :  { %3219 = shalt.err (!%p3216_p4)
}
 0x4e5   :  { %s3220_s7 = scalar_lea.hbm %s5101_s4, 128 }
 0x4e6   :  { %p3221_p5 = scmp.ne.s32.totalorder %s5101_s4, %s3220_s7  ;;  %p3224_p6 = scmp.lt.u32.totalorder %s3220_s7, %s5101_s4 }
 0x4e8   :  { %p3226_p7 = pnand %p3224_p6, %p3221_p5 }
 0x4ea   :  { %3229 = shalt.err (!%p3226_p7)
}
 0x4eb   :  { %3102 = dma.vmem_to_hbm [thread:$0]  %s3100_s29, 128, %s5101_s4, [#allocation3]  }
 0x4ec   :  { %3230 = dma.done.wait [#allocation3], 128  }
 0x4ed   :  { %3231 = vsyncadd [#allocation3], 4294967168 }
 0x4ee   :  { %3106 = vsyncpa [#allocation3], 1 }

</bundles_post_ra>
